<compile_context>
chip_gen: v5e
topology: v5e:2x2
jax: 0.10.0
libtpu: 0.0.40
codegen_flags: <defaults>
</compile_context>

<pallas_src>
import functools

import jax
import jax.numpy as jnp
from jax.experimental import pallas as pl
from jax.experimental.pallas import tpu as pltpu

FEAT_C = 8   # generator feature channels (c)
IN_C = 8     # padded per-domain input channels: depth, img x3, noise, 3x zero


def _ilog2(n):
    assert n > 0 and (n & (n - 1)) == 0, "spatial dims must be powers of two"
    return n.bit_length() - 1


# -----------------------------------------------------------------------------
# In-kernel building blocks (pure jnp/lax -> lowers on Mosaic and in interpret)
# -----------------------------------------------------------------------------

def _conv3x3(x, w, b, col_ref, height, width, relu):
    """3x3 'same' conv in channels-first, flattened-(b, y, x)-lane layout.

    x: (Cin, L) with L = B*H*W, lane = b*H*W + y*W + x
    w: (Cout, 9*Cin) with column = Cin*(3*dy + dx) + cin
    b: (Cout, 1);  col_ref: VMEM scratch with >= 9*Cin rows, >= L lanes.

    Each tap is a lane roll + border mask (zero 'same' padding and the
    batch-boundary wrap are both folded into the mask), written into the
    im2col scratch; the conv is then ONE lane-dense MXU matmul (bf16 in,
    f32 accumulate).
    """
    cin, lanes = x.shape
    hw = height * width
    lw = _ilog2(width)
    lane = jax.lax.broadcasted_iota(jnp.int32, (1, lanes), 1)
    pos = lane & (hw - 1)
    ys = pos >> lw
    xs = pos & (width - 1)
    for t in range(9):
        dy, dx = t // 3 - 1, t % 3 - 1
        s = dy * width + dx
        shifted = x if s == 0 else jnp.roll(x, -s, axis=1)
        valid = ((ys + dy >= 0) & (ys + dy < height) &
                 (xs + dx >= 0) & (xs + dx < width))
        col_ref[t * cin:(t + 1) * cin, 0:lanes] = shifted * valid.astype(x.dtype)
    col = col_ref[0:9 * cin, 0:lanes]
    y = jnp.dot(w.astype(jnp.bfloat16), col.astype(jnp.bfloat16),
                preferred_element_type=jnp.float32) + b
    return jnp.maximum(y, 0.0) if relu else y


def _dense(w, x, b):
    return jnp.dot(w.astype(jnp.bfloat16), x.astype(jnp.bfloat16),
                   preferred_element_type=jnp.float32) + b


def _avgpool_matrix(height, width, bsz):
    """(L, L/4) selection matrix: 2x2 average pool as one lane-dense matmul."""
    hw, hw2 = height * width, (height // 2) * (width // 2)
    ls, ld = bsz * hw, bsz * hw2
    i = jax.lax.broadcasted_iota(jnp.int32, (ls, ld), 0)
    j = jax.lax.broadcasted_iota(jnp.int32, (ls, ld), 1)
    bi, pi = i >> _ilog2(hw), i & (hw - 1)
    yi, xi = pi >> _ilog2(width), pi & (width - 1)
    bj, pj = j >> _ilog2(hw2), j & (hw2 - 1)
    yj, xj = pj >> _ilog2(width // 2), pj & (width // 2 - 1)
    sel = (bi == bj) & ((yi >> 1) == yj) & ((xi >> 1) == xj)
    return jnp.where(sel, 0.25, 0.0).astype(jnp.float32)


# -----------------------------------------------------------------------------
# The single fused kernel: G_A + G_B + Up + Down
# -----------------------------------------------------------------------------

def _sr_model_kernel(x_ref, w_ref, b_ref, fake_ref, up_ref, dn_ref, col_ref,
                     *, height, width, bsz, c):
    hw = height * width
    eps = 1e-5
    X = x_ref[...]                                    # (2*IN_C, L): rows 0:8 domain A, 8:16 domain B

    # ---- both generators, layer 1 (one shared im2col, interleaved block weights)
    x1 = _conv3x3(X, w_ref[0], b_ref[0], col_ref, height, width, relu=True)  # (4c, L)
    # rows: 0:c content_A | c:2c style_A | 2c:3c content_B | 3c:4c style_B

    # ---- AdaIN per instance (stats over each image's own H*W lanes)
    parts = []
    for bi in range(bsz):
        seg = x1[:, bi * hw:(bi + 1) * hw]            # (4c, hw)
        mu = jnp.mean(seg, axis=1, keepdims=True)
        var = jnp.mean(jnp.square(seg - mu), axis=1, keepdims=True)
        norm = (seg - mu) * jax.lax.rsqrt(var + eps)
        h_a = norm[0:c] * jnp.sqrt(var[c:2 * c] + eps) + mu[c:2 * c]
        h_b = norm[2 * c:3 * c] * jnp.sqrt(var[3 * c:4 * c] + eps) + mu[3 * c:4 * c]
        parts.append(jnp.concatenate([h_a, h_b], axis=0))   # (2c, hw)
    h_mid = jnp.concatenate(parts, axis=1)                  # (2c, L)

    # ---- both generators, layer 2 + 1x1 depth head
    feat = _conv3x3(h_mid, w_ref[1][0:2 * c, :], b_ref[1][0:2 * c, :],
                    col_ref, height, width, relu=True)      # (2c, L): [x_A; x_B]
    fake_ref[...] = _dense(w_ref[2][0:2, 0:2 * c], feat, b_ref[2][0:2, :])   # (2, L)

    # ---- Up head on x_A: conv3x3(nearest_up2x(.)) as 4 phase convs at low res
    feat_a = feat[0:c]
    up_h = _conv3x3(feat_a, w_ref[3][:, 0:9 * c], b_ref[3],
                    col_ref, height, width, relu=True)      # (4c, L): 4 phases x c
    up_ref[...] = _dense(w_ref[4][0:4, 0:4 * c], up_h, b_ref[4][0:4, :])     # (4, L)

    # ---- Down head on x_B: 2x2 avg-pool (selection matmul) -> conv3x3 -> 1x1
    feat_b = feat[c:2 * c]
    pool = _avgpool_matrix(height, width, bsz)               # (L, L/4), built in-kernel
    pooled = jnp.dot(feat_b.astype(jnp.bfloat16), pool.astype(jnp.bfloat16),
                     preferred_element_type=jnp.float32)     # (c, L/4)
    dn_h = _conv3x3(pooled, w_ref[5][0:c, 0:9 * c], b_ref[5][0:c, :],
                    col_ref, height // 2, width // 2, relu=True)             # (c, L/4)
    dn_ref[...] = _dense(w_ref[6][0:1, 0:c], dn_h, b_ref[6][0:1, :])         # (1, L/4)


# -----------------------------------------------------------------------------
# Host-side packing / forward wrapper
# -----------------------------------------------------------------------------

def _pack_domain(depth, img, noise):
    """(B,1,H,W)+(B,3,H,W)+(B,1,H,W) -> (8, B*H*W), lane = b*HW + y*W + x."""
    bsz, _, h, w = depth.shape
    x = jnp.concatenate([depth, img, noise,
                         jnp.zeros((bsz, 3, h, w), jnp.float32)], axis=1)   # (B, 8, H, W)
    return x.reshape(bsz, IN_C, h * w).transpose(1, 0, 2).reshape(IN_C, bsz * h * w)


def sr_model_forward(real_depth_A, real_img_A, real_depth_B, real_img_B,
                     packed, noise_key):
    bsz, _, h, w = real_depth_A.shape
    hw = h * w
    lanes = bsz * hw

    # TODO(synk): original uses on-device torch.randn per generator; pltpu PRNG
    # has no interpret lowering, so noise is drawn host-side (independent per
    # generator, matching the two torch.randn_like calls).
    k_a, k_b = jax.random.split(noise_key)
    noise_a = jax.random.normal(k_a, (bsz, 1, h, w), jnp.float32)
    noise_b = jax.random.normal(k_b, (bsz, 1, h, w), jnp.float32)

    x = jnp.concatenate([_pack_domain(real_depth_A, real_img_A, noise_a),
                         _pack_domain(real_depth_B, real_img_B, noise_b)],
                        axis=0)                              # (16, B*HW)

    kern = functools.partial(_sr_model_kernel,
                             height=h, width=w, bsz=bsz, c=FEAT_C)
    fake2, up4, dn1 = pl.pallas_call(
        kern,
        out_shape=(jax.ShapeDtypeStruct((2, lanes), jnp.float32),
                   jax.ShapeDtypeStruct((4, lanes), jnp.float32),
                   jax.ShapeDtypeStruct((1, lanes // 4), jnp.float32)),
        # No grid: whole arrays live in VMEM (total footprint < 2 MiB).
        scratch_shapes=[pltpu.VMEM((9 * 2 * IN_C, lanes), jnp.float32)],
    )(x, packed["W"], packed["b"])

    fake_depth_B = fake2[0].reshape(bsz, 1, h, w)
    fake_depth_A = fake2[1].reshape(bsz, 1, h, w)
    # interleave the 4 pixel-shuffle phases -> (B, 1, 2H, 2W)
    fake_depth_B_sr = (up4.reshape(2, 2, bsz, h, w)
                          .transpose(2, 3, 0, 4, 1)
                          .reshape(bsz, 1, 2 * h, 2 * w))
    fake_depth_A_sr = dn1.reshape(bsz, 1, h // 2, w // 2)

    # TODO(synk): training-only branches (surface normals, hole masks, cycle
    # reconstructions, discriminators, checkpoint loading) are not part of the
    # eval forward pass and are intentionally omitted; mu/std of the style
    # features stay internal to the kernel (only consumed in training).
    return fake_depth_B, fake_depth_A, fake_depth_B_sr, fake_depth_A_sr


# -----------------------------------------------------------------------------
# Deterministic synthetic parameters, pre-packed for the fused kernel
# TODO(synk): network.define_Gen / define_Sr internals are external; these are
# synthetic stand-ins that preserve the I/O contract of the eval forward pass.
# -----------------------------------------------------------------------------

def _conv_to_mat(wconv):
    """(Co, Ci, 3, 3) -> (Co, 9*Ci) with column = Ci*(3*dy+dx) + ci."""
    co, ci = wconv.shape[0], wconv.shape[1]
    return jnp.transpose(wconv, (0, 2, 3, 1)).reshape(co, 9 * ci)


def _interleave_pair(wa, wb, cin):
    """Block weights for the stacked-domain im2col: A rows read A channels only."""
    r = wa.shape[0]
    wa3, wb3 = wa.reshape(r, 9, cin), wb.reshape(r, 9, cin)
    big = jnp.zeros((2 * r, 9, 2 * cin), jnp.float32)
    big = big.at[:r, :, :cin].set(wa3).at[r:, :, cin:].set(wb3)
    return big.reshape(2 * r, 18 * cin)


# conv3x3(nearest_up2x(x)) == 4 phase (pixel-shuffle) convs on x at low res.
_PHASE_R = jnp.array([[[1, 0, 0], [0, 1, 1], [0, 0, 0]],
                      [[0, 0, 0], [1, 1, 0], [0, 0, 1]]], jnp.float32)


def _upsample_phase_weights(wconv):
    co, ci = wconv.shape[0], wconv.shape[1]
    weff = jnp.einsum('pad,qbe,oide->pqoabi', _PHASE_R, _PHASE_R, wconv)
    return weff.reshape(4 * co, 9 * ci)          # rows: phase-major, p = 2*py + px


def init_params(key, feat_c=FEAT_C):
    assert feat_c == 8, "packed layout assumes 8 feature channels"
    c = feat_c
    ks = iter(jax.random.split(key, 24))

    def w(shape, scale=0.1):
        return scale * jax.random.normal(next(ks), shape, jnp.float32)

    def gen():
        return dict(w_content=w((c, 5, 3, 3)), b_content=w((c,), 0.01),
                    w_style=w((c, 3, 3, 3)), b_style=w((c,), 0.01),
                    w_mid=w((c, c, 3, 3)), b_mid=w((c,), 0.01),
                    w_out=w((1, c)), b_out=w((1,), 0.01))

    def head():
        return dict(w_conv=w((c, c, 3, 3)), b_conv=w((c,), 0.01),
                    w_out=w((1, c)), b_out=w((1,), 0.01))

    g_a, g_b, up, dn = gen(), gen(), head(), head()

    def l1_mat(g):   # content conv sees [depth, img, noise]; style conv sees img only
        wc = jnp.zeros((c, IN_C, 3, 3), jnp.float32).at[:, 0:5].set(g["w_content"])
        ws = jnp.zeros((c, IN_C, 3, 3), jnp.float32).at[:, 1:4].set(g["w_style"])
        return jnp.concatenate([_conv_to_mat(wc), _conv_to_mat(ws)], axis=0)   # (2c, 72)

    w1 = _interleave_pair(l1_mat(g_a), l1_mat(g_b), IN_C)                       # (32, 144)
    b1 = jnp.concatenate([g_a["b_content"], g_a["b_style"],
                          g_b["b_content"], g_b["b_style"]])
    w2 = _interleave_pair(_conv_to_mat(g_a["w_mid"]), _conv_to_mat(g_b["w_mid"]), c)  # (16, 144)
    b2 = jnp.concatenate([g_a["b_mid"], g_b["b_mid"]])
    w3 = (jnp.zeros((2, 2 * c), jnp.float32)
          .at[0:1, 0:c].set(g_a["w_out"]).at[1:2, c:2 * c].set(g_b["w_out"]))
    b3 = jnp.concatenate([g_a["b_out"], g_b["b_out"]])

    wu1 = _upsample_phase_weights(up["w_conv"])                                 # (32, 72)
    bu1 = jnp.tile(up["b_conv"], 4)
    wu2 = jnp.zeros((4, 4 * c), jnp.float32)
    for p in range(4):
        wu2 = wu2.at[p:p + 1, p * c:(p + 1) * c].set(up["w_out"])
    bu2 = jnp.tile(up["b_out"], 4)

    wd1, bd1 = _conv_to_mat(dn["w_conv"]), dn["b_conv"]                         # (8, 72)
    wd2, bd2 = dn["w_out"], dn["b_out"]                                         # (1, 8)

    def embed_w(m):
        return jnp.zeros((32, 144), jnp.float32).at[:m.shape[0], :m.shape[1]].set(m)

    def embed_b(v):
        return jnp.zeros((32, 1), jnp.float32).at[:v.shape[0], 0].set(v)

    wstack = jnp.stack([embed_w(m) for m in (w1, w2, w3, wu1, wu2, wd1, wd2)])  # (7, 32, 144)
    bstack = jnp.stack([embed_b(v) for v in (b1, b2, b3, bu1, bu2, bd1, bd2)])  # (7, 32, 1)
    return {"W": wstack, "b": bstack}


# -----------------------------------------------------------------------------
# Main
# -----------------------------------------------------------------------------

if __name__ == "__main__":
    B, H, W = 2, 16, 16
    key = jax.random.PRNGKey(0)
    k_da, k_ia, k_db, k_ib, k_par, k_noise = jax.random.split(key, 6)

    # PyTorch NCHW convention.
    real_depth_A = jax.random.normal(k_da, (B, 1, H, W), jnp.float32)
    real_img_A = jax.random.normal(k_ia, (B, 3, H, W), jnp.float32)
    real_depth_B = jax.random.normal(k_db, (B, 1, H, W), jnp.float32)
    real_img_B = jax.random.normal(k_ib, (B, 3, H, W), jnp.float32)

    params = init_params(k_par)

    fwd = jax.jit(functools.partial(sr_model_forward,
                                    packed=params, noise_key=k_noise))
    fake_B, fake_A, fake_B_sr, fake_A_sr = fwd(
        real_depth_A, real_img_A, real_depth_B, real_img_B)

    for o in (fake_B, fake_A, fake_B_sr, fake_A_sr):
        jax.block_until_ready(o)

    assert fake_B.shape == (B, 1, H, W)
    assert fake_A.shape == (B, 1, H, W)
    assert fake_B_sr.shape == (B, 1, 2 * H, 2 * W)
    assert fake_A_sr.shape == (B, 1, H // 2, W // 2)
    assert all(bool(jnp.all(jnp.isfinite(o)))
               for o in (fake_B, fake_A, fake_B_sr, fake_A_sr))

    print("KERNEL_OK")
</pallas_src>

<mosaic_0001>
module attributes {stable_mosaic.version = 11 : i64} {
  func.func @_sr_model_kernel(%arg0: memref<16x512xf32, #tpu.memory_space<vmem>>, %arg1: memref<7x32x144xf32, #tpu.memory_space<vmem>>, %arg2: memref<7x32x1xf32, #tpu.memory_space<vmem>>, %arg3: memref<2x512xf32, #tpu.memory_space<vmem>>, %arg4: memref<4x512xf32, #tpu.memory_space<vmem>>, %arg5: memref<1x128xf32, #tpu.memory_space<vmem>>, %arg6: memref<144x512xf32, #tpu.memory_space<vmem>>) attributes {dimension_semantics = [], scalar_prefetch = 0 : i64, scratch_operands = 1 : i64, tpu.core_type = #tpu.core_type<tc>} {
    %c0 = arith.constant 0 : index
    %c0_0 = arith.constant 0 : index
    %0 = vector.load %arg0[%c0, %c0_0] : memref<16x512xf32, #tpu.memory_space<vmem>>, vector<16x512xf32>
    %c0_1 = arith.constant 0 : index
    %c0_2 = arith.constant 0 : index
    %c0_3 = arith.constant 0 : index
    %1 = vector.load %arg1[%c0_1, %c0_2, %c0_3] : memref<7x32x144xf32, #tpu.memory_space<vmem>>, vector<1x32x144xf32>
    %2 = vector.shape_cast %1 : vector<1x32x144xf32> to vector<32x144xf32>
    %c0_4 = arith.constant 0 : index
    %c0_5 = arith.constant 0 : index
    %c0_6 = arith.constant 0 : index
    %3 = vector.load %arg2[%c0_4, %c0_5, %c0_6] : memref<7x32x1xf32, #tpu.memory_space<vmem>>, vector<1x32x1xf32>
    %4 = vector.shape_cast %3 : vector<1x32x1xf32> to vector<32x1xf32>
    %5 = tpu.iota {dimensions = array<i32: 1>} : vector<1x512xi32>
    %c255_i32 = arith.constant 255 : i32
    %6 = vector.broadcast %c255_i32 : i32 to vector<1x512xi32>
    %7 = arith.andi %5, %6 : vector<1x512xi32>
    %c4_i32 = arith.constant 4 : i32
    %8 = vector.broadcast %c4_i32 : i32 to vector<1x512xi32>
    %9 = arith.shrsi %7, %8 : vector<1x512xi32>
    %c15_i32 = arith.constant 15 : i32
    %10 = vector.broadcast %c15_i32 : i32 to vector<1x512xi32>
    %11 = arith.andi %7, %10 : vector<1x512xi32>
    %12 = vector.extract_strided_slice %0 {offsets = [0, 495], sizes = [16, 17], strides = [1, 1]} : vector<16x512xf32> to vector<16x17xf32>
    %13 = vector.extract_strided_slice %0 {offsets = [0, 0], sizes = [16, 495], strides = [1, 1]} : vector<16x512xf32> to vector<16x495xf32>
    %14 = tpu.concatenate %12, %13 in 1 : vector<16x17xf32>, vector<16x495xf32> -> vector<16x512xf32>
    %c-1_i32 = arith.constant -1 : i32
    %15 = vector.broadcast %c-1_i32 : i32 to vector<1x512xi32>
    %16 = arith.addi %9, %15 : vector<1x512xi32>
    %c0_i32 = arith.constant 0 : i32
    %17 = vector.broadcast %c0_i32 : i32 to vector<1x512xi32>
    %18 = arith.cmpi sge, %16, %17 : vector<1x512xi32>
    %c-1_i32_7 = arith.constant -1 : i32
    %19 = vector.broadcast %c-1_i32_7 : i32 to vector<1x512xi32>
    %20 = arith.addi %9, %19 : vector<1x512xi32>
    %c16_i32 = arith.constant 16 : i32
    %21 = vector.broadcast %c16_i32 : i32 to vector<1x512xi32>
    %22 = arith.cmpi slt, %20, %21 : vector<1x512xi32>
    %23 = arith.andi %18, %22 : vector<1x512xi1>
    %c-1_i32_8 = arith.constant -1 : i32
    %24 = vector.broadcast %c-1_i32_8 : i32 to vector<1x512xi32>
    %25 = arith.addi %11, %24 : vector<1x512xi32>
    %c0_i32_9 = arith.constant 0 : i32
    %26 = vector.broadcast %c0_i32_9 : i32 to vector<1x512xi32>
    %27 = arith.cmpi sge, %25, %26 : vector<1x512xi32>
    %28 = arith.andi %23, %27 : vector<1x512xi1>
    %c-1_i32_10 = arith.constant -1 : i32
    %29 = vector.broadcast %c-1_i32_10 : i32 to vector<1x512xi32>
    %30 = arith.addi %11, %29 : vector<1x512xi32>
    %c16_i32_11 = arith.constant 16 : i32
    %31 = vector.broadcast %c16_i32_11 : i32 to vector<1x512xi32>
    %32 = arith.cmpi slt, %30, %31 : vector<1x512xi32>
    %33 = arith.andi %28, %32 : vector<1x512xi1>
    %34 = arith.extui %33 : vector<1x512xi1> to vector<1x512xi32>
    %35 = arith.sitofp %34 : vector<1x512xi32> to vector<1x512xf32>
    %36 = vector.broadcast %35 : vector<1x512xf32> to vector<16x512xf32>
    %37 = arith.mulf %14, %36 : vector<16x512xf32>
    %c0_12 = arith.constant 0 : index
    %c0_13 = arith.constant 0 : index
    %38 = vector.load %arg6[%c0_12, %c0_13] : memref<144x512xf32, #tpu.memory_space<vmem>>, vector<16x512xf32>
    tpu.vector_store %arg6[%c0_12, %c0_13], %37 {strides = array<i32>} : memref<144x512xf32, #tpu.memory_space<vmem>>, vector<16x512xf32>,
    %39 = vector.extract_strided_slice %0 {offsets = [0, 496], sizes = [16, 16], strides = [1, 1]} : vector<16x512xf32> to vector<16x16xf32>
    %40 = vector.extract_strided_slice %0 {offsets = [0, 0], sizes = [16, 496], strides = [1, 1]} : vector<16x512xf32> to vector<16x496xf32>
    %41 = tpu.concatenate %39, %40 in 1 : vector<16x16xf32>, vector<16x496xf32> -> vector<16x512xf32>
    %c-1_i32_14 = arith.constant -1 : i32
    %42 = vector.broadcast %c-1_i32_14 : i32 to vector<1x512xi32>
    %43 = arith.addi %9, %42 : vector<1x512xi32>
    %c0_i32_15 = arith.constant 0 : i32
    %44 = vector.broadcast %c0_i32_15 : i32 to vector<1x512xi32>
    %45 = arith.cmpi sge, %43, %44 : vector<1x512xi32>
    %c-1_i32_16 = arith.constant -1 : i32
    %46 = vector.broadcast %c-1_i32_16 : i32 to vector<1x512xi32>
    %47 = arith.addi %9, %46 : vector<1x512xi32>
    %c16_i32_17 = arith.constant 16 : i32
    %48 = vector.broadcast %c16_i32_17 : i32 to vector<1x512xi32>
    %49 = arith.cmpi slt, %47, %48 : vector<1x512xi32>
    %50 = arith.andi %45, %49 : vector<1x512xi1>
    %c0_i32_18 = arith.constant 0 : i32
    %51 = vector.broadcast %c0_i32_18 : i32 to vector<1x512xi32>
    %52 = arith.addi %11, %51 : vector<1x512xi32>
    %c0_i32_19 = arith.constant 0 : i32
    %53 = vector.broadcast %c0_i32_19 : i32 to vector<1x512xi32>
    %54 = arith.cmpi sge, %52, %53 : vector<1x512xi32>
    %55 = arith.andi %50, %54 : vector<1x512xi1>
    %c0_i32_20 = arith.constant 0 : i32
    %56 = vector.broadcast %c0_i32_20 : i32 to vector<1x512xi32>
    %57 = arith.addi %11, %56 : vector<1x512xi32>
    %c16_i32_21 = arith.constant 16 : i32
    %58 = vector.broadcast %c16_i32_21 : i32 to vector<1x512xi32>
    %59 = arith.cmpi slt, %57, %58 : vector<1x512xi32>
    %60 = arith.andi %55, %59 : vector<1x512xi1>
    %61 = arith.extui %60 : vector<1x512xi1> to vector<1x512xi32>
    %62 = arith.sitofp %61 : vector<1x512xi32> to vector<1x512xf32>
    %63 = vector.broadcast %62 : vector<1x512xf32> to vector<16x512xf32>
    %64 = arith.mulf %41, %63 : vector<16x512xf32>
    %c16 = arith.constant 16 : index
    %c0_22 = arith.constant 0 : index
    %65 = vector.load %arg6[%c16, %c0_22] : memref<144x512xf32, #tpu.memory_space<vmem>>, vector<16x512xf32>
    tpu.vector_store %arg6[%c16, %c0_22], %64 {strides = array<i32>} : memref<144x512xf32, #tpu.memory_space<vmem>>, vector<16x512xf32>,
    %66 = vector.extract_strided_slice %0 {offsets = [0, 497], sizes = [16, 15], strides = [1, 1]} : vector<16x512xf32> to vector<16x15xf32>
    %67 = vector.extract_strided_slice %0 {offsets = [0, 0], sizes = [16, 497], strides = [1, 1]} : vector<16x512xf32> to vector<16x497xf32>
    %68 = tpu.concatenate %66, %67 in 1 : vector<16x15xf32>, vector<16x497xf32> -> vector<16x512xf32>
    %c-1_i32_23 = arith.constant -1 : i32
    %69 = vector.broadcast %c-1_i32_23 : i32 to vector<1x512xi32>
    %70 = arith.addi %9, %69 : vector<1x512xi32>
    %c0_i32_24 = arith.constant 0 : i32
    %71 = vector.broadcast %c0_i32_24 : i32 to vector<1x512xi32>
    %72 = arith.cmpi sge, %70, %71 : vector<1x512xi32>
    %c-1_i32_25 = arith.constant -1 : i32
    %73 = vector.broadcast %c-1_i32_25 : i32 to vector<1x512xi32>
    %74 = arith.addi %9, %73 : vector<1x512xi32>
    %c16_i32_26 = arith.constant 16 : i32
    %75 = vector.broadcast %c16_i32_26 : i32 to vector<1x512xi32>
    %76 = arith.cmpi slt, %74, %75 : vector<1x512xi32>
    %77 = arith.andi %72, %76 : vector<1x512xi1>
    %c1_i32 = arith.constant 1 : i32
    %78 = vector.broadcast %c1_i32 : i32 to vector<1x512xi32>
    %79 = arith.addi %11, %78 : vector<1x512xi32>
    %c0_i32_27 = arith.constant 0 : i32
    %80 = vector.broadcast %c0_i32_27 : i32 to vector<1x512xi32>
    %81 = arith.cmpi sge, %79, %80 : vector<1x512xi32>
    %82 = arith.andi %77, %81 : vector<1x512xi1>
    %c1_i32_28 = arith.constant 1 : i32
    %83 = vector.broadcast %c1_i32_28 : i32 to vector<1x512xi32>
    %84 = arith.addi %11, %83 : vector<1x512xi32>
    %c16_i32_29 = arith.constant 16 : i32
    %85 = vector.broadcast %c16_i32_29 : i32 to vector<1x512xi32>
    %86 = arith.cmpi slt, %84, %85 : vector<1x512xi32>
    %87 = arith.andi %82, %86 : vector<1x512xi1>
    %88 = arith.extui %87 : vector<1x512xi1> to vector<1x512xi32>
    %89 = arith.sitofp %88 : vector<1x512xi32> to vector<1x512xf32>
    %90 = vector.broadcast %89 : vector<1x512xf32> to vector<16x512xf32>
    %91 = arith.mulf %68, %90 : vector<16x512xf32>
    %c32 = arith.constant 32 : index
    %c0_30 = arith.constant 0 : index
    %92 = vector.load %arg6[%c32, %c0_30] : memref<144x512xf32, #tpu.memory_space<vmem>>, vector<16x512xf32>
    tpu.vector_store %arg6[%c32, %c0_30], %91 {strides = array<i32>} : memref<144x512xf32, #tpu.memory_space<vmem>>, vector<16x512xf32>,
    %93 = vector.extract_strided_slice %0 {offsets = [0, 511], sizes = [16, 1], strides = [1, 1]} : vector<16x512xf32> to vector<16x1xf32>
    %94 = vector.extract_strided_slice %0 {offsets = [0, 0], sizes = [16, 511], strides = [1, 1]} : vector<16x512xf32> to vector<16x511xf32>
    %95 = tpu.concatenate %93, %94 in 1 : vector<16x1xf32>, vector<16x511xf32> -> vector<16x512xf32>
    %c0_i32_31 = arith.constant 0 : i32
    %96 = vector.broadcast %c0_i32_31 : i32 to vector<1x512xi32>
    %97 = arith.addi %9, %96 : vector<1x512xi32>
    %c0_i32_32 = arith.constant 0 : i32
    %98 = vector.broadcast %c0_i32_32 : i32 to vector<1x512xi32>
    %99 = arith.cmpi sge, %97, %98 : vector<1x512xi32>
    %c0_i32_33 = arith.constant 0 : i32
    %100 = vector.broadcast %c0_i32_33 : i32 to vector<1x512xi32>
    %101 = arith.addi %9, %100 : vector<1x512xi32>
    %c16_i32_34 = arith.constant 16 : i32
    %102 = vector.broadcast %c16_i32_34 : i32 to vector<1x512xi32>
    %103 = arith.cmpi slt, %101, %102 : vector<1x512xi32>
    %104 = arith.andi %99, %103 : vector<1x512xi1>
    %c-1_i32_35 = arith.constant -1 : i32
    %105 = vector.broadcast %c-1_i32_35 : i32 to vector<1x512xi32>
    %106 = arith.addi %11, %105 : vector<1x512xi32>
    %c0_i32_36 = arith.constant 0 : i32
    %107 = vector.broadcast %c0_i32_36 : i32 to vector<1x512xi32>
    %108 = arith.cmpi sge, %106, %107 : vector<1x512xi32>
    %109 = arith.andi %104, %108 : vector<1x512xi1>
    %c-1_i32_37 = arith.constant -1 : i32
    %110 = vector.broadcast %c-1_i32_37 : i32 to vector<1x512xi32>
    %111 = arith.addi %11, %110 : vector<1x512xi32>
    %c16_i32_38 = arith.constant 16 : i32
    %112 = vector.broadcast %c16_i32_38 : i32 to vector<1x512xi32>
    %113 = arith.cmpi slt, %111, %112 : vector<1x512xi32>
    %114 = arith.andi %109, %113 : vector<1x512xi1>
    %115 = arith.extui %114 : vector<1x512xi1> to vector<1x512xi32>
    %116 = arith.sitofp %115 : vector<1x512xi32> to vector<1x512xf32>
    %117 = vector.broadcast %116 : vector<1x512xf32> to vector<16x512xf32>
    %118 = arith.mulf %95, %117 : vector<16x512xf32>
    %c48 = arith.constant 48 : index
    %c0_39 = arith.constant 0 : index
    %119 = vector.load %arg6[%c48, %c0_39] : memref<144x512xf32, #tpu.memory_space<vmem>>, vector<16x512xf32>
    tpu.vector_store %arg6[%c48, %c0_39], %118 {strides = array<i32>} : memref<144x512xf32, #tpu.memory_space<vmem>>, vector<16x512xf32>,
    %c0_i32_40 = arith.constant 0 : i32
    %120 = vector.broadcast %c0_i32_40 : i32 to vector<1x512xi32>
    %121 = arith.addi %9, %120 : vector<1x512xi32>
    %c0_i32_41 = arith.constant 0 : i32
    %122 = vector.broadcast %c0_i32_41 : i32 to vector<1x512xi32>
    %123 = arith.cmpi sge, %121, %122 : vector<1x512xi32>
    %c0_i32_42 = arith.constant 0 : i32
    %124 = vector.broadcast %c0_i32_42 : i32 to vector<1x512xi32>
    %125 = arith.addi %9, %124 : vector<1x512xi32>
    %c16_i32_43 = arith.constant 16 : i32
    %126 = vector.broadcast %c16_i32_43 : i32 to vector<1x512xi32>
    %127 = arith.cmpi slt, %125, %126 : vector<1x512xi32>
    %128 = arith.andi %123, %127 : vector<1x512xi1>
    %c0_i32_44 = arith.constant 0 : i32
    %129 = vector.broadcast %c0_i32_44 : i32 to vector<1x512xi32>
    %130 = arith.addi %11, %129 : vector<1x512xi32>
    %c0_i32_45 = arith.constant 0 : i32
    %131 = vector.broadcast %c0_i32_45 : i32 to vector<1x512xi32>
    %132 = arith.cmpi sge, %130, %131 : vector<1x512xi32>
    %133 = arith.andi %128, %132 : vector<1x512xi1>
    %c0_i32_46 = arith.constant 0 : i32
    %134 = vector.broadcast %c0_i32_46 : i32 to vector<1x512xi32>
    %135 = arith.addi %11, %134 : vector<1x512xi32>
    %c16_i32_47 = arith.constant 16 : i32
    %136 = vector.broadcast %c16_i32_47 : i32 to vector<1x512xi32>
    %137 = arith.cmpi slt, %135, %136 : vector<1x512xi32>
    %138 = arith.andi %133, %137 : vector<1x512xi1>
    %139 = arith.extui %138 : vector<1x512xi1> to vector<1x512xi32>
    %140 = arith.sitofp %139 : vector<1x512xi32> to vector<1x512xf32>
    %141 = vector.broadcast %140 : vector<1x512xf32> to vector<16x512xf32>
    %142 = arith.mulf %0, %141 : vector<16x512xf32>
    %c64 = arith.constant 64 : index
    %c0_48 = arith.constant 0 : index
    %143 = vector.load %arg6[%c64, %c0_48] : memref<144x512xf32, #tpu.memory_space<vmem>>, vector<16x512xf32>
    tpu.vector_store %arg6[%c64, %c0_48], %142 {strides = array<i32>} : memref<144x512xf32, #tpu.memory_space<vmem>>, vector<16x512xf32>,
    %144 = vector.extract_strided_slice %0 {offsets = [0, 1], sizes = [16, 511], strides = [1, 1]} : vector<16x512xf32> to vector<16x511xf32>
    %145 = vector.extract_strided_slice %0 {offsets = [0, 0], sizes = [16, 1], strides = [1, 1]} : vector<16x512xf32> to vector<16x1xf32>
    %146 = tpu.concatenate %144, %145 in 1 : vector<16x511xf32>, vector<16x1xf32> -> vector<16x512xf32>
    %c0_i32_49 = arith.constant 0 : i32
    %147 = vector.broadcast %c0_i32_49 : i32 to vector<1x512xi32>
    %148 = arith.addi %9, %147 : vector<1x512xi32>
    %c0_i32_50 = arith.constant 0 : i32
    %149 = vector.broadcast %c0_i32_50 : i32 to vector<1x512xi32>
    %150 = arith.cmpi sge, %148, %149 : vector<1x512xi32>
    %c0_i32_51 = arith.constant 0 : i32
    %151 = vector.broadcast %c0_i32_51 : i32 to vector<1x512xi32>
    %152 = arith.addi %9, %151 : vector<1x512xi32>
    %c16_i32_52 = arith.constant 16 : i32
    %153 = vector.broadcast %c16_i32_52 : i32 to vector<1x512xi32>
    %154 = arith.cmpi slt, %152, %153 : vector<1x512xi32>
    %155 = arith.andi %150, %154 : vector<1x512xi1>
    %c1_i32_53 = arith.constant 1 : i32
    %156 = vector.broadcast %c1_i32_53 : i32 to vector<1x512xi32>
    %157 = arith.addi %11, %156 : vector<1x512xi32>
    %c0_i32_54 = arith.constant 0 : i32
    %158 = vector.broadcast %c0_i32_54 : i32 to vector<1x512xi32>
    %159 = arith.cmpi sge, %157, %158 : vector<1x512xi32>
    %160 = arith.andi %155, %159 : vector<1x512xi1>
    %c1_i32_55 = arith.constant 1 : i32
    %161 = vector.broadcast %c1_i32_55 : i32 to vector<1x512xi32>
    %162 = arith.addi %11, %161 : vector<1x512xi32>
    %c16_i32_56 = arith.constant 16 : i32
    %163 = vector.broadcast %c16_i32_56 : i32 to vector<1x512xi32>
    %164 = arith.cmpi slt, %162, %163 : vector<1x512xi32>
    %165 = arith.andi %160, %164 : vector<1x512xi1>
    %166 = arith.extui %165 : vector<1x512xi1> to vector<1x512xi32>
    %167 = arith.sitofp %166 : vector<1x512xi32> to vector<1x512xf32>
    %168 = vector.broadcast %167 : vector<1x512xf32> to vector<16x512xf32>
    %169 = arith.mulf %146, %168 : vector<16x512xf32>
    %c80 = arith.constant 80 : index
    %c0_57 = arith.constant 0 : index
    %170 = vector.load %arg6[%c80, %c0_57] : memref<144x512xf32, #tpu.memory_space<vmem>>, vector<16x512xf32>
    tpu.vector_store %arg6[%c80, %c0_57], %169 {strides = array<i32>} : memref<144x512xf32, #tpu.memory_space<vmem>>, vector<16x512xf32>,
    %171 = vector.extract_strided_slice %0 {offsets = [0, 15], sizes = [16, 497], strides = [1, 1]} : vector<16x512xf32> to vector<16x497xf32>
    %172 = vector.extract_strided_slice %0 {offsets = [0, 0], sizes = [16, 15], strides = [1, 1]} : vector<16x512xf32> to vector<16x15xf32>
    %173 = tpu.concatenate %171, %172 in 1 : vector<16x497xf32>, vector<16x15xf32> -> vector<16x512xf32>
    %c1_i32_58 = arith.constant 1 : i32
    %174 = vector.broadcast %c1_i32_58 : i32 to vector<1x512xi32>
    %175 = arith.addi %9, %174 : vector<1x512xi32>
    %c0_i32_59 = arith.constant 0 : i32
    %176 = vector.broadcast %c0_i32_59 : i32 to vector<1x512xi32>
    %177 = arith.cmpi sge, %175, %176 : vector<1x512xi32>
    %c1_i32_60 = arith.constant 1 : i32
    %178 = vector.broadcast %c1_i32_60 : i32 to vector<1x512xi32>
    %179 = arith.addi %9, %178 : vector<1x512xi32>
    %c16_i32_61 = arith.constant 16 : i32
    %180 = vector.broadcast %c16_i32_61 : i32 to vector<1x512xi32>
    %181 = arith.cmpi slt, %179, %180 : vector<1x512xi32>
    %182 = arith.andi %177, %181 : vector<1x512xi1>
    %c-1_i32_62 = arith.constant -1 : i32
    %183 = vector.broadcast %c-1_i32_62 : i32 to vector<1x512xi32>
    %184 = arith.addi %11, %183 : vector<1x512xi32>
    %c0_i32_63 = arith.constant 0 : i32
    %185 = vector.broadcast %c0_i32_63 : i32 to vector<1x512xi32>
    %186 = arith.cmpi sge, %184, %185 : vector<1x512xi32>
    %187 = arith.andi %182, %186 : vector<1x512xi1>
    %c-1_i32_64 = arith.constant -1 : i32
    %188 = vector.broadcast %c-1_i32_64 : i32 to vector<1x512xi32>
    %189 = arith.addi %11, %188 : vector<1x512xi32>
    %c16_i32_65 = arith.constant 16 : i32
    %190 = vector.broadcast %c16_i32_65 : i32 to vector<1x512xi32>
    %191 = arith.cmpi slt, %189, %190 : vector<1x512xi32>
    %192 = arith.andi %187, %191 : vector<1x512xi1>
    %193 = arith.extui %192 : vector<1x512xi1> to vector<1x512xi32>
    %194 = arith.sitofp %193 : vector<1x512xi32> to vector<1x512xf32>
    %195 = vector.broadcast %194 : vector<1x512xf32> to vector<16x512xf32>
    %196 = arith.mulf %173, %195 : vector<16x512xf32>
    %c96 = arith.constant 96 : index
    %c0_66 = arith.constant 0 : index
    %197 = vector.load %arg6[%c96, %c0_66] : memref<144x512xf32, #tpu.memory_space<vmem>>, vector<16x512xf32>
    tpu.vector_store %arg6[%c96, %c0_66], %196 {strides = array<i32>} : memref<144x512xf32, #tpu.memory_space<vmem>>, vector<16x512xf32>,
    %198 = vector.extract_strided_slice %0 {offsets = [0, 16], sizes = [16, 496], strides = [1, 1]} : vector<16x512xf32> to vector<16x496xf32>
    %199 = vector.extract_strided_slice %0 {offsets = [0, 0], sizes = [16, 16], strides = [1, 1]} : vector<16x512xf32> to vector<16x16xf32>
    %200 = tpu.concatenate %198, %199 in 1 : vector<16x496xf32>, vector<16x16xf32> -> vector<16x512xf32>
    %c1_i32_67 = arith.constant 1 : i32
    %201 = vector.broadcast %c1_i32_67 : i32 to vector<1x512xi32>
    %202 = arith.addi %9, %201 : vector<1x512xi32>
    %c0_i32_68 = arith.constant 0 : i32
    %203 = vector.broadcast %c0_i32_68 : i32 to vector<1x512xi32>
    %204 = arith.cmpi sge, %202, %203 : vector<1x512xi32>
    %c1_i32_69 = arith.constant 1 : i32
    %205 = vector.broadcast %c1_i32_69 : i32 to vector<1x512xi32>
    %206 = arith.addi %9, %205 : vector<1x512xi32>
    %c16_i32_70 = arith.constant 16 : i32
    %207 = vector.broadcast %c16_i32_70 : i32 to vector<1x512xi32>
    %208 = arith.cmpi slt, %206, %207 : vector<1x512xi32>
    %209 = arith.andi %204, %208 : vector<1x512xi1>
    %c0_i32_71 = arith.constant 0 : i32
    %210 = vector.broadcast %c0_i32_71 : i32 to vector<1x512xi32>
    %211 = arith.addi %11, %210 : vector<1x512xi32>
    %c0_i32_72 = arith.constant 0 : i32
    %212 = vector.broadcast %c0_i32_72 : i32 to vector<1x512xi32>
    %213 = arith.cmpi sge, %211, %212 : vector<1x512xi32>
    %214 = arith.andi %209, %213 : vector<1x512xi1>
    %c0_i32_73 = arith.constant 0 : i32
    %215 = vector.broadcast %c0_i32_73 : i32 to vector<1x512xi32>
    %216 = arith.addi %11, %215 : vector<1x512xi32>
    %c16_i32_74 = arith.constant 16 : i32
    %217 = vector.broadcast %c16_i32_74 : i32 to vector<1x512xi32>
    %218 = arith.cmpi slt, %216, %217 : vector<1x512xi32>
    %219 = arith.andi %214, %218 : vector<1x512xi1>
    %220 = arith.extui %219 : vector<1x512xi1> to vector<1x512xi32>
    %221 = arith.sitofp %220 : vector<1x512xi32> to vector<1x512xf32>
    %222 = vector.broadcast %221 : vector<1x512xf32> to vector<16x512xf32>
    %223 = arith.mulf %200, %222 : vector<16x512xf32>
    %c112 = arith.constant 112 : index
    %c0_75 = arith.constant 0 : index
    %224 = vector.load %arg6[%c112, %c0_75] : memref<144x512xf32, #tpu.memory_space<vmem>>, vector<16x512xf32>
    tpu.vector_store %arg6[%c112, %c0_75], %223 {strides = array<i32>} : memref<144x512xf32, #tpu.memory_space<vmem>>, vector<16x512xf32>,
    %225 = vector.extract_strided_slice %0 {offsets = [0, 17], sizes = [16, 495], strides = [1, 1]} : vector<16x512xf32> to vector<16x495xf32>
    %226 = vector.extract_strided_slice %0 {offsets = [0, 0], sizes = [16, 17], strides = [1, 1]} : vector<16x512xf32> to vector<16x17xf32>
    %227 = tpu.concatenate %225, %226 in 1 : vector<16x495xf32>, vector<16x17xf32> -> vector<16x512xf32>
    %c1_i32_76 = arith.constant 1 : i32
    %228 = vector.broadcast %c1_i32_76 : i32 to vector<1x512xi32>
    %229 = arith.addi %9, %228 : vector<1x512xi32>
    %c0_i32_77 = arith.constant 0 : i32
    %230 = vector.broadcast %c0_i32_77 : i32 to vector<1x512xi32>
    %231 = arith.cmpi sge, %229, %230 : vector<1x512xi32>
    %c1_i32_78 = arith.constant 1 : i32
    %232 = vector.broadcast %c1_i32_78 : i32 to vector<1x512xi32>
    %233 = arith.addi %9, %232 : vector<1x512xi32>
    %c16_i32_79 = arith.constant 16 : i32
    %234 = vector.broadcast %c16_i32_79 : i32 to vector<1x512xi32>
    %235 = arith.cmpi slt, %233, %234 : vector<1x512xi32>
    %236 = arith.andi %231, %235 : vector<1x512xi1>
    %c1_i32_80 = arith.constant 1 : i32
    %237 = vector.broadcast %c1_i32_80 : i32 to vector<1x512xi32>
    %238 = arith.addi %11, %237 : vector<1x512xi32>
    %c0_i32_81 = arith.constant 0 : i32
    %239 = vector.broadcast %c0_i32_81 : i32 to vector<1x512xi32>
    %240 = arith.cmpi sge, %238, %239 : vector<1x512xi32>
    %241 = arith.andi %236, %240 : vector<1x512xi1>
    %c1_i32_82 = arith.constant 1 : i32
    %242 = vector.broadcast %c1_i32_82 : i32 to vector<1x512xi32>
    %243 = arith.addi %11, %242 : vector<1x512xi32>
    %c16_i32_83 = arith.constant 16 : i32
    %244 = vector.broadcast %c16_i32_83 : i32 to vector<1x512xi32>
    %245 = arith.cmpi slt, %243, %244 : vector<1x512xi32>
    %246 = arith.andi %241, %245 : vector<1x512xi1>
    %247 = arith.extui %246 : vector<1x512xi1> to vector<1x512xi32>
    %248 = arith.sitofp %247 : vector<1x512xi32> to vector<1x512xf32>
    %249 = vector.broadcast %248 : vector<1x512xf32> to vector<16x512xf32>
    %250 = arith.mulf %227, %249 : vector<16x512xf32>
    %c128 = arith.constant 128 : index
    %c0_84 = arith.constant 0 : index
    %251 = vector.load %arg6[%c128, %c0_84] : memref<144x512xf32, #tpu.memory_space<vmem>>, vector<16x512xf32>
    tpu.vector_store %arg6[%c128, %c0_84], %250 {strides = array<i32>} : memref<144x512xf32, #tpu.memory_space<vmem>>, vector<16x512xf32>,
    %c0_85 = arith.constant 0 : index
    %c0_86 = arith.constant 0 : index
    %252 = vector.load %arg6[%c0_85, %c0_86] : memref<144x512xf32, #tpu.memory_space<vmem>>, vector<144x512xf32>
    %253 = arith.truncf %2 : vector<32x144xf32> to vector<32x144xbf16>
    %254 = arith.truncf %252 : vector<144x512xf32> to vector<144x512xbf16>
    %cst = arith.constant dense<0.000000e+00> : vector<32x512xf32>
    %255 = tpu.matmul %253, %254, %cst {dimension_numbers = #tpu.dot_dimension_numbers<[1], [0], [0], [1], [0, 0, 1, 1], [], []>} : vector<32x144xbf16>, vector<144x512xbf16>, vector<32x512xf32> -> vector<32x512xf32>
    %256 = vector.broadcast %4 : vector<32x1xf32> to vector<32x512xf32>
    %257 = arith.addf %255, %256 : vector<32x512xf32>
    %cst_87 = arith.constant 0.000000e+00 : f32
    %258 = vector.broadcast %cst_87 : f32 to vector<32x512xf32>
    %259 = arith.maximumf %257, %258 : vector<32x512xf32>
    %260 = vector.extract_strided_slice %259 {offsets = [0, 0], sizes = [32, 256], strides = [1, 1]} : vector<32x512xf32> to vector<32x256xf32>
    %cst_88 = arith.constant dense<0.000000e+00> : vector<32xf32>
    %261 = vector.multi_reduction <add>, %260, %cst_88 [1] : vector<32x256xf32> to vector<32xf32>
    %262 = vector.shape_cast %261 : vector<32xf32> to vector<32x1xf32>
    %cst_89 = arith.constant 2.560000e+02 : f32
    %263 = vector.broadcast %cst_89 : f32 to vector<32x1xf32>
    %264 = arith.divf %262, %263 : vector<32x1xf32>
    %265 = vector.broadcast %264 : vector<32x1xf32> to vector<32x256xf32>
    %266 = arith.subf %260, %265 : vector<32x256xf32>
    %267 = arith.mulf %266, %266 : vector<32x256xf32>
    %cst_90 = arith.constant dense<0.000000e+00> : vector<32xf32>
    %268 = vector.multi_reduction <add>, %267, %cst_90 [1] : vector<32x256xf32> to vector<32xf32>
    %269 = vector.shape_cast %268 : vector<32xf32> to vector<32x1xf32>
    %cst_91 = arith.constant 2.560000e+02 : f32
    %270 = vector.broadcast %cst_91 : f32 to vector<32x1xf32>
    %271 = arith.divf %269, %270 : vector<32x1xf32>
    %272 = vector.broadcast %264 : vector<32x1xf32> to vector<32x256xf32>
    %273 = arith.subf %260, %272 : vector<32x256xf32>
    %cst_92 = arith.constant 9.99999974E-6 : f32
    %274 = vector.broadcast %cst_92 : f32 to vector<32x1xf32>
    %275 = arith.addf %271, %274 : vector<32x1xf32>
    %276 = math.rsqrt %275 : vector<32x1xf32>
    %277 = vector.broadcast %276 : vector<32x1xf32> to vector<32x256xf32>
    %278 = arith.mulf %273, %277 : vector<32x256xf32>
    %279 = vector.extract_strided_slice %278 {offsets = [0, 0], sizes = [8, 256], strides = [1, 1]} : vector<32x256xf32> to vector<8x256xf32>
    %280 = vector.extract_strided_slice %271 {offsets = [8, 0], sizes = [8, 1], strides = [1, 1]} : vector<32x1xf32> to vector<8x1xf32>
    %cst_93 = arith.constant 9.99999974E-6 : f32
    %281 = vector.broadcast %cst_93 : f32 to vector<8x1xf32>
    %282 = arith.addf %280, %281 : vector<8x1xf32>
    %283 = math.sqrt %282 : vector<8x1xf32>
    %284 = vector.broadcast %283 : vector<8x1xf32> to vector<8x256xf32>
    %285 = arith.mulf %279, %284 : vector<8x256xf32>
    %286 = vector.extract_strided_slice %264 {offsets = [8, 0], sizes = [8, 1], strides = [1, 1]} : vector<32x1xf32> to vector<8x1xf32>
    %287 = vector.broadcast %286 : vector<8x1xf32> to vector<8x256xf32>
    %288 = arith.addf %285, %287 : vector<8x256xf32>
    %289 = vector.extract_strided_slice %278 {offsets = [16, 0], sizes = [8, 256], strides = [1, 1]} : vector<32x256xf32> to vector<8x256xf32>
    %290 = vector.extract_strided_slice %271 {offsets = [24, 0], sizes = [8, 1], strides = [1, 1]} : vector<32x1xf32> to vector<8x1xf32>
    %cst_94 = arith.constant 9.99999974E-6 : f32
    %291 = vector.broadcast %cst_94 : f32 to vector<8x1xf32>
    %292 = arith.addf %290, %291 : vector<8x1xf32>
    %293 = math.sqrt %292 : vector<8x1xf32>
    %294 = vector.broadcast %293 : vector<8x1xf32> to vector<8x256xf32>
    %295 = arith.mulf %289, %294 : vector<8x256xf32>
    %296 = vector.extract_strided_slice %264 {offsets = [24, 0], sizes = [8, 1], strides = [1, 1]} : vector<32x1xf32> to vector<8x1xf32>
    %297 = vector.broadcast %296 : vector<8x1xf32> to vector<8x256xf32>
    %298 = arith.addf %295, %297 : vector<8x256xf32>
    %299 = tpu.concatenate %288, %298 in 0 : vector<8x256xf32>, vector<8x256xf32> -> vector<16x256xf32>
    %300 = vector.extract_strided_slice %259 {offsets = [0, 256], sizes = [32, 256], strides = [1, 1]} : vector<32x512xf32> to vector<32x256xf32>
    %cst_95 = arith.constant dense<0.000000e+00> : vector<32xf32>
    %301 = vector.multi_reduction <add>, %300, %cst_95 [1] : vector<32x256xf32> to vector<32xf32>
    %302 = vector.shape_cast %301 : vector<32xf32> to vector<32x1xf32>
    %cst_96 = arith.constant 2.560000e+02 : f32
    %303 = vector.broadcast %cst_96 : f32 to vector<32x1xf32>
    %304 = arith.divf %302, %303 : vector<32x1xf32>
    %305 = vector.broadcast %304 : vector<32x1xf32> to vector<32x256xf32>
    %306 = arith.subf %300, %305 : vector<32x256xf32>
    %307 = arith.mulf %306, %306 : vector<32x256xf32>
    %cst_97 = arith.constant dense<0.000000e+00> : vector<32xf32>
    %308 = vector.multi_reduction <add>, %307, %cst_97 [1] : vector<32x256xf32> to vector<32xf32>
    %309 = vector.shape_cast %308 : vector<32xf32> to vector<32x1xf32>
    %cst_98 = arith.constant 2.560000e+02 : f32
    %310 = vector.broadcast %cst_98 : f32 to vector<32x1xf32>
    %311 = arith.divf %309, %310 : vector<32x1xf32>
    %312 = vector.broadcast %304 : vector<32x1xf32> to vector<32x256xf32>
    %313 = arith.subf %300, %312 : vector<32x256xf32>
    %cst_99 = arith.constant 9.99999974E-6 : f32
    %314 = vector.broadcast %cst_99 : f32 to vector<32x1xf32>
    %315 = arith.addf %311, %314 : vector<32x1xf32>
    %316 = math.rsqrt %315 : vector<32x1xf32>
    %317 = vector.broadcast %316 : vector<32x1xf32> to vector<32x256xf32>
    %318 = arith.mulf %313, %317 : vector<32x256xf32>
    %319 = vector.extract_strided_slice %318 {offsets = [0, 0], sizes = [8, 256], strides = [1, 1]} : vector<32x256xf32> to vector<8x256xf32>
    %320 = vector.extract_strided_slice %311 {offsets = [8, 0], sizes = [8, 1], strides = [1, 1]} : vector<32x1xf32> to vector<8x1xf32>
    %cst_100 = arith.constant 9.99999974E-6 : f32
    %321 = vector.broadcast %cst_100 : f32 to vector<8x1xf32>
    %322 = arith.addf %320, %321 : vector<8x1xf32>
    %323 = math.sqrt %322 : vector<8x1xf32>
    %324 = vector.broadcast %323 : vector<8x1xf32> to vector<8x256xf32>
    %325 = arith.mulf %319, %324 : vector<8x256xf32>
    %326 = vector.extract_strided_slice %304 {offsets = [8, 0], sizes = [8, 1], strides = [1, 1]} : vector<32x1xf32> to vector<8x1xf32>
    %327 = vector.broadcast %326 : vector<8x1xf32> to vector<8x256xf32>
    %328 = arith.addf %325, %327 : vector<8x256xf32>
    %329 = vector.extract_strided_slice %318 {offsets = [16, 0], sizes = [8, 256], strides = [1, 1]} : vector<32x256xf32> to vector<8x256xf32>
    %330 = vector.extract_strided_slice %311 {offsets = [24, 0], sizes = [8, 1], strides = [1, 1]} : vector<32x1xf32> to vector<8x1xf32>
    %cst_101 = arith.constant 9.99999974E-6 : f32
    %331 = vector.broadcast %cst_101 : f32 to vector<8x1xf32>
    %332 = arith.addf %330, %331 : vector<8x1xf32>
    %333 = math.sqrt %332 : vector<8x1xf32>
    %334 = vector.broadcast %333 : vector<8x1xf32> to vector<8x256xf32>
    %335 = arith.mulf %329, %334 : vector<8x256xf32>
    %336 = vector.extract_strided_slice %304 {offsets = [24, 0], sizes = [8, 1], strides = [1, 1]} : vector<32x1xf32> to vector<8x1xf32>
    %337 = vector.broadcast %336 : vector<8x1xf32> to vector<8x256xf32>
    %338 = arith.addf %335, %337 : vector<8x256xf32>
    %339 = tpu.concatenate %328, %338 in 0 : vector<8x256xf32>, vector<8x256xf32> -> vector<16x256xf32>
    %340 = tpu.concatenate %299, %339 in 1 : vector<16x256xf32>, vector<16x256xf32> -> vector<16x512xf32>
    %c1 = arith.constant 1 : index
    %c0_102 = arith.constant 0 : index
    %c0_103 = arith.constant 0 : index
    %341 = vector.load %arg1[%c1, %c0_102, %c0_103] : memref<7x32x144xf32, #tpu.memory_space<vmem>>, vector<1x32x144xf32>
    %342 = vector.shape_cast %341 : vector<1x32x144xf32> to vector<32x144xf32>
    %343 = vector.extract_strided_slice %342 {offsets = [0, 0], sizes = [16, 144], strides = [1, 1]} : vector<32x144xf32> to vector<16x144xf32>
    %c1_104 = arith.constant 1 : index
    %c0_105 = arith.constant 0 : index
    %c0_106 = arith.constant 0 : index
    %344 = vector.load %arg2[%c1_104, %c0_105, %c0_106] : memref<7x32x1xf32, #tpu.memory_space<vmem>>, vector<1x32x1xf32>
    %345 = vector.shape_cast %344 : vector<1x32x1xf32> to vector<32x1xf32>
    %346 = vector.extract_strided_slice %345 {offsets = [0, 0], sizes = [16, 1], strides = [1, 1]} : vector<32x1xf32> to vector<16x1xf32>
    %347 = tpu.iota {dimensions = array<i32: 1>} : vector<1x512xi32>
    %c255_i32_107 = arith.constant 255 : i32
    %348 = vector.broadcast %c255_i32_107 : i32 to vector<1x512xi32>
    %349 = arith.andi %347, %348 : vector<1x512xi32>
    %c4_i32_108 = arith.constant 4 : i32
    %350 = vector.broadcast %c4_i32_108 : i32 to vector<1x512xi32>
    %351 = arith.shrsi %349, %350 : vector<1x512xi32>
    %c15_i32_109 = arith.constant 15 : i32
    %352 = vector.broadcast %c15_i32_109 : i32 to vector<1x512xi32>
    %353 = arith.andi %349, %352 : vector<1x512xi32>
    %354 = vector.extract_strided_slice %340 {offsets = [0, 495], sizes = [16, 17], strides = [1, 1]} : vector<16x512xf32> to vector<16x17xf32>
    %355 = vector.extract_strided_slice %340 {offsets = [0, 0], sizes = [16, 495], strides = [1, 1]} : vector<16x512xf32> to vector<16x495xf32>
    %356 = tpu.concatenate %354, %355 in 1 : vector<16x17xf32>, vector<16x495xf32> -> vector<16x512xf32>
    %c-1_i32_110 = arith.constant -1 : i32
    %357 = vector.broadcast %c-1_i32_110 : i32 to vector<1x512xi32>
    %358 = arith.addi %351, %357 : vector<1x512xi32>
    %c0_i32_111 = arith.constant 0 : i32
    %359 = vector.broadcast %c0_i32_111 : i32 to vector<1x512xi32>
    %360 = arith.cmpi sge, %358, %359 : vector<1x512xi32>
    %c-1_i32_112 = arith.constant -1 : i32
    %361 = vector.broadcast %c-1_i32_112 : i32 to vector<1x512xi32>
    %362 = arith.addi %351, %361 : vector<1x512xi32>
    %c16_i32_113 = arith.constant 16 : i32
    %363 = vector.broadcast %c16_i32_113 : i32 to vector<1x512xi32>
    %364 = arith.cmpi slt, %362, %363 : vector<1x512xi32>
    %365 = arith.andi %360, %364 : vector<1x512xi1>
    %c-1_i32_114 = arith.constant -1 : i32
    %366 = vector.broadcast %c-1_i32_114 : i32 to vector<1x512xi32>
    %367 = arith.addi %353, %366 : vector<1x512xi32>
    %c0_i32_115 = arith.constant 0 : i32
    %368 = vector.broadcast %c0_i32_115 : i32 to vector<1x512xi32>
    %369 = arith.cmpi sge, %367, %368 : vector<1x512xi32>
    %370 = arith.andi %365, %369 : vector<1x512xi1>
    %c-1_i32_116 = arith.constant -1 : i32
    %371 = vector.broadcast %c-1_i32_116 : i32 to vector<1x512xi32>
    %372 = arith.addi %353, %371 : vector<1x512xi32>
    %c16_i32_117 = arith.constant 16 : i32
    %373 = vector.broadcast %c16_i32_117 : i32 to vector<1x512xi32>
    %374 = arith.cmpi slt, %372, %373 : vector<1x512xi32>
    %375 = arith.andi %370, %374 : vector<1x512xi1>
    %376 = arith.extui %375 : vector<1x512xi1> to vector<1x512xi32>
    %377 = arith.sitofp %376 : vector<1x512xi32> to vector<1x512xf32>
    %378 = vector.broadcast %377 : vector<1x512xf32> to vector<16x512xf32>
    %379 = arith.mulf %356, %378 : vector<16x512xf32>
    %c0_118 = arith.constant 0 : index
    %c0_119 = arith.constant 0 : index
    %380 = vector.load %arg6[%c0_118, %c0_119] : memref<144x512xf32, #tpu.memory_space<vmem>>, vector<16x512xf32>
    tpu.vector_store %arg6[%c0_118, %c0_119], %379 {strides = array<i32>} : memref<144x512xf32, #tpu.memory_space<vmem>>, vector<16x512xf32>,
    %381 = vector.extract_strided_slice %340 {offsets = [0, 496], sizes = [16, 16], strides = [1, 1]} : vector<16x512xf32> to vector<16x16xf32>
    %382 = vector.extract_strided_slice %340 {offsets = [0, 0], sizes = [16, 496], strides = [1, 1]} : vector<16x512xf32> to vector<16x496xf32>
    %383 = tpu.concatenate %381, %382 in 1 : vector<16x16xf32>, vector<16x496xf32> -> vector<16x512xf32>
    %c-1_i32_120 = arith.constant -1 : i32
    %384 = vector.broadcast %c-1_i32_120 : i32 to vector<1x512xi32>
    %385 = arith.addi %351, %384 : vector<1x512xi32>
    %c0_i32_121 = arith.constant 0 : i32
    %386 = vector.broadcast %c0_i32_121 : i32 to vector<1x512xi32>
    %387 = arith.cmpi sge, %385, %386 : vector<1x512xi32>
    %c-1_i32_122 = arith.constant -1 : i32
    %388 = vector.broadcast %c-1_i32_122 : i32 to vector<1x512xi32>
    %389 = arith.addi %351, %388 : vector<1x512xi32>
    %c16_i32_123 = arith.constant 16 : i32
    %390 = vector.broadcast %c16_i32_123 : i32 to vector<1x512xi32>
    %391 = arith.cmpi slt, %389, %390 : vector<1x512xi32>
    %392 = arith.andi %387, %391 : vector<1x512xi1>
    %c0_i32_124 = arith.constant 0 : i32
    %393 = vector.broadcast %c0_i32_124 : i32 to vector<1x512xi32>
    %394 = arith.addi %353, %393 : vector<1x512xi32>
    %c0_i32_125 = arith.constant 0 : i32
    %395 = vector.broadcast %c0_i32_125 : i32 to vector<1x512xi32>
    %396 = arith.cmpi sge, %394, %395 : vector<1x512xi32>
    %397 = arith.andi %392, %396 : vector<1x512xi1>
    %c0_i32_126 = arith.constant 0 : i32
    %398 = vector.broadcast %c0_i32_126 : i32 to vector<1x512xi32>
    %399 = arith.addi %353, %398 : vector<1x512xi32>
    %c16_i32_127 = arith.constant 16 : i32
    %400 = vector.broadcast %c16_i32_127 : i32 to vector<1x512xi32>
    %401 = arith.cmpi slt, %399, %400 : vector<1x512xi32>
    %402 = arith.andi %397, %401 : vector<1x512xi1>
    %403 = arith.extui %402 : vector<1x512xi1> to vector<1x512xi32>
    %404 = arith.sitofp %403 : vector<1x512xi32> to vector<1x512xf32>
    %405 = vector.broadcast %404 : vector<1x512xf32> to vector<16x512xf32>
    %406 = arith.mulf %383, %405 : vector<16x512xf32>
    %c16_128 = arith.constant 16 : index
    %c0_129 = arith.constant 0 : index
    %407 = vector.load %arg6[%c16_128, %c0_129] : memref<144x512xf32, #tpu.memory_space<vmem>>, vector<16x512xf32>
    tpu.vector_store %arg6[%c16_128, %c0_129], %406 {strides = array<i32>} : memref<144x512xf32, #tpu.memory_space<vmem>>, vector<16x512xf32>,
    %408 = vector.extract_strided_slice %340 {offsets = [0, 497], sizes = [16, 15], strides = [1, 1]} : vector<16x512xf32> to vector<16x15xf32>
    %409 = vector.extract_strided_slice %340 {offsets = [0, 0], sizes = [16, 497], strides = [1, 1]} : vector<16x512xf32> to vector<16x497xf32>
    %410 = tpu.concatenate %408, %409 in 1 : vector<16x15xf32>, vector<16x497xf32> -> vector<16x512xf32>
    %c-1_i32_130 = arith.constant -1 : i32
    %411 = vector.broadcast %c-1_i32_130 : i32 to vector<1x512xi32>
    %412 = arith.addi %351, %411 : vector<1x512xi32>
    %c0_i32_131 = arith.constant 0 : i32
    %413 = vector.broadcast %c0_i32_131 : i32 to vector<1x512xi32>
    %414 = arith.cmpi sge, %412, %413 : vector<1x512xi32>
    %c-1_i32_132 = arith.constant -1 : i32
    %415 = vector.broadcast %c-1_i32_132 : i32 to vector<1x512xi32>
    %416 = arith.addi %351, %415 : vector<1x512xi32>
    %c16_i32_133 = arith.constant 16 : i32
    %417 = vector.broadcast %c16_i32_133 : i32 to vector<1x512xi32>
    %418 = arith.cmpi slt, %416, %417 : vector<1x512xi32>
    %419 = arith.andi %414, %418 : vector<1x512xi1>
    %c1_i32_134 = arith.constant 1 : i32
    %420 = vector.broadcast %c1_i32_134 : i32 to vector<1x512xi32>
    %421 = arith.addi %353, %420 : vector<1x512xi32>
    %c0_i32_135 = arith.constant 0 : i32
    %422 = vector.broadcast %c0_i32_135 : i32 to vector<1x512xi32>
    %423 = arith.cmpi sge, %421, %422 : vector<1x512xi32>
    %424 = arith.andi %419, %423 : vector<1x512xi1>
    %c1_i32_136 = arith.constant 1 : i32
    %425 = vector.broadcast %c1_i32_136 : i32 to vector<1x512xi32>
    %426 = arith.addi %353, %425 : vector<1x512xi32>
    %c16_i32_137 = arith.constant 16 : i32
    %427 = vector.broadcast %c16_i32_137 : i32 to vector<1x512xi32>
    %428 = arith.cmpi slt, %426, %427 : vector<1x512xi32>
    %429 = arith.andi %424, %428 : vector<1x512xi1>
    %430 = arith.extui %429 : vector<1x512xi1> to vector<1x512xi32>
    %431 = arith.sitofp %430 : vector<1x512xi32> to vector<1x512xf32>
    %432 = vector.broadcast %431 : vector<1x512xf32> to vector<16x512xf32>
    %433 = arith.mulf %410, %432 : vector<16x512xf32>
    %c32_138 = arith.constant 32 : index
    %c0_139 = arith.constant 0 : index
    %434 = vector.load %arg6[%c32_138, %c0_139] : memref<144x512xf32, #tpu.memory_space<vmem>>, vector<16x512xf32>
    tpu.vector_store %arg6[%c32_138, %c0_139], %433 {strides = array<i32>} : memref<144x512xf32, #tpu.memory_space<vmem>>, vector<16x512xf32>,
    %435 = vector.extract_strided_slice %340 {offsets = [0, 511], sizes = [16, 1], strides = [1, 1]} : vector<16x512xf32> to vector<16x1xf32>
    %436 = vector.extract_strided_slice %340 {offsets = [0, 0], sizes = [16, 511], strides = [1, 1]} : vector<16x512xf32> to vector<16x511xf32>
    %437 = tpu.concatenate %435, %436 in 1 : vector<16x1xf32>, vector<16x511xf32> -> vector<16x512xf32>
    %c0_i32_140 = arith.constant 0 : i32
    %438 = vector.broadcast %c0_i32_140 : i32 to vector<1x512xi32>
    %439 = arith.addi %351, %438 : vector<1x512xi32>
    %c0_i32_141 = arith.constant 0 : i32
    %440 = vector.broadcast %c0_i32_141 : i32 to vector<1x512xi32>
    %441 = arith.cmpi sge, %439, %440 : vector<1x512xi32>
    %c0_i32_142 = arith.constant 0 : i32
    %442 = vector.broadcast %c0_i32_142 : i32 to vector<1x512xi32>
    %443 = arith.addi %351, %442 : vector<1x512xi32>
    %c16_i32_143 = arith.constant 16 : i32
    %444 = vector.broadcast %c16_i32_143 : i32 to vector<1x512xi32>
    %445 = arith.cmpi slt, %443, %444 : vector<1x512xi32>
    %446 = arith.andi %441, %445 : vector<1x512xi1>
    %c-1_i32_144 = arith.constant -1 : i32
    %447 = vector.broadcast %c-1_i32_144 : i32 to vector<1x512xi32>
    %448 = arith.addi %353, %447 : vector<1x512xi32>
    %c0_i32_145 = arith.constant 0 : i32
    %449 = vector.broadcast %c0_i32_145 : i32 to vector<1x512xi32>
    %450 = arith.cmpi sge, %448, %449 : vector<1x512xi32>
    %451 = arith.andi %446, %450 : vector<1x512xi1>
    %c-1_i32_146 = arith.constant -1 : i32
    %452 = vector.broadcast %c-1_i32_146 : i32 to vector<1x512xi32>
    %453 = arith.addi %353, %452 : vector<1x512xi32>
    %c16_i32_147 = arith.constant 16 : i32
    %454 = vector.broadcast %c16_i32_147 : i32 to vector<1x512xi32>
    %455 = arith.cmpi slt, %453, %454 : vector<1x512xi32>
    %456 = arith.andi %451, %455 : vector<1x512xi1>
    %457 = arith.extui %456 : vector<1x512xi1> to vector<1x512xi32>
    %458 = arith.sitofp %457 : vector<1x512xi32> to vector<1x512xf32>
    %459 = vector.broadcast %458 : vector<1x512xf32> to vector<16x512xf32>
    %460 = arith.mulf %437, %459 : vector<16x512xf32>
    %c48_148 = arith.constant 48 : index
    %c0_149 = arith.constant 0 : index
    %461 = vector.load %arg6[%c48_148, %c0_149] : memref<144x512xf32, #tpu.memory_space<vmem>>, vector<16x512xf32>
    tpu.vector_store %arg6[%c48_148, %c0_149], %460 {strides = array<i32>} : memref<144x512xf32, #tpu.memory_space<vmem>>, vector<16x512xf32>,
    %c0_i32_150 = arith.constant 0 : i32
    %462 = vector.broadcast %c0_i32_150 : i32 to vector<1x512xi32>
    %463 = arith.addi %351, %462 : vector<1x512xi32>
    %c0_i32_151 = arith.constant 0 : i32
    %464 = vector.broadcast %c0_i32_151 : i32 to vector<1x512xi32>
    %465 = arith.cmpi sge, %463, %464 : vector<1x512xi32>
    %c0_i32_152 = arith.constant 0 : i32
    %466 = vector.broadcast %c0_i32_152 : i32 to vector<1x512xi32>
    %467 = arith.addi %351, %466 : vector<1x512xi32>
    %c16_i32_153 = arith.constant 16 : i32
    %468 = vector.broadcast %c16_i32_153 : i32 to vector<1x512xi32>
    %469 = arith.cmpi slt, %467, %468 : vector<1x512xi32>
    %470 = arith.andi %465, %469 : vector<1x512xi1>
    %c0_i32_154 = arith.constant 0 : i32
    %471 = vector.broadcast %c0_i32_154 : i32 to vector<1x512xi32>
    %472 = arith.addi %353, %471 : vector<1x512xi32>
    %c0_i32_155 = arith.constant 0 : i32
    %473 = vector.broadcast %c0_i32_155 : i32 to vector<1x512xi32>
    %474 = arith.cmpi sge, %472, %473 : vector<1x512xi32>
    %475 = arith.andi %470, %474 : vector<1x512xi1>
    %c0_i32_156 = arith.constant 0 : i32
    %476 = vector.broadcast %c0_i32_156 : i32 to vector<1x512xi32>
    %477 = arith.addi %353, %476 : vector<1x512xi32>
    %c16_i32_157 = arith.constant 16 : i32
    %478 = vector.broadcast %c16_i32_157 : i32 to vector<1x512xi32>
    %479 = arith.cmpi slt, %477, %478 : vector<1x512xi32>
    %480 = arith.andi %475, %479 : vector<1x512xi1>
    %481 = arith.extui %480 : vector<1x512xi1> to vector<1x512xi32>
    %482 = arith.sitofp %481 : vector<1x512xi32> to vector<1x512xf32>
    %483 = vector.broadcast %482 : vector<1x512xf32> to vector<16x512xf32>
    %484 = arith.mulf %340, %483 : vector<16x512xf32>
    %c64_158 = arith.constant 64 : index
    %c0_159 = arith.constant 0 : index
    %485 = vector.load %arg6[%c64_158, %c0_159] : memref<144x512xf32, #tpu.memory_space<vmem>>, vector<16x512xf32>
    tpu.vector_store %arg6[%c64_158, %c0_159], %484 {strides = array<i32>} : memref<144x512xf32, #tpu.memory_space<vmem>>, vector<16x512xf32>,
    %486 = vector.extract_strided_slice %340 {offsets = [0, 1], sizes = [16, 511], strides = [1, 1]} : vector<16x512xf32> to vector<16x511xf32>
    %487 = vector.extract_strided_slice %340 {offsets = [0, 0], sizes = [16, 1], strides = [1, 1]} : vector<16x512xf32> to vector<16x1xf32>
    %488 = tpu.concatenate %486, %487 in 1 : vector<16x511xf32>, vector<16x1xf32> -> vector<16x512xf32>
    %c0_i32_160 = arith.constant 0 : i32
    %489 = vector.broadcast %c0_i32_160 : i32 to vector<1x512xi32>
    %490 = arith.addi %351, %489 : vector<1x512xi32>
    %c0_i32_161 = arith.constant 0 : i32
    %491 = vector.broadcast %c0_i32_161 : i32 to vector<1x512xi32>
    %492 = arith.cmpi sge, %490, %491 : vector<1x512xi32>
    %c0_i32_162 = arith.constant 0 : i32
    %493 = vector.broadcast %c0_i32_162 : i32 to vector<1x512xi32>
    %494 = arith.addi %351, %493 : vector<1x512xi32>
    %c16_i32_163 = arith.constant 16 : i32
    %495 = vector.broadcast %c16_i32_163 : i32 to vector<1x512xi32>
    %496 = arith.cmpi slt, %494, %495 : vector<1x512xi32>
    %497 = arith.andi %492, %496 : vector<1x512xi1>
    %c1_i32_164 = arith.constant 1 : i32
    %498 = vector.broadcast %c1_i32_164 : i32 to vector<1x512xi32>
    %499 = arith.addi %353, %498 : vector<1x512xi32>
    %c0_i32_165 = arith.constant 0 : i32
    %500 = vector.broadcast %c0_i32_165 : i32 to vector<1x512xi32>
    %501 = arith.cmpi sge, %499, %500 : vector<1x512xi32>
    %502 = arith.andi %497, %501 : vector<1x512xi1>
    %c1_i32_166 = arith.constant 1 : i32
    %503 = vector.broadcast %c1_i32_166 : i32 to vector<1x512xi32>
    %504 = arith.addi %353, %503 : vector<1x512xi32>
    %c16_i32_167 = arith.constant 16 : i32
    %505 = vector.broadcast %c16_i32_167 : i32 to vector<1x512xi32>
    %506 = arith.cmpi slt, %504, %505 : vector<1x512xi32>
    %507 = arith.andi %502, %506 : vector<1x512xi1>
    %508 = arith.extui %507 : vector<1x512xi1> to vector<1x512xi32>
    %509 = arith.sitofp %508 : vector<1x512xi32> to vector<1x512xf32>
    %510 = vector.broadcast %509 : vector<1x512xf32> to vector<16x512xf32>
    %511 = arith.mulf %488, %510 : vector<16x512xf32>
    %c80_168 = arith.constant 80 : index
    %c0_169 = arith.constant 0 : index
    %512 = vector.load %arg6[%c80_168, %c0_169] : memref<144x512xf32, #tpu.memory_space<vmem>>, vector<16x512xf32>
    tpu.vector_store %arg6[%c80_168, %c0_169], %511 {strides = array<i32>} : memref<144x512xf32, #tpu.memory_space<vmem>>, vector<16x512xf32>,
    %513 = vector.extract_strided_slice %340 {offsets = [0, 15], sizes = [16, 497], strides = [1, 1]} : vector<16x512xf32> to vector<16x497xf32>
    %514 = vector.extract_strided_slice %340 {offsets = [0, 0], sizes = [16, 15], strides = [1, 1]} : vector<16x512xf32> to vector<16x15xf32>
    %515 = tpu.concatenate %513, %514 in 1 : vector<16x497xf32>, vector<16x15xf32> -> vector<16x512xf32>
    %c1_i32_170 = arith.constant 1 : i32
    %516 = vector.broadcast %c1_i32_170 : i32 to vector<1x512xi32>
    %517 = arith.addi %351, %516 : vector<1x512xi32>
    %c0_i32_171 = arith.constant 0 : i32
    %518 = vector.broadcast %c0_i32_171 : i32 to vector<1x512xi32>
    %519 = arith.cmpi sge, %517, %518 : vector<1x512xi32>
    %c1_i32_172 = arith.constant 1 : i32
    %520 = vector.broadcast %c1_i32_172 : i32 to vector<1x512xi32>
    %521 = arith.addi %351, %520 : vector<1x512xi32>
    %c16_i32_173 = arith.constant 16 : i32
    %522 = vector.broadcast %c16_i32_173 : i32 to vector<1x512xi32>
    %523 = arith.cmpi slt, %521, %522 : vector<1x512xi32>
    %524 = arith.andi %519, %523 : vector<1x512xi1>
    %c-1_i32_174 = arith.constant -1 : i32
    %525 = vector.broadcast %c-1_i32_174 : i32 to vector<1x512xi32>
    %526 = arith.addi %353, %525 : vector<1x512xi32>
    %c0_i32_175 = arith.constant 0 : i32
    %527 = vector.broadcast %c0_i32_175 : i32 to vector<1x512xi32>
    %528 = arith.cmpi sge, %526, %527 : vector<1x512xi32>
    %529 = arith.andi %524, %528 : vector<1x512xi1>
    %c-1_i32_176 = arith.constant -1 : i32
    %530 = vector.broadcast %c-1_i32_176 : i32 to vector<1x512xi32>
    %531 = arith.addi %353, %530 : vector<1x512xi32>
    %c16_i32_177 = arith.constant 16 : i32
    %532 = vector.broadcast %c16_i32_177 : i32 to vector<1x512xi32>
    %533 = arith.cmpi slt, %531, %532 : vector<1x512xi32>
    %534 = arith.andi %529, %533 : vector<1x512xi1>
    %535 = arith.extui %534 : vector<1x512xi1> to vector<1x512xi32>
    %536 = arith.sitofp %535 : vector<1x512xi32> to vector<1x512xf32>
    %537 = vector.broadcast %536 : vector<1x512xf32> to vector<16x512xf32>
    %538 = arith.mulf %515, %537 : vector<16x512xf32>
    %c96_178 = arith.constant 96 : index
    %c0_179 = arith.constant 0 : index
    %539 = vector.load %arg6[%c96_178, %c0_179] : memref<144x512xf32, #tpu.memory_space<vmem>>, vector<16x512xf32>
    tpu.vector_store %arg6[%c96_178, %c0_179], %538 {strides = array<i32>} : memref<144x512xf32, #tpu.memory_space<vmem>>, vector<16x512xf32>,
    %540 = vector.extract_strided_slice %340 {offsets = [0, 16], sizes = [16, 496], strides = [1, 1]} : vector<16x512xf32> to vector<16x496xf32>
    %541 = vector.extract_strided_slice %340 {offsets = [0, 0], sizes = [16, 16], strides = [1, 1]} : vector<16x512xf32> to vector<16x16xf32>
    %542 = tpu.concatenate %540, %541 in 1 : vector<16x496xf32>, vector<16x16xf32> -> vector<16x512xf32>
    %c1_i32_180 = arith.constant 1 : i32
    %543 = vector.broadcast %c1_i32_180 : i32 to vector<1x512xi32>
    %544 = arith.addi %351, %543 : vector<1x512xi32>
    %c0_i32_181 = arith.constant 0 : i32
    %545 = vector.broadcast %c0_i32_181 : i32 to vector<1x512xi32>
    %546 = arith.cmpi sge, %544, %545 : vector<1x512xi32>
    %c1_i32_182 = arith.constant 1 : i32
    %547 = vector.broadcast %c1_i32_182 : i32 to vector<1x512xi32>
    %548 = arith.addi %351, %547 : vector<1x512xi32>
    %c16_i32_183 = arith.constant 16 : i32
    %549 = vector.broadcast %c16_i32_183 : i32 to vector<1x512xi32>
    %550 = arith.cmpi slt, %548, %549 : vector<1x512xi32>
    %551 = arith.andi %546, %550 : vector<1x512xi1>
    %c0_i32_184 = arith.constant 0 : i32
    %552 = vector.broadcast %c0_i32_184 : i32 to vector<1x512xi32>
    %553 = arith.addi %353, %552 : vector<1x512xi32>
    %c0_i32_185 = arith.constant 0 : i32
    %554 = vector.broadcast %c0_i32_185 : i32 to vector<1x512xi32>
    %555 = arith.cmpi sge, %553, %554 : vector<1x512xi32>
    %556 = arith.andi %551, %555 : vector<1x512xi1>
    %c0_i32_186 = arith.constant 0 : i32
    %557 = vector.broadcast %c0_i32_186 : i32 to vector<1x512xi32>
    %558 = arith.addi %353, %557 : vector<1x512xi32>
    %c16_i32_187 = arith.constant 16 : i32
    %559 = vector.broadcast %c16_i32_187 : i32 to vector<1x512xi32>
    %560 = arith.cmpi slt, %558, %559 : vector<1x512xi32>
    %561 = arith.andi %556, %560 : vector<1x512xi1>
    %562 = arith.extui %561 : vector<1x512xi1> to vector<1x512xi32>
    %563 = arith.sitofp %562 : vector<1x512xi32> to vector<1x512xf32>
    %564 = vector.broadcast %563 : vector<1x512xf32> to vector<16x512xf32>
    %565 = arith.mulf %542, %564 : vector<16x512xf32>
    %c112_188 = arith.constant 112 : index
    %c0_189 = arith.constant 0 : index
    %566 = vector.load %arg6[%c112_188, %c0_189] : memref<144x512xf32, #tpu.memory_space<vmem>>, vector<16x512xf32>
    tpu.vector_store %arg6[%c112_188, %c0_189], %565 {strides = array<i32>} : memref<144x512xf32, #tpu.memory_space<vmem>>, vector<16x512xf32>,
    %567 = vector.extract_strided_slice %340 {offsets = [0, 17], sizes = [16, 495], strides = [1, 1]} : vector<16x512xf32> to vector<16x495xf32>
    %568 = vector.extract_strided_slice %340 {offsets = [0, 0], sizes = [16, 17], strides = [1, 1]} : vector<16x512xf32> to vector<16x17xf32>
    %569 = tpu.concatenate %567, %568 in 1 : vector<16x495xf32>, vector<16x17xf32> -> vector<16x512xf32>
    %c1_i32_190 = arith.constant 1 : i32
    %570 = vector.broadcast %c1_i32_190 : i32 to vector<1x512xi32>
    %571 = arith.addi %351, %570 : vector<1x512xi32>
    %c0_i32_191 = arith.constant 0 : i32
    %572 = vector.broadcast %c0_i32_191 : i32 to vector<1x512xi32>
    %573 = arith.cmpi sge, %571, %572 : vector<1x512xi32>
    %c1_i32_192 = arith.constant 1 : i32
    %574 = vector.broadcast %c1_i32_192 : i32 to vector<1x512xi32>
    %575 = arith.addi %351, %574 : vector<1x512xi32>
    %c16_i32_193 = arith.constant 16 : i32
    %576 = vector.broadcast %c16_i32_193 : i32 to vector<1x512xi32>
    %577 = arith.cmpi slt, %575, %576 : vector<1x512xi32>
    %578 = arith.andi %573, %577 : vector<1x512xi1>
    %c1_i32_194 = arith.constant 1 : i32
    %579 = vector.broadcast %c1_i32_194 : i32 to vector<1x512xi32>
    %580 = arith.addi %353, %579 : vector<1x512xi32>
    %c0_i32_195 = arith.constant 0 : i32
    %581 = vector.broadcast %c0_i32_195 : i32 to vector<1x512xi32>
    %582 = arith.cmpi sge, %580, %581 : vector<1x512xi32>
    %583 = arith.andi %578, %582 : vector<1x512xi1>
    %c1_i32_196 = arith.constant 1 : i32
    %584 = vector.broadcast %c1_i32_196 : i32 to vector<1x512xi32>
    %585 = arith.addi %353, %584 : vector<1x512xi32>
    %c16_i32_197 = arith.constant 16 : i32
    %586 = vector.broadcast %c16_i32_197 : i32 to vector<1x512xi32>
    %587 = arith.cmpi slt, %585, %586 : vector<1x512xi32>
    %588 = arith.andi %583, %587 : vector<1x512xi1>
    %589 = arith.extui %588 : vector<1x512xi1> to vector<1x512xi32>
    %590 = arith.sitofp %589 : vector<1x512xi32> to vector<1x512xf32>
    %591 = vector.broadcast %590 : vector<1x512xf32> to vector<16x512xf32>
    %592 = arith.mulf %569, %591 : vector<16x512xf32>
    %c128_198 = arith.constant 128 : index
    %c0_199 = arith.constant 0 : index
    %593 = vector.load %arg6[%c128_198, %c0_199] : memref<144x512xf32, #tpu.memory_space<vmem>>, vector<16x512xf32>
    tpu.vector_store %arg6[%c128_198, %c0_199], %592 {strides = array<i32>} : memref<144x512xf32, #tpu.memory_space<vmem>>, vector<16x512xf32>,
    %c0_200 = arith.constant 0 : index
    %c0_201 = arith.constant 0 : index
    %594 = vector.load %arg6[%c0_200, %c0_201] : memref<144x512xf32, #tpu.memory_space<vmem>>, vector<144x512xf32>
    %595 = arith.truncf %343 : vector<16x144xf32> to vector<16x144xbf16>
    %596 = arith.truncf %594 : vector<144x512xf32> to vector<144x512xbf16>
    %cst_202 = arith.constant dense<0.000000e+00> : vector<16x512xf32>
    %597 = tpu.matmul %595, %596, %cst_202 {dimension_numbers = #tpu.dot_dimension_numbers<[1], [0], [0], [1], [0, 0, 1, 1], [], []>} : vector<16x144xbf16>, vector<144x512xbf16>, vector<16x512xf32> -> vector<16x512xf32>
    %598 = vector.broadcast %346 : vector<16x1xf32> to vector<16x512xf32>
    %599 = arith.addf %597, %598 : vector<16x512xf32>
    %cst_203 = arith.constant 0.000000e+00 : f32
    %600 = vector.broadcast %cst_203 : f32 to vector<16x512xf32>
    %601 = arith.maximumf %599, %600 : vector<16x512xf32>
    %c2 = arith.constant 2 : index
    %c0_204 = arith.constant 0 : index
    %c0_205 = arith.constant 0 : index
    %602 = vector.load %arg1[%c2, %c0_204, %c0_205] : memref<7x32x144xf32, #tpu.memory_space<vmem>>, vector<1x32x144xf32>
    %603 = vector.shape_cast %602 : vector<1x32x144xf32> to vector<32x144xf32>
    %604 = vector.extract_strided_slice %603 {offsets = [0, 0], sizes = [2, 16], strides = [1, 1]} : vector<32x144xf32> to vector<2x16xf32>
    %c2_206 = arith.constant 2 : index
    %c0_207 = arith.constant 0 : index
    %c0_208 = arith.constant 0 : index
    %605 = vector.load %arg2[%c2_206, %c0_207, %c0_208] : memref<7x32x1xf32, #tpu.memory_space<vmem>>, vector<1x32x1xf32>
    %606 = vector.shape_cast %605 : vector<1x32x1xf32> to vector<32x1xf32>
    %607 = vector.extract_strided_slice %606 {offsets = [0, 0], sizes = [2, 1], strides = [1, 1]} : vector<32x1xf32> to vector<2x1xf32>
    %608 = arith.truncf %604 : vector<2x16xf32> to vector<2x16xbf16>
    %609 = arith.truncf %601 : vector<16x512xf32> to vector<16x512xbf16>
    %cst_209 = arith.constant dense<0.000000e+00> : vector<2x512xf32>
    %610 = tpu.matmul %608, %609, %cst_209 {dimension_numbers = #tpu.dot_dimension_numbers<[1], [0], [0], [1], [0, 0, 1, 1], [], []>} : vector<2x16xbf16>, vector<16x512xbf16>, vector<2x512xf32> -> vector<2x512xf32>
    %611 = vector.broadcast %607 : vector<2x1xf32> to vector<2x512xf32>
    %612 = arith.addf %610, %611 : vector<2x512xf32>
    %c0_210 = arith.constant 0 : index
    %c0_211 = arith.constant 0 : index
    %613 = vector.load %arg3[%c0_210, %c0_211] : memref<2x512xf32, #tpu.memory_space<vmem>>, vector<2x512xf32>
    tpu.vector_store %arg3[%c0_210, %c0_211], %612 {strides = array<i32>} : memref<2x512xf32, #tpu.memory_space<vmem>>, vector<2x512xf32>,
    %614 = vector.extract_strided_slice %601 {offsets = [0, 0], sizes = [8, 512], strides = [1, 1]} : vector<16x512xf32> to vector<8x512xf32>
    %c3 = arith.constant 3 : index
    %c0_212 = arith.constant 0 : index
    %c0_213 = arith.constant 0 : index
    %615 = vector.load %arg1[%c3, %c0_212, %c0_213] : memref<7x32x144xf32, #tpu.memory_space<vmem>>, vector<1x32x144xf32>
    %616 = vector.shape_cast %615 : vector<1x32x144xf32> to vector<32x144xf32>
    %617 = vector.extract_strided_slice %616 {offsets = [0, 0], sizes = [32, 72], strides = [1, 1]} : vector<32x144xf32> to vector<32x72xf32>
    %c3_214 = arith.constant 3 : index
    %c0_215 = arith.constant 0 : index
    %c0_216 = arith.constant 0 : index
    %618 = vector.load %arg2[%c3_214, %c0_215, %c0_216] : memref<7x32x1xf32, #tpu.memory_space<vmem>>, vector<1x32x1xf32>
    %619 = vector.shape_cast %618 : vector<1x32x1xf32> to vector<32x1xf32>
    %620 = tpu.iota {dimensions = array<i32: 1>} : vector<1x512xi32>
    %c255_i32_217 = arith.constant 255 : i32
    %621 = vector.broadcast %c255_i32_217 : i32 to vector<1x512xi32>
    %622 = arith.andi %620, %621 : vector<1x512xi32>
    %c4_i32_218 = arith.constant 4 : i32
    %623 = vector.broadcast %c4_i32_218 : i32 to vector<1x512xi32>
    %624 = arith.shrsi %622, %623 : vector<1x512xi32>
    %c15_i32_219 = arith.constant 15 : i32
    %625 = vector.broadcast %c15_i32_219 : i32 to vector<1x512xi32>
    %626 = arith.andi %622, %625 : vector<1x512xi32>
    %627 = vector.extract_strided_slice %614 {offsets = [0, 495], sizes = [8, 17], strides = [1, 1]} : vector<8x512xf32> to vector<8x17xf32>
    %628 = vector.extract_strided_slice %614 {offsets = [0, 0], sizes = [8, 495], strides = [1, 1]} : vector<8x512xf32> to vector<8x495xf32>
    %629 = tpu.concatenate %627, %628 in 1 : vector<8x17xf32>, vector<8x495xf32> -> vector<8x512xf32>
    %c-1_i32_220 = arith.constant -1 : i32
    %630 = vector.broadcast %c-1_i32_220 : i32 to vector<1x512xi32>
    %631 = arith.addi %624, %630 : vector<1x512xi32>
    %c0_i32_221 = arith.constant 0 : i32
    %632 = vector.broadcast %c0_i32_221 : i32 to vector<1x512xi32>
    %633 = arith.cmpi sge, %631, %632 : vector<1x512xi32>
    %c-1_i32_222 = arith.constant -1 : i32
    %634 = vector.broadcast %c-1_i32_222 : i32 to vector<1x512xi32>
    %635 = arith.addi %624, %634 : vector<1x512xi32>
    %c16_i32_223 = arith.constant 16 : i32
    %636 = vector.broadcast %c16_i32_223 : i32 to vector<1x512xi32>
    %637 = arith.cmpi slt, %635, %636 : vector<1x512xi32>
    %638 = arith.andi %633, %637 : vector<1x512xi1>
    %c-1_i32_224 = arith.constant -1 : i32
    %639 = vector.broadcast %c-1_i32_224 : i32 to vector<1x512xi32>
    %640 = arith.addi %626, %639 : vector<1x512xi32>
    %c0_i32_225 = arith.constant 0 : i32
    %641 = vector.broadcast %c0_i32_225 : i32 to vector<1x512xi32>
    %642 = arith.cmpi sge, %640, %641 : vector<1x512xi32>
    %643 = arith.andi %638, %642 : vector<1x512xi1>
    %c-1_i32_226 = arith.constant -1 : i32
    %644 = vector.broadcast %c-1_i32_226 : i32 to vector<1x512xi32>
    %645 = arith.addi %626, %644 : vector<1x512xi32>
    %c16_i32_227 = arith.constant 16 : i32
    %646 = vector.broadcast %c16_i32_227 : i32 to vector<1x512xi32>
    %647 = arith.cmpi slt, %645, %646 : vector<1x512xi32>
    %648 = arith.andi %643, %647 : vector<1x512xi1>
    %649 = arith.extui %648 : vector<1x512xi1> to vector<1x512xi32>
    %650 = arith.sitofp %649 : vector<1x512xi32> to vector<1x512xf32>
    %651 = vector.broadcast %650 : vector<1x512xf32> to vector<8x512xf32>
    %652 = arith.mulf %629, %651 : vector<8x512xf32>
    %c0_228 = arith.constant 0 : index
    %c0_229 = arith.constant 0 : index
    %653 = vector.load %arg6[%c0_228, %c0_229] : memref<144x512xf32, #tpu.memory_space<vmem>>, vector<8x512xf32>
    tpu.vector_store %arg6[%c0_228, %c0_229], %652 {strides = array<i32>} : memref<144x512xf32, #tpu.memory_space<vmem>>, vector<8x512xf32>,
    %654 = vector.extract_strided_slice %614 {offsets = [0, 496], sizes = [8, 16], strides = [1, 1]} : vector<8x512xf32> to vector<8x16xf32>
    %655 = vector.extract_strided_slice %614 {offsets = [0, 0], sizes = [8, 496], strides = [1, 1]} : vector<8x512xf32> to vector<8x496xf32>
    %656 = tpu.concatenate %654, %655 in 1 : vector<8x16xf32>, vector<8x496xf32> -> vector<8x512xf32>
    %c-1_i32_230 = arith.constant -1 : i32
    %657 = vector.broadcast %c-1_i32_230 : i32 to vector<1x512xi32>
    %658 = arith.addi %624, %657 : vector<1x512xi32>
    %c0_i32_231 = arith.constant 0 : i32
    %659 = vector.broadcast %c0_i32_231 : i32 to vector<1x512xi32>
    %660 = arith.cmpi sge, %658, %659 : vector<1x512xi32>
    %c-1_i32_232 = arith.constant -1 : i32
    %661 = vector.broadcast %c-1_i32_232 : i32 to vector<1x512xi32>
    %662 = arith.addi %624, %661 : vector<1x512xi32>
    %c16_i32_233 = arith.constant 16 : i32
    %663 = vector.broadcast %c16_i32_233 : i32 to vector<1x512xi32>
    %664 = arith.cmpi slt, %662, %663 : vector<1x512xi32>
    %665 = arith.andi %660, %664 : vector<1x512xi1>
    %c0_i32_234 = arith.constant 0 : i32
    %666 = vector.broadcast %c0_i32_234 : i32 to vector<1x512xi32>
    %667 = arith.addi %626, %666 : vector<1x512xi32>
    %c0_i32_235 = arith.constant 0 : i32
    %668 = vector.broadcast %c0_i32_235 : i32 to vector<1x512xi32>
    %669 = arith.cmpi sge, %667, %668 : vector<1x512xi32>
    %670 = arith.andi %665, %669 : vector<1x512xi1>
    %c0_i32_236 = arith.constant 0 : i32
    %671 = vector.broadcast %c0_i32_236 : i32 to vector<1x512xi32>
    %672 = arith.addi %626, %671 : vector<1x512xi32>
    %c16_i32_237 = arith.constant 16 : i32
    %673 = vector.broadcast %c16_i32_237 : i32 to vector<1x512xi32>
    %674 = arith.cmpi slt, %672, %673 : vector<1x512xi32>
    %675 = arith.andi %670, %674 : vector<1x512xi1>
    %676 = arith.extui %675 : vector<1x512xi1> to vector<1x512xi32>
    %677 = arith.sitofp %676 : vector<1x512xi32> to vector<1x512xf32>
    %678 = vector.broadcast %677 : vector<1x512xf32> to vector<8x512xf32>
    %679 = arith.mulf %656, %678 : vector<8x512xf32>
    %c8 = arith.constant 8 : index
    %c0_238 = arith.constant 0 : index
    %680 = vector.load %arg6[%c8, %c0_238] : memref<144x512xf32, #tpu.memory_space<vmem>>, vector<8x512xf32>
    tpu.vector_store %arg6[%c8, %c0_238], %679 {strides = array<i32>} : memref<144x512xf32, #tpu.memory_space<vmem>>, vector<8x512xf32>,
    %681 = vector.extract_strided_slice %614 {offsets = [0, 497], sizes = [8, 15], strides = [1, 1]} : vector<8x512xf32> to vector<8x15xf32>
    %682 = vector.extract_strided_slice %614 {offsets = [0, 0], sizes = [8, 497], strides = [1, 1]} : vector<8x512xf32> to vector<8x497xf32>
    %683 = tpu.concatenate %681, %682 in 1 : vector<8x15xf32>, vector<8x497xf32> -> vector<8x512xf32>
    %c-1_i32_239 = arith.constant -1 : i32
    %684 = vector.broadcast %c-1_i32_239 : i32 to vector<1x512xi32>
    %685 = arith.addi %624, %684 : vector<1x512xi32>
    %c0_i32_240 = arith.constant 0 : i32
    %686 = vector.broadcast %c0_i32_240 : i32 to vector<1x512xi32>
    %687 = arith.cmpi sge, %685, %686 : vector<1x512xi32>
    %c-1_i32_241 = arith.constant -1 : i32
    %688 = vector.broadcast %c-1_i32_241 : i32 to vector<1x512xi32>
    %689 = arith.addi %624, %688 : vector<1x512xi32>
    %c16_i32_242 = arith.constant 16 : i32
    %690 = vector.broadcast %c16_i32_242 : i32 to vector<1x512xi32>
    %691 = arith.cmpi slt, %689, %690 : vector<1x512xi32>
    %692 = arith.andi %687, %691 : vector<1x512xi1>
    %c1_i32_243 = arith.constant 1 : i32
    %693 = vector.broadcast %c1_i32_243 : i32 to vector<1x512xi32>
    %694 = arith.addi %626, %693 : vector<1x512xi32>
    %c0_i32_244 = arith.constant 0 : i32
    %695 = vector.broadcast %c0_i32_244 : i32 to vector<1x512xi32>
    %696 = arith.cmpi sge, %694, %695 : vector<1x512xi32>
    %697 = arith.andi %692, %696 : vector<1x512xi1>
    %c1_i32_245 = arith.constant 1 : i32
    %698 = vector.broadcast %c1_i32_245 : i32 to vector<1x512xi32>
    %699 = arith.addi %626, %698 : vector<1x512xi32>
    %c16_i32_246 = arith.constant 16 : i32
    %700 = vector.broadcast %c16_i32_246 : i32 to vector<1x512xi32>
    %701 = arith.cmpi slt, %699, %700 : vector<1x512xi32>
    %702 = arith.andi %697, %701 : vector<1x512xi1>
    %703 = arith.extui %702 : vector<1x512xi1> to vector<1x512xi32>
    %704 = arith.sitofp %703 : vector<1x512xi32> to vector<1x512xf32>
    %705 = vector.broadcast %704 : vector<1x512xf32> to vector<8x512xf32>
    %706 = arith.mulf %683, %705 : vector<8x512xf32>
    %c16_247 = arith.constant 16 : index
    %c0_248 = arith.constant 0 : index
    %707 = vector.load %arg6[%c16_247, %c0_248] : memref<144x512xf32, #tpu.memory_space<vmem>>, vector<8x512xf32>
    tpu.vector_store %arg6[%c16_247, %c0_248], %706 {strides = array<i32>} : memref<144x512xf32, #tpu.memory_space<vmem>>, vector<8x512xf32>,
    %708 = vector.extract_strided_slice %614 {offsets = [0, 511], sizes = [8, 1], strides = [1, 1]} : vector<8x512xf32> to vector<8x1xf32>
    %709 = vector.extract_strided_slice %614 {offsets = [0, 0], sizes = [8, 511], strides = [1, 1]} : vector<8x512xf32> to vector<8x511xf32>
    %710 = tpu.concatenate %708, %709 in 1 : vector<8x1xf32>, vector<8x511xf32> -> vector<8x512xf32>
    %c0_i32_249 = arith.constant 0 : i32
    %711 = vector.broadcast %c0_i32_249 : i32 to vector<1x512xi32>
    %712 = arith.addi %624, %711 : vector<1x512xi32>
    %c0_i32_250 = arith.constant 0 : i32
    %713 = vector.broadcast %c0_i32_250 : i32 to vector<1x512xi32>
    %714 = arith.cmpi sge, %712, %713 : vector<1x512xi32>
    %c0_i32_251 = arith.constant 0 : i32
    %715 = vector.broadcast %c0_i32_251 : i32 to vector<1x512xi32>
    %716 = arith.addi %624, %715 : vector<1x512xi32>
    %c16_i32_252 = arith.constant 16 : i32
    %717 = vector.broadcast %c16_i32_252 : i32 to vector<1x512xi32>
    %718 = arith.cmpi slt, %716, %717 : vector<1x512xi32>
    %719 = arith.andi %714, %718 : vector<1x512xi1>
    %c-1_i32_253 = arith.constant -1 : i32
    %720 = vector.broadcast %c-1_i32_253 : i32 to vector<1x512xi32>
    %721 = arith.addi %626, %720 : vector<1x512xi32>
    %c0_i32_254 = arith.constant 0 : i32
    %722 = vector.broadcast %c0_i32_254 : i32 to vector<1x512xi32>
    %723 = arith.cmpi sge, %721, %722 : vector<1x512xi32>
    %724 = arith.andi %719, %723 : vector<1x512xi1>
    %c-1_i32_255 = arith.constant -1 : i32
    %725 = vector.broadcast %c-1_i32_255 : i32 to vector<1x512xi32>
    %726 = arith.addi %626, %725 : vector<1x512xi32>
    %c16_i32_256 = arith.constant 16 : i32
    %727 = vector.broadcast %c16_i32_256 : i32 to vector<1x512xi32>
    %728 = arith.cmpi slt, %726, %727 : vector<1x512xi32>
    %729 = arith.andi %724, %728 : vector<1x512xi1>
    %730 = arith.extui %729 : vector<1x512xi1> to vector<1x512xi32>
    %731 = arith.sitofp %730 : vector<1x512xi32> to vector<1x512xf32>
    %732 = vector.broadcast %731 : vector<1x512xf32> to vector<8x512xf32>
    %733 = arith.mulf %710, %732 : vector<8x512xf32>
    %c24 = arith.constant 24 : index
    %c0_257 = arith.constant 0 : index
    %734 = vector.load %arg6[%c24, %c0_257] : memref<144x512xf32, #tpu.memory_space<vmem>>, vector<8x512xf32>
    tpu.vector_store %arg6[%c24, %c0_257], %733 {strides = array<i32>} : memref<144x512xf32, #tpu.memory_space<vmem>>, vector<8x512xf32>,
    %c0_i32_258 = arith.constant 0 : i32
    %735 = vector.broadcast %c0_i32_258 : i32 to vector<1x512xi32>
    %736 = arith.addi %624, %735 : vector<1x512xi32>
    %c0_i32_259 = arith.constant 0 : i32
    %737 = vector.broadcast %c0_i32_259 : i32 to vector<1x512xi32>
    %738 = arith.cmpi sge, %736, %737 : vector<1x512xi32>
    %c0_i32_260 = arith.constant 0 : i32
    %739 = vector.broadcast %c0_i32_260 : i32 to vector<1x512xi32>
    %740 = arith.addi %624, %739 : vector<1x512xi32>
    %c16_i32_261 = arith.constant 16 : i32
    %741 = vector.broadcast %c16_i32_261 : i32 to vector<1x512xi32>
    %742 = arith.cmpi slt, %740, %741 : vector<1x512xi32>
    %743 = arith.andi %738, %742 : vector<1x512xi1>
    %c0_i32_262 = arith.constant 0 : i32
    %744 = vector.broadcast %c0_i32_262 : i32 to vector<1x512xi32>
    %745 = arith.addi %626, %744 : vector<1x512xi32>
    %c0_i32_263 = arith.constant 0 : i32
    %746 = vector.broadcast %c0_i32_263 : i32 to vector<1x512xi32>
    %747 = arith.cmpi sge, %745, %746 : vector<1x512xi32>
    %748 = arith.andi %743, %747 : vector<1x512xi1>
    %c0_i32_264 = arith.constant 0 : i32
    %749 = vector.broadcast %c0_i32_264 : i32 to vector<1x512xi32>
    %750 = arith.addi %626, %749 : vector<1x512xi32>
    %c16_i32_265 = arith.constant 16 : i32
    %751 = vector.broadcast %c16_i32_265 : i32 to vector<1x512xi32>
    %752 = arith.cmpi slt, %750, %751 : vector<1x512xi32>
    %753 = arith.andi %748, %752 : vector<1x512xi1>
    %754 = arith.extui %753 : vector<1x512xi1> to vector<1x512xi32>
    %755 = arith.sitofp %754 : vector<1x512xi32> to vector<1x512xf32>
    %756 = vector.broadcast %755 : vector<1x512xf32> to vector<8x512xf32>
    %757 = arith.mulf %614, %756 : vector<8x512xf32>
    %c32_266 = arith.constant 32 : index
    %c0_267 = arith.constant 0 : index
    %758 = vector.load %arg6[%c32_266, %c0_267] : memref<144x512xf32, #tpu.memory_space<vmem>>, vector<8x512xf32>
    tpu.vector_store %arg6[%c32_266, %c0_267], %757 {strides = array<i32>} : memref<144x512xf32, #tpu.memory_space<vmem>>, vector<8x512xf32>,
    %759 = vector.extract_strided_slice %614 {offsets = [0, 1], sizes = [8, 511], strides = [1, 1]} : vector<8x512xf32> to vector<8x511xf32>
    %760 = vector.extract_strided_slice %614 {offsets = [0, 0], sizes = [8, 1], strides = [1, 1]} : vector<8x512xf32> to vector<8x1xf32>
    %761 = tpu.concatenate %759, %760 in 1 : vector<8x511xf32>, vector<8x1xf32> -> vector<8x512xf32>
    %c0_i32_268 = arith.constant 0 : i32
    %762 = vector.broadcast %c0_i32_268 : i32 to vector<1x512xi32>
    %763 = arith.addi %624, %762 : vector<1x512xi32>
    %c0_i32_269 = arith.constant 0 : i32
    %764 = vector.broadcast %c0_i32_269 : i32 to vector<1x512xi32>
    %765 = arith.cmpi sge, %763, %764 : vector<1x512xi32>
    %c0_i32_270 = arith.constant 0 : i32
    %766 = vector.broadcast %c0_i32_270 : i32 to vector<1x512xi32>
    %767 = arith.addi %624, %766 : vector<1x512xi32>
    %c16_i32_271 = arith.constant 16 : i32
    %768 = vector.broadcast %c16_i32_271 : i32 to vector<1x512xi32>
    %769 = arith.cmpi slt, %767, %768 : vector<1x512xi32>
    %770 = arith.andi %765, %769 : vector<1x512xi1>
    %c1_i32_272 = arith.constant 1 : i32
    %771 = vector.broadcast %c1_i32_272 : i32 to vector<1x512xi32>
    %772 = arith.addi %626, %771 : vector<1x512xi32>
    %c0_i32_273 = arith.constant 0 : i32
    %773 = vector.broadcast %c0_i32_273 : i32 to vector<1x512xi32>
    %774 = arith.cmpi sge, %772, %773 : vector<1x512xi32>
    %775 = arith.andi %770, %774 : vector<1x512xi1>
    %c1_i32_274 = arith.constant 1 : i32
    %776 = vector.broadcast %c1_i32_274 : i32 to vector<1x512xi32>
    %777 = arith.addi %626, %776 : vector<1x512xi32>
    %c16_i32_275 = arith.constant 16 : i32
    %778 = vector.broadcast %c16_i32_275 : i32 to vector<1x512xi32>
    %779 = arith.cmpi slt, %777, %778 : vector<1x512xi32>
    %780 = arith.andi %775, %779 : vector<1x512xi1>
    %781 = arith.extui %780 : vector<1x512xi1> to vector<1x512xi32>
    %782 = arith.sitofp %781 : vector<1x512xi32> to vector<1x512xf32>
    %783 = vector.broadcast %782 : vector<1x512xf32> to vector<8x512xf32>
    %784 = arith.mulf %761, %783 : vector<8x512xf32>
    %c40 = arith.constant 40 : index
    %c0_276 = arith.constant 0 : index
    %785 = vector.load %arg6[%c40, %c0_276] : memref<144x512xf32, #tpu.memory_space<vmem>>, vector<8x512xf32>
    tpu.vector_store %arg6[%c40, %c0_276], %784 {strides = array<i32>} : memref<144x512xf32, #tpu.memory_space<vmem>>, vector<8x512xf32>,
    %786 = vector.extract_strided_slice %614 {offsets = [0, 15], sizes = [8, 497], strides = [1, 1]} : vector<8x512xf32> to vector<8x497xf32>
    %787 = vector.extract_strided_slice %614 {offsets = [0, 0], sizes = [8, 15], strides = [1, 1]} : vector<8x512xf32> to vector<8x15xf32>
    %788 = tpu.concatenate %786, %787 in 1 : vector<8x497xf32>, vector<8x15xf32> -> vector<8x512xf32>
    %c1_i32_277 = arith.constant 1 : i32
    %789 = vector.broadcast %c1_i32_277 : i32 to vector<1x512xi32>
    %790 = arith.addi %624, %789 : vector<1x512xi32>
    %c0_i32_278 = arith.constant 0 : i32
    %791 = vector.broadcast %c0_i32_278 : i32 to vector<1x512xi32>
    %792 = arith.cmpi sge, %790, %791 : vector<1x512xi32>
    %c1_i32_279 = arith.constant 1 : i32
    %793 = vector.broadcast %c1_i32_279 : i32 to vector<1x512xi32>
    %794 = arith.addi %624, %793 : vector<1x512xi32>
    %c16_i32_280 = arith.constant 16 : i32
    %795 = vector.broadcast %c16_i32_280 : i32 to vector<1x512xi32>
    %796 = arith.cmpi slt, %794, %795 : vector<1x512xi32>
    %797 = arith.andi %792, %796 : vector<1x512xi1>
    %c-1_i32_281 = arith.constant -1 : i32
    %798 = vector.broadcast %c-1_i32_281 : i32 to vector<1x512xi32>
    %799 = arith.addi %626, %798 : vector<1x512xi32>
    %c0_i32_282 = arith.constant 0 : i32
    %800 = vector.broadcast %c0_i32_282 : i32 to vector<1x512xi32>
    %801 = arith.cmpi sge, %799, %800 : vector<1x512xi32>
    %802 = arith.andi %797, %801 : vector<1x512xi1>
    %c-1_i32_283 = arith.constant -1 : i32
    %803 = vector.broadcast %c-1_i32_283 : i32 to vector<1x512xi32>
    %804 = arith.addi %626, %803 : vector<1x512xi32>
    %c16_i32_284 = arith.constant 16 : i32
    %805 = vector.broadcast %c16_i32_284 : i32 to vector<1x512xi32>
    %806 = arith.cmpi slt, %804, %805 : vector<1x512xi32>
    %807 = arith.andi %802, %806 : vector<1x512xi1>
    %808 = arith.extui %807 : vector<1x512xi1> to vector<1x512xi32>
    %809 = arith.sitofp %808 : vector<1x512xi32> to vector<1x512xf32>
    %810 = vector.broadcast %809 : vector<1x512xf32> to vector<8x512xf32>
    %811 = arith.mulf %788, %810 : vector<8x512xf32>
    %c48_285 = arith.constant 48 : index
    %c0_286 = arith.constant 0 : index
    %812 = vector.load %arg6[%c48_285, %c0_286] : memref<144x512xf32, #tpu.memory_space<vmem>>, vector<8x512xf32>
    tpu.vector_store %arg6[%c48_285, %c0_286], %811 {strides = array<i32>} : memref<144x512xf32, #tpu.memory_space<vmem>>, vector<8x512xf32>,
    %813 = vector.extract_strided_slice %614 {offsets = [0, 16], sizes = [8, 496], strides = [1, 1]} : vector<8x512xf32> to vector<8x496xf32>
    %814 = vector.extract_strided_slice %614 {offsets = [0, 0], sizes = [8, 16], strides = [1, 1]} : vector<8x512xf32> to vector<8x16xf32>
    %815 = tpu.concatenate %813, %814 in 1 : vector<8x496xf32>, vector<8x16xf32> -> vector<8x512xf32>
    %c1_i32_287 = arith.constant 1 : i32
    %816 = vector.broadcast %c1_i32_287 : i32 to vector<1x512xi32>
    %817 = arith.addi %624, %816 : vector<1x512xi32>
    %c0_i32_288 = arith.constant 0 : i32
    %818 = vector.broadcast %c0_i32_288 : i32 to vector<1x512xi32>
    %819 = arith.cmpi sge, %817, %818 : vector<1x512xi32>
    %c1_i32_289 = arith.constant 1 : i32
    %820 = vector.broadcast %c1_i32_289 : i32 to vector<1x512xi32>
    %821 = arith.addi %624, %820 : vector<1x512xi32>
    %c16_i32_290 = arith.constant 16 : i32
    %822 = vector.broadcast %c16_i32_290 : i32 to vector<1x512xi32>
    %823 = arith.cmpi slt, %821, %822 : vector<1x512xi32>
    %824 = arith.andi %819, %823 : vector<1x512xi1>
    %c0_i32_291 = arith.constant 0 : i32
    %825 = vector.broadcast %c0_i32_291 : i32 to vector<1x512xi32>
    %826 = arith.addi %626, %825 : vector<1x512xi32>
    %c0_i32_292 = arith.constant 0 : i32
    %827 = vector.broadcast %c0_i32_292 : i32 to vector<1x512xi32>
    %828 = arith.cmpi sge, %826, %827 : vector<1x512xi32>
    %829 = arith.andi %824, %828 : vector<1x512xi1>
    %c0_i32_293 = arith.constant 0 : i32
    %830 = vector.broadcast %c0_i32_293 : i32 to vector<1x512xi32>
    %831 = arith.addi %626, %830 : vector<1x512xi32>
    %c16_i32_294 = arith.constant 16 : i32
    %832 = vector.broadcast %c16_i32_294 : i32 to vector<1x512xi32>
    %833 = arith.cmpi slt, %831, %832 : vector<1x512xi32>
    %834 = arith.andi %829, %833 : vector<1x512xi1>
    %835 = arith.extui %834 : vector<1x512xi1> to vector<1x512xi32>
    %836 = arith.sitofp %835 : vector<1x512xi32> to vector<1x512xf32>
    %837 = vector.broadcast %836 : vector<1x512xf32> to vector<8x512xf32>
    %838 = arith.mulf %815, %837 : vector<8x512xf32>
    %c56 = arith.constant 56 : index
    %c0_295 = arith.constant 0 : index
    %839 = vector.load %arg6[%c56, %c0_295] : memref<144x512xf32, #tpu.memory_space<vmem>>, vector<8x512xf32>
    tpu.vector_store %arg6[%c56, %c0_295], %838 {strides = array<i32>} : memref<144x512xf32, #tpu.memory_space<vmem>>, vector<8x512xf32>,
    %840 = vector.extract_strided_slice %614 {offsets = [0, 17], sizes = [8, 495], strides = [1, 1]} : vector<8x512xf32> to vector<8x495xf32>
    %841 = vector.extract_strided_slice %614 {offsets = [0, 0], sizes = [8, 17], strides = [1, 1]} : vector<8x512xf32> to vector<8x17xf32>
    %842 = tpu.concatenate %840, %841 in 1 : vector<8x495xf32>, vector<8x17xf32> -> vector<8x512xf32>
    %c1_i32_296 = arith.constant 1 : i32
    %843 = vector.broadcast %c1_i32_296 : i32 to vector<1x512xi32>
    %844 = arith.addi %624, %843 : vector<1x512xi32>
    %c0_i32_297 = arith.constant 0 : i32
    %845 = vector.broadcast %c0_i32_297 : i32 to vector<1x512xi32>
    %846 = arith.cmpi sge, %844, %845 : vector<1x512xi32>
    %c1_i32_298 = arith.constant 1 : i32
    %847 = vector.broadcast %c1_i32_298 : i32 to vector<1x512xi32>
    %848 = arith.addi %624, %847 : vector<1x512xi32>
    %c16_i32_299 = arith.constant 16 : i32
    %849 = vector.broadcast %c16_i32_299 : i32 to vector<1x512xi32>
    %850 = arith.cmpi slt, %848, %849 : vector<1x512xi32>
    %851 = arith.andi %846, %850 : vector<1x512xi1>
    %c1_i32_300 = arith.constant 1 : i32
    %852 = vector.broadcast %c1_i32_300 : i32 to vector<1x512xi32>
    %853 = arith.addi %626, %852 : vector<1x512xi32>
    %c0_i32_301 = arith.constant 0 : i32
    %854 = vector.broadcast %c0_i32_301 : i32 to vector<1x512xi32>
    %855 = arith.cmpi sge, %853, %854 : vector<1x512xi32>
    %856 = arith.andi %851, %855 : vector<1x512xi1>
    %c1_i32_302 = arith.constant 1 : i32
    %857 = vector.broadcast %c1_i32_302 : i32 to vector<1x512xi32>
    %858 = arith.addi %626, %857 : vector<1x512xi32>
    %c16_i32_303 = arith.constant 16 : i32
    %859 = vector.broadcast %c16_i32_303 : i32 to vector<1x512xi32>
    %860 = arith.cmpi slt, %858, %859 : vector<1x512xi32>
    %861 = arith.andi %856, %860 : vector<1x512xi1>
    %862 = arith.extui %861 : vector<1x512xi1> to vector<1x512xi32>
    %863 = arith.sitofp %862 : vector<1x512xi32> to vector<1x512xf32>
    %864 = vector.broadcast %863 : vector<1x512xf32> to vector<8x512xf32>
    %865 = arith.mulf %842, %864 : vector<8x512xf32>
    %c64_304 = arith.constant 64 : index
    %c0_305 = arith.constant 0 : index
    %866 = vector.load %arg6[%c64_304, %c0_305] : memref<144x512xf32, #tpu.memory_space<vmem>>, vector<8x512xf32>
    tpu.vector_store %arg6[%c64_304, %c0_305], %865 {strides = array<i32>} : memref<144x512xf32, #tpu.memory_space<vmem>>, vector<8x512xf32>,
    %c0_306 = arith.constant 0 : index
    %c0_307 = arith.constant 0 : index
    %867 = vector.load %arg6[%c0_306, %c0_307] : memref<144x512xf32, #tpu.memory_space<vmem>>, vector<72x512xf32>
    %868 = arith.truncf %617 : vector<32x72xf32> to vector<32x72xbf16>
    %869 = arith.truncf %867 : vector<72x512xf32> to vector<72x512xbf16>
    %cst_308 = arith.constant dense<0.000000e+00> : vector<32x512xf32>
    %870 = tpu.matmul %868, %869, %cst_308 {dimension_numbers = #tpu.dot_dimension_numbers<[1], [0], [0], [1], [0, 0, 1, 1], [], []>} : vector<32x72xbf16>, vector<72x512xbf16>, vector<32x512xf32> -> vector<32x512xf32>
    %871 = vector.broadcast %619 : vector<32x1xf32> to vector<32x512xf32>
    %872 = arith.addf %870, %871 : vector<32x512xf32>
    %cst_309 = arith.constant 0.000000e+00 : f32
    %873 = vector.broadcast %cst_309 : f32 to vector<32x512xf32>
    %874 = arith.maximumf %872, %873 : vector<32x512xf32>
    %c4 = arith.constant 4 : index
    %c0_310 = arith.constant 0 : index
    %c0_311 = arith.constant 0 : index
    %875 = vector.load %arg1[%c4, %c0_310, %c0_311] : memref<7x32x144xf32, #tpu.memory_space<vmem>>, vector<1x32x144xf32>
    %876 = vector.shape_cast %875 : vector<1x32x144xf32> to vector<32x144xf32>
    %877 = vector.extract_strided_slice %876 {offsets = [0, 0], sizes = [4, 32], strides = [1, 1]} : vector<32x144xf32> to vector<4x32xf32>
    %c4_312 = arith.constant 4 : index
    %c0_313 = arith.constant 0 : index
    %c0_314 = arith.constant 0 : index
    %878 = vector.load %arg2[%c4_312, %c0_313, %c0_314] : memref<7x32x1xf32, #tpu.memory_space<vmem>>, vector<1x32x1xf32>
    %879 = vector.shape_cast %878 : vector<1x32x1xf32> to vector<32x1xf32>
    %880 = vector.extract_strided_slice %879 {offsets = [0, 0], sizes = [4, 1], strides = [1, 1]} : vector<32x1xf32> to vector<4x1xf32>
    %881 = arith.truncf %877 : vector<4x32xf32> to vector<4x32xbf16>
    %882 = arith.truncf %874 : vector<32x512xf32> to vector<32x512xbf16>
    %cst_315 = arith.constant dense<0.000000e+00> : vector<4x512xf32>
    %883 = tpu.matmul %881, %882, %cst_315 {dimension_numbers = #tpu.dot_dimension_numbers<[1], [0], [0], [1], [0, 0, 1, 1], [], []>} : vector<4x32xbf16>, vector<32x512xbf16>, vector<4x512xf32> -> vector<4x512xf32>
    %884 = vector.broadcast %880 : vector<4x1xf32> to vector<4x512xf32>
    %885 = arith.addf %883, %884 : vector<4x512xf32>
    %c0_316 = arith.constant 0 : index
    %c0_317 = arith.constant 0 : index
    %886 = vector.load %arg4[%c0_316, %c0_317] : memref<4x512xf32, #tpu.memory_space<vmem>>, vector<4x512xf32>
    tpu.vector_store %arg4[%c0_316, %c0_317], %885 {strides = array<i32>} : memref<4x512xf32, #tpu.memory_space<vmem>>, vector<4x512xf32>,
    %887 = vector.extract_strided_slice %601 {offsets = [8, 0], sizes = [8, 512], strides = [1, 1]} : vector<16x512xf32> to vector<8x512xf32>
    %888 = tpu.iota {dimensions = array<i32: 0>} : vector<512x128xi32>
    %889 = tpu.iota {dimensions = array<i32: 1>} : vector<512x128xi32>
    %c8_i32 = arith.constant 8 : i32
    %890 = vector.broadcast %c8_i32 : i32 to vector<512x128xi32>
    %891 = arith.shrsi %888, %890 : vector<512x128xi32>
    %c255_i32_318 = arith.constant 255 : i32
    %892 = vector.broadcast %c255_i32_318 : i32 to vector<512x128xi32>
    %893 = arith.andi %888, %892 : vector<512x128xi32>
    %c4_i32_319 = arith.constant 4 : i32
    %894 = vector.broadcast %c4_i32_319 : i32 to vector<512x128xi32>
    %895 = arith.shrsi %893, %894 : vector<512x128xi32>
    %c15_i32_320 = arith.constant 15 : i32
    %896 = vector.broadcast %c15_i32_320 : i32 to vector<512x128xi32>
    %897 = arith.andi %893, %896 : vector<512x128xi32>
    %c6_i32 = arith.constant 6 : i32
    %898 = vector.broadcast %c6_i32 : i32 to vector<512x128xi32>
    %899 = arith.shrsi %889, %898 : vector<512x128xi32>
    %c63_i32 = arith.constant 63 : i32
    %900 = vector.broadcast %c63_i32 : i32 to vector<512x128xi32>
    %901 = arith.andi %889, %900 : vector<512x128xi32>
    %c3_i32 = arith.constant 3 : i32
    %902 = vector.broadcast %c3_i32 : i32 to vector<512x128xi32>
    %903 = arith.shrsi %901, %902 : vector<512x128xi32>
    %c7_i32 = arith.constant 7 : i32
    %904 = vector.broadcast %c7_i32 : i32 to vector<512x128xi32>
    %905 = arith.andi %901, %904 : vector<512x128xi32>
    %906 = arith.cmpi eq, %891, %899 : vector<512x128xi32>
    %c1_i32_321 = arith.constant 1 : i32
    %907 = vector.broadcast %c1_i32_321 : i32 to vector<512x128xi32>
    %908 = arith.shrsi %895, %907 : vector<512x128xi32>
    %909 = arith.cmpi eq, %908, %903 : vector<512x128xi32>
    %910 = arith.andi %906, %909 : vector<512x128xi1>
    %c1_i32_322 = arith.constant 1 : i32
    %911 = vector.broadcast %c1_i32_322 : i32 to vector<512x128xi32>
    %912 = arith.shrsi %897, %911 : vector<512x128xi32>
    %913 = arith.cmpi eq, %912, %905 : vector<512x128xi32>
    %914 = arith.andi %910, %913 : vector<512x128xi1>
    %cst_323 = arith.constant 2.500000e-01 : f32
    %cst_324 = arith.constant 0.000000e+00 : f32
    %915 = vector.broadcast %cst_323 : f32 to vector<512x128xf32>
    %916 = vector.broadcast %cst_324 : f32 to vector<512x128xf32>
    %917 = arith.select %914, %915, %916 : vector<512x128xi1>, vector<512x128xf32>
    %918 = arith.truncf %887 : vector<8x512xf32> to vector<8x512xbf16>
    %919 = arith.truncf %917 : vector<512x128xf32> to vector<512x128xbf16>
    %cst_325 = arith.constant dense<0.000000e+00> : vector<8x128xf32>
    %920 = tpu.matmul %918, %919, %cst_325 {dimension_numbers = #tpu.dot_dimension_numbers<[1], [0], [0], [1], [0, 0, 1, 1], [], []>} : vector<8x512xbf16>, vector<512x128xbf16>, vector<8x128xf32> -> vector<8x128xf32>
    %c5 = arith.constant 5 : index
    %c0_326 = arith.constant 0 : index
    %c0_327 = arith.constant 0 : index
    %921 = vector.load %arg1[%c5, %c0_326, %c0_327] : memref<7x32x144xf32, #tpu.memory_space<vmem>>, vector<1x32x144xf32>
    %922 = vector.shape_cast %921 : vector<1x32x144xf32> to vector<32x144xf32>
    %923 = vector.extract_strided_slice %922 {offsets = [0, 0], sizes = [8, 72], strides = [1, 1]} : vector<32x144xf32> to vector<8x72xf32>
    %c5_328 = arith.constant 5 : index
    %c0_329 = arith.constant 0 : index
    %c0_330 = arith.constant 0 : index
    %924 = vector.load %arg2[%c5_328, %c0_329, %c0_330] : memref<7x32x1xf32, #tpu.memory_space<vmem>>, vector<1x32x1xf32>
    %925 = vector.shape_cast %924 : vector<1x32x1xf32> to vector<32x1xf32>
    %926 = vector.extract_strided_slice %925 {offsets = [0, 0], sizes = [8, 1], strides = [1, 1]} : vector<32x1xf32> to vector<8x1xf32>
    %927 = tpu.iota {dimensions = array<i32: 1>} : vector<1x128xi32>
    %c63_i32_331 = arith.constant 63 : i32
    %928 = vector.broadcast %c63_i32_331 : i32 to vector<1x128xi32>
    %929 = arith.andi %927, %928 : vector<1x128xi32>
    %c3_i32_332 = arith.constant 3 : i32
    %930 = vector.broadcast %c3_i32_332 : i32 to vector<1x128xi32>
    %931 = arith.shrsi %929, %930 : vector<1x128xi32>
    %c7_i32_333 = arith.constant 7 : i32
    %932 = vector.broadcast %c7_i32_333 : i32 to vector<1x128xi32>
    %933 = arith.andi %929, %932 : vector<1x128xi32>
    %934 = vector.extract_strided_slice %920 {offsets = [0, 119], sizes = [8, 9], strides = [1, 1]} : vector<8x128xf32> to vector<8x9xf32>
    %935 = vector.extract_strided_slice %920 {offsets = [0, 0], sizes = [8, 119], strides = [1, 1]} : vector<8x128xf32> to vector<8x119xf32>
    %936 = tpu.concatenate %934, %935 in 1 : vector<8x9xf32>, vector<8x119xf32> -> vector<8x128xf32>
    %c-1_i32_334 = arith.constant -1 : i32
    %937 = vector.broadcast %c-1_i32_334 : i32 to vector<1x128xi32>
    %938 = arith.addi %931, %937 : vector<1x128xi32>
    %c0_i32_335 = arith.constant 0 : i32
    %939 = vector.broadcast %c0_i32_335 : i32 to vector<1x128xi32>
    %940 = arith.cmpi sge, %938, %939 : vector<1x128xi32>
    %c-1_i32_336 = arith.constant -1 : i32
    %941 = vector.broadcast %c-1_i32_336 : i32 to vector<1x128xi32>
    %942 = arith.addi %931, %941 : vector<1x128xi32>
    %c8_i32_337 = arith.constant 8 : i32
    %943 = vector.broadcast %c8_i32_337 : i32 to vector<1x128xi32>
    %944 = arith.cmpi slt, %942, %943 : vector<1x128xi32>
    %945 = arith.andi %940, %944 : vector<1x128xi1>
    %c-1_i32_338 = arith.constant -1 : i32
    %946 = vector.broadcast %c-1_i32_338 : i32 to vector<1x128xi32>
    %947 = arith.addi %933, %946 : vector<1x128xi32>
    %c0_i32_339 = arith.constant 0 : i32
    %948 = vector.broadcast %c0_i32_339 : i32 to vector<1x128xi32>
    %949 = arith.cmpi sge, %947, %948 : vector<1x128xi32>
    %950 = arith.andi %945, %949 : vector<1x128xi1>
    %c-1_i32_340 = arith.constant -1 : i32
    %951 = vector.broadcast %c-1_i32_340 : i32 to vector<1x128xi32>
    %952 = arith.addi %933, %951 : vector<1x128xi32>
    %c8_i32_341 = arith.constant 8 : i32
    %953 = vector.broadcast %c8_i32_341 : i32 to vector<1x128xi32>
    %954 = arith.cmpi slt, %952, %953 : vector<1x128xi32>
    %955 = arith.andi %950, %954 : vector<1x128xi1>
    %956 = arith.extui %955 : vector<1x128xi1> to vector<1x128xi32>
    %957 = arith.sitofp %956 : vector<1x128xi32> to vector<1x128xf32>
    %958 = vector.broadcast %957 : vector<1x128xf32> to vector<8x128xf32>
    %959 = arith.mulf %936, %958 : vector<8x128xf32>
    %c0_342 = arith.constant 0 : index
    %c0_343 = arith.constant 0 : index
    %960 = vector.load %arg6[%c0_342, %c0_343] : memref<144x512xf32, #tpu.memory_space<vmem>>, vector<8x128xf32>
    tpu.vector_store %arg6[%c0_342, %c0_343], %959 {strides = array<i32>} : memref<144x512xf32, #tpu.memory_space<vmem>>, vector<8x128xf32>,
    %961 = vector.extract_strided_slice %920 {offsets = [0, 120], sizes = [8, 8], strides = [1, 1]} : vector<8x128xf32> to vector<8x8xf32>
    %962 = vector.extract_strided_slice %920 {offsets = [0, 0], sizes = [8, 120], strides = [1, 1]} : vector<8x128xf32> to vector<8x120xf32>
    %963 = tpu.concatenate %961, %962 in 1 : vector<8x8xf32>, vector<8x120xf32> -> vector<8x128xf32>
    %c-1_i32_344 = arith.constant -1 : i32
    %964 = vector.broadcast %c-1_i32_344 : i32 to vector<1x128xi32>
    %965 = arith.addi %931, %964 : vector<1x128xi32>
    %c0_i32_345 = arith.constant 0 : i32
    %966 = vector.broadcast %c0_i32_345 : i32 to vector<1x128xi32>
    %967 = arith.cmpi sge, %965, %966 : vector<1x128xi32>
    %c-1_i32_346 = arith.constant -1 : i32
    %968 = vector.broadcast %c-1_i32_346 : i32 to vector<1x128xi32>
    %969 = arith.addi %931, %968 : vector<1x128xi32>
    %c8_i32_347 = arith.constant 8 : i32
    %970 = vector.broadcast %c8_i32_347 : i32 to vector<1x128xi32>
    %971 = arith.cmpi slt, %969, %970 : vector<1x128xi32>
    %972 = arith.andi %967, %971 : vector<1x128xi1>
    %c0_i32_348 = arith.constant 0 : i32
    %973 = vector.broadcast %c0_i32_348 : i32 to vector<1x128xi32>
    %974 = arith.addi %933, %973 : vector<1x128xi32>
    %c0_i32_349 = arith.constant 0 : i32
    %975 = vector.broadcast %c0_i32_349 : i32 to vector<1x128xi32>
    %976 = arith.cmpi sge, %974, %975 : vector<1x128xi32>
    %977 = arith.andi %972, %976 : vector<1x128xi1>
    %c0_i32_350 = arith.constant 0 : i32
    %978 = vector.broadcast %c0_i32_350 : i32 to vector<1x128xi32>
    %979 = arith.addi %933, %978 : vector<1x128xi32>
    %c8_i32_351 = arith.constant 8 : i32
    %980 = vector.broadcast %c8_i32_351 : i32 to vector<1x128xi32>
    %981 = arith.cmpi slt, %979, %980 : vector<1x128xi32>
    %982 = arith.andi %977, %981 : vector<1x128xi1>
    %983 = arith.extui %982 : vector<1x128xi1> to vector<1x128xi32>
    %984 = arith.sitofp %983 : vector<1x128xi32> to vector<1x128xf32>
    %985 = vector.broadcast %984 : vector<1x128xf32> to vector<8x128xf32>
    %986 = arith.mulf %963, %985 : vector<8x128xf32>
    %c8_352 = arith.constant 8 : index
    %c0_353 = arith.constant 0 : index
    %987 = vector.load %arg6[%c8_352, %c0_353] : memref<144x512xf32, #tpu.memory_space<vmem>>, vector<8x128xf32>
    tpu.vector_store %arg6[%c8_352, %c0_353], %986 {strides = array<i32>} : memref<144x512xf32, #tpu.memory_space<vmem>>, vector<8x128xf32>,
    %988 = vector.extract_strided_slice %920 {offsets = [0, 121], sizes = [8, 7], strides = [1, 1]} : vector<8x128xf32> to vector<8x7xf32>
    %989 = vector.extract_strided_slice %920 {offsets = [0, 0], sizes = [8, 121], strides = [1, 1]} : vector<8x128xf32> to vector<8x121xf32>
    %990 = tpu.concatenate %988, %989 in 1 : vector<8x7xf32>, vector<8x121xf32> -> vector<8x128xf32>
    %c-1_i32_354 = arith.constant -1 : i32
    %991 = vector.broadcast %c-1_i32_354 : i32 to vector<1x128xi32>
    %992 = arith.addi %931, %991 : vector<1x128xi32>
    %c0_i32_355 = arith.constant 0 : i32
    %993 = vector.broadcast %c0_i32_355 : i32 to vector<1x128xi32>
    %994 = arith.cmpi sge, %992, %993 : vector<1x128xi32>
    %c-1_i32_356 = arith.constant -1 : i32
    %995 = vector.broadcast %c-1_i32_356 : i32 to vector<1x128xi32>
    %996 = arith.addi %931, %995 : vector<1x128xi32>
    %c8_i32_357 = arith.constant 8 : i32
    %997 = vector.broadcast %c8_i32_357 : i32 to vector<1x128xi32>
    %998 = arith.cmpi slt, %996, %997 : vector<1x128xi32>
    %999 = arith.andi %994, %998 : vector<1x128xi1>
    %c1_i32_358 = arith.constant 1 : i32
    %1000 = vector.broadcast %c1_i32_358 : i32 to vector<1x128xi32>
    %1001 = arith.addi %933, %1000 : vector<1x128xi32>
    %c0_i32_359 = arith.constant 0 : i32
    %1002 = vector.broadcast %c0_i32_359 : i32 to vector<1x128xi32>
    %1003 = arith.cmpi sge, %1001, %1002 : vector<1x128xi32>
    %1004 = arith.andi %999, %1003 : vector<1x128xi1>
    %c1_i32_360 = arith.constant 1 : i32
    %1005 = vector.broadcast %c1_i32_360 : i32 to vector<1x128xi32>
    %1006 = arith.addi %933, %1005 : vector<1x128xi32>
    %c8_i32_361 = arith.constant 8 : i32
    %1007 = vector.broadcast %c8_i32_361 : i32 to vector<1x128xi32>
    %1008 = arith.cmpi slt, %1006, %1007 : vector<1x128xi32>
    %1009 = arith.andi %1004, %1008 : vector<1x128xi1>
    %1010 = arith.extui %1009 : vector<1x128xi1> to vector<1x128xi32>
    %1011 = arith.sitofp %1010 : vector<1x128xi32> to vector<1x128xf32>
    %1012 = vector.broadcast %1011 : vector<1x128xf32> to vector<8x128xf32>
    %1013 = arith.mulf %990, %1012 : vector<8x128xf32>
    %c16_362 = arith.constant 16 : index
    %c0_363 = arith.constant 0 : index
    %1014 = vector.load %arg6[%c16_362, %c0_363] : memref<144x512xf32, #tpu.memory_space<vmem>>, vector<8x128xf32>
    tpu.vector_store %arg6[%c16_362, %c0_363], %1013 {strides = array<i32>} : memref<144x512xf32, #tpu.memory_space<vmem>>, vector<8x128xf32>,
    %1015 = vector.extract_strided_slice %920 {offsets = [0, 127], sizes = [8, 1], strides = [1, 1]} : vector<8x128xf32> to vector<8x1xf32>
    %1016 = vector.extract_strided_slice %920 {offsets = [0, 0], sizes = [8, 127], strides = [1, 1]} : vector<8x128xf32> to vector<8x127xf32>
    %1017 = tpu.concatenate %1015, %1016 in 1 : vector<8x1xf32>, vector<8x127xf32> -> vector<8x128xf32>
    %c0_i32_364 = arith.constant 0 : i32
    %1018 = vector.broadcast %c0_i32_364 : i32 to vector<1x128xi32>
    %1019 = arith.addi %931, %1018 : vector<1x128xi32>
    %c0_i32_365 = arith.constant 0 : i32
    %1020 = vector.broadcast %c0_i32_365 : i32 to vector<1x128xi32>
    %1021 = arith.cmpi sge, %1019, %1020 : vector<1x128xi32>
    %c0_i32_366 = arith.constant 0 : i32
    %1022 = vector.broadcast %c0_i32_366 : i32 to vector<1x128xi32>
    %1023 = arith.addi %931, %1022 : vector<1x128xi32>
    %c8_i32_367 = arith.constant 8 : i32
    %1024 = vector.broadcast %c8_i32_367 : i32 to vector<1x128xi32>
    %1025 = arith.cmpi slt, %1023, %1024 : vector<1x128xi32>
    %1026 = arith.andi %1021, %1025 : vector<1x128xi1>
    %c-1_i32_368 = arith.constant -1 : i32
    %1027 = vector.broadcast %c-1_i32_368 : i32 to vector<1x128xi32>
    %1028 = arith.addi %933, %1027 : vector<1x128xi32>
    %c0_i32_369 = arith.constant 0 : i32
    %1029 = vector.broadcast %c0_i32_369 : i32 to vector<1x128xi32>
    %1030 = arith.cmpi sge, %1028, %1029 : vector<1x128xi32>
    %1031 = arith.andi %1026, %1030 : vector<1x128xi1>
    %c-1_i32_370 = arith.constant -1 : i32
    %1032 = vector.broadcast %c-1_i32_370 : i32 to vector<1x128xi32>
    %1033 = arith.addi %933, %1032 : vector<1x128xi32>
    %c8_i32_371 = arith.constant 8 : i32
    %1034 = vector.broadcast %c8_i32_371 : i32 to vector<1x128xi32>
    %1035 = arith.cmpi slt, %1033, %1034 : vector<1x128xi32>
    %1036 = arith.andi %1031, %1035 : vector<1x128xi1>
    %1037 = arith.extui %1036 : vector<1x128xi1> to vector<1x128xi32>
    %1038 = arith.sitofp %1037 : vector<1x128xi32> to vector<1x128xf32>
    %1039 = vector.broadcast %1038 : vector<1x128xf32> to vector<8x128xf32>
    %1040 = arith.mulf %1017, %1039 : vector<8x128xf32>
    %c24_372 = arith.constant 24 : index
    %c0_373 = arith.constant 0 : index
    %1041 = vector.load %arg6[%c24_372, %c0_373] : memref<144x512xf32, #tpu.memory_space<vmem>>, vector<8x128xf32>
    tpu.vector_store %arg6[%c24_372, %c0_373], %1040 {strides = array<i32>} : memref<144x512xf32, #tpu.memory_space<vmem>>, vector<8x128xf32>,
    %c0_i32_374 = arith.constant 0 : i32
    %1042 = vector.broadcast %c0_i32_374 : i32 to vector<1x128xi32>
    %1043 = arith.addi %931, %1042 : vector<1x128xi32>
    %c0_i32_375 = arith.constant 0 : i32
    %1044 = vector.broadcast %c0_i32_375 : i32 to vector<1x128xi32>
    %1045 = arith.cmpi sge, %1043, %1044 : vector<1x128xi32>
    %c0_i32_376 = arith.constant 0 : i32
    %1046 = vector.broadcast %c0_i32_376 : i32 to vector<1x128xi32>
    %1047 = arith.addi %931, %1046 : vector<1x128xi32>
    %c8_i32_377 = arith.constant 8 : i32
    %1048 = vector.broadcast %c8_i32_377 : i32 to vector<1x128xi32>
    %1049 = arith.cmpi slt, %1047, %1048 : vector<1x128xi32>
    %1050 = arith.andi %1045, %1049 : vector<1x128xi1>
    %c0_i32_378 = arith.constant 0 : i32
    %1051 = vector.broadcast %c0_i32_378 : i32 to vector<1x128xi32>
    %1052 = arith.addi %933, %1051 : vector<1x128xi32>
    %c0_i32_379 = arith.constant 0 : i32
    %1053 = vector.broadcast %c0_i32_379 : i32 to vector<1x128xi32>
    %1054 = arith.cmpi sge, %1052, %1053 : vector<1x128xi32>
    %1055 = arith.andi %1050, %1054 : vector<1x128xi1>
    %c0_i32_380 = arith.constant 0 : i32
    %1056 = vector.broadcast %c0_i32_380 : i32 to vector<1x128xi32>
    %1057 = arith.addi %933, %1056 : vector<1x128xi32>
    %c8_i32_381 = arith.constant 8 : i32
    %1058 = vector.broadcast %c8_i32_381 : i32 to vector<1x128xi32>
    %1059 = arith.cmpi slt, %1057, %1058 : vector<1x128xi32>
    %1060 = arith.andi %1055, %1059 : vector<1x128xi1>
    %1061 = arith.extui %1060 : vector<1x128xi1> to vector<1x128xi32>
    %1062 = arith.sitofp %1061 : vector<1x128xi32> to vector<1x128xf32>
    %1063 = vector.broadcast %1062 : vector<1x128xf32> to vector<8x128xf32>
    %1064 = arith.mulf %920, %1063 : vector<8x128xf32>
    %c32_382 = arith.constant 32 : index
    %c0_383 = arith.constant 0 : index
    %1065 = vector.load %arg6[%c32_382, %c0_383] : memref<144x512xf32, #tpu.memory_space<vmem>>, vector<8x128xf32>
    tpu.vector_store %arg6[%c32_382, %c0_383], %1064 {strides = array<i32>} : memref<144x512xf32, #tpu.memory_space<vmem>>, vector<8x128xf32>,
    %1066 = vector.extract_strided_slice %920 {offsets = [0, 1], sizes = [8, 127], strides = [1, 1]} : vector<8x128xf32> to vector<8x127xf32>
    %1067 = vector.extract_strided_slice %920 {offsets = [0, 0], sizes = [8, 1], strides = [1, 1]} : vector<8x128xf32> to vector<8x1xf32>
    %1068 = tpu.concatenate %1066, %1067 in 1 : vector<8x127xf32>, vector<8x1xf32> -> vector<8x128xf32>
    %c0_i32_384 = arith.constant 0 : i32
    %1069 = vector.broadcast %c0_i32_384 : i32 to vector<1x128xi32>
    %1070 = arith.addi %931, %1069 : vector<1x128xi32>
    %c0_i32_385 = arith.constant 0 : i32
    %1071 = vector.broadcast %c0_i32_385 : i32 to vector<1x128xi32>
    %1072 = arith.cmpi sge, %1070, %1071 : vector<1x128xi32>
    %c0_i32_386 = arith.constant 0 : i32
    %1073 = vector.broadcast %c0_i32_386 : i32 to vector<1x128xi32>
    %1074 = arith.addi %931, %1073 : vector<1x128xi32>
    %c8_i32_387 = arith.constant 8 : i32
    %1075 = vector.broadcast %c8_i32_387 : i32 to vector<1x128xi32>
    %1076 = arith.cmpi slt, %1074, %1075 : vector<1x128xi32>
    %1077 = arith.andi %1072, %1076 : vector<1x128xi1>
    %c1_i32_388 = arith.constant 1 : i32
    %1078 = vector.broadcast %c1_i32_388 : i32 to vector<1x128xi32>
    %1079 = arith.addi %933, %1078 : vector<1x128xi32>
    %c0_i32_389 = arith.constant 0 : i32
    %1080 = vector.broadcast %c0_i32_389 : i32 to vector<1x128xi32>
    %1081 = arith.cmpi sge, %1079, %1080 : vector<1x128xi32>
    %1082 = arith.andi %1077, %1081 : vector<1x128xi1>
    %c1_i32_390 = arith.constant 1 : i32
    %1083 = vector.broadcast %c1_i32_390 : i32 to vector<1x128xi32>
    %1084 = arith.addi %933, %1083 : vector<1x128xi32>
    %c8_i32_391 = arith.constant 8 : i32
    %1085 = vector.broadcast %c8_i32_391 : i32 to vector<1x128xi32>
    %1086 = arith.cmpi slt, %1084, %1085 : vector<1x128xi32>
    %1087 = arith.andi %1082, %1086 : vector<1x128xi1>
    %1088 = arith.extui %1087 : vector<1x128xi1> to vector<1x128xi32>
    %1089 = arith.sitofp %1088 : vector<1x128xi32> to vector<1x128xf32>
    %1090 = vector.broadcast %1089 : vector<1x128xf32> to vector<8x128xf32>
    %1091 = arith.mulf %1068, %1090 : vector<8x128xf32>
    %c40_392 = arith.constant 40 : index
    %c0_393 = arith.constant 0 : index
    %1092 = vector.load %arg6[%c40_392, %c0_393] : memref<144x512xf32, #tpu.memory_space<vmem>>, vector<8x128xf32>
    tpu.vector_store %arg6[%c40_392, %c0_393], %1091 {strides = array<i32>} : memref<144x512xf32, #tpu.memory_space<vmem>>, vector<8x128xf32>,
    %1093 = vector.extract_strided_slice %920 {offsets = [0, 7], sizes = [8, 121], strides = [1, 1]} : vector<8x128xf32> to vector<8x121xf32>
    %1094 = vector.extract_strided_slice %920 {offsets = [0, 0], sizes = [8, 7], strides = [1, 1]} : vector<8x128xf32> to vector<8x7xf32>
    %1095 = tpu.concatenate %1093, %1094 in 1 : vector<8x121xf32>, vector<8x7xf32> -> vector<8x128xf32>
    %c1_i32_394 = arith.constant 1 : i32
    %1096 = vector.broadcast %c1_i32_394 : i32 to vector<1x128xi32>
    %1097 = arith.addi %931, %1096 : vector<1x128xi32>
    %c0_i32_395 = arith.constant 0 : i32
    %1098 = vector.broadcast %c0_i32_395 : i32 to vector<1x128xi32>
    %1099 = arith.cmpi sge, %1097, %1098 : vector<1x128xi32>
    %c1_i32_396 = arith.constant 1 : i32
    %1100 = vector.broadcast %c1_i32_396 : i32 to vector<1x128xi32>
    %1101 = arith.addi %931, %1100 : vector<1x128xi32>
    %c8_i32_397 = arith.constant 8 : i32
    %1102 = vector.broadcast %c8_i32_397 : i32 to vector<1x128xi32>
    %1103 = arith.cmpi slt, %1101, %1102 : vector<1x128xi32>
    %1104 = arith.andi %1099, %1103 : vector<1x128xi1>
    %c-1_i32_398 = arith.constant -1 : i32
    %1105 = vector.broadcast %c-1_i32_398 : i32 to vector<1x128xi32>
    %1106 = arith.addi %933, %1105 : vector<1x128xi32>
    %c0_i32_399 = arith.constant 0 : i32
    %1107 = vector.broadcast %c0_i32_399 : i32 to vector<1x128xi32>
    %1108 = arith.cmpi sge, %1106, %1107 : vector<1x128xi32>
    %1109 = arith.andi %1104, %1108 : vector<1x128xi1>
    %c-1_i32_400 = arith.constant -1 : i32
    %1110 = vector.broadcast %c-1_i32_400 : i32 to vector<1x128xi32>
    %1111 = arith.addi %933, %1110 : vector<1x128xi32>
    %c8_i32_401 = arith.constant 8 : i32
    %1112 = vector.broadcast %c8_i32_401 : i32 to vector<1x128xi32>
    %1113 = arith.cmpi slt, %1111, %1112 : vector<1x128xi32>
    %1114 = arith.andi %1109, %1113 : vector<1x128xi1>
    %1115 = arith.extui %1114 : vector<1x128xi1> to vector<1x128xi32>
    %1116 = arith.sitofp %1115 : vector<1x128xi32> to vector<1x128xf32>
    %1117 = vector.broadcast %1116 : vector<1x128xf32> to vector<8x128xf32>
    %1118 = arith.mulf %1095, %1117 : vector<8x128xf32>
    %c48_402 = arith.constant 48 : index
    %c0_403 = arith.constant 0 : index
    %1119 = vector.load %arg6[%c48_402, %c0_403] : memref<144x512xf32, #tpu.memory_space<vmem>>, vector<8x128xf32>
    tpu.vector_store %arg6[%c48_402, %c0_403], %1118 {strides = array<i32>} : memref<144x512xf32, #tpu.memory_space<vmem>>, vector<8x128xf32>,
    %1120 = vector.extract_strided_slice %920 {offsets = [0, 8], sizes = [8, 120], strides = [1, 1]} : vector<8x128xf32> to vector<8x120xf32>
    %1121 = vector.extract_strided_slice %920 {offsets = [0, 0], sizes = [8, 8], strides = [1, 1]} : vector<8x128xf32> to vector<8x8xf32>
    %1122 = tpu.concatenate %1120, %1121 in 1 : vector<8x120xf32>, vector<8x8xf32> -> vector<8x128xf32>
    %c1_i32_404 = arith.constant 1 : i32
    %1123 = vector.broadcast %c1_i32_404 : i32 to vector<1x128xi32>
    %1124 = arith.addi %931, %1123 : vector<1x128xi32>
    %c0_i32_405 = arith.constant 0 : i32
    %1125 = vector.broadcast %c0_i32_405 : i32 to vector<1x128xi32>
    %1126 = arith.cmpi sge, %1124, %1125 : vector<1x128xi32>
    %c1_i32_406 = arith.constant 1 : i32
    %1127 = vector.broadcast %c1_i32_406 : i32 to vector<1x128xi32>
    %1128 = arith.addi %931, %1127 : vector<1x128xi32>
    %c8_i32_407 = arith.constant 8 : i32
    %1129 = vector.broadcast %c8_i32_407 : i32 to vector<1x128xi32>
    %1130 = arith.cmpi slt, %1128, %1129 : vector<1x128xi32>
    %1131 = arith.andi %1126, %1130 : vector<1x128xi1>
    %c0_i32_408 = arith.constant 0 : i32
    %1132 = vector.broadcast %c0_i32_408 : i32 to vector<1x128xi32>
    %1133 = arith.addi %933, %1132 : vector<1x128xi32>
    %c0_i32_409 = arith.constant 0 : i32
    %1134 = vector.broadcast %c0_i32_409 : i32 to vector<1x128xi32>
    %1135 = arith.cmpi sge, %1133, %1134 : vector<1x128xi32>
    %1136 = arith.andi %1131, %1135 : vector<1x128xi1>
    %c0_i32_410 = arith.constant 0 : i32
    %1137 = vector.broadcast %c0_i32_410 : i32 to vector<1x128xi32>
    %1138 = arith.addi %933, %1137 : vector<1x128xi32>
    %c8_i32_411 = arith.constant 8 : i32
    %1139 = vector.broadcast %c8_i32_411 : i32 to vector<1x128xi32>
    %1140 = arith.cmpi slt, %1138, %1139 : vector<1x128xi32>
    %1141 = arith.andi %1136, %1140 : vector<1x128xi1>
    %1142 = arith.extui %1141 : vector<1x128xi1> to vector<1x128xi32>
    %1143 = arith.sitofp %1142 : vector<1x128xi32> to vector<1x128xf32>
    %1144 = vector.broadcast %1143 : vector<1x128xf32> to vector<8x128xf32>
    %1145 = arith.mulf %1122, %1144 : vector<8x128xf32>
    %c56_412 = arith.constant 56 : index
    %c0_413 = arith.constant 0 : index
    %1146 = vector.load %arg6[%c56_412, %c0_413] : memref<144x512xf32, #tpu.memory_space<vmem>>, vector<8x128xf32>
    tpu.vector_store %arg6[%c56_412, %c0_413], %1145 {strides = array<i32>} : memref<144x512xf32, #tpu.memory_space<vmem>>, vector<8x128xf32>,
    %1147 = vector.extract_strided_slice %920 {offsets = [0, 9], sizes = [8, 119], strides = [1, 1]} : vector<8x128xf32> to vector<8x119xf32>
    %1148 = vector.extract_strided_slice %920 {offsets = [0, 0], sizes = [8, 9], strides = [1, 1]} : vector<8x128xf32> to vector<8x9xf32>
    %1149 = tpu.concatenate %1147, %1148 in 1 : vector<8x119xf32>, vector<8x9xf32> -> vector<8x128xf32>
    %c1_i32_414 = arith.constant 1 : i32
    %1150 = vector.broadcast %c1_i32_414 : i32 to vector<1x128xi32>
    %1151 = arith.addi %931, %1150 : vector<1x128xi32>
    %c0_i32_415 = arith.constant 0 : i32
    %1152 = vector.broadcast %c0_i32_415 : i32 to vector<1x128xi32>
    %1153 = arith.cmpi sge, %1151, %1152 : vector<1x128xi32>
    %c1_i32_416 = arith.constant 1 : i32
    %1154 = vector.broadcast %c1_i32_416 : i32 to vector<1x128xi32>
    %1155 = arith.addi %931, %1154 : vector<1x128xi32>
    %c8_i32_417 = arith.constant 8 : i32
    %1156 = vector.broadcast %c8_i32_417 : i32 to vector<1x128xi32>
    %1157 = arith.cmpi slt, %1155, %1156 : vector<1x128xi32>
    %1158 = arith.andi %1153, %1157 : vector<1x128xi1>
    %c1_i32_418 = arith.constant 1 : i32
    %1159 = vector.broadcast %c1_i32_418 : i32 to vector<1x128xi32>
    %1160 = arith.addi %933, %1159 : vector<1x128xi32>
    %c0_i32_419 = arith.constant 0 : i32
    %1161 = vector.broadcast %c0_i32_419 : i32 to vector<1x128xi32>
    %1162 = arith.cmpi sge, %1160, %1161 : vector<1x128xi32>
    %1163 = arith.andi %1158, %1162 : vector<1x128xi1>
    %c1_i32_420 = arith.constant 1 : i32
    %1164 = vector.broadcast %c1_i32_420 : i32 to vector<1x128xi32>
    %1165 = arith.addi %933, %1164 : vector<1x128xi32>
    %c8_i32_421 = arith.constant 8 : i32
    %1166 = vector.broadcast %c8_i32_421 : i32 to vector<1x128xi32>
    %1167 = arith.cmpi slt, %1165, %1166 : vector<1x128xi32>
    %1168 = arith.andi %1163, %1167 : vector<1x128xi1>
    %1169 = arith.extui %1168 : vector<1x128xi1> to vector<1x128xi32>
    %1170 = arith.sitofp %1169 : vector<1x128xi32> to vector<1x128xf32>
    %1171 = vector.broadcast %1170 : vector<1x128xf32> to vector<8x128xf32>
    %1172 = arith.mulf %1149, %1171 : vector<8x128xf32>
    %c64_422 = arith.constant 64 : index
    %c0_423 = arith.constant 0 : index
    %1173 = vector.load %arg6[%c64_422, %c0_423] : memref<144x512xf32, #tpu.memory_space<vmem>>, vector<8x128xf32>
    tpu.vector_store %arg6[%c64_422, %c0_423], %1172 {strides = array<i32>} : memref<144x512xf32, #tpu.memory_space<vmem>>, vector<8x128xf32>,
    %c0_424 = arith.constant 0 : index
    %c0_425 = arith.constant 0 : index
    %1174 = vector.load %arg6[%c0_424, %c0_425] : memref<144x512xf32, #tpu.memory_space<vmem>>, vector<72x128xf32>
    %1175 = arith.truncf %923 : vector<8x72xf32> to vector<8x72xbf16>
    %1176 = arith.truncf %1174 : vector<72x128xf32> to vector<72x128xbf16>
    %cst_426 = arith.constant dense<0.000000e+00> : vector<8x128xf32>
    %1177 = tpu.matmul %1175, %1176, %cst_426 {dimension_numbers = #tpu.dot_dimension_numbers<[1], [0], [0], [1], [0, 0, 1, 1], [], []>} : vector<8x72xbf16>, vector<72x128xbf16>, vector<8x128xf32> -> vector<8x128xf32>
    %1178 = vector.broadcast %926 : vector<8x1xf32> to vector<8x128xf32>
    %1179 = arith.addf %1177, %1178 : vector<8x128xf32>
    %cst_427 = arith.constant 0.000000e+00 : f32
    %1180 = vector.broadcast %cst_427 : f32 to vector<8x128xf32>
    %1181 = arith.maximumf %1179, %1180 : vector<8x128xf32>
    %c6 = arith.constant 6 : index
    %c0_428 = arith.constant 0 : index
    %c0_429 = arith.constant 0 : index
    %1182 = vector.load %arg1[%c6, %c0_428, %c0_429] : memref<7x32x144xf32, #tpu.memory_space<vmem>>, vector<1x32x144xf32>
    %1183 = vector.shape_cast %1182 : vector<1x32x144xf32> to vector<32x144xf32>
    %1184 = vector.extract_strided_slice %1183 {offsets = [0, 0], sizes = [1, 8], strides = [1, 1]} : vector<32x144xf32> to vector<1x8xf32>
    %c6_430 = arith.constant 6 : index
    %c0_431 = arith.constant 0 : index
    %c0_432 = arith.constant 0 : index
    %1185 = vector.load %arg2[%c6_430, %c0_431, %c0_432] : memref<7x32x1xf32, #tpu.memory_space<vmem>>, vector<1x32x1xf32>
    %1186 = vector.shape_cast %1185 : vector<1x32x1xf32> to vector<32x1xf32>
    %1187 = vector.extract_strided_slice %1186 {offsets = [0, 0], sizes = [1, 1], strides = [1, 1]} : vector<32x1xf32> to vector<1x1xf32>
    %1188 = arith.truncf %1184 : vector<1x8xf32> to vector<1x8xbf16>
    %1189 = arith.truncf %1181 : vector<8x128xf32> to vector<8x128xbf16>
    %cst_433 = arith.constant dense<0.000000e+00> : vector<1x128xf32>
    %1190 = tpu.matmul %1188, %1189, %cst_433 {dimension_numbers = #tpu.dot_dimension_numbers<[1], [0], [0], [1], [0, 0, 1, 1], [], []>} : vector<1x8xbf16>, vector<8x128xbf16>, vector<1x128xf32> -> vector<1x128xf32>
    %1191 = vector.broadcast %1187 : vector<1x1xf32> to vector<1x128xf32>
    %1192 = arith.addf %1190, %1191 : vector<1x128xf32>
    %c0_434 = arith.constant 0 : index
    %c0_435 = arith.constant 0 : index
    %1193 = vector.load %arg5[%c0_434, %c0_435] : memref<1x128xf32, #tpu.memory_space<vmem>>, vector<1x128xf32>
    tpu.vector_store %arg5[%c0_434, %c0_435], %1192 {strides = array<i32>} : memref<1x128xf32, #tpu.memory_space<vmem>>, vector<1x128xf32>,
    return
  }
}

</mosaic_0001>

<bundles_post_ra>
// kernel: squeeze.14
= control target key start
LH: loop header
LB: loop body
LE: loop exit
PB: predicated region body
PF: predicated region fallthrough
CT: control target
= control target key end

     0   :  { %s130_s0 = inlined_call_operand.vmem [shape: f32[512], index: 0, kind: input, shape index: {}]   ;;  %s131_s1 = inlined_call_operand.hbm [shape: f32[2,1,16,16], index: 1, kind: output, shape index: {}]  }
   0x1   :  { %v5_v0 = vld [vmem:[%s130_s0] sm:$0xf] }
   0x2   :  { %6 = vst [vmem:[#allocation2] sm:$0xf] %v5_v0 }
   0x3   :  { %2 = vsyncpa [#allocation1], 0  ;;  %s98_s0 = smov 112   ;;  %s99_s8 = smov 80   ;;  %vm8_vm0 = vcmask 130048  }
   0x4   :  { %s100_s9 = smov 48   ;;  %s101_s10 = smov 96  }
   0x5   :  { %s102_s11 = smov 64   ;;  %s103_s12 = smov 32  }
   0x6   :  { %s104_s13 = smov 16   ;;  %s105_s14 = smov [#allocation0]  }
   0x7   :  { %s55_s15 = sshll.u32 %s105_s14, 4  ;;  %s57_s1 = sshll.u32 %s131_s1, 4  ;;  %s56_s15 = int_to_ptr.vmem [resolvable:$true] %s55_s15  ;;  %s58_s1 = int_to_ptr.hbm [resolvable:$true] %s57_s1 }
   0x9   :  { %v10_v1 = vld [vmem:[#allocation2] sm:$0xf]  }
   0xa   :  { %v22_v2 = vld [vmem:[#allocation2] sm:$0xf]   ;;  %11 = vrot.lane.b32.xlu0 %v10_v1, %s98_s0 }
   0xb   :  { %23 = vrot.lane.b32.xlu1 %v22_v2, %s99_s8  ;;  %v34_v3 = vld [vmem:[#allocation2] sm:$0xf]  }
   0xc   :  { %35 = vrot.lane.b32.xlu2 %v34_v3, %s100_s9  ;;  %v16_v4 = vld [vmem:[#allocation2] sm:$0xf]  }
   0xd   :  { %v28_v5 = vld [vmem:[#allocation2] sm:$0xf]  }
   0xe   :  { %v40_v6 = vld [vmem:[#allocation2] sm:$0xf]  }
   0xf   :  { %v46_v7 = vld [vmem:[#allocation2] sm:$0xf]  }
  0x10   :  { %v7_v9 = vld [vmem:[#allocation2] sm:$0xf]  }
  0x11   :  { %9 = vst.msk [vmem:[#allocation0] ss:$8 sm:$0xf] %vm8_vm0, %v7_v9  }
  0x12   :  { %17 = vrot.lane.b32.xlu0 %v16_v4, %s101_s10 }
  0x13   :  { %29 = vrot.lane.b32.xlu1 %v28_v5, %s102_s11 }
  0x14   :  { %41 = vrot.lane.b32.xlu2 %v40_v6, %s103_s12 }
  0x1a   :  { %47 = vrot.lane.b32.xlu0 %v46_v7, %s104_s13 }
  0x66   :  { %v36_v8 = vpop.permute.xlu2 %35  }
  0x67   :  { %39 = vst.msk [vmem:[#allocation0 + $0x5] ss:$8 sm:$0xf] %vm8_vm0, %v36_v8  }
  0x6e   :  { %v42_v10 = vpop.permute.xlu2 %41  }
  0x6f   :  { %45 = vst.msk [vmem:[#allocation0 + $0x6] ss:$8 sm:$0xf] %vm8_vm0, %v42_v10  }
  0x7c   :  { %v12_v11 = vpop.permute.xlu0 %11  }
  0x7d   :  { %v24_v12 = vpop.permute.xlu1 %23   ;;  %15 = vst.msk [vmem:[#allocation0 + $0x1] ss:$8 sm:$0xf] %vm8_vm0, %v12_v11  }
  0x7e   :  { %27 = vst.msk [vmem:[#allocation0 + $0x3] ss:$8 sm:$0xf] %vm8_vm0, %v24_v12  }
  0x84   :  { %v18_v13 = vpop.permute.xlu0 %17  }
  0x85   :  { %v30_v14 = vpop.permute.xlu1 %29   ;;  %21 = vst.msk [vmem:[#allocation0 + $0x2] ss:$8 sm:$0xf] %vm8_vm0, %v18_v13  }
  0x86   :  { %33 = vst.msk [vmem:[#allocation0 + $0x4] ss:$8 sm:$0xf] %vm8_vm0, %v30_v14  }
  0x8c   :  { %v48_v15 = vpop.permute.xlu0 %47  }
  0x8d   :  { %51 = vst.msk [vmem:[#allocation0 + $0x7] ss:$8 sm:$0xf] %vm8_vm0, %v48_v15  }
  0x8e   :  { %60 = dma.vmem_to_hbm [thread:$0]  %s56_s15, 512, %s58_s1, [#allocation1]  }
  0x8f   :  { %96 = dma.done.wait [#allocation1], 512  }
  0x90   :  { %97 = vsyncadd [#allocation1], 4294966784 }
  0x91   :  { %63 = vsyncpa [#allocation1], 1 }

// kernel: sr_model_forward.3
= control target key start
LH: loop header
LB: loop body
LE: loop exit
PB: predicated region body
PF: predicated region fallthrough
CT: control target
= control target key end

     0   :  { %s3803_s22 = smov 112   ;;  %s3804_s23 = smov 113   ;;  %v7544_v9 = vlaneseq  ;;  %v7545_v24 = vmov 0.0   ;;  %vm7543_vm4 = vcmask 916480   ;;  %vm7542_vm7 = vcmask 924672   ;;  %s7535_s0 = inlined_call_operand.vmem [shape: f32[16,512], index: 0, kind: input, shape index: {}]   ;;  %s7536_s1 = inlined_call_operand.vmem [shape: f32[7,32,144], index: 1, kind: input, shape index: {}]   ;;  %s7537_s2 = inlined_call_operand.vmem [shape: f32[7,32,1], index: 2, kind: input, shape index: {}]   ;;  %s7538_s3 = inlined_call_operand.vmem [shape: f32[2,512], index: 3, kind: output, shape index: {0}]   ;;  %s7539_s4 = inlined_call_operand.vmem [shape: f32[4,512], index: 4, kind: output, shape index: {1}]   ;;  %s7540_s5 = inlined_call_operand.vmem [shape: f32[1,128], index: 5, kind: output, shape index: {2}]  }
   0x1   :  { %v3854_v0 = vld [vmem:[%s7535_s0 + $0x28] sm:$0xff]  ;;  %v3870_v2 = vld [vmem:[%s7535_s0 + $0x30] sm:$0xff]  ;;  %v3886_v4 = vld [vmem:[%s7535_s0] sm:$0xff]  ;;  %s3805_s7 = smov 127   ;;  %s3806_s8 = smov 1  }
   0x2   :  { %v3859_v1 = vld [vmem:[%s7535_s0 + $0x8] sm:$0xff]  ;;  %583 = vrot.lane.b32.xlu1 %v3854_v0, %s3803_s22  ;;  %v3875_v3 = vld [vmem:[%s7535_s0 + $0x10] sm:$0xff]  ;;  %v3897_v5 = vld [vmem:[%s7535_s0 + $0x20] sm:$0xff]  ;;  %s3807_s9 = smov 15   ;;  %s3808_s14 = smov 16   ;;  %v3972_v10 = vand.u32 127, %v7544_v9 }
   0x3   :  { %492 = vrot.lane.b32.xlu2 %v3859_v1, %s3804_s23  ;;  %575 = vrot.lane.b32.xlu0 %v3859_v1, %s3803_s22  ;;  %v3932_v6 = vld [vmem:[%s7535_s0 + $0x18] sm:$0xff]  ;;  %s3810_s15 = smov 111   ;;  %s3815_s10 = smov 120  }
   0x4   :  { %v3943_v7 = vld [vmem:[%s7535_s0 + $0x38] sm:$0xff]  ;;  %s3809_s0 = smov 17   ;;  %7656 = vst [vmem:[#allocation3_spill] sm:$0xff] %v3972_v10  ;;  %v40_v12 = vadd.s32 128, %v3972_v10  ;;  %v43_v23 = vand.u32 255, %v3972_v10  ;;  %v41_v9 = vadd.s32 256, %v3972_v10 }
   0x5   :  { %s3816_s11 = smov 121   ;;  %s3817_s12 = smov 119  }
   0x6   :  { %v44_v13 = vand.u32 255, %v40_v12  ;;  %v4031_v32 = vshra.s32 %v43_v23, 4  ;;  %v51_v53 = vand.u32 15, %v43_v23  ;;  %s3818_s13 = smov 7   ;;  %s3819_s16 = smov 8  }
   0x8   :  { %v3985_v15 = vshra.s32 %v44_v13, 4  ;;  %v52_v17 = vand.u32 15, %v44_v13  ;;  %v525_v35 = vadd.s32 1, %v4031_v32  ;;  %v4101_v58 = vadd.s32 4294967295, %v51_v53 }
   0xa   :  { %585 = vrot.lane.b32.xlu1 %v3870_v2, %s3803_s22  ;;  %v526_v16 = vadd.s32 1, %v3985_v15  ;;  %v3996_v21 = vadd.s32 4294967295, %v52_v17  ;;  %vm529_vm9 = vcmp.ge.s32.totalorder %v525_v35, 0  ;;  %vm533_vm10 = vcmp.lt.s32.totalorder %v525_v35, 16 }
   0xb   :  { %494 = vrot.lane.b32.xlu2 %v3875_v3, %s3804_s23  ;;  %577 = vrot.lane.b32.xlu0 %v3875_v3, %s3803_s22  ;;  %v4060_v44 = vadd.s32 1, %v52_v17  ;;  %vm348_vm11 = vcmp.ge.s32.totalorder %v3985_v15, 0  ;;  %vm352_vm12 = vcmp.lt.s32.totalorder %v3985_v15, 16  ;;  %vm4064_vm13 = vmand %vm529_vm9, %vm533_vm10  ;;  %vm118_vm9 = vcmp.ge.s32.totalorder %v4101_v58, 0 }
   0xc   :  { %vm530_vm0 = vcmp.ge.s32.totalorder %v526_v16, 0  ;;  %vm534_vm1 = vcmp.lt.s32.totalorder %v526_v16, 16  ;;  %vm119_vm3 = vcmp.ge.s32.totalorder %v3996_v21, 0  ;;  %vm127_vm5 = vcmp.lt.s32.totalorder %v3996_v21, 16  ;;  %vm4075_vm15 = vmand %vm348_vm11, %vm352_vm12 }
   0xd   :  { %vm4002_vm2 = vmand %vm530_vm0, %vm534_vm1  ;;  %vm273_vm14 = vcmp.ge.s32.totalorder %v4060_v44, 0  ;;  %v4086_v51 = vsel %vm4064_vm13, 1.0, %v7545_v24  ;;  %vm281_vm0 = vcmp.lt.s32.totalorder %v4060_v44, 16  ;;  %v4119_v62 = vsel %vm4075_vm15, 1.0, %v7545_v24 }
   0xe   :  { %v4012_v25 = vsel %vm4002_vm2, 1.0, %v7545_v24  ;;  %vm542_vm6 = vmand %vm4002_vm2, %vm119_vm3  ;;  %7665 = vst [vmem:[#allocation6_spill] sm:$0xff] %v4086_v51  ;;  %v4126_v16 = vadd.s32 1, %v51_v53  ;;  %vm347_vm10 = vcmp.ge.s32.totalorder %v4031_v32, 0  ;;  %vm351_vm11 = vcmp.lt.s32.totalorder %v4031_v32, 16 }
   0xf   :  { %7659 = vst [vmem:[#allocation4_spill] sm:$0xff] %v4012_v25  ;;  %vm546_vm8 = vmand %vm542_vm6, %vm127_vm5  ;;  %vm7541_vm6 = vcmask 1039360   ;;  %v412_v23 = vmul.f32 %v4119_v62, %v3854_v0 }
  0x10   :  { %v4051_v39 = vsel %vm546_vm8, 1.0, %v7545_v24  ;;  %vm459_vm1 = vmand %vm4075_vm15, %vm273_vm14  ;;  %7667 = vst [vmem:[#allocation8_spill] sm:$0xff] %v4119_v62 }
  0x11   :  { %7660 = vst [vmem:[#allocation5_spill] sm:$0xff] %v4051_v39  ;;  %vm463_vm8 = vmand %vm459_vm1, %vm281_vm0  ;;  %vm280_vm1 = vcmp.lt.s32.totalorder %v4126_v16, 16 }
  0x12   :  { %502 = vrot.lane.b32.xlu1 %v3870_v2, %s3804_s23  ;;  %v4114_v61 = vsel %vm463_vm8, 1.0, %v7545_v24  ;;  %vm541_vm12 = vmand %vm4064_vm13, %vm118_vm9 }
  0x13   :  { %573 = vrot.lane.b32.xlu2 %v3886_v4, %s3803_s22  ;;  %500 = vrot.lane.b32.xlu0 %v3854_v0, %s3804_s23  ;;  %7666 = vst [vmem:[#allocation7_spill] sm:$0xff] %v4114_v61  ;;  %vm4145_vm8 = vmand %vm347_vm10, %vm351_vm11 }
  0x14   :  { %vm462_vm10 = vmand %vm4145_vm8, %vm280_vm1 }
  0x15   :  { %vm360_vm11 = vmand %vm4075_vm15, %vm119_vm3 }
  0x1a   :  { %425 = vrot.lane.b32.xlu1 %v3859_v1, %s3805_s7 }
  0x1b   :  { %427 = vrot.lane.b32.xlu2 %v3875_v3, %s3805_s7  ;;  %581 = vrot.lane.b32.xlu0 %v3897_v5, %s3803_s22 }
  0x22   :  { %435 = vrot.lane.b32.xlu1 %v3870_v2, %s3805_s7 }
  0x23   :  { %490 = vrot.lane.b32.xlu2 %v3886_v4, %s3804_s23  ;;  %433 = vrot.lane.b32.xlu0 %v3854_v0, %s3805_s7 }
  0x2a   :  { %423 = vrot.lane.b32.xlu1 %v3886_v4, %s3805_s7 }
  0x2b   :  { %431 = vrot.lane.b32.xlu2 %v3897_v5, %s3805_s7  ;;  %498 = vrot.lane.b32.xlu0 %v3897_v5, %s3804_s23 }
  0x32   :  { %320 = vrot.lane.b32.xlu1 %v3859_v1, %s3806_s8 }
  0x33   :  { %324 = vrot.lane.b32.xlu2 %v3897_v5, %s3806_s8  ;;  %318 = vrot.lane.b32.xlu0 %v3886_v4, %s3806_s8 }
  0x3a   :  { %239 = vrot.lane.b32.xlu1 %v3886_v4, %s3807_s9 }
  0x3b   :  { %241 = vrot.lane.b32.xlu2 %v3859_v1, %s3807_s9  ;;  %326 = vrot.lane.b32.xlu0 %v3854_v0, %s3806_s8 }
  0x42   :  { %247 = vrot.lane.b32.xlu1 %v3854_v0, %s3807_s9 }
  0x43   :  { %312 = vrot.lane.b32.xlu2 %v3932_v6, %s3806_s8  ;;  %245 = vrot.lane.b32.xlu0 %v3897_v5, %s3807_s9 }
  0x4a   :  { %164 = vrot.lane.b32.xlu1 %v3886_v4, %s3808_s14 }
  0x4b   :  { %166 = vrot.lane.b32.xlu2 %v3859_v1, %s3808_s14  ;;  %314 = vrot.lane.b32.xlu0 %v3943_v7, %s3806_s8 }
  0x52   :  { %172 = vrot.lane.b32.xlu1 %v3854_v0, %s3808_s14 }
  0x53   :  { %233 = vrot.lane.b32.xlu2 %v3932_v6, %s3807_s9  ;;  %170 = vrot.lane.b32.xlu0 %v3897_v5, %s3808_s14 }
  0x5a   :  { %69 = vrot.lane.b32.xlu1 %v3886_v4, %s3809_s0 }
  0x5b   :  { %71 = vrot.lane.b32.xlu2 %v3859_v1, %s3809_s0  ;;  %235 = vrot.lane.b32.xlu0 %v3943_v7, %s3807_s9 }
  0x5d   :  { %v3963_v8 = vpop.permute.xlu2 %492 }
  0x62   :  { %77 = vrot.lane.b32.xlu1 %v3854_v0, %s3809_s0 }
  0x63   :  { %158 = vrot.lane.b32.xlu2 %v3932_v6, %s3808_s14  ;;  %75 = vrot.lane.b32.xlu0 %v3897_v5, %s3809_s0 }
  0x65   :  { %v3974_v11 = vpop.permute.xlu2 %494 }
  0x66   :  { %v508_v36 = vsel %vm7542_vm7, %v3963_v8, %v3974_v11 }
  0x67   :  { %v558_v42 = vmul.f32 %v4051_v39, %v508_v36 }
  0x6a   :  { %642 = vrot.lane.b32.xlu1 %v3859_v1, %s3810_s15 }
  0x6b   :  { %644 = vrot.lane.b32.xlu2 %v3875_v3, %s3810_s15  ;;  %160 = vrot.lane.b32.xlu0 %v3943_v7, %s3808_s14 }
  0x6d   :  { %v3983_v14 = vpop.permute.xlu2 %573 }
  0x72   :  { %652 = vrot.lane.b32.xlu1 %v3870_v2, %s3810_s15 }
  0x73   :  { %57 = vrot.lane.b32.xlu2 %v3932_v6, %s3809_s0  ;;  %650 = vrot.lane.b32.xlu0 %v3854_v0, %s3810_s15 }
  0x74   :  { %v584_v18 = vpop.permute.xlu1 %583 }
  0x75   :  { %v3994_v19 = vpop.permute.xlu2 %427  ;;  %v576_v20 = vpop.permute.xlu0 %575 }
  0x76   :  { %v590_v50 = vsel %vm7543_vm4, %v3983_v14, %v576_v20 }
  0x77   :  { %v624_v55 = vmul.f32 %v4086_v51, %v590_v50 }
  0x7a   :  { %640 = vrot.lane.b32.xlu1 %v3886_v4, %s3810_s15 }
  0x7b   :  { %648 = vrot.lane.b32.xlu2 %v3897_v5, %s3810_s15  ;;  %59 = vrot.lane.b32.xlu0 %v3943_v7, %s3809_s0 }
  0x7c   :  { %v4015_v26 = vpop.permute.xlu1 %585 }
  0x7d   :  { %v4017_v27 = vpop.permute.xlu2 %490  ;;  %v4019_v28 = vpop.permute.xlu0 %577  ;;  %v594_v29 = vsel %vm7543_vm4, %v584_v18, %v4015_v26 }
  0x7e   :  { %v591_v30 = vsel %vm7543_vm4, %v576_v20, %v4019_v28  ;;  %v629_v31 = vmul.f32 %v4012_v25, %v594_v29  ;;  %v408_v20 = vmul.f32 %v4119_v62, %v3859_v1  ;;  %v507_v1 = vsel %vm7542_vm7, %v4017_v27, %v3963_v8 }
  0x7f   :  { %v625_v33 = vmul.f32 %v4012_v25, %v591_v30 }
  0x80   :  { %v800_v0 = vpack.c.bf16 %v412_v23, %v408_v20 }
  0x81   :  { %v812_v34 = vpack.c.bf16 %v629_v31, %v625_v33  ;;  %v4157_v33 = vsel %vm541_vm12, 1.0, %v7545_v24 }
  0x82   :  { %587 = vrot.lane.b32.xlu1 %v3943_v7, %s3803_s22  ;;  %7670 = vst [vmem:[#allocation9_spill] sm:$0xff] %v4157_v33 }
  0x83   :  { %496 = vrot.lane.b32.xlu2 %v3932_v6, %s3804_s23  ;;  %883 = vmatpush.bf16.msra.mxu2 %v812_v34 }
  0x84   :  { %579 = vrot.lane.b32.xlu0 %v3932_v6, %s3803_s22  ;;  %v4046_v37 = vpop.permute.xlu1 %502 }
  0x85   :  { %v4048_v38 = vpop.permute.xlu2 %431  ;;  %v4053_v40 = vpop.permute.xlu0 %500 }
  0x86   :  { %v511_v41 = vsel %vm7542_vm7, %v4053_v40, %v4046_v37 }
  0x87   :  { %v562_v43 = vmul.f32 %v4051_v39, %v511_v41  ;;  %v557_v41 = vmul.f32 %v4157_v33, %v507_v1 }
  0x89   :  { %v808_v45 = vpack.c.bf16 %v562_v43, %v558_v42 }
  0x8a   :  { %429 = vrot.lane.b32.xlu1 %v3932_v6, %s3805_s7 }
  0x8b   :  { %437 = vrot.lane.b32.xlu2 %v3943_v7, %s3805_s7  ;;  %884 = vmatpush.bf16.msra.mxu2 %v808_v45  ;;  %v4177_v45 = vsel %vm462_vm10, 1.0, %v7545_v24 }
  0x8c   :  { %504 = vrot.lane.b32.xlu0 %v3943_v7, %s3804_s23  ;;  %v426_v48 = vpop.permute.xlu1 %425  ;;  %7671 = vst [vmem:[#allocation10_spill] sm:$0xff] %v4177_v45 }
  0x8d   :  { %v4079_v49 = vpop.permute.xlu2 %324  ;;  %v4088_v52 = vpop.permute.xlu0 %581  ;;  %v441_v59 = vsel %vm7541_vm6, %v426_v48, %v3994_v19 }
  0x8e   :  { %v593_v54 = vsel %vm7543_vm4, %v4088_v52, %v584_v18  ;;  %v475_v17 = vmul.f32 %v4114_v61, %v441_v59 }
  0x8f   :  { %v628_v56 = vmul.f32 %v4086_v51, %v593_v54 }
  0x91   :  { %v811_v57 = vpack.c.bf16 %v628_v56, %v624_v55 }
  0x92   :  { %328 = vrot.lane.b32.xlu1 %v3870_v2, %s3806_s8 }
  0x93   :  { %243 = vrot.lane.b32.xlu2 %v3875_v3, %s3807_s9  ;;  %845 = vmatpush.bf16.msra.mxu0 %v811_v57  ;;  %v99_v57 = vadd.s32 4294967295, %v3985_v15 }
  0x94   :  { %322 = vrot.lane.b32.xlu0 %v3875_v3, %s3806_s8  ;;  %v4111_v60 = vpop.permute.xlu1 %435 }
  0x95   :  { %v434_v63 = vpop.permute.xlu0 %433  ;;  %v4121_v12 = vpop.permute.xlu2 %241  ;;  %vm103_vm12 = vcmp.ge.s32.totalorder %v99_v57, 0  ;;  %vm107_vm10 = vcmp.lt.s32.totalorder %v99_v57, 16 }
  0x96   :  { %v444_v13 = vsel %vm7541_vm6, %v434_v63, %v4111_v60  ;;  %v443_v43 = vsel %vm7541_vm6, %v4048_v38, %v434_v63  ;;  %vm4209_vm4 = vmand %vm103_vm12, %vm107_vm10 }
  0x97   :  { %v479_v18 = vmul.f32 %v4114_v61, %v444_v13  ;;  %v478_v53 = vmul.f32 %v4177_v45, %v443_v43  ;;  %vm277_vm15 = vmand %vm4209_vm4, %vm273_vm14 }
  0x98   :  { %vm359_vm12 = vmand %vm4145_vm8, %vm118_vm9 }
  0x99   :  { %v804_v29 = vpack.c.bf16 %v479_v18, %v475_v17  ;;  %v4251_v57 = vsel %vm359_vm12, 1.0, %v7545_v24 }
  0x9a   :  { %168 = vrot.lane.b32.xlu1 %v3875_v3, %s3808_s14  ;;  %7677 = vst [vmem:[#allocation14_spill] sm:$0xff] %v4251_v57 }
  0x9b   :  { %174 = vrot.lane.b32.xlu2 %v3870_v2, %s3808_s14  ;;  %885 = vmatpush.bf16.msra.mxu2 %v804_v29 }
  0x9c   :  { %249 = vrot.lane.b32.xlu0 %v3870_v2, %s3807_s9  ;;  %v4154_v31 = vpop.permute.xlu1 %423 }
  0x9d   :  { %v4159_v34 = vpop.permute.xlu0 %498  ;;  %v440_v36 = vsel %vm7541_vm6, %v4154_v31, %v426_v48  ;;  %v4170_v8 = vpop.permute.xlu2 %312  ;;  %vm7576_vm6 = vcmask 7168  }
  0x9e   :  { %v510_v35 = vsel %vm7542_vm7, %v4159_v34, %v4053_v40  ;;  %v4182_v40 = vsel %vm4145_vm8, 1.0, %v7545_v24  ;;  %v474_v48 = vmul.f32 %v4177_v45, %v440_v36  ;;  %vm364_vm7 = vmand %vm360_vm11, %vm127_vm5  ;;  %vm7575_vm11 = vcmask 121856  }
  0x9f   :  { %v561_v42 = vmul.f32 %v4157_v33, %v510_v35  ;;  %886 = vmatpush.bf16.msra.mxu2 %v800_v0  ;;  %7672 = vst [vmem:[#allocation11_spill] sm:$0xff] %v4182_v40  ;;  %v407_v54 = vmul.f32 %v4182_v40, %v3886_v4  ;;  %v411_v55 = vmul.f32 %v4182_v40, %v3897_v5  ;;  %v4216_v17 = vsel %vm364_vm7, 1.0, %v7545_v24  ;;  %vm285_vm7 = vmand %vm277_vm15, %vm281_vm0 }
  0xa0   :  { %v803_v63 = vpack.c.bf16 %v478_v53, %v474_v48  ;;  %7675 = vst [vmem:[#allocation12_spill] sm:$0xff] %v4216_v17  ;;  %vm176_vm8 = vcmask 130048  }
  0xa1   :  { %v807_v50 = vpack.c.bf16 %v561_v42, %v557_v41  ;;  %v799_v13 = vpack.c.bf16 %v411_v55, %v407_v54  ;;  %v4238_v41 = vsel %vm285_vm7, 1.0, %v7545_v24 }
  0xa2   :  { %654 = vrot.lane.b32.xlu1 %v3943_v7, %s3810_s15  ;;  %7676 = vst [vmem:[#allocation13_spill] sm:$0xff] %v4238_v41 }
  0xa3   :  { %73 = vrot.lane.b32.xlu2 %v3875_v3, %s3809_s0  ;;  %846 = vmatpush.bf16.msra.mxu0 %v807_v50 }
  0xa4   :  { %646 = vrot.lane.b32.xlu0 %v3932_v6, %s3810_s15  ;;  %v4196_v56 = vpop.permute.xlu1 %320 }
  0xa5   :  { %v319_v59 = vpop.permute.xlu0 %318  ;;  %v4203_v4 = vpop.permute.xlu2 %166 }
  0xa6   :  { %v331_v15 = vsel %vm7576_vm6, %v319_v59, %v4196_v56  ;;  %v345_v54 = vsel %vm7576_vm6, %v4170_v8, %v319_v59 }
  0xa7   :  { %847 = vmatpush.bf16.msra.mxu0 %v803_v63  ;;  %v376_v23 = vmul.f32 %v4216_v17, %v331_v15 }
  0xab   :  { %848 = vmatpush.bf16.msra.mxu0 %v799_v13 }
  0xac   :  { %79 = vrot.lane.b32.xlu0 %v3870_v2, %s3809_s0  ;;  %v240_v47 = vpop.permute.xlu1 %239 }
  0xad   :  { %v4218_v18 = vpop.permute.xlu0 %326  ;;  %v4231_v1 = vpop.permute.xlu2 %233  ;;  %v252_v35 = vsel %vm7575_vm11, %v240_v47, %v4121_v12 }
  0xae   :  { %v334_v20 = vsel %vm7576_vm6, %v4079_v49, %v4218_v18  ;;  %v297_v50 = vmul.f32 %v4238_v41, %v252_v35 }
  0xaf   :  { %v380_v29 = vmul.f32 %v4216_v17, %v334_v20  ;;  %v375_v20 = vmul.f32 %v4251_v57, %v345_v54 }
  0xb1   :  { %v796_v0 = vpack.c.bf16 %v380_v29, %v376_v23  ;;  %v98_v23 = vadd.s32 4294967295, %v4031_v32 }
  0xb3   :  { %887 = vmatpush.bf16.msra.mxu2 %v796_v0  ;;  %vm102_vm10 = vcmp.ge.s32.totalorder %v98_v23, 0  ;;  %vm106_vm15 = vcmp.lt.s32.totalorder %v98_v23, 16 }
  0xb4   :  { %v4235_v36 = vpop.permute.xlu1 %247  ;;  %vm4274_vm7 = vmand %vm102_vm10, %vm106_vm15  ;;  %vm7573_vm15 = vcmask 138240  }
  0xb5   :  { %v246_v42 = vpop.permute.xlu0 %245  ;;  %v4253_v63 = vpop.permute.xlu2 %71  ;;  %vm284_vm12 = vmand %vm4274_vm7, %vm280_vm1 }
  0xb6   :  { %v255_v43 = vsel %vm7575_vm11, %v246_v42, %v4235_v36  ;;  %vm123_vm10 = vmand %vm4209_vm4, %vm119_vm3 }
  0xb7   :  { %v301_v48 = vmul.f32 %v4238_v41, %v255_v43  ;;  %vm676_vm3 = vmand %vm4002_vm2, %vm273_vm14 }
  0xb8   :  { %vm680_vm2 = vmand %vm676_vm3, %vm281_vm0 }
  0xb9   :  { %v792_v53 = vpack.c.bf16 %v301_v48, %v297_v50  ;;  %vm122_vm14 = vmand %vm4274_vm7, %vm118_vm9 }
  0xbb   :  { %888 = vmatpush.bf16.msra.mxu2 %v792_v53 }
  0xbc   :  { %v165_v55 = vpop.permute.xlu1 %164 }
  0xbd   :  { %v4255_v13 = vpop.permute.xlu0 %314  ;;  %v177_v29 = vsel %vm176_vm8, %v165_v55, %v4203_v4  ;;  %v4278_v50 = vpop.permute.xlu2 %158 }
  0xbe   :  { %v346_v15 = vsel %vm7576_vm6, %v4255_v13, %v4079_v49  ;;  %v4270_v49 = vsel %vm4209_vm4, 1.0, %v7545_v24  ;;  %vm7574_vm4 = vcmask 908288  }
  0xbf   :  { %v379_v30 = vmul.f32 %v4251_v57, %v346_v15  ;;  %7678 = vst [vmem:[#allocation15_spill] sm:$0xff] %v4270_v49  ;;  %v218_v48 = vmul.f32 %v4270_v49, %v177_v29  ;;  %v266_v15 = vsel %vm7575_vm11, %v4231_v1, %v240_v47  ;;  %v27_v57 = vld [vmem:[%s7536_s1 + $0x8] sm:$0xff] }
  0xc1   :  { %v795_v59 = vpack.c.bf16 %v379_v30, %v375_v20  ;;  %v4291_v30 = vsel %vm284_vm12, 1.0, %v7545_v24  ;;  %vm131_vm12 = vmand %vm123_vm10, %vm127_vm5 }
  0xc2   :  { %7681 = vst [vmem:[#allocation16_spill] sm:$0xff] %v4291_v30  ;;  %v296_v29 = vmul.f32 %v4291_v30, %v266_v15  ;;  %v4313_v5 = vsel %vm131_vm12, 1.0, %v7545_v24  ;;  %v42_v24 = vadd.s32 384, %v3972_v10  ;;  %v34_v10 = vld [vmem:[%s7537_s2] sm:$0xff]  ;;  %vm679_vm5 = vmand %vm4064_vm13, %vm280_vm1 }
  0xc3   :  { %849 = vmatpush.bf16.msra.mxu0 %v795_v59  ;;  %7682 = vst [vmem:[#allocation17_spill] sm:$0xff] %v4313_v5 }
  0xc4   :  { %v4265_v0 = vpop.permute.xlu1 %172 }
  0xc5   :  { %v171_v35 = vpop.permute.xlu0 %170  ;;  %v4303_v47 = vpop.permute.xlu2 %644 }
  0xc6   :  { %v180_v43 = vsel %vm176_vm8, %v171_v35, %v4265_v0 }
  0xc7   :  { %v222_v53 = vmul.f32 %v4270_v49, %v180_v43 }
  0xc9   :  { %v788_v54 = vpack.c.bf16 %v222_v53, %v218_v48 }
  0xcb   :  { %889 = vmatpush.bf16.msra.mxu2 %v788_v54 }
  0xcc   :  { %v4288_v20 = vpop.permute.xlu1 %69 }
  0xcd   :  { %v4293_v23 = vpop.permute.xlu0 %235  ;;  %v4332_v41 = vpop.permute.xlu2 %57 }
  0xce   :  { %v267_v59 = vsel %vm7575_vm11, %v4293_v23, %v246_v42  ;;  %v82_v42 = vsel %vm7573_vm15, %v4288_v20, %v4253_v63  ;;  %v96_v32 = vsel %vm7573_vm15, %v4332_v41, %v4288_v20 }
  0xcf   :  { %v300_v43 = vmul.f32 %v4291_v30, %v267_v59  ;;  %v143_v59 = vmul.f32 %v4313_v5, %v82_v42  ;;  %v191_v42 = vsel %vm176_vm8, %v4278_v50, %v165_v55 }
  0xd1   :  { %v791_v48 = vpack.c.bf16 %v300_v43, %v296_v29  ;;  %v26_v29 = vld [vmem:[%s7536_s1] sm:$0xff]  ;;  %v28_v43 = vld [vmem:[%s7536_s1 + $0x10] sm:$0xff] }
  0xd2   :  { %v4330_v49 = vpack.c.bf16 %v28_v43, %v26_v29  ;;  %v45_v29 = vand.u32 255, %v41_v9  ;;  %v46_v43 = vand.u32 255, %v42_v24  ;;  %v35_v9 = vld [vmem:[%s7537_s2 + $0x8] sm:$0xff]  ;;  %v3812_v24 = vmov 0  }
  0xd3   :  { %850 = vmatpush.bf16.msra.mxu0 %v791_v48  ;;  %3784 = vset.pattern.permute.xlu0 %v3812_v24 }
  0xd4   :  { %v4310_v53 = vpop.permute.xlu1 %77  ;;  %3782 = vset.pattern.permute.xlu1 %v3812_v24  ;;  %821 = vperm.xlu0 %3784, %v34_v10   ;;  %v4362_v22 = vshra.s32 %v45_v29, 4  ;;  %v53_v10 = vand.u32 15, %v45_v29  ;;  %v29_v29 = vld [vmem:[%s7536_s1 + $0x18] sm:$0xff] }
  0xd5   :  { %v4315_v54 = vpop.permute.xlu0 %75  ;;  %826 = vperm.xlu1 %3782, %v35_v9   ;;  %3783 = vset.pattern.permute.xlu2 %v3812_v24  ;;  %v54_v9 = vand.u32 15, %v46_v43  ;;  %v4409_v46 = vpack.c.bf16 %v29_v29, %v27_v57 }
  0xd6   :  { %v85_v15 = vsel %vm7573_vm15, %v4315_v54, %v4310_v53  ;;  %v527_v24 = vadd.s32 1, %v4362_v22  ;;  %v4405_v25 = vadd.s32 4294967295, %v53_v10 }
  0xd7   :  { %v147_v21 = vmul.f32 %v4313_v5, %v85_v15  ;;  %v7683_v5 = vmov 0.0   ;;  %v4407_v16 = vadd.s32 4294967295, %v54_v9  ;;  %v4439_v20 = vadd.s32 1, %v54_v9 }
  0xd8   :  { %v4341_v61 = vsel %vm4274_vm7, 1.0, %v7683_v5  ;;  %vm531_vm13 = vcmp.ge.s32.totalorder %v527_v24, 0  ;;  %vm535_vm0 = vcmp.lt.s32.totalorder %v527_v24, 16  ;;  %v4424_v57 = vsel %vm122_vm14, 1.0, %v7683_v5 }
  0xd9   :  { %v784_v48 = vpack.c.bf16 %v147_v21, %v143_v59  ;;  %7684 = vst [vmem:[#allocation18_spill] sm:$0xff] %v4341_v61  ;;  %v217_v55 = vmul.f32 %v4341_v61, %v191_v42  ;;  %v4364_v42 = vshra.s32 %v46_v43, 4  ;;  %v36_v43 = vld [vmem:[%s7537_s2 + $0x10] sm:$0xff]  ;;  %v4426_v24 = vadd.s32 1, %v53_v10  ;;  %vm4433_vm7 = vmand %vm531_vm13, %vm535_vm0 }
  0xda   :  { %7687 = vst [vmem:[#allocation21_spill] sm:$0xff] %v4424_v57  ;;  %vm7580_vm10 = vcmp.ge.s32.totalorder %v4405_v25, 0  ;;  %vm7577_vm12 = vcmp.ge.s32.totalorder %v4407_v16, 0  ;;  %vm7591_vm11 = vcmp.ge.s32.totalorder %v4439_v20, 0 }
  0xdb   :  { %890 = vmatpush.bf16.msra.mxu2 %v784_v48  ;;  %vm350_vm14 = vcmp.ge.s32.totalorder %v4364_v42, 0  ;;  %vm354_vm13 = vcmp.lt.s32.totalorder %v4364_v42, 16  ;;  %vm543_vm0 = vmand %vm4433_vm7, %vm7580_vm10 }
  0xdc   :  { %v4336_v15 = vpop.permute.xlu1 %642  ;;  %vm4480_vm6 = vmand %vm350_vm14, %vm354_vm13 }
  0xdd   :  { %v4343_v59 = vpop.permute.xlu0 %160  ;;  %v658_v62 = vsel %vm7574_vm4, %v4336_v15, %v4303_v47  ;;  %831 = vperm.xlu1 %3782, %v36_v43  }
  0xde   :  { %v192_v21 = vsel %vm176_vm8, %v4343_v59, %v171_v35  ;;  %891 = vmatmul.bf16.vlgmr.msra.gmra.mxu2 %v4330_v49 }
  0xdf   :  { %v221_v48 = vmul.f32 %v4341_v61, %v192_v21 }
  0xe1   :  { %v787_v35 = vpack.c.bf16 %v221_v48, %v217_v55  ;;  %v4372_v55 = vsel %vm680_vm2, 1.0, %v7683_v5  ;;  %v4374_v48 = vpop.permute.xlu2 %648  ;;  %vm349_vm2 = vcmp.ge.s32.totalorder %v4362_v22, 0 }
  0xe2   :  { %7685 = vst [vmem:[#allocation19_spill] sm:$0xff] %v4372_v55  ;;  %v692_v61 = vmul.f32 %v4372_v55, %v658_v62  ;;  %v32_v62 = vld [vmem:[%s7536_s1 + $0x30] sm:$0xff] }
  0xe3   :  { %851 = vmatpush.bf16.msra.mxu0 %v787_v35  ;;  %v528_v35 = vadd.s32 1, %v4364_v42 }
  0xe4   :  { %v4366_v21 = vpop.permute.xlu1 %652 }
  0xe5   :  { %v651_v44 = vpop.permute.xlu0 %650  ;;  %vm532_vm1 = vcmp.ge.s32.totalorder %v528_v35, 0  ;;  %vm536_vm9 = vcmp.lt.s32.totalorder %v528_v35, 16 }
  0xe6   :  { %v661_v39 = vsel %vm7574_vm4, %v651_v44, %v4366_v21  ;;  %v660_v17 = vsel %vm7574_vm4, %v4374_v48, %v651_v44  ;;  %vm4450_vm3 = vmand %vm532_vm1, %vm536_vm9  ;;  %vm7584_vm1 = vcmp.lt.s32.totalorder %v4405_v25, 16 }
  0xe7   :  { %v696_v30 = vmul.f32 %v4372_v55, %v661_v39  ;;  %v30_v39 = vld [vmem:[%s7536_s1 + $0x20] sm:$0xff]  ;;  %vm4470_vm9 = vmand %vm4450_vm3, %vm7577_vm12  ;;  %vm7704_vm12 = vcmask 916480  }
  0xe8   :  { %v4416_v58 = vpack.c.bf16 %v32_v62, %v30_v39  ;;  %vm7705_vm10 = vmmov %vm7704_vm12 }
  0xe9   :  { %v816_v55 = vpack.c.bf16 %v696_v30, %v692_v61  ;;  %v4414_v61 = vsel %vm679_vm5, 1.0, %v7683_v5  ;;  %v497_v62 = vpop.permute.xlu2 %496  ;;  %vm353_vm5 = vcmp.lt.s32.totalorder %v4362_v22, 16 }
  0xea   :  { %7686 = vst [vmem:[#allocation20_spill] sm:$0xff] %v4414_v61 }
  0xeb   :  { %909 = vmatpush.bf16.msra.mxu3 %v816_v55 }
  0xec   :  { %v4421_v30 = vpop.permute.xlu1 %640 }
  0xed   :  { %v4428_v55 = vpop.permute.xlu0 %59  ;;  %v657_v44 = vsel %vm7574_vm4, %v4421_v30, %v4336_v15  ;;  %v695_v15 = vmul.f32 %v4414_v61, %v660_v17  ;;  %vm4475_vm4 = vmand %vm349_vm2, %vm353_vm5  ;;  %vm129_vm2 = vcmp.lt.s32.totalorder %v4407_v16, 16 }
  0xee   :  { %v97_v10 = vsel %vm7573_vm15, %v4428_v55, %v4315_v54  ;;  %3641 = vmatmul.msk.bf16.vlgmr.msra.gmra.mxu3 %vm176_vm8, %v4409_v46  ;;  %v691_v43 = vmul.f32 %v4414_v61, %v657_v44  ;;  %v142_v54 = vmul.f32 %v4424_v57, %v96_v32  ;;  %896 = vmatmul.bf16.gmra.mxu2 %v4416_v58  ;;  %vm7583_vm15 = vcmp.ge.s32.totalorder %v4426_v24, 0  ;;  %vm4497_vm5 = vmand %vm543_vm0, %vm7584_vm1 }
  0xef   :  { %v146_v9 = vmul.f32 %v4424_v57, %v97_v10  ;;  %vm4506_vm13 = vmand %vm4475_vm4, %vm7583_vm15  ;;  %vm283_vm0 = vcmp.lt.s32.totalorder %v4439_v20, 16  ;;  %v4550_v32 = vsel %vm4497_vm5, 1.0, %v7683_v5  ;;  %vm7711_vm5 = vcmask 1039360  }
  0xf0   :  { %v815_v17 = vpack.c.bf16 %v695_v15, %v691_v43  ;;  %v4487_v15 = vsel %vm4433_vm7, 1.0, %v7683_v5  ;;  %vm461_vm15 = vmand %vm4480_vm6, %vm7591_vm11 }
  0xf1   :  { %v783_v35 = vpack.c.bf16 %v146_v9, %v142_v54  ;;  %7698 = vst [vmem:[#allocation22_spill] sm:$0xff] %v4487_v15  ;;  %v4492_v54 = vsel %vm4450_vm3, 1.0, %v7683_v5  ;;  %vm7706_vm1 = vmmov %vm7705_vm10 }
  0xf2   :  { %871 = vmatpush.bf16.msra.mxu1 %v815_v17  ;;  %7699 = vst [vmem:[#allocation23_spill] sm:$0xff] %v4492_v54  ;;  %vm7707_vm14 = vmmov %vm7706_vm1 }
  0xf3   :  { %852 = vmatpush.bf16.msra.mxu0 %v783_v35 }
  0xf4   :  { %v588_v43 = vpop.permute.xlu1 %587 }
  0xf5   :  { %v595_v57 = vsel %vm7704_vm12, %v4015_v26, %v588_v43  ;;  %v607_v61 = vsel %vm7705_vm10, %v588_v43, %v4088_v52  ;;  %3639 = vmatmul.msk.bf16.vlgmr.msra.gmra.mxu1 %vm176_vm8, %v4409_v46  ;;  %vm548_vm10 = vmand %vm4470_vm9, %vm129_vm2  ;;  %vm7708_vm12 = vcmp.lt.s32.totalorder %v4426_v24, 16  ;;  %vm7709_vm9 = vcmask 924672  }
  0xf6   :  { %v580_v35 = vpop.permute.xlu0 %579  ;;  %853 = vmatmul.bf16.vlgmr.msra.gmra.mxu0 %v4330_v49  ;;  %v630_v52 = vmul.f32 %v4487_v15, %v595_v57  ;;  %v631_v51 = vmul.f32 %v4492_v54, %v607_v61  ;;  %vm7710_vm11 = vmmov %vm7709_vm9 }
  0xf7   :  { %v592_v45 = vsel %vm7706_vm1, %v4019_v28, %v580_v35  ;;  %v606_v33 = vsel %vm7707_vm14, %v580_v35, %v3983_v14  ;;  %v31_v28 = vld [vmem:[%s7536_s1 + $0x28] sm:$0xff]  ;;  %v33_v14 = vld [vmem:[%s7536_s1 + $0x38] sm:$0xff]  ;;  %vm464_vm1 = vmand %vm4506_vm13, %vm7708_vm12  ;;  %v509_v35 = vsel %vm7709_vm9, %v3974_v11, %v497_v62  ;;  %v523_v17 = vsel %vm7710_vm11, %v497_v62, %v4017_v27 }
  0xf8   :  { %v626_v26 = vmul.f32 %v4487_v15, %v592_v45  ;;  %v627_v43 = vmul.f32 %v4492_v54, %v606_v33  ;;  %v100_v33 = vadd.s32 4294967295, %v4362_v22  ;;  %vm465_vm14 = vmand %vm461_vm15, %vm283_vm0  ;;  %v438_v45 = vpop.permute.xlu2 %437  ;;  %v4557_v54 = vsel %vm548_vm10, 1.0, %v7683_v5 }
  0xf9   :  { %v4559_v22 = vpack.c.bf16 %v33_v14, %v31_v28  ;;  %v4565_v9 = vsel %vm465_vm14, 1.0, %v7683_v5  ;;  %v445_v27 = vsel %vm7711_vm5, %v4111_v60, %v438_v45  ;;  %vm7712_vm13 = vmmov %vm7709_vm9  ;;  %vm7716_vm14 = vcmp.ge.s32.totalorder %v4405_v25, 0 }
  0xfa   :  { %v813_v61 = vpack.c.bf16 %v630_v52, %v626_v26  ;;  %v814_v57 = vpack.c.bf16 %v631_v51, %v627_v43  ;;  %v4562_v51 = vsel %vm464_vm1, 1.0, %v7683_v5  ;;  %v101_v26 = vadd.s32 4294967295, %v4364_v42  ;;  %vm7713_vm10 = vmmov %vm7709_vm9 }
  0xfb   :  { %vm104_vm15 = vcmp.ge.s32.totalorder %v100_v33, 0  ;;  %vm108_vm11 = vcmp.lt.s32.totalorder %v100_v33, 16  ;;  %v559_v52 = vmul.f32 %v4550_v32, %v509_v35  ;;  %v560_v43 = vmul.f32 %v4557_v54, %v523_v17  ;;  %vm7714_vm12 = vmmov %vm7711_vm5 }
  0xfc   :  { %921 = vmatpush.bf16.msrb.mxu1 %v813_v61  ;;  %959 = vmatpush.bf16.msrb.mxu0 %v814_v57  ;;  %v430_v11 = vpop.permute.xlu1 %429  ;;  %vm7715_vm1 = vmmov %vm7711_vm5  ;;  %v480_v33 = vmul.f32 %v4562_v51, %v445_v27 }
  0xfd   :  { %v442_v42 = vsel %vm7714_vm12, %v3994_v19, %v430_v11  ;;  %v456_v61 = vsel %vm7715_vm1, %v430_v11, %v4154_v31  ;;  %vm361_vm9 = vmand %vm4475_vm4, %vm7716_vm14  ;;  %v4597_v19 = vsel %vm4475_vm4, 1.0, %v7683_v5  ;;  %vm105_vm12 = vcmp.ge.s32.totalorder %v101_v26, 0 }
  0xfe   :  { %v505_v62 = vpop.permute.xlu0 %504  ;;  %3642 = vmatmul.msk.bf16.gmra.mxu3 %vm176_vm8, %v4559_v22  ;;  %vm7717_vm5 = vmmov %vm7715_vm1  ;;  %vm109_vm1 = vcmp.lt.s32.totalorder %v101_v26, 16  ;;  %v4608_v31 = vsel %vm4480_vm6, 1.0, %v7683_v5  ;;  %v477_v57 = vmul.f32 %v4565_v9, %v456_v61  ;;  %vm7722_vm4 = vcmp.lt.s32.totalorder %v4405_v25, 16 }
  0xff   :  { %v512_v28 = vsel %vm7712_vm13, %v4046_v37, %v505_v62  ;;  %v524_v14 = vsel %vm7713_vm10, %v505_v62, %v4159_v34  ;;  %v457_v37 = vsel %vm7717_vm5, %v438_v45, %v4048_v38  ;;  %vm7718_vm13 = vcmp.ge.s32.totalorder %v4407_v16, 0  ;;  %vm4601_vm14 = vmand %vm104_vm15, %vm108_vm11  ;;  %7721 = vst [vmem:[#allocation24_spill] sm:$0xff] %v4608_v31 }
 0x100   :  { %v563_v60 = vmul.f32 %v4550_v32, %v512_v28  ;;  %v564_v34 = vmul.f32 %v4557_v54, %v524_v14  ;;  %vm362_vm10 = vmand %vm4480_vm6, %vm7718_vm13  ;;  %v476_v45 = vmul.f32 %v4562_v51, %v442_v42  ;;  %v481_v17 = vmul.f32 %v4565_v9, %v457_v37  ;;  %v244_v11 = vpop.permute.xlu2 %243 }
 0x101   :  { %vm365_vm5 = vmand %vm361_vm9, %vm7722_vm4  ;;  %v409_v10 = vmul.f32 %v4597_v19, %v3875_v3  ;;  %v413_v62 = vmul.f32 %v4597_v19, %v3870_v2  ;;  %v410_v27 = vmul.f32 %v4608_v31, %v3932_v6  ;;  %vm7725_vm11 = vcmp.ge.s32.totalorder %v4426_v24, 0 }
 0x102   :  { %v809_v44 = vpack.c.bf16 %v563_v60, %v559_v52  ;;  %v810_v35 = vpack.c.bf16 %v564_v34, %v560_v43  ;;  %vm366_vm15 = vmand %vm362_vm10, %vm129_vm2  ;;  %v414_v52 = vmul.f32 %v4608_v31, %v3943_v7  ;;  %v4639_v28 = vsel %vm365_vm5, 1.0, %v7683_v5  ;;  %v37_v34 = vld [vmem:[%s7537_s2 + $0x18] sm:$0xff] }
 0x103   :  { %vm4620_vm6 = vmand %vm105_vm12, %vm109_vm1  ;;  %7728 = vst [vmem:[#allocation25_spill] sm:$0xff] %v4639_v28  ;;  %v4642_v2 = vsel %vm366_vm15, 1.0, %v7683_v5  ;;  %v805_v6 = vpack.c.bf16 %v480_v33, %v476_v45  ;;  %v806_v42 = vpack.c.bf16 %v481_v17, %v477_v57  ;;  %vm7730_vm13 = vcmp.ge.s32.totalorder %v4439_v20, 0  ;;  %836 = vperm.xlu2 %3783, %v37_v34  }
 0x104   :  { %922 = vmatpush.bf16.msrb.mxu1 %v809_v44  ;;  %960 = vmatpush.bf16.msrb.mxu0 %v810_v35  ;;  %vm4634_vm9 = vmand %vm4601_vm14, %vm7725_vm11  ;;  %v329_v43 = vpop.permute.xlu1 %328  ;;  %7729 = vst [vmem:[#allocation26_spill] sm:$0xff] %v4642_v2  ;;  %vm7731_vm12 = vcmask 7168   ;;  %vm7735_vm15 = vcmp.lt.s32.totalorder %v4426_v24, 16 }
 0x105   :  { %3640 = vmatmul.msk.bf16.gmra.mxu1 %vm176_vm8, %v4559_v22  ;;  %vm279_vm10 = vmand %vm4620_vm6, %vm7730_vm13 }
 0x106   :  { %v323_v14 = vpop.permute.xlu0 %322  ;;  %vm7732_vm1 = vmmov %vm7731_vm12  ;;  %858 = vmatmul.bf16.gmra.mxu0 %v4416_v58 }
 0x107   :  { %v332_v7 = vsel %vm7731_vm12, %v4196_v56, %v323_v14  ;;  %v333_v61 = vsel %vm7732_vm1, %v323_v14, %v4170_v8  ;;  %vm7733_vm4 = vmmov %vm7732_vm1  ;;  %v801_v8 = vpack.c.bf16 %v413_v62, %v409_v10  ;;  %v802_v56 = vpack.c.bf16 %v414_v52, %v410_v27 }
 0x108   :  { %v335_v37 = vsel %vm7733_vm4, %v4218_v18, %v329_v43  ;;  %vm7734_vm5 = vmmov %vm7732_vm1  ;;  %923 = vmatpush.bf16.msrb.mxu1 %v805_v6  ;;  %961 = vmatpush.bf16.msrb.mxu0 %v806_v42  ;;  %v377_v18 = vmul.f32 %v4639_v28, %v332_v7  ;;  %vm7740_vm12 = vcmp.ge.s32.totalorder %v4426_v24, 0  ;;  %vm7743_vm4 = vcmp.ge.s32.totalorder %v4439_v20, 0 }
 0x109   :  { %v336_v60 = vsel %vm7734_vm5, %v329_v43, %v4255_v13  ;;  %vm286_vm11 = vmand %vm4634_vm9, %vm7735_vm15  ;;  %v378_v13 = vmul.f32 %v4642_v2, %v333_v61  ;;  %v381_v45 = vmul.f32 %v4639_v28, %v335_v37  ;;  %vm7737_vm9 = vcmask 121856  }
 0x10a   :  { %vm287_vm13 = vmand %vm279_vm10, %vm283_vm0  ;;  %v382_v57 = vmul.f32 %v4642_v2, %v336_v60  ;;  %v4673_v44 = vsel %vm286_vm11, 1.0, %v7683_v5  ;;  %v253_v35 = vsel %vm7737_vm9, %v4121_v12, %v244_v11  ;;  %v175_v12 = vpop.permute.xlu2 %174 }
 0x10b   :  { %7736 = vst [vmem:[#allocation27_spill] sm:$0xff] %v4673_v44  ;;  %v4678_v33 = vsel %vm287_vm13, 1.0, %v7683_v5  ;;  %vm7739_vm10 = vmmov %vm7737_vm9  ;;  %v298_v27 = vmul.f32 %v4673_v44, %v253_v35  ;;  %v797_v3 = vpack.c.bf16 %v381_v45, %v377_v18 }
 0x10c   :  { %924 = vmatpush.bf16.msrb.mxu1 %v801_v8  ;;  %962 = vmatpush.bf16.msrb.mxu0 %v802_v56  ;;  %7738 = vst [vmem:[#allocation28_spill] sm:$0xff] %v4678_v33  ;;  %v254_v17 = vsel %vm7739_vm10, %v244_v11, %v4231_v1  ;;  %v169_v10 = vpop.permute.xlu1 %168  ;;  %vm4686_vm1 = vmand %vm4433_vm7, %vm7740_vm12  ;;  %v798_v43 = vpack.c.bf16 %v382_v57, %v378_v13  ;;  %vm7754_vm10 = vcmask 908288  }
 0x10d   :  { %vm4695_vm5 = vmand %vm4450_vm3, %vm7743_vm4  ;;  %v178_v14 = vsel %vm176_vm8, %v4203_v4, %v169_v10  ;;  %v179_v6 = vsel %vm176_vm8, %v169_v10, %v4278_v50  ;;  %v299_v42 = vmul.f32 %v4678_v33, %v254_v17  ;;  %vm7748_vm3 = vcmp.lt.s32.totalorder %v4426_v24, 16 }
 0x10e   :  { %v250_v52 = vpop.permute.xlu0 %249  ;;  %vm7746_vm15 = vmmov %vm7737_vm9  ;;  %v4717_v4 = vsel %vm4601_vm14, 1.0, %v7683_v5  ;;  %v181_v50 = vsel %vm176_vm8, %v4265_v0, %v175_v12 }
 0x10f   :  { %v256_v29 = vsel %vm7746_vm15, %v4235_v36, %v250_v52  ;;  %vm7747_vm7 = vmmov %vm7737_vm9  ;;  %7749 = vst [vmem:[#allocation29_spill] sm:$0xff] %v4717_v4  ;;  %v4722_v36 = vsel %vm4620_vm6, 1.0, %v7683_v5  ;;  %v219_v24 = vmul.f32 %v4717_v4, %v178_v14  ;;  %v223_v34 = vmul.f32 %v4717_v4, %v181_v50 }
 0x110   :  { %v257_v11 = vsel %vm7747_vm7, %v250_v52, %v4293_v23  ;;  %v302_v39 = vmul.f32 %v4673_v44, %v256_v29  ;;  %925 = vmatpush.bf16.msrb.mxu1 %v797_v3  ;;  %963 = vmatpush.bf16.msrb.mxu0 %v798_v43  ;;  %vm681_vm11 = vmand %vm4686_vm1, %vm7748_vm3  ;;  %7750 = vst [vmem:[#allocation30_spill] sm:$0xff] %v4722_v36  ;;  %vm7756_vm1 = vcmp.ge.s32.totalorder %v4407_v16, 0  ;;  %vm7759_vm15 = vcmp.lt.s32.totalorder %v4405_v25, 16 }
 0x111   :  { %v303_v7 = vmul.f32 %v4678_v33, %v257_v11  ;;  %v182_v23 = vsel %vm176_vm8, %v175_v12, %v4343_v59  ;;  %vm682_vm13 = vmand %vm4695_vm5, %vm283_vm0  ;;  %v220_v61 = vmul.f32 %v4722_v36, %v179_v6  ;;  %v4737_v0 = vsel %vm681_vm11, 1.0, %v7683_v5 }
 0x112   :  { %v793_v37 = vpack.c.bf16 %v302_v39, %v298_v27  ;;  %v224_v8 = vmul.f32 %v4722_v36, %v182_v23  ;;  %v4740_v59 = vsel %vm682_vm13, 1.0, %v7683_v5  ;;  %vm7751_vm0 = vcmp.ge.s32.totalorder %v4405_v25, 0  ;;  %vm7755_vm12 = vmmov %vm7754_vm10 }
 0x113   :  { %v794_v60 = vpack.c.bf16 %v303_v7, %v299_v42  ;;  %vm4746_vm9 = vmand %vm4601_vm14, %vm7751_vm0  ;;  %v789_v57 = vpack.c.bf16 %v223_v34, %v219_v24  ;;  %vm7762_vm3 = vcmask 138240  }
 0x114   :  { %926 = vmatpush.bf16.msrb.mxu1 %v793_v37  ;;  %v655_v20 = vpop.permute.xlu1 %654  ;;  %v790_v35 = vpack.c.bf16 %v224_v8, %v220_v61  ;;  %vm125_vm4 = vmand %vm4620_vm6, %vm7756_vm1 }
 0x115   :  { %964 = vmatpush.bf16.msrb.mxu0 %v794_v60  ;;  %v662_v13 = vsel %vm7754_vm10, %v4366_v21, %v655_v20  ;;  %v674_v45 = vsel %vm7755_vm12, %v655_v20, %v4374_v48  ;;  %vm7757_vm5 = vmmov %vm7754_vm10 }
 0x116   :  { %v647_v18 = vpop.permute.xlu0 %646  ;;  %vm7758_vm14 = vmmov %vm7757_vm5  ;;  %v697_v10 = vmul.f32 %v4737_v0, %v662_v13  ;;  %v698_v21 = vmul.f32 %v4740_v59, %v674_v45 }
 0x117   :  { %v659_v38 = vsel %vm7757_vm5, %v4303_v47, %v647_v18  ;;  %v673_v17 = vsel %vm7758_vm14, %v647_v18, %v4421_v30  ;;  %vm132_vm6 = vmand %vm4746_vm9, %vm7759_vm15  ;;  %v74_v47 = vpop.permute.xlu2 %73 }
 0x118   :  { %v693_v62 = vmul.f32 %v4737_v0, %v659_v38  ;;  %v694_v48 = vmul.f32 %v4740_v59, %v673_v17  ;;  %927 = vmatpush.bf16.msrb.mxu1 %v789_v57  ;;  %vm133_vm7 = vmand %vm125_vm4, %vm129_vm2  ;;  %v4773_v27 = vsel %vm132_vm6, 1.0, %v7683_v5  ;;  %v83_v25 = vsel %vm7762_vm3, %v4253_v63, %v74_v47 }
 0x119   :  { %965 = vmatpush.bf16.msrb.mxu0 %v790_v35  ;;  %7760 = vst [vmem:[#allocation31_spill] sm:$0xff] %v4773_v27  ;;  %v4776_v12 = vsel %vm133_vm7, 1.0, %v7683_v5  ;;  %vm7763_vm11 = vmmov %vm7762_vm3  ;;  %v144_v1 = vmul.f32 %v4773_v27, %v83_v25 }
 0x11a   :  { %v817_v30 = vpack.c.bf16 %v697_v10, %v693_v62  ;;  %v818_v26 = vpack.c.bf16 %v698_v21, %v694_v48  ;;  %7761 = vst [vmem:[#allocation32_spill] sm:$0xff] %v4776_v12  ;;  %v84_v52 = vsel %vm7763_vm11, %v74_v47, %v4332_v41  ;;  %vm7764_vm2 = vmmov %vm7762_vm3 }
 0x11b   :  { %vm7765_vm13 = vmmov %vm7764_vm2  ;;  %v145_v63 = vmul.f32 %v4776_v12, %v84_v52 }
 0x11c   :  { %947 = vmatpush.bf16.msrb.mxu3 %v817_v30  ;;  %985 = vmatpush.bf16.msrb.mxu2 %v818_v26 }
 0x11e   :  { %v80_v3 = vpop.permute.xlu0 %79 }
 0x11f   :  { %v86_v16 = vsel %vm7764_vm2, %v4310_v53, %v80_v3  ;;  %v87_v43 = vsel %vm7765_vm13, %v80_v3, %v4428_v55  ;;  %3643 = vmatmul.msk.bf16.vlgmr.msrb.gmra.mxu3 %vm176_vm8, %v4409_v46  ;;  %3645 = vmatmul.msk.bf16.vlgmr.msrb.gmra.mxu2 %vm176_vm8, %v4409_v46 }
 0x120   :  { %v148_v29 = vmul.f32 %v4773_v27, %v86_v16  ;;  %v149_v41 = vmul.f32 %v4776_v12, %v87_v43 }
 0x122   :  { %v785_v11 = vpack.c.bf16 %v148_v29, %v144_v1  ;;  %v786_v14 = vpack.c.bf16 %v149_v41, %v145_v63 }
 0x124   :  { %928 = vmatpush.bf16.msrb.mxu1 %v785_v11  ;;  %966 = vmatpush.bf16.msrb.mxu0 %v786_v14 }
 0x127   :  { %929 = vmatmul.bf16.vlgmr.msrb.gmra.mxu1 %v4330_v49  ;;  %967 = vmatmul.bf16.vlgmr.msrb.gmra.mxu0 %v4330_v49 }
 0x12f   :  { %3644 = vmatmul.msk.bf16.gmra.mxu3 %vm176_vm8, %v4559_v22  ;;  %3646 = vmatmul.msk.bf16.gmra.mxu2 %vm176_vm8, %v4559_v22 }
 0x137   :  { %934 = vmatmul.bf16.gmra.mxu1 %v4416_v58  ;;  %972 = vmatmul.bf16.gmra.mxu0 %v4416_v58 }
 0x146   :  { %v822_v46 = vpop.permute.xlu0 %821 }
 0x147   :  { %v827_v23 = vpop.permute.xlu1 %826 }
 0x14f   :  { %v832_v45 = vpop.permute.xlu1 %831 }
 0x15d   :  { %v837_v62 = vpop.permute.xlu2 %836 }
 0x161   :  { %v892_v53 = vpop.f32.mrf.mxu2 }
 0x162   :  { %v893_v55 = vadd.f32 %v892_v53, %v822_v46 }
 0x169   :  { %v894_v42 = vpop.f32.mrf.mxu2 }
 0x16a   :  { %v895_v60 = vadd.f32 %v894_v42, %v827_v23 }
 0x171   :  { %v911_v6 = vpop.f32.mrf.mxu3  ;;  %v897_v20 = vpop.f32.mrf.mxu2 }
 0x172   :  { %v873_v39 = vpop.f32.mrf.mxu1  ;;  %v4802_v7 = vadd.f32 %v911_v6, %v893_v55  ;;  %v898_v17 = vadd.f32 %v897_v20, %v832_v45 }
 0x173   :  { %v854_v50 = vpop.f32.mrf.mxu0 }
 0x174   :  { %v855_v49 = vadd.f32 %v854_v50, %v822_v46  ;;  %v998_v61 = vmax.f32 %v4802_v7, 0.0 }
 0x176   :  { %v4804_v24 = vadd.f32 %v873_v39, %v855_v49 }
 0x178   :  { %v997_v22 = vmax.f32 %v4804_v24, 0.0 }
 0x179   :  { %v913_v37 = vpop.f32.mrf.mxu3  ;;  %v899_v47 = vpop.f32.mrf.mxu2 }
 0x17a   :  { %v875_v58 = vpop.f32.mrf.mxu1  ;;  %v1013_v34 = vadd.f32 %v998_v61, %v997_v22  ;;  %v4812_v56 = vadd.f32 %v913_v37, %v895_v60  ;;  %v900_v52 = vadd.f32 %v899_v47, %v837_v62 }
 0x17b   :  { %v856_v8 = vpop.f32.mrf.mxu0 }
 0x17c   :  { %v857_v18 = vadd.f32 %v856_v8, %v827_v23  ;;  %1014 = vadd.xlane.f32.xlu0 %v1013_v34  ;;  %v1002_v57 = vmax.f32 %v4812_v56, 0.0 }
 0x17e   :  { %v4814_v13 = vadd.f32 %v875_v58, %v857_v18 }
 0x180   :  { %v1001_v35 = vmax.f32 %v4814_v13, 0.0 }
 0x181   :  { %v916_v38 = vpop.f32.mrf.mxu3 }
 0x182   :  { %v1016_v10 = vadd.f32 %v1002_v57, %v1001_v35  ;;  %v878_v21 = vpop.f32.mrf.mxu1  ;;  %v4822_v30 = vadd.f32 %v916_v38, %v898_v17 }
 0x183   :  { %v859_v48 = vpop.f32.mrf.mxu0 }
 0x184   :  { %v860_v26 = vadd.f32 %v859_v48, %v832_v45  ;;  %1017 = vadd.xlane.f32.xlu2 %v1016_v10  ;;  %v1006_v3 = vmax.f32 %v4822_v30, 0.0 }
 0x186   :  { %v4824_v25 = vadd.f32 %v878_v21, %v860_v26 }
 0x188   :  { %v1005_v16 = vmax.f32 %v4824_v25, 0.0 }
 0x189   :  { %v918_v43 = vpop.f32.mrf.mxu3 }
 0x18a   :  { %v1019_v1 = vadd.f32 %v1006_v3, %v1005_v16  ;;  %v4832_v63 = vadd.f32 %v918_v43, %v900_v52  ;;  %v880_v41 = vpop.f32.mrf.mxu1 }
 0x18b   :  { %v861_v29 = vpop.f32.mrf.mxu0 }
 0x18c   :  { %v862_v11 = vadd.f32 %v861_v29, %v837_v62  ;;  %1020 = vadd.xlane.f32.xlu2 %v1019_v1  ;;  %v1010_v53 = vmax.f32 %v4832_v63, 0.0 }
 0x18e   :  { %v4834_v14 = vadd.f32 %v880_v41, %v862_v11 }
 0x190   :  { %v1009_v55 = vmax.f32 %v4834_v14, 0.0 }
 0x192   :  { %v1022_v6 = vadd.f32 %v1010_v53, %v1009_v55 }
 0x194   :  { %1023 = vadd.xlane.f32.xlu1 %v1022_v6 }
 0x1a2   :  { %v949_v42 = vpop.f32.mrf.mxu3  ;;  %v987_v39 = vpop.f32.mrf.mxu2 }
 0x1a4   :  { %v930_v50 = vpop.f32.mrf.mxu1  ;;  %v968_v49 = vpop.f32.mrf.mxu0 }
 0x1a5   :  { %v931_v37 = vadd.f32 %v930_v50, %v822_v46  ;;  %v969_v60 = vadd.f32 %v968_v49, %v822_v46 }
 0x1a7   :  { %v4842_v58 = vadd.f32 %v949_v42, %v931_v37  ;;  %v4844_v34 = vadd.f32 %v987_v39, %v969_v60 }
 0x1a9   :  { %v999_v8 = vmax.f32 %v4842_v58, 0.0  ;;  %v1000_v20 = vmax.f32 %v4844_v34, 0.0 }
 0x1aa   :  { %v951_v18 = vpop.f32.mrf.mxu3  ;;  %v989_v38 = vpop.f32.mrf.mxu2 }
 0x1ab   :  { %v1128_v17 = vadd.f32 %v1000_v20, %v999_v8 }
 0x1ac   :  { %v932_v10 = vpop.f32.mrf.mxu1  ;;  %v970_v21 = vpop.f32.mrf.mxu0 }
 0x1ad   :  { %v933_v48 = vadd.f32 %v932_v10, %v827_v23  ;;  %v971_v47 = vadd.f32 %v970_v21, %v827_v23  ;;  %1129 = vadd.xlane.f32.xlu2 %v1128_v17 }
 0x1af   :  { %v4852_v46 = vadd.f32 %v951_v18, %v933_v48  ;;  %v4854_v26 = vadd.f32 %v989_v38, %v971_v47 }
 0x1b1   :  { %v1003_v52 = vmax.f32 %v4852_v46, 0.0  ;;  %v1004_v43 = vmax.f32 %v4854_v26, 0.0 }
 0x1b2   :  { %v954_v1 = vpop.f32.mrf.mxu3  ;;  %v992_v29 = vpop.f32.mrf.mxu2 }
 0x1b3   :  { %v1131_v41 = vadd.f32 %v1004_v43, %v1003_v52 }
 0x1b4   :  { %v935_v11 = vpop.f32.mrf.mxu1  ;;  %v973_v6 = vpop.f32.mrf.mxu0 }
 0x1b5   :  { %v936_v42 = vadd.f32 %v935_v11, %v832_v45  ;;  %v974_v23 = vadd.f32 %v973_v6, %v832_v45  ;;  %1132 = vadd.xlane.f32.xlu2 %v1131_v41  ;;  %v3813_v11 = vmov 256.0  }
 0x1b6   :  { %3785 = vrcp.f32 %v3813_v11 }
 0x1b7   :  { %v4862_v39 = vadd.f32 %v954_v1, %v936_v42  ;;  %v4864_v50 = vadd.f32 %v992_v29, %v974_v23 }
 0x1b9   :  { %v1007_v49 = vmax.f32 %v4862_v39, 0.0  ;;  %v1008_v37 = vmax.f32 %v4864_v50, 0.0 }
 0x1ba   :  { %v956_v18 = vpop.f32.mrf.mxu3  ;;  %v994_v38 = vpop.f32.mrf.mxu2 }
 0x1bb   :  { %v1134_v60 = vadd.f32 %v1008_v37, %v1007_v49 }
 0x1bc   :  { %v937_v17 = vpop.f32.mrf.mxu1  ;;  %v975_v10 = vpop.f32.mrf.mxu0 }
 0x1bd   :  { %v938_v21 = vadd.f32 %v937_v17, %v837_v62  ;;  %v976_v45 = vadd.f32 %v975_v10, %v837_v62  ;;  %1135 = vadd.xlane.f32.xlu0 %v1134_v60  ;;  %v3786_v6 = vpop.eup %3785 }
 0x1be   :  { %v1026_v42 = vmul.f32 256.0, %v3786_v6  ;;  %vm1030_vm0 = vweird.f32 %v3786_v6 }
 0x1bf   :  { %v4872_v48 = vadd.f32 %v956_v18, %v938_v21  ;;  %v4874_v47 = vadd.f32 %v994_v38, %v976_v45 }
 0x1c0   :  { %v1027_v62 = vsub.f32 1.0, %v1026_v42 }
 0x1c1   :  { %v1011_v1 = vmax.f32 %v4872_v48, 0.0  ;;  %v1012_v29 = vmax.f32 %v4874_v47, 0.0 }
 0x1c2   :  { %v1028_v23 = vmul.f32 %v3786_v6, %v1027_v62 }
 0x1c3   :  { %v1137_v41 = vadd.f32 %v1012_v29, %v1011_v1 }
 0x1c4   :  { %v1029_v60 = vadd.f32 %v3786_v6, %v1028_v23 }
 0x1c5   :  { %1138 = vadd.xlane.f32.xlu1 %v1137_v41 }
 0x1c6   :  { %v4882_v18 = vsel %vm1030_vm0, %v3786_v6, %v1029_v60 }
 0x1ef   :  { %v1015_v38 = vpop.xlane.xlu0 %1014 }
 0x1f0   :  { %v1032_v17 = vmul.f32 %v4882_v18, %v1015_v38 }
 0x1f2   :  { %v4887_v10 = vsub.f32 %v997_v22, %v1032_v17  ;;  %v4891_v21 = vsub.f32 %v998_v61, %v1032_v17 }
 0x1f4   :  { %v1044_v45 = vmul.f32 %v4887_v10, %v4887_v10  ;;  %v1045_v41 = vmul.f32 %v4891_v21, %v4891_v21 }
 0x1f6   :  { %v1052_v11 = vadd.f32 %v1045_v41, %v1044_v45 }
 0x1f7   :  { %v1018_v6 = vpop.xlane.xlu2 %1017 }
 0x1f8   :  { %v4898_v42 = vmul.f32 %v4882_v18, %v1018_v6  ;;  %1053 = vadd.xlane.f32.xlu0 %v1052_v11 }
 0x1fa   :  { %v1038_v24 = vsub.f32 %v1001_v35, %v4898_v42  ;;  %v1039_v7 = vsub.f32 %v1002_v57, %v4898_v42 }
 0x1fc   :  { %v1046_v61 = vmul.f32 %v1038_v24, %v1038_v24  ;;  %v1047_v22 = vmul.f32 %v1039_v7, %v1039_v7 }
 0x1fe   :  { %v1055_v62 = vadd.f32 %v1047_v22, %v1046_v61 }
 0x1ff   :  { %v1021_v23 = vpop.xlane.xlu2 %1020 }
 0x200   :  { %v1034_v60 = vmul.f32 %v4882_v18, %v1021_v23  ;;  %1056 = vadd.xlane.f32.xlu1 %v1055_v62 }
 0x202   :  { %v4909_v38 = vsub.f32 %v1005_v16, %v1034_v60  ;;  %v4913_v17 = vsub.f32 %v1006_v3, %v1034_v60 }
 0x204   :  { %v1048_v13 = vmul.f32 %v4909_v38, %v4909_v38  ;;  %v1049_v56 = vmul.f32 %v4913_v17, %v4913_v17 }
 0x206   :  { %v1058_v57 = vadd.f32 %v1049_v56, %v1048_v13 }
 0x207   :  { %v1024_v35 = vpop.xlane.xlu1 %1023 }
 0x208   :  { %v4920_v45 = vmul.f32 %v4882_v18, %v1024_v35  ;;  %1059 = vadd.xlane.f32.xlu1 %v1058_v57 }
 0x20a   :  { %v1042_v25 = vsub.f32 %v1009_v55, %v4920_v45  ;;  %v1043_v30 = vsub.f32 %v1010_v53, %v4920_v45 }
 0x20c   :  { %v1050_v3 = vmul.f32 %v1042_v25, %v1042_v25  ;;  %v1051_v16 = vmul.f32 %v1043_v30, %v1043_v30 }
 0x20e   :  { %v1061_v41 = vadd.f32 %v1051_v16, %v1050_v3 }
 0x210   :  { %1062 = vadd.xlane.f32.xlu2 %v1061_v41 }
 0x220   :  { %v1130_v11 = vpop.xlane.xlu2 %1129 }
 0x221   :  { %v1140_v6 = vmul.f32 %v1130_v11, %v4882_v18 }
 0x223   :  { %v4931_v24 = vsub.f32 %v999_v8, %v1140_v6  ;;  %v4935_v7 = vsub.f32 %v1000_v20, %v1140_v6 }
 0x225   :  { %v1152_v14 = vmul.f32 %v4931_v24, %v4931_v24  ;;  %v1153_v63 = vmul.f32 %v4935_v7, %v4935_v7 }
 0x227   :  { %v1160_v53 = vadd.f32 %v1153_v63, %v1152_v14 }
 0x228   :  { %v1133_v55 = vpop.xlane.xlu2 %1132 }
 0x229   :  { %v4942_v61 = vmul.f32 %v1133_v55, %v4882_v18  ;;  %1161 = vadd.xlane.f32.xlu1 %v1160_v53 }
 0x22b   :  { %v1146_v58 = vsub.f32 %v1003_v52, %v4942_v61  ;;  %v1147_v34 = vsub.f32 %v1004_v43, %v4942_v61 }
 0x22d   :  { %v1154_v8 = vmul.f32 %v1146_v58, %v1146_v58  ;;  %v1155_v20 = vmul.f32 %v1147_v34, %v1147_v34 }
 0x22f   :  { %v1163_v22 = vadd.f32 %v1155_v20, %v1154_v8 }
 0x230   :  { %v1136_v62 = vpop.xlane.xlu0 %1135 }
 0x231   :  { %v1142_v23 = vmul.f32 %v1136_v62, %v4882_v18  ;;  %1164 = vadd.xlane.f32.xlu2 %v1163_v22 }
 0x233   :  { %v4953_v60 = vsub.f32 %v1007_v49, %v1142_v23  ;;  %v4957_v13 = vsub.f32 %v1008_v37, %v1142_v23 }
 0x235   :  { %v1156_v46 = vmul.f32 %v4953_v60, %v4953_v60  ;;  %v1157_v26 = vmul.f32 %v4957_v13, %v4957_v13 }
 0x237   :  { %v1166_v52 = vadd.f32 %v1157_v26, %v1156_v46 }
 0x238   :  { %v1139_v43 = vpop.xlane.xlu1 %1138 }
 0x239   :  { %v4964_v56 = vmul.f32 %v1139_v43, %v4882_v18  ;;  %1167 = vadd.xlane.f32.xlu2 %v1166_v52 }
 0x23b   :  { %v1150_v39 = vsub.f32 %v1011_v1, %v4964_v56  ;;  %v1151_v50 = vsub.f32 %v1012_v29, %v4964_v56 }
 0x23d   :  { %v1158_v49 = vmul.f32 %v1150_v39, %v1150_v39  ;;  %v1159_v37 = vmul.f32 %v1151_v50, %v1151_v50 }
 0x23f   :  { %v1169_v57 = vadd.f32 %v1159_v37, %v1158_v49 }
 0x241   :  { %1170 = vadd.xlane.f32.xlu0 %v1169_v57 }
 0x26b   :  { %v1054_v35 = vpop.xlane.xlu0 %1053 }
 0x26c   :  { %v1064_v25 = vmul.f32 %v1054_v35, %v4882_v18 }
 0x26e   :  { %v1068_v30 = vadd.f32 1e-05, %v1064_v25 }
 0x270   :  { %3787 = vrsqrt.f32 %v1068_v30  ;;  %vm1076_vm10 = vweird.f32 %v1068_v30 }
 0x273   :  { %v1057_v3 = vpop.xlane.xlu1 %1056 }
 0x274   :  { %v1065_v16 = vmul.f32 %v1057_v3, %v4882_v18 }
 0x276   :  { %v3788_v41 = vpop.eup %3787  ;;  %v1094_v11 = vadd.f32 1e-05, %v1065_v16 }
 0x277   :  { %v1071_v48 = vmul.f32 %v3788_v41, %v1068_v30  ;;  %vm1077_vm9 = vweird.f32 %v3788_v41 }
 0x278   :  { %3789 = vrsqrt.f32 %v1094_v11  ;;  %vm1078_vm12 = vmor %vm1076_vm10, %vm1077_vm9  ;;  %vm1102_vm1 = vcmp.eq.f32.partialorder %v1094_v11, inf  ;;  %v1105_v49 = vand.u32 2147483648, %v1094_v11  ;;  %vm1104_vm4 = vcmp.eq.f32.partialorder %v1094_v11, 0.0 }
 0x279   :  { %v1072_v1 = vmul.f32 %v3788_v41, %v1071_v48 }
 0x27b   :  { %v1060_v6 = vpop.xlane.xlu1 %1059  ;;  %v1073_v47 = vmul.f32 0.5, %v1072_v1 }
 0x27c   :  { %v1066_v29 = vmul.f32 %v1060_v6, %v4882_v18 }
 0x27d   :  { %v1074_v55 = vsub.f32 1.5, %v1073_v47 }
 0x27e   :  { %v3790_v14 = vpop.eup %3789  ;;  %v1069_v63 = vadd.f32 1e-05, %v1066_v29 }
 0x27f   :  { %v1096_v53 = vmul.f32 %v3790_v14, %v1094_v11  ;;  %v1075_v20 = vmul.f32 %v3788_v41, %v1074_v55 }
 0x280   :  { %3791 = vrsqrt.f32 %v1069_v63  ;;  %vm1086_vm14 = vweird.f32 %v1069_v63 }
 0x281   :  { %v1097_v58 = vmul.f32 %v3790_v14, %v1096_v53  ;;  %v1079_v43 = vsel %vm1078_vm12, %v3788_v41, %v1075_v20 }
 0x282   :  { %v1090_v37 = vmul.f32 %v1079_v43, %v4887_v10  ;;  %v1091_v57 = vmul.f32 %v1079_v43, %v4891_v21 }
 0x283   :  { %v1098_v34 = vmul.f32 0.5, %v1097_v58  ;;  %v1063_v8 = vpop.xlane.xlu2 %1062 }
 0x284   :  { %v1067_v22 = vmul.f32 %v1063_v8, %v4882_v18 }
 0x285   :  { %v1099_v62 = vsub.f32 1.5, %v1098_v34 }
 0x286   :  { %v3792_v23 = vpop.eup %3791  ;;  %v1111_v46 = vadd.f32 1e-05, %v1067_v22 }
 0x287   :  { %v1100_v26 = vmul.f32 %v3790_v14, %v1099_v62  ;;  %v1081_v52 = vmul.f32 %v3792_v23, %v1069_v63  ;;  %vm1087_vm5 = vweird.f32 %v3792_v23 }
 0x288   :  { %3793 = vrsqrt.f32 %v1111_v46  ;;  %vm1088_vm15 = vmor %vm1086_vm14, %vm1087_vm5  ;;  %vm1119_vm6 = vcmp.eq.f32.partialorder %v1111_v46, inf  ;;  %v1122_v55 = vand.u32 2147483648, %v1111_v46  ;;  %vm1121_vm7 = vcmp.eq.f32.partialorder %v1111_v46, 0.0 }
 0x289   :  { %v1101_v39 = vmul.f32 %v1100_v26, %v1094_v11  ;;  %v1082_v50 = vmul.f32 %v3792_v23, %v1081_v52  ;;  %vm7768_vm5 = vcmask 916480  }
 0x28a   :  { %vm7769_vm14 = vmmov %vm7768_vm5 }
 0x28b   :  { %v1103_v35 = vsel %vm1102_vm1, %v1094_v11, %v1101_v39  ;;  %v1083_v3 = vmul.f32 0.5, %v1082_v50 }
 0x28c   :  { %v1106_v25 = vsel %vm1104_vm4, %v1105_v49, %v1103_v35 }
 0x28d   :  { %v1107_v16 = vmul.f32 %v1106_v25, %v1090_v37  ;;  %v1108_v30 = vmul.f32 %v1106_v25, %v1091_v57  ;;  %v1084_v47 = vsub.f32 1.5, %v1083_v3 }
 0x28e   :  { %v3794_v48 = vpop.eup %3793 }
 0x28f   :  { %v1109_v1 = vadd.f32 %v1107_v16, %v4898_v42  ;;  %v4980_v41 = vadd.f32 %v1108_v30, %v4898_v42  ;;  %v1113_v6 = vmul.f32 %v3794_v48, %v1111_v46  ;;  %v1085_v21 = vmul.f32 %v3792_v23, %v1084_v47 }
 0x291   :  { %v1114_v29 = vmul.f32 %v3794_v48, %v1113_v6  ;;  %1470 = vrot.lane.b32.xlu2 %v4980_v41, %s3805_s7  ;;  %1570 = vrot.lane.b32.xlu1 %v4980_v41, %s3803_s22  ;;  %v1089_v42 = vsel %vm1088_vm15, %v3792_v23, %v1085_v21  ;;  %v4998_v22 = vmul.f32 %v4182_v40, %v1109_v1  ;;  %vm7772_vm15 = vcmask 924672  }
 0x292   :  { %1568 = vrot.lane.b32.xlu0 %v1109_v1, %s3803_s22  ;;  %v1092_v58 = vmul.f32 %v1089_v42, %v4909_v38  ;;  %v1093_v39 = vmul.f32 %v1089_v42, %v4913_v17 }
 0x293   :  { %v1115_v10 = vmul.f32 0.5, %v1114_v29 }
 0x295   :  { %v1116_v11 = vsub.f32 1.5, %v1115_v10 }
 0x297   :  { %v1117_v14 = vmul.f32 %v3794_v48, %v1116_v11 }
 0x299   :  { %v1118_v53 = vmul.f32 %v1117_v14, %v1111_v46  ;;  %1358 = vrot.lane.b32.xlu2 %v1109_v1, %s3807_s9  ;;  %1518 = vrot.lane.b32.xlu1 %v1109_v1, %s3804_s23 }
 0x29a   :  { %1520 = vrot.lane.b32.xlu0 %v4980_v41, %s3804_s23 }
 0x29b   :  { %v1120_v34 = vsel %vm1119_vm6, %v1111_v46, %v1118_v53  ;;  %vm7774_vm6 = vcmask 7168  }
 0x29c   :  { %v1123_v8 = vsel %vm1121_vm7, %v1122_v55, %v1120_v34  ;;  %v1162_v26 = vpop.xlane.xlu1 %1161  ;;  %vm7775_vm7 = vmmov %vm7772_vm15 }
 0x29d   :  { %v1124_v20 = vmul.f32 %v1123_v8, %v1092_v58  ;;  %v1172_v43 = vmul.f32 %v1162_v26, %v4882_v18  ;;  %v1125_v50 = vmul.f32 %v1123_v8, %v1093_v39 }
 0x29f   :  { %v4993_v63 = vadd.f32 %v1124_v20, %v4920_v45  ;;  %v1176_v49 = vadd.f32 1e-05, %v1172_v43  ;;  %v5016_v37 = vadd.f32 %v1125_v50, %v4920_v45 }
 0x2a1   :  { %1618 = vrot.lane.b32.xlu2 %v1109_v1, %s3810_s15  ;;  %1308 = vrot.lane.b32.xlu1 %v1109_v1, %s3808_s14  ;;  %v5002_v62 = vmul.f32 %v4182_v40, %v4993_v63  ;;  %vm1184_vm11 = vweird.f32 %v1176_v49  ;;  %v7784_v40 = vld [vmem:[#allocation20_spill] sm:$0xff] }
 0x2a2   :  { %1468 = vrot.lane.b32.xlu0 %v1109_v1, %s3805_s7 }
 0x2a4   :  { %v1165_v38 = vpop.xlane.xlu2 %1164 }
 0x2a5   :  { %v1173_v46 = vmul.f32 %v1165_v38, %v4882_v18 }
 0x2a7   :  { %v1202_v52 = vadd.f32 1e-05, %v1173_v46 }
 0x2a9   :  { %1410 = vrot.lane.b32.xlu2 %v4980_v41, %s3806_s8  ;;  %1620 = vrot.lane.b32.xlu1 %v4980_v41, %s3810_s15  ;;  %3795 = vrsqrt.f32 %v1202_v52  ;;  %vm1210_vm2 = vcmp.eq.f32.partialorder %v1202_v52, inf  ;;  %v1213_v34 = vand.u32 2147483648, %v1202_v52  ;;  %vm1212_vm0 = vcmp.eq.f32.partialorder %v1202_v52, 0.0 }
 0x2aa   :  { %1408 = vrot.lane.b32.xlu0 %v1109_v1, %s3806_s8  ;;  %3797 = vrsqrt.f32 %v1176_v49 }
 0x2ac   :  { %v1168_v10 = vpop.xlane.xlu2 %1167 }
 0x2ad   :  { %v1174_v14 = vmul.f32 %v1168_v10, %v4882_v18 }
 0x2af   :  { %v3796_v57 = vpop.eup %3795  ;;  %v1177_v55 = vadd.f32 1e-05, %v1174_v14 }
 0x2b0   :  { %v1204_v35 = vmul.f32 %v3796_v57, %v1202_v52  ;;  %v3798_v17 = vpop.eup %3797 }
 0x2b1   :  { %1576 = vrot.lane.b32.xlu2 %v4993_v63, %s3803_s22  ;;  %1258 = vrot.lane.b32.xlu1 %v1109_v1, %s3809_s0  ;;  %v1179_v45 = vmul.f32 %v3798_v17, %v1176_v49  ;;  %vm1185_vm3 = vweird.f32 %v3798_v17  ;;  %vm1194_vm10 = vweird.f32 %v1177_v55 }
 0x2b2   :  { %1578 = vrot.lane.b32.xlu0 %v5016_v37, %s3803_s22  ;;  %v1205_v25 = vmul.f32 %v3796_v57, %v1204_v35  ;;  %vm1186_vm13 = vmor %vm1184_vm11, %vm1185_vm3  ;;  %vm7778_vm3 = vcmask 1039360   ;;  %vm7779_vm11 = vcmask 908288  }
 0x2b3   :  { %v1180_v16 = vmul.f32 %v3798_v17, %v1179_v45 }
 0x2b4   :  { %v1206_v3 = vmul.f32 0.5, %v1205_v25  ;;  %v1171_v48 = vpop.xlane.xlu0 %1170 }
 0x2b5   :  { %v1181_v1 = vmul.f32 0.5, %v1180_v16  ;;  %v1175_v6 = vmul.f32 %v1171_v48, %v4882_v18 }
 0x2b6   :  { %v1207_v30 = vsub.f32 1.5, %v1206_v3 }
 0x2b7   :  { %v1182_v29 = vsub.f32 1.5, %v1181_v1  ;;  %v1219_v21 = vadd.f32 1e-05, %v1175_v6 }
 0x2b8   :  { %v1208_v47 = vmul.f32 %v3796_v57, %v1207_v30 }
 0x2b9   :  { %1526 = vrot.lane.b32.xlu2 %v4993_v63, %s3804_s23  ;;  %1360 = vrot.lane.b32.xlu1 %v4980_v41, %s3807_s9  ;;  %v1183_v42 = vmul.f32 %v3798_v17, %v1182_v29  ;;  %3799 = vrsqrt.f32 %v1219_v21  ;;  %vm1227_vm12 = vcmp.eq.f32.partialorder %v1219_v21, inf  ;;  %v1230_v48 = vand.u32 2147483648, %v1219_v21 }
 0x2ba   :  { %1478 = vrot.lane.b32.xlu0 %v5016_v37, %s3805_s7  ;;  %v1209_v11 = vmul.f32 %v1208_v47, %v1202_v52  ;;  %3801 = vrsqrt.f32 %v1177_v55  ;;  %vm1229_vm4 = vcmp.eq.f32.partialorder %v1219_v21, 0.0 }
 0x2bb   :  { %v1187_v58 = vsel %vm1186_vm13, %v3798_v17, %v1183_v42  ;;  %vm7781_vm13 = vmmov %vm7778_vm3 }
 0x2bc   :  { %v1211_v53 = vsel %vm1210_vm2, %v1202_v52, %v1209_v11  ;;  %v1199_v8 = vmul.f32 %v1187_v58, %v4935_v7  ;;  %v1198_v52 = vmul.f32 %v1187_v58, %v4931_v24  ;;  %vm7780_vm2 = vmmov %vm7775_vm7 }
 0x2bd   :  { %v1214_v18 = vsel %vm1212_vm0, %v1213_v34, %v1211_v53  ;;  %vm7783_vm0 = vmmov %vm7779_vm11 }
 0x2be   :  { %v1216_v38 = vmul.f32 %v1214_v18, %v1199_v8 }
 0x2bf   :  { %v3800_v20 = vpop.eup %3799 }
 0x2c0   :  { %v1221_v46 = vmul.f32 %v3800_v20, %v1219_v21  ;;  %v3802_v26 = vpop.eup %3801  ;;  %v5051_v43 = vadd.f32 %v1216_v38, %v4942_v61 }
 0x2c1   :  { %1414 = vrot.lane.b32.xlu2 %v4993_v63, %s3806_s8  ;;  %1528 = vrot.lane.b32.xlu1 %v5016_v37, %s3804_s23  ;;  %v1189_v39 = vmul.f32 %v3802_v26, %v1177_v55  ;;  %vm1195_vm9 = vweird.f32 %v3802_v26 }
 0x2c2   :  { %1314 = vrot.lane.b32.xlu0 %v4993_v63, %s3808_s14  ;;  %7766 = vst [vmem:[#allocation33_spill] sm:$0xff] %v5051_v43  ;;  %v1222_v7 = vmul.f32 %v3800_v20, %v1221_v46  ;;  %vm1196_vm1 = vmor %vm1194_vm10, %vm1195_vm9 }
 0x2c3   :  { %v1190_v49 = vmul.f32 %v3802_v26, %v1189_v39  ;;  %vm7786_vm9 = vmmov %vm7774_vm6 }
 0x2c4   :  { %v1223_v50 = vmul.f32 0.5, %v1222_v7  ;;  %vm7789_vm10 = vmmov %vm7774_vm6 }
 0x2c5   :  { %v1191_v24 = vmul.f32 0.5, %v1190_v49 }
 0x2c6   :  { %v1224_v35 = vsub.f32 1.5, %v1223_v50  ;;  %v7770_v50 = vld [vmem:[#allocation6_spill] sm:$0xff] }
 0x2c7   :  { %v1192_v25 = vsub.f32 1.5, %v1191_v24 }
 0x2c8   :  { %v1225_v17 = vmul.f32 %v3800_v20, %v1224_v35 }
 0x2c9   :  { %1628 = vrot.lane.b32.xlu2 %v5016_v37, %s3810_s15  ;;  %1476 = vrot.lane.b32.xlu1 %v4993_v63, %s3805_s7 }
 0x2ca   :  { %1626 = vrot.lane.b32.xlu0 %v4993_v63, %s3810_s15  ;;  %v1226_v45 = vmul.f32 %v1225_v17, %v1219_v21 }
 0x2cc   :  { %v1228_v16 = vsel %vm1227_vm12, %v1219_v21, %v1226_v45  ;;  %vm7795_vm12 = vmmov %vm7768_vm5 }
 0x2cd   :  { %v1231_v1 = vsel %vm1229_vm4, %v1230_v48, %v1228_v16  ;;  %vm7800_vm4 = vmmov %vm7774_vm6 }
 0x2d1   :  { %1366 = vrot.lane.b32.xlu2 %v5016_v37, %s3807_s9  ;;  %1364 = vrot.lane.b32.xlu1 %v4993_v63, %s3807_s9 }
 0x2d2   :  { %1264 = vrot.lane.b32.xlu0 %v4993_v63, %s3809_s0  ;;  %v1215_v63 = vmul.f32 %v1214_v18, %v1198_v52 }
 0x2d4   :  { %v5061_v57 = vadd.f32 %v1215_v63, %v4942_v61  ;;  %v1193_v61 = vmul.f32 %v3802_v26, %v1192_v25 }
 0x2d6   :  { %v1197_v30 = vsel %vm1196_vm1, %v3802_v26, %v1193_v61  ;;  %vm7796_vm1 = vmmov %vm7768_vm5 }
 0x2d7   :  { %v1201_v6 = vmul.f32 %v1197_v30, %v4957_v13  ;;  %v1200_v21 = vmul.f32 %v1197_v30, %v4953_v60 }
 0x2d9   :  { %1402 = vrot.lane.b32.xlu2 %v5051_v43, %s3806_s8  ;;  %1352 = vrot.lane.b32.xlu1 %v5051_v43, %s3807_s9  ;;  %v1233_v47 = vmul.f32 %v1231_v1, %v1201_v6  ;;  %v1232_v13 = vmul.f32 %v1231_v1, %v1200_v21 }
 0x2da   :  { %1416 = vrot.lane.b32.xlu0 %v5016_v37, %s3806_s8 }
 0x2db   :  { %v5087_v10 = vadd.f32 %v1233_v47, %v4964_v56  ;;  %v5099_v14 = vadd.f32 %v1232_v13, %v4964_v56  ;;  %v7777_v47 = vld [vmem:[#allocation9_spill] sm:$0xff] }
 0x2e1   :  { %1522 = vrot.lane.b32.xlu2 %v5061_v57, %s3804_s23  ;;  %1572 = vrot.lane.b32.xlu1 %v5061_v57, %s3803_s22 }
 0x2e2   :  { %1302 = vrot.lane.b32.xlu0 %v5051_v43, %s3808_s14 }
 0x2e9   :  { %1624 = vrot.lane.b32.xlu2 %v5051_v43, %s3810_s15  ;;  %1524 = vrot.lane.b32.xlu1 %v5051_v43, %s3804_s23 }
 0x2ea   :  { %1574 = vrot.lane.b32.xlu0 %v5051_v43, %s3803_s22 }
 0x2eb   :  { %v5075_v3 = vpop.permute.xlu2 %1470 }
 0x2f1   :  { %1312 = vrot.lane.b32.xlu2 %v5061_v57, %s3808_s14  ;;  %1472 = vrot.lane.b32.xlu1 %v5061_v57, %s3805_s7 }
 0x2f2   :  { %1246 = vrot.lane.b32.xlu0 %v5051_v43, %s3809_s0 }
 0x2f3   :  { %v5084_v29 = vpop.permute.xlu2 %1358 }
 0x2f4   :  { %7767 = vst [vmem:[#allocation34_spill] sm:$0xff] %v5084_v29 }
 0x2f9   :  { %1412 = vrot.lane.b32.xlu1 %v5061_v57, %s3806_s8  ;;  %1304 = vrot.lane.b32.xlu2 %v5087_v10, %s3808_s14 }
 0x2fa   :  { %1474 = vrot.lane.b32.xlu0 %v5051_v43, %s3805_s7 }
 0x2fb   :  { %v5096_v11 = vpop.permute.xlu2 %1618 }
 0x301   :  { %1404 = vrot.lane.b32.xlu1 %v5087_v10, %s3806_s8  ;;  %1580 = vrot.lane.b32.xlu2 %v5099_v14, %s3803_s22 }
 0x302   :  { %1622 = vrot.lane.b32.xlu0 %v5061_v57, %s3810_s15 }
 0x303   :  { %v5107_v60 = vpop.permute.xlu1 %1570  ;;  %v5109_v42 = vpop.permute.xlu2 %1410 }
 0x304   :  { %v5111_v53 = vpop.permute.xlu0 %1568 }
 0x305   :  { %v1584_v26 = vsel %vm7768_vm5, %v5111_v53, %v5107_v60  ;;  %vm7804_vm5 = vmmov %vm7796_vm1 }
 0x306   :  { %v1602_v49 = vmul.f32 %v7770_v50, %v1584_v26  ;;  %v3651_v26 = vld [vmem:[%s7537_s2 + $0x20] sm:$0xff] }
 0x309   :  { %1316 = vrot.lane.b32.xlu1 %v5016_v37, %s3808_s14  ;;  %1248 = vrot.lane.b32.xlu2 %v5087_v10, %s3809_s0 }
 0x30a   :  { %1362 = vrot.lane.b32.xlu0 %v5061_v57, %s3807_s9 }
 0x30b   :  { %v5119_v56 = vpop.permute.xlu2 %1576  ;;  %v5121_v55 = vpop.permute.xlu1 %1518 }
 0x30c   :  { %v1521_v58 = vpop.permute.xlu0 %1520 }
 0x30d   :  { %v1534_v61 = vsel %vm7772_vm15, %v5121_v55, %v1521_v58  ;;  %vm7806_vm15 = vmmov %vm7796_vm1 }
 0x30e   :  { %v1552_v21 = vmul.f32 %v7777_v47, %v1534_v61 }
 0x311   :  { %1582 = vrot.lane.b32.xlu1 %v5087_v10, %s3803_s22  ;;  %1532 = vrot.lane.b32.xlu2 %v5087_v10, %s3804_s23 }
 0x312   :  { %1354 = vrot.lane.b32.xlu0 %v5087_v10, %s3807_s9 }
 0x313   :  { %v5129_v34 = vpop.permute.xlu2 %1526  ;;  %v5131_v18 = vpop.permute.xlu1 %1308 }
 0x314   :  { %v5133_v8 = vpop.permute.xlu0 %1468 }
 0x319   :  { %1482 = vrot.lane.b32.xlu1 %v5087_v10, %s3805_s7  ;;  %1480 = vrot.lane.b32.xlu2 %v5099_v14, %s3805_s7 }
 0x31a   :  { %1310 = vrot.lane.b32.xlu0 %v4980_v41, %s3808_s14 }
 0x31b   :  { %v5141_v20 = vpop.permute.xlu2 %1414  ;;  %v5143_v38 = vpop.permute.xlu1 %1620 }
 0x31c   :  { %v1409_v46 = vpop.permute.xlu0 %1408 }
 0x321   :  { %1630 = vrot.lane.b32.xlu1 %v5099_v14, %s3810_s15  ;;  %1418 = vrot.lane.b32.xlu2 %v5099_v14, %s3806_s8 }
 0x322   :  { %1530 = vrot.lane.b32.xlu0 %v5099_v14, %s3804_s23 }
 0x323   :  { %v5154_v52 = vpop.permute.xlu2 %1628  ;;  %v5156_v7 = vpop.permute.xlu1 %1258 }
 0x324   :  { %v5158_v39 = vpop.permute.xlu0 %1578 }
 0x325   :  { %v1587_v63 = vsel %vm7769_vm14, %v5119_v56, %v5158_v39  ;;  %vm7805_vm14 = vcmask 121856  }
 0x326   :  { %v1606_v35 = vmul.f32 %v7770_v50, %v1587_v63 }
 0x328   :  { %v1770_v24 = vpack.c.bf16 %v1606_v35, %v1602_v49  ;;  %v1484_v49 = vsel %vm7778_vm3, %v5133_v8, %v5075_v3  ;;  %v1634_v35 = vsel %vm7779_vm11, %v5096_v11, %v5143_v38  ;;  %vm7813_vm11 = vmmov %vm7783_vm0 }
 0x329   :  { %1368 = vrot.lane.b32.xlu1 %v5099_v14, %s3807_s9  ;;  %1260 = vrot.lane.b32.xlu2 %v4980_v41, %s3809_s0  ;;  %v1652_v50 = vmul.f32 %v7784_v40, %v1634_v35  ;;  %v7785_v35 = vpack.c.bf16 %v5002_v62, %v4998_v22  ;;  %v7797_v22 = vld [vmem:[#allocation4_spill] sm:$0xff] }
 0x32a   :  { %1632 = vrot.lane.b32.xlu0 %v5087_v10, %s3810_s15  ;;  %1791 = vmatpush.bf16.msra.mxu1 %v1770_v24 }
 0x32b   :  { %v5171_v17 = vpop.permute.xlu2 %1366  ;;  %v5173_v25 = vpop.permute.xlu1 %1360 }
 0x32c   :  { %7771 = vst [vmem:[#allocation35_spill] sm:$0xff] %v5173_v25  ;;  %v5175_v45 = vpop.permute.xlu0 %1478 }
 0x331   :  { %1262 = vrot.lane.b32.xlu1 %v5061_v57, %s3809_s0  ;;  %1268 = vrot.lane.b32.xlu2 %v5099_v14, %s3809_s0 }
 0x332   :  { %1318 = vrot.lane.b32.xlu0 %v5099_v14, %s3808_s14 }
 0x333   :  { %v5185_v16 = vpop.permute.xlu2 %1402  ;;  %v5187_v30 = vpop.permute.xlu1 %1528 }
 0x334   :  { %7773 = vst [vmem:[#allocation36_spill] sm:$0xff] %v5185_v16  ;;  %v5191_v48 = vsel %vm7774_vm6, %v5185_v16, %v1409_v46  ;;  %v1537_v1 = vsel %vm7775_vm7, %v5129_v34, %v5187_v30  ;;  %v5196_v6 = vpop.permute.xlu0 %1314  ;;  %vm7807_vm6 = vmmov %vm7805_vm14  ;;  %vm7810_vm7 = vcmask 138240  }
 0x335   :  { %7776 = vst [vmem:[#allocation37_spill] sm:$0xff] %v5196_v6  ;;  %v1556_v13 = vmul.f32 %v7777_v47, %v1537_v1  ;;  %vm7811_vm3 = vmmov %vm7810_vm7 }
 0x337   :  { %v1766_v63 = vpack.c.bf16 %v1556_v13, %v1552_v21 }
 0x339   :  { %1780 = vperm.xlu1 %3782, %v3651_v26   ;;  %1792 = vmatpush.bf16.msra.mxu1 %v1766_v63  ;;  %v7782_v26 = vld [vmem:[#allocation10_spill] sm:$0xff] }
 0x33a   :  { %1266 = vrot.lane.b32.xlu0 %v5016_v37, %s3809_s0  ;;  %v1502_v63 = vmul.f32 %v7782_v26, %v1484_v49 }
 0x33b   :  { %v5211_v24 = vpop.permute.xlu2 %1522  ;;  %v5213_v61 = vpop.permute.xlu1 %1476 }
 0x33c   :  { %v5217_v1 = vsel %vm7780_vm2, %v1521_v58, %v5211_v24  ;;  %v1487_v21 = vsel %vm7781_vm13, %v5213_v61, %v5175_v45  ;;  %v5222_v13 = vpop.permute.xlu0 %1626  ;;  %v3652_v58 = vld [vmem:[%s7537_s2 + $0x28] sm:$0xff]  ;;  %vm7814_vm2 = vmmov %vm7796_vm1 }
 0x33d   :  { %v1506_v23 = vmul.f32 %v7782_v26, %v1487_v21  ;;  %v1637_v5 = vsel %vm7783_vm0, %v5222_v13, %v5154_v52  ;;  %vm7816_vm13 = vmmov %vm7783_vm0  ;;  %vm7818_vm0 = vcmask 924672  }
 0x33e   :  { %v1656_v47 = vmul.f32 %v7784_v40, %v1637_v5  ;;  %v1420_v5 = vsel %vm7786_vm9, %v1409_v46, %v5109_v42  ;;  %vm7819_vm9 = vmmov %vm7818_vm0 }
 0x33f   :  { %v1762_v12 = vpack.c.bf16 %v1506_v23, %v1502_v63 }
 0x340   :  { %v1774_v27 = vpack.c.bf16 %v1656_v47, %v1652_v50  ;;  %v7790_v50 = vld [vmem:[#allocation12_spill] sm:$0xff] }
 0x341   :  { %1793 = vmatpush.bf16.msra.mxu1 %v1762_v12  ;;  %v5255_v47 = vmul.f32 %v7790_v50, %v1420_v5 }
 0x342   :  { %1785 = vperm.xlu0 %3784, %v3652_v58   ;;  %1812 = vmatpush.bf16.msra.mxu3 %v1774_v27 }
 0x343   :  { %v5234_v49 = vpop.permute.xlu2 %1624  ;;  %v5236_v21 = vpop.permute.xlu1 %1364  ;;  %7791 = vst [vmem:[#allocation40_spill] sm:$0xff] %v5255_v47 }
 0x344   :  { %v5238_v26 = vpop.permute.xlu0 %1264 }
 0x345   :  { %1794 = vmatpush.bf16.msra.mxu1 %v7785_v35 }
 0x34b   :  { %v5245_v40 = vpop.permute.xlu2 %1312  ;;  %v5247_v23 = vpop.permute.xlu1 %1352 }
 0x34c   :  { %7787 = vst [vmem:[#allocation38_spill] sm:$0xff] %v5245_v40  ;;  %v5249_v12 = vpop.permute.xlu0 %1416 }
 0x34d   :  { %7788 = vst [vmem:[#allocation39_spill] sm:$0xff] %v5247_v23  ;;  %v1423_v27 = vsel %vm7789_vm10, %v5141_v20, %v5249_v12  ;;  %vm7820_vm10 = vmmov %vm7796_vm1 }
 0x34e   :  { %v5258_v63 = vmul.f32 %v7790_v50, %v1423_v27 }
 0x350   :  { %7792 = vst [vmem:[#allocation41_spill] sm:$0xff] %v5258_v63 }
 0x353   :  { %v1573_v62 = vpop.permute.xlu1 %1572  ;;  %v5262_v46 = vpop.permute.xlu2 %1304 }
 0x354   :  { %7793 = vst [vmem:[#allocation42_spill] sm:$0xff] %v5262_v46  ;;  %v1303_v58 = vpop.permute.xlu0 %1302  ;;  %v1585_v36 = vsel %vm7795_vm12, %v5107_v60, %v1573_v62  ;;  %vm7821_vm12 = vmmov %vm7818_vm0 }
 0x355   :  { %v5266_v35 = vsel %vm176_vm8, %v5245_v40, %v1303_v58  ;;  %v1603_v33 = vmul.f32 %v7797_v22, %v1585_v36  ;;  %v3650_v36 = vld [vmem:[%s7536_s1 + $0x58] sm:$0xff] }
 0x356   :  { %7794 = vst [vmem:[#allocation43_spill] sm:$0xff] %v5266_v35 }
 0x35b   :  { %v5270_v4 = vpop.permute.xlu1 %1524  ;;  %v1581_v5 = vpop.permute.xlu2 %1580 }
 0x35c   :  { %v1588_v27 = vsel %vm7796_vm1, %v5158_v39, %v1581_v5  ;;  %v5274_v50 = vpop.permute.xlu0 %1574  ;;  %v3648_v39 = vld [vmem:[%s7536_s1 + $0x48] sm:$0xff]  ;;  %vm7822_vm1 = vcmask 1039360  }
 0x35d   :  { %v1607_v47 = vmul.f32 %v7797_v22, %v1588_v27  ;;  %v5292_v44 = vpack.c.bf16 %v3650_v36, %v3648_v39  ;;  %v7801_v27 = vld [vmem:[#allocation14_spill] sm:$0xff]  ;;  %v1586_v25 = vsel %vm7804_vm5, %v1573_v62, %v5274_v50  ;;  %vm7826_vm5 = vmmov %vm7822_vm1 }
 0x35e   :  { %v1436_v22 = vmul.f32 %v7801_v27, %v5191_v48  ;;  %v1335_v48 = vsel %vm176_vm8, %v5262_v46, %v5196_v6 }
 0x35f   :  { %v1771_v63 = vpack.c.bf16 %v1607_v47, %v1603_v33  ;;  %7798 = vst [vmem:[#allocation44_spill] sm:$0xff] %v5292_v44  ;;  %3653 = vmatmul.msk.bf16.vlgmr.msra.gmra.mxu3 %vm176_vm8, %v5292_v44 }
 0x361   :  { %1819 = vmatpush.bf16.msra.mxu0 %v1771_v63 }
 0x363   :  { %v5278_v2 = vpop.permute.xlu1 %1472  ;;  %v5306_v39 = vpop.permute.xlu2 %1248 }
 0x364   :  { %v5280_v35 = vpop.permute.xlu0 %1246 }
 0x36b   :  { %v5282_v40 = vpop.permute.xlu1 %1412 }
 0x36c   :  { %v5284_v60 = vpop.permute.xlu0 %1474 }
 0x373   :  { %v5296_v33 = vpop.permute.xlu1 %1404 }
 0x374   :  { %7799 = vst [vmem:[#allocation45_spill] sm:$0xff] %v5296_v33  ;;  %v1435_v47 = vsel %vm7800_vm4, %v5296_v33, %v5141_v20  ;;  %v5301_v63 = vpop.permute.xlu0 %1622  ;;  %v1384_v20 = vsel %vm7805_vm14, %v5247_v23, %v5084_v29  ;;  %v7809_v29 = vld [vmem:[#allocation18_spill] sm:$0xff]  ;;  %vm7825_vm4 = vmmov %vm7813_vm11 }
 0x375   :  { %v1440_v16 = vmul.f32 %v7801_v27, %v1435_v47  ;;  %v1334_v47 = vsel %vm176_vm8, %v1303_v58, %v5131_v18  ;;  %v1604_v27 = vmul.f32 %v4487_v15, %v1586_v25  ;;  %v1285_v25 = vsel %vm7810_vm7, %v5306_v39, %v5238_v26  ;;  %vm7827_vm14 = vmmov %vm7818_vm0 }
 0x376   :  { %v1336_v28 = vmul.f32 %v7809_v29, %v1334_v47  ;;  %v1284_v58 = vsel %vm7811_vm3, %v5280_v35, %v5156_v7  ;;  %vm7830_vm7 = vmmov %vm7822_vm1 }
 0x377   :  { %v1754_v43 = vpack.c.bf16 %v1440_v16, %v1436_v22  ;;  %v1533_v16 = vpop.permute.xlu2 %1532  ;;  %vm7832_vm3 = vmmov %vm7822_vm1 }
 0x379   :  { %1795 = vmatpush.bf16.msra.mxu1 %v1754_v43 }
 0x37b   :  { %v5308_v36 = vpop.permute.xlu1 %1316 }
 0x37c   :  { %7802 = vst [vmem:[#allocation46_spill] sm:$0xff] %v5308_v36  ;;  %v5310_v44 = vpop.permute.xlu0 %1362  ;;  %v7808_v36 = vld [vmem:[#allocation16_spill] sm:$0xff] }
 0x37d   :  { %7803 = vst [vmem:[#allocation47_spill] sm:$0xff] %v5310_v44  ;;  %v1386_v44 = vmul.f32 %v7808_v36, %v1384_v20  ;;  %v7812_v20 = vld [vmem:[#allocation21_spill] sm:$0xff] }
 0x37f   :  { %v1481_v47 = vpop.permute.xlu2 %1480 }
 0x383   :  { %v1583_v33 = vpop.permute.xlu1 %1582 }
 0x384   :  { %v1589_v43 = vsel %vm7806_vm15, %v1581_v5, %v1583_v33  ;;  %v5321_v22 = vpop.permute.xlu0 %1354  ;;  %v1340_v5 = vmul.f32 %v7809_v29, %v1335_v48  ;;  %vm7828_vm15 = vmmov %vm7818_vm0 }
 0x385   :  { %v1608_v62 = vmul.f32 %v4487_v15, %v1589_v43  ;;  %v1385_v23 = vsel %vm7807_vm6, %v5321_v22, %v5236_v21  ;;  %v1290_v15 = vmul.f32 %v7812_v20, %v1285_v25  ;;  %vm7829_vm6 = vmmov %vm7822_vm1 }
 0x386   :  { %v1390_v46 = vmul.f32 %v7808_v36, %v1385_v23  ;;  %v1286_v23 = vmul.f32 %v7812_v20, %v1284_v58  ;;  %v1746_v48 = vpack.c.bf16 %v1340_v5, %v1336_v28  ;;  %v7815_v28 = vld [vmem:[#allocation5_spill] sm:$0xff]  ;;  %v1650_v58 = vsel %vm7816_vm13, %v5234_v49, %v5096_v11 }
 0x387   :  { %v1772_v6 = vpack.c.bf16 %v1608_v62, %v1604_v27  ;;  %v1601_v62 = vsel %vm7814_vm2, %v1583_v33, %v5119_v56  ;;  %v1553_v5 = vmul.f32 %v7815_v28, %v5217_v1  ;;  %v1536_v56 = vsel %vm7818_vm0, %v5211_v24, %v5270_v4  ;;  %vm7834_vm2 = vmmov %vm7822_vm1 }
 0x388   :  { %v1750_v31 = vpack.c.bf16 %v1390_v46, %v1386_v44  ;;  %v3647_v44 = vld [vmem:[%s7536_s1 + $0x40] sm:$0xff]  ;;  %v3649_v46 = vld [vmem:[%s7536_s1 + $0x50] sm:$0xff]  ;;  %v1550_v1 = vsel %vm7819_vm9, %v5270_v4, %v5121_v55  ;;  %v1600_v11 = vsel %vm7820_vm10, %v5274_v50, %v5111_v53  ;;  %vm7835_vm13 = vcmask 7168   ;;  %vm7836_vm0 = vmmov %vm7825_vm4 }
 0x389   :  { %1847 = vmatpush.bf16.msra.mxu2 %v1772_v6  ;;  %v1742_v6 = vpack.c.bf16 %v1290_v15, %v1286_v23  ;;  %v5355_v25 = vpack.c.bf16 %v3649_v46, %v3647_v44  ;;  %v7823_v23 = vld [vmem:[#allocation19_spill] sm:$0xff]  ;;  %vm7837_vm9 = vmmov %vm7836_vm0  ;;  %vm7838_vm10 = vcmask 121856  }
 0x38a   :  { %1796 = vmatpush.bf16.msra.mxu1 %v1750_v31  ;;  %v1635_v31 = vsel %vm7813_vm11, %v5143_v38, %v5301_v63  ;;  %v7824_v46 = vld [vmem:[#allocation23_spill] sm:$0xff]  ;;  %vm7833_vm11 = vmmov %vm7825_vm4 }
 0x38b   :  { %v1483_v43 = vpop.permute.xlu1 %1482  ;;  %v1653_v44 = vmul.f32 %v7823_v23, %v1635_v31  ;;  %v1605_v50 = vmul.f32 %v7824_v46, %v1600_v11 }
 0x38c   :  { %v5342_v27 = vpop.permute.xlu0 %1310  ;;  %v1489_v4 = vsel %vm7826_vm5, %v1481_v47, %v1483_v43 }
 0x38d   :  { %v1508_v11 = vmul.f32 %v4562_v51, %v1489_v4  ;;  %v7841_v4 = vld [vmem:[#allocation25_spill] sm:$0xff] }
 0x38e   :  { %1797 = vmatpush.bf16.msra.mxu1 %v1746_v48  ;;  %v7817_v48 = vld [vmem:[#allocation8_spill] sm:$0xff] }
 0x38f   :  { %v5364_v15 = vmul.f32 %v7817_v48, %v4980_v41  ;;  %v5368_v38 = vmul.f32 %v7817_v48, %v5016_v37  ;;  %v1551_v41 = vsel %vm7821_vm12, %v1533_v16, %v5129_v34  ;;  %v1488_v37 = vsel %vm7822_vm1, %v5175_v45, %v1481_v47  ;;  %vm7839_vm12 = vmmov %vm7835_vm13 }
 0x390   :  { %v1554_v45 = vmul.f32 %v4550_v32, %v1536_v56  ;;  %v1485_v47 = vsel %vm7829_vm6, %v5075_v3, %v5278_v2  ;;  %v1419_v56 = vpop.permute.xlu2 %1418  ;;  %vm7844_vm1 = vmmov %vm7838_vm10 }
 0x391   :  { %v1759_v3 = vpack.c.bf16 %v5368_v38, %v5364_v15  ;;  %v1458_v15 = vmul.f32 %v4597_v19, %v5099_v14  ;;  %v1500_v38 = vsel %vm7834_vm2, %v5284_v60, %v5133_v8  ;;  %vm7849_vm5 = vmmov %vm7839_vm12 }
 0x392   :  { %1798 = vmatpush.bf16.msra.mxu1 %v1742_v6  ;;  %v1609_v6 = vmul.f32 %v7824_v46, %v1601_v62  ;;  %v1559_v62 = vmul.f32 %v4557_v54, %v1551_v41  ;;  %vm7856_vm6 = vmmov %vm7844_vm1 }
 0x393   :  { %v1631_v33 = vpop.permute.xlu1 %1630 }
 0x394   :  { %v1638_v24 = vsel %vm7825_vm4, %v5154_v52, %v1631_v33  ;;  %v1531_v29 = vpop.permute.xlu0 %1530  ;;  %v1773_v36 = vpack.c.bf16 %v1609_v6, %v1605_v50  ;;  %vm7845_vm4 = vmmov %vm7844_vm1 }
 0x395   :  { %v1657_v55 = vmul.f32 %v7823_v23, %v1638_v24  ;;  %v1538_v53 = vsel %vm7827_vm14, %v5187_v30, %v1531_v29  ;;  %v1539_v34 = vsel %vm7828_vm15, %v1531_v29, %v1533_v16  ;;  %1799 = vmatmul.bf16.vlgmr.msra.gmra.mxu1 %v5355_v25  ;;  %v1486_v29 = vsel %vm7830_vm7, %v5278_v2, %v5284_v60  ;;  %v7831_v16 = vld [vmem:[#allocation7_spill] sm:$0xff]  ;;  %vm7851_vm14 = vmmov %vm7844_vm1 }
 0x396   :  { %v1557_v31 = vmul.f32 %v7815_v28, %v1538_v53  ;;  %v1558_v52 = vmul.f32 %v4550_v32, %v1539_v34  ;;  %v1507_v24 = vmul.f32 %v7831_v16, %v1488_v37  ;;  %v1555_v34 = vmul.f32 %v4557_v54, %v1550_v1  ;;  %vm7853_vm15 = vmmov %vm7849_vm5 }
 0x397   :  { %v1775_v30 = vpack.c.bf16 %v1657_v55, %v1653_v44  ;;  %v1503_v41 = vmul.f32 %v7831_v16, %v1485_v47  ;;  %v1504_v46 = vmul.f32 %v4562_v51, %v1486_v29  ;;  %v1501_v2 = vsel %vm7832_vm3, %v1483_v43, %v5213_v61  ;;  %v7843_v47 = vld [vmem:[#allocation34_spill] sm:$0xff]  ;;  %vm7864_vm7 = vmmov %vm7844_vm1 }
 0x398   :  { %v1767_v20 = vpack.c.bf16 %v1557_v31, %v1553_v5  ;;  %v1768_v53 = vpack.c.bf16 %v1558_v52, %v1554_v45  ;;  %v1655_v37 = vmul.f32 %v4740_v59, %v1650_v58  ;;  %v1636_v5 = vsel %vm7833_vm11, %v5301_v63, %v5234_v49  ;;  %v7842_v52 = vld [vmem:[#allocation35_spill] sm:$0xff] }
 0x399   :  { %1840 = vmatpush.bf16.msrb.mxu1 %v1775_v30  ;;  %v1454_v1 = vmul.f32 %v4597_v19, %v5061_v57  ;;  %v1763_v43 = vpack.c.bf16 %v1507_v24, %v1503_v41  ;;  %v1769_v44 = vpack.c.bf16 %v1559_v62, %v1555_v34  ;;  %v1424_v58 = vsel %vm7835_vm13, %v5249_v12, %v1419_v56  ;;  %v7847_v24 = vld [vmem:[#allocation13_spill] sm:$0xff]  ;;  %v1261_v41 = vpop.permute.xlu2 %1260 }
 0x39a   :  { %1820 = vmatpush.bf16.msra.mxu0 %v1767_v20  ;;  %1848 = vmatpush.bf16.msra.mxu2 %v1768_v53  ;;  %v1764_v20 = vpack.c.bf16 %v1508_v11, %v1504_v46  ;;  %v1509_v49 = vmul.f32 %v4565_v9, %v1501_v2  ;;  %v1654_v14 = vmul.f32 %v4737_v0, %v1636_v5  ;;  %v7848_v53 = vld [vmem:[#allocation45_spill] sm:$0xff]  ;;  %v7850_v2 = vld [vmem:[#allocation47_spill] sm:$0xff]  ;;  %vm7869_vm3 = vcmask 138240  }
 0x39b   :  { %v1373_v12 = vsel %vm7838_vm10, %v5236_v21, %v5171_v17  ;;  %v1421_v60 = vsel %vm7839_vm12, %v5109_v42, %v5282_v40  ;;  %v1442_v55 = vmul.f32 %v7841_v4, %v1424_v58  ;;  %v1760_v31 = vpack.c.bf16 %v1458_v15, %v1454_v1  ;;  %v7846_v42 = vld [vmem:[#allocation33_spill] sm:$0xff]  ;;  %v7852_v1 = vld [vmem:[#allocation36_spill] sm:$0xff]  ;;  %vm7871_vm11 = vmmov %vm7869_vm3 }
 0x39c   :  { %v1633_v61 = vpop.permute.xlu0 %1632  ;;  %v1370_v62 = vsel %vm7844_vm1, %v7843_v47, %v7842_v52  ;;  %v1391_v11 = vmul.f32 %v7847_v24, %v1373_v12  ;;  %v1425_v34 = vsel %vm7849_vm5, %v1419_v56, %v7848_v53  ;;  %v1422_v15 = vsel %vm7853_vm15, %v5282_v40, %v7852_v1  ;;  %v7859_v40 = vld [vmem:[#allocation37_spill] sm:$0xff]  ;;  %v7861_v12 = vld [vmem:[#allocation40_spill] sm:$0xff]  ;;  %v7870_v53 = vld [vmem:[#allocation42_spill] sm:$0xff] }
 0x39d   :  { %1875 = vmatpush.bf16.msra.mxu1 %v1773_v36  ;;  %v1639_v63 = vsel %vm7836_vm0, %v1631_v33, %v1633_v61  ;;  %v1651_v57 = vsel %vm7837_vm9, %v1633_v61, %v5222_v13  ;;  %v1369_v36 = vpop.permute.xlu1 %1368  ;;  %v1505_v33 = vmul.f32 %v4565_v9, %v1500_v38  ;;  %v7840_v13 = vld [vmem:[#allocation24_spill] sm:$0xff]  ;;  %v1387_v5 = vmul.f32 %v7847_v24, %v1370_v62  ;;  %v7854_v38 = vld [vmem:[#allocation27_spill] sm:$0xff]  ;;  %v7868_v62 = vld [vmem:[#allocation29_spill] sm:$0xff] }
 0x39e   :  { %v1658_v6 = vmul.f32 %v4737_v0, %v1639_v63  ;;  %v1659_v8 = vmul.f32 %v4740_v59, %v1651_v57  ;;  %1821 = vmatpush.bf16.msra.mxu0 %v1763_v43  ;;  %1849 = vmatpush.bf16.msra.mxu2 %v1764_v20  ;;  %v1459_v46 = vmul.f32 %v7840_v13, %v5087_v10  ;;  %v7858_v57 = vld [vmem:[#allocation44_spill] sm:$0xff]  ;;  %vm7873_vm2 = vmmov %vm7869_vm3  ;;  %vm7881_vm10 = vcmask 908288  }
 0x39f   :  { %v1374_v21 = vsel %vm7845_vm4, %v5171_v17, %v1369_v36  ;;  %v1765_v29 = vpack.c.bf16 %v1509_v49, %v1505_v33  ;;  %v1455_v30 = vmul.f32 %v7840_v13, %v7846_v42  ;;  %v1438_v10 = vmul.f32 %v7841_v4, %v1421_v60  ;;  %v7857_v49 = vld [vmem:[#allocation46_spill] sm:$0xff]  ;;  %vm7875_vm13 = vmmov %vm7873_vm2 }
 0x3a0   :  { %v1776_v45 = vpack.c.bf16 %v1658_v6, %v1654_v14  ;;  %v1777_v50 = vpack.c.bf16 %v1659_v8, %v1655_v37  ;;  %v1371_v37 = vsel %vm7851_vm14, %v7842_v52, %v7850_v2  ;;  %v1392_v61 = vmul.f32 %v7854_v38, %v1374_v21  ;;  %v7860_v8 = vld [vmem:[#allocation41_spill] sm:$0xff]  ;;  %vm7876_vm0 = vmmov %vm7873_vm2 }
 0x3a1   :  { %1876 = vmatpush.bf16.msra.mxu1 %v1769_v44  ;;  %v1761_v17 = vpack.c.bf16 %v1459_v46, %v1455_v30  ;;  %v1756_v43 = vpack.c.bf16 %v1442_v55, %v1438_v10  ;;  %v1320_v44 = vsel %vm176_vm8, %v5131_v18, %v5342_v27  ;;  %v1375_v58 = vsel %vm7856_vm6, %v1369_v36, %v5321_v22  ;;  %v7863_v36 = vld [vmem:[#allocation39_spill] sm:$0xff]  ;;  %v7865_v46 = vld [vmem:[#allocation38_spill] sm:$0xff]  ;;  %vm7879_vm9 = vmmov %vm7876_vm0 }
 0x3a2   :  { %1822 = vmatpush.bf16.msra.mxu0 %v1759_v3  ;;  %1850 = vmatpush.bf16.msra.mxu2 %v1760_v31  ;;  %v7855_v3 = vld [vmem:[#allocation26_spill] sm:$0xff]  ;;  %v1323_v14 = vsel %vm176_vm8, %v7859_v40, %v7857_v49  ;;  %v1388_v6 = vmul.f32 %v7854_v38, %v1371_v37  ;;  %v7862_v60 = vpack.c.bf16 %v7860_v8, %v7861_v12  ;;  %v7867_v31 = vld [vmem:[#allocation28_spill] sm:$0xff]  ;;  %v7872_v37 = vld [vmem:[#allocation17_spill] sm:$0xff]  ;;  %vm7642_vm12 = vcmask 1043456  }
 0x3a3   :  { %1868 = vmatpush.bf16.msrb.mxu3 %v1776_v45  ;;  %v1443_v20 = vmul.f32 %v7855_v3, %v1425_v34  ;;  %v1751_v18 = vpack.c.bf16 %v1391_v11, %v1387_v5  ;;  %v1439_v22 = vmul.f32 %v7855_v3, %v1422_v15  ;;  %v1372_v33 = vsel %vm7864_vm7, %v7850_v2, %v7863_v36  ;;  %v7866_v45 = vld [vmem:[#allocation15_spill] sm:$0xff]  ;;  %v1269_v5 = vpop.permute.xlu2 %1268  ;;  %vm7882_vm1 = vmmov %vm7881_vm10 }
 0x3a4   :  { %v1319_v56 = vpop.permute.xlu0 %1318  ;;  %v1321_v55 = vsel %vm176_vm8, %v5342_v27, %v7865_v46  ;;  %v1393_v52 = vmul.f32 %v7867_v31, %v1375_v58  ;;  %v1341_v42 = vmul.f32 %v7866_v45, %v1323_v14  ;;  %v1270_v30 = vsel %vm7869_vm3, %v5156_v7, %v1261_v41  ;;  %v7878_v14 = vld [vmem:[#allocation43_spill] sm:$0xff]  ;;  %vm7889_vm15 = vmmov %vm7882_vm1 }
 0x3a5   :  { %1877 = vmatpush.bf16.msra.mxu1 %v1765_v29  ;;  %v1324_v63 = vsel %vm176_vm8, %v7857_v49, %v1319_v56  ;;  %v1263_v47 = vpop.permute.xlu1 %1262  ;;  %v1752_v29 = vpack.c.bf16 %v1392_v61, %v1388_v6  ;;  %v1757_v11 = vpack.c.bf16 %v1443_v20, %v1439_v22  ;;  %v1389_v27 = vmul.f32 %v7867_v31, %v1372_v33  ;;  %v7874_v20 = vld [vmem:[#allocation30_spill] sm:$0xff]  ;;  %v7877_v49 = vld [vmem:[#allocation31_spill] sm:$0xff]  ;;  %vm7890_vm6 = vmmov %vm7882_vm1 }
 0x3a6   :  { %3654 = vmatmul.msk.bf16.vlgmr.msrb.gmra.mxu1 %vm176_vm8, %v7858_v57  ;;  %1823 = vmatpush.bf16.msra.mxu0 %v7862_v60  ;;  %v1342_v21 = vmul.f32 %v7868_v62, %v1324_v63  ;;  %v1338_v10 = vmul.f32 %v7868_v62, %v1321_v55  ;;  %v1325_v34 = vsel %vm176_vm8, %v1319_v56, %v7870_v53  ;;  %vm7884_vm4 = vcmask 924672  }
 0x3a7   :  { %1896 = vmatpush.bf16.msra.mxu3 %v1777_v50  ;;  %1851 = vmatpush.bf16.msra.mxu2 %v1756_v43  ;;  %v1337_v50 = vmul.f32 %v7866_v45, %v1320_v44  ;;  %v1271_v2 = vsel %vm7871_vm11, %v1261_v41, %v1263_v47  ;;  %v1753_v7 = vpack.c.bf16 %v1393_v52, %v1389_v27  ;;  %vm7885_vm5 = vcmask 1039360   ;;  %vm7894_vm3 = vmmov %vm7884_vm4 }
 0x3a8   :  { %3655 = vmatmul.msk.bf16.vlgmr.msrb.gmra.mxu3 %vm176_vm8, %v7858_v57  ;;  %v1748_v61 = vpack.c.bf16 %v1342_v21, %v1338_v10  ;;  %v1272_v43 = vsel %vm7873_vm2, %v1263_v47, %v5280_v35  ;;  %v1343_v44 = vmul.f32 %v7874_v20, %v1325_v34  ;;  %v1288_v41 = vmul.f32 %v7877_v49, %v1271_v2  ;;  %vm7891_vm7 = vmmov %vm7885_vm5 }
 0x3a9   :  { %1878 = vmatpush.bf16.msra.mxu1 %v1761_v17  ;;  %v1287_v17 = vmul.f32 %v7872_v37, %v1270_v30  ;;  %v1747_v15 = vpack.c.bf16 %v1341_v42, %v1337_v50  ;;  %v1339_v6 = vmul.f32 %v7874_v20, %v7878_v14  ;;  %v1275_v35 = vsel %vm7879_vm9, %v1269_v5, %v5306_v39  ;;  %vm7895_vm11 = vmmov %vm7885_vm5 }
 0x3aa   :  { %1824 = vmatpush.bf16.msra.mxu0 %v1751_v18  ;;  %vm7886_vm14 = vcmask 916480   ;;  %vm7900_vm9 = vmmov %vm7894_vm3 }
 0x3ab   :  { %1852 = vmatpush.bf16.msra.mxu2 %v1752_v29  ;;  %v1749_v18 = vpack.c.bf16 %v1343_v44, %v1339_v6  ;;  %vm7896_vm2 = vmmov %vm7886_vm14 }
 0x3ac   :  { %v1267_v1 = vpop.permute.xlu0 %1266 }
 0x3ad   :  { %1879 = vmatpush.bf16.msra.mxu1 %v1757_v11  ;;  %v1273_v56 = vsel %vm7875_vm13, %v5238_v26, %v1267_v1  ;;  %v1274_v58 = vsel %vm7876_vm0, %v1267_v1, %v1269_v5  ;;  %v7880_v26 = vld [vmem:[#allocation32_spill] sm:$0xff]  ;;  %v1781_v33 = vpop.permute.xlu1 %1780  ;;  %vm7898_vm13 = vmmov %vm7894_vm3  ;;  %vm7899_vm0 = vcmask 7168  }
 0x3ae   :  { %v1291_v63 = vmul.f32 %v7872_v37, %v1273_v56  ;;  %v1292_v40 = vmul.f32 %v7877_v49, %v1274_v58  ;;  %1825 = vmatpush.bf16.msra.mxu0 %v1747_v15  ;;  %v1289_v60 = vmul.f32 %v7880_v26, %v1272_v43  ;;  %v1293_v22 = vmul.f32 %v7880_v26, %v1275_v35 }
 0x3af   :  { %1853 = vmatpush.bf16.msra.mxu2 %v1748_v61 }
 0x3b0   :  { %v1743_v8 = vpack.c.bf16 %v1291_v63, %v1287_v17  ;;  %v1744_v12 = vpack.c.bf16 %v1292_v40, %v1288_v41  ;;  %v1745_v36 = vpack.c.bf16 %v1293_v22, %v1289_v60 }
 0x3b1   :  { %1880 = vmatpush.bf16.msra.mxu1 %v1753_v7 }
 0x3b2   :  { %1826 = vmatpush.bf16.msra.mxu0 %v1743_v8 }
 0x3b3   :  { %1854 = vmatpush.bf16.msra.mxu2 %v1744_v12 }
 0x3b4   :  { %v1786_v47 = vpop.permute.xlu0 %1785 }
 0x3b5   :  { %1881 = vmatpush.bf16.msra.mxu1 %v1749_v18  ;;  %1827 = vmatmul.bf16.vlgmr.msra.gmra.mxu0 %v5355_v25 }
 0x3b6   :  { %1855 = vmatmul.bf16.vlgmr.msra.gmra.mxu2 %v5355_v25 }
 0x3b8   :  { %3656 = vmatmul.msk.bf16.vlgmr.msra.gmra.mxu3 %vm176_vm8, %v7858_v57 }
 0x3b9   :  { %1882 = vmatpush.bf16.msra.mxu1 %v1745_v36 }
 0x3bc   :  { %1883 = vmatmul.bf16.vlgmr.msra.gmra.mxu1 %v5355_v25 }
 0x3e2   :  { %v1814_v39 = vpop.f32.mrf.mxu3 }
 0x3ea   :  { %v1816_v21 = vpop.f32.mrf.mxu3 }
 0x412   :  { %v1800_v46 = vpop.f32.mrf.mxu1 }
 0x413   :  { %v1801_v55 = vadd.f32 %v1800_v46, %v1781_v33 }
 0x415   :  { %v1815_v50 = vadd.f32 %v1814_v39, %v1801_v55 }
 0x417   :  { %v5520_v52 = vmax.f32 %v1815_v50, 0.0 }
 0x419   :  { %2062 = vrot.lane.b32.xlu0 %v5520_v52, %s3807_s9  ;;  %2142 = vrot.lane.b32.xlu1 %v5520_v52, %s3804_s23 }
 0x41a   :  { %2192 = vrot.lane.b32.xlu2 %v5520_v52, %s3810_s15  ;;  %v1802_v57 = vpop.f32.mrf.mxu1 }
 0x41b   :  { %v1803_v25 = vadd.f32 %v1802_v57, %v1786_v47  ;;  %v3670_v57 = vld [vmem:[%s7537_s2 + $0x78] sm:$0xff] }
 0x41d   :  { %v1817_v29 = vadd.f32 %v1816_v21, %v1803_v25  ;;  %v3667_v21 = vld [vmem:[%s7537_s2 + $0x60] sm:$0xff] }
 0x41f   :  { %v5528_v42 = vmax.f32 %v1817_v29, 0.0  ;;  %v3669_v29 = vld [vmem:[%s7537_s2 + $0x70] sm:$0xff] }
 0x421   :  { %v1916_v30 = vpack.c.bf16 %v5528_v42, %v5520_v52  ;;  %2087 = vrot.lane.b32.xlu1 %v5520_v52, %s3806_s8 }
 0x422   :  { %2167 = vrot.lane.b32.xlu2 %v5520_v52, %s3803_s22 }
 0x423   :  { %1935 = vmatpush.bf16.msrb.mxu0 %v1916_v30  ;;  %v1842_v11 = vpop.f32.mrf.mxu1  ;;  %v3657_v30 = vld [vmem:[%s7536_s1 + $0x80] sm:$0xff] }
 0x429   :  { %2012 = vrot.lane.b32.xlu1 %v5520_v52, %s3809_s0 }
 0x42a   :  { %2117 = vrot.lane.b32.xlu2 %v5520_v52, %s3805_s7 }
 0x42b   :  { %v1870_v27 = vpop.f32.mrf.mxu3  ;;  %v1844_v10 = vpop.f32.mrf.mxu1 }
 0x432   :  { %2037 = vrot.lane.b32.xlu2 %v5520_v52, %s3808_s14  ;;  %v1828_v34 = vpop.f32.mrf.mxu0 }
 0x433   :  { %v1872_v53 = vpop.f32.mrf.mxu3  ;;  %v1829_v2 = vadd.f32 %v1828_v34, %v1781_v33 }
 0x435   :  { %v1843_v17 = vadd.f32 %v1842_v11, %v1829_v2  ;;  %v3668_v11 = vld [vmem:[%s7537_s2 + $0x68] sm:$0xff] }
 0x437   :  { %v5542_v5 = vmax.f32 %v1843_v17, 0.0 }
 0x439   :  { %v1884_v1 = vpop.f32.mrf.mxu1  ;;  %v1856_v15 = vpop.f32.mrf.mxu2  ;;  %2144 = vrot.lane.b32.xlu0 %v5542_v5, %s3804_s23  ;;  %2194 = vrot.lane.b32.xlu1 %v5542_v5, %s3810_s15 }
 0x43a   :  { %v1857_v61 = vadd.f32 %v1856_v15, %v1781_v33  ;;  %v1830_v43 = vpop.f32.mrf.mxu0  ;;  %v1885_v58 = vadd.f32 %v1884_v1, %v1781_v33 }
 0x43b   :  { %v1898_v7 = vpop.f32.mrf.mxu3  ;;  %v1831_v56 = vadd.f32 %v1830_v43, %v1786_v47 }
 0x43c   :  { %v1871_v44 = vadd.f32 %v1870_v27, %v1857_v61  ;;  %v1899_v8 = vadd.f32 %v1898_v7, %v1885_v58  ;;  %v1915_v27 = vpack.c.bf16 %v3657_v30, %v3657_v30  ;;  %v7888_v30 = vld [vmem:[#allocation6_spill] sm:$0xff] }
 0x43d   :  { %v1845_v63 = vadd.f32 %v1844_v10, %v1831_v56 }
 0x43e   :  { %v5548_v41 = vmax.f32 %v1871_v44, 0.0  ;;  %v5560_v39 = vmax.f32 %v1899_v8, 0.0  ;;  %3659 = vmatmul.msk.bf16.vlgmr.msrb.gmra.mxu0 %vm176_vm8, %v1915_v27 }
 0x43f   :  { %v5550_v40 = vmax.f32 %v1845_v63, 0.0 }
 0x440   :  { %2066 = vrot.lane.b32.xlu2 %v5548_v41, %s3807_s9 }
 0x441   :  { %v1886_v14 = vpop.f32.mrf.mxu1  ;;  %v1858_v35 = vpop.f32.mrf.mxu2  ;;  %v1917_v12 = vpack.c.bf16 %v5550_v40, %v5542_v5  ;;  %2064 = vrot.lane.b32.xlu0 %v5542_v5, %s3807_s9  ;;  %2169 = vrot.lane.b32.xlu1 %v5542_v5, %s3803_s22 }
 0x442   :  { %v1887_v6 = vadd.f32 %v1886_v14, %v1786_v47  ;;  %v1859_v60 = vadd.f32 %v1858_v35, %v1786_v47  ;;  %v7883_v35 = vld [vmem:[#allocation20_spill] sm:$0xff] }
 0x443   :  { %v1900_v18 = vpop.f32.mrf.mxu3  ;;  %1948 = vmatpush.bf16.msrb.mxu2 %v1917_v12 }
 0x444   :  { %v1873_v22 = vadd.f32 %v1872_v53, %v1859_v60  ;;  %v1901_v36 = vadd.f32 %v1900_v18, %v1887_v6 }
 0x446   :  { %v5562_v33 = vmax.f32 %v1873_v22, 0.0  ;;  %v5564_v46 = vmax.f32 %v1901_v36, 0.0  ;;  %3660 = vmatmul.msk.bf16.vlgmr.msrb.gmra.mxu2 %vm176_vm8, %v1915_v27 }
 0x448   :  { %v1918_v55 = vpack.c.bf16 %v5562_v33, %v5548_v41  ;;  %v1919_v50 = vpack.c.bf16 %v5564_v46, %v5560_v39  ;;  %2198 = vrot.lane.b32.xlu2 %v5560_v39, %s3810_s15 }
 0x449   :  { %2196 = vrot.lane.b32.xlu0 %v5548_v41, %s3810_s15  ;;  %2119 = vrot.lane.b32.xlu1 %v5542_v5, %s3805_s7 }
 0x44a   :  { %1974 = vmatpush.bf16.msra.mxu0 %v1919_v50  ;;  %1961 = vmatpush.bf16.msrb.mxu3 %v1918_v55 }
 0x44d   :  { %3661 = vmatmul.msk.bf16.vlgmr.msrb.gmra.mxu3 %vm176_vm8, %v1915_v27 }
 0x44e   :  { %3662 = vmatmul.msk.bf16.vlgmr.msra.gmra.mxu0 %vm176_vm8, %v1915_v27 }
 0x450   :  { %2148 = vrot.lane.b32.xlu2 %v5560_v39, %s3804_s23 }
 0x451   :  { %2146 = vrot.lane.b32.xlu0 %v5548_v41, %s3804_s23  ;;  %2089 = vrot.lane.b32.xlu1 %v5542_v5, %s3806_s8 }
 0x458   :  { %2123 = vrot.lane.b32.xlu2 %v5560_v39, %s3805_s7 }
 0x459   :  { %2121 = vrot.lane.b32.xlu0 %v5548_v41, %s3805_s7  ;;  %2014 = vrot.lane.b32.xlu1 %v5542_v5, %s3809_s0 }
 0x460   :  { %2084 = vrot.lane.b32.xlu2 %v5560_v39, %s3806_s8 }
 0x461   :  { %2091 = vrot.lane.b32.xlu0 %v5548_v41, %s3806_s8  ;;  %2171 = vrot.lane.b32.xlu1 %v5548_v41, %s3803_s22 }
 0x468   :  { %2006 = vrot.lane.b32.xlu2 %v5560_v39, %s3809_s0 }
 0x469   :  { %2173 = vrot.lane.b32.xlu0 %v5560_v39, %s3803_s22  ;;  %2059 = vrot.lane.b32.xlu1 %v5560_v39, %s3807_s9  ;;  %s3820_s22 = smov 9  }
 0x470   :  { %2039 = vrot.lane.b32.xlu2 %v5542_v5, %s3808_s14 }
 0x471   :  { %2034 = vrot.lane.b32.xlu0 %v5560_v39, %s3808_s14  ;;  %2041 = vrot.lane.b32.xlu1 %v5548_v41, %s3808_s14 }
 0x474   :  { %v2193_v47 = vpop.permute.xlu2 %2192 }
 0x478   :  { %2292 = vperm.xlu2 %3783, %v3670_v57  }
 0x479   :  { %2016 = vrot.lane.b32.xlu0 %v5548_v41, %s3809_s0  ;;  %2277 = vperm.xlu1 %3782, %v3667_v21   ;;  %v7887_v21 = vld [vmem:[#allocation9_spill] sm:$0xff] }
 0x47c   :  { %v5614_v25 = vpop.permute.xlu2 %2167 }
 0x481   :  { %2287 = vperm.xlu0 %3784, %v3669_v29  }
 0x484   :  { %v2118_v10 = vpop.permute.xlu2 %2117 }
 0x489   :  { %2282 = vperm.xlu0 %3784, %v3668_v11  }
 0x48b   :  { %v5628_v53 = vpop.permute.xlu1 %2142  ;;  %v5638_v61 = vpop.permute.xlu0 %2062 }
 0x48c   :  { %v5630_v34 = vpop.permute.xlu2 %2037 }
 0x493   :  { %v5633_v2 = vpop.permute.xlu1 %2087 }
 0x49a   :  { %v5635_v17 = vpop.permute.xlu2 %2066 }
 0x49b   :  { %v5640_v7 = vpop.permute.xlu1 %2012 }
 0x4a2   :  { %v2199_v1 = vpop.permute.xlu2 %2198 }
 0x4a3   :  { %v2208_v15 = vsel %vm7881_vm10, %v2199_v1, %v2193_v47  ;;  %vm7901_vm10 = vcmask 121856  }
 0x4a4   :  { %v2212_v43 = vmul.f32 %v4740_v59, %v2208_v15 }
 0x4a6   :  { %v2274_v44 = vpack.c.bf16 %v2212_v43, %v2212_v43 }
 0x4a8   :  { %v2312_v56 = vsel %vm7642_vm12, %v2274_v44, 0 }
 0x4a9   :  { %2374 = vmatpush.bf16.msrb.mxu0 %v2312_v56 }
 0x4aa   :  { %v2149_v58 = vpop.permute.xlu2 %2148 }
 0x4ab   :  { %v2195_v63 = vpop.permute.xlu1 %2194  ;;  %v2145_v14 = vpop.permute.xlu0 %2144 }
 0x4ac   :  { %v2200_v6 = vsel %vm7882_vm1, %v2193_v47, %v2195_v63  ;;  %v2150_v22 = vsel %vm7884_vm4, %v5628_v53, %v2145_v14  ;;  %v5657_v47 = vmul.f32 %v7840_v13, %v5560_v39  ;;  %vm7902_vm1 = vmmov %vm7899_vm0 }
 0x4ad   :  { %v2209_v8 = vmul.f32 %v7883_v35, %v2200_v6  ;;  %v2159_v29 = vmul.f32 %v7887_v21, %v2150_v22  ;;  %v7892_v35 = vld [vmem:[#allocation10_spill] sm:$0xff]  ;;  %vm7904_vm4 = vmmov %vm7885_vm5 }
 0x4af   :  { %v2271_v12 = vpack.c.bf16 %v2209_v8, %v2209_v8 }
 0x4b1   :  { %v2303_v18 = vsel %vm7642_vm12, %v2271_v12, 0  ;;  %v7893_v12 = vld [vmem:[#allocation11_spill] sm:$0xff] }
 0x4b2   :  { %v2124_v60 = vpop.permute.xlu2 %2123  ;;  %2317 = vmatpush.bf16.msra.mxu2 %v2303_v18  ;;  %v2109_v18 = vmul.f32 %v7893_v12, %v5520_v52 }
 0x4b3   :  { %v2133_v59 = vsel %vm7885_vm5, %v2124_v60, %v2118_v10  ;;  %v2170_v55 = vpop.permute.xlu1 %2169  ;;  %v5653_v50 = vpop.permute.xlu0 %2064  ;;  %vm7905_vm5 = vmmov %vm7896_vm2 }
 0x4b4   :  { %v5651_v36 = vmul.f32 %v4565_v9, %v2133_v59  ;;  %v2175_v57 = vsel %vm7886_vm14, %v5614_v25, %v2170_v55  ;;  %vm7906_vm14 = vmmov %vm7896_vm2 }
 0x4b5   :  { %v2184_v11 = vmul.f32 %v7888_v30, %v2175_v57 }
 0x4b6   :  { %v2266_v27 = vpack.c.bf16 %v5651_v36, %v5657_v47 }
 0x4b7   :  { %v2267_v15 = vpack.c.bf16 %v2184_v11, %v2159_v29 }
 0x4b9   :  { %2318 = vmatpush.bf16.msra.mxu2 %v2267_v15 }
 0x4bb   :  { %v2197_v9 = vpop.permute.xlu0 %2196  ;;  %v2120_v43 = vpop.permute.xlu1 %2119 }
 0x4bc   :  { %v2201_v44 = vsel %vm7889_vm15, %v2195_v63, %v2197_v9  ;;  %v2202_v56 = vsel %vm7890_vm6, %v2197_v9, %v2199_v1  ;;  %v2125_v13 = vsel %vm7891_vm7, %v2118_v10, %v2120_v43  ;;  %vm7907_vm15 = vcmask 138240   ;;  %vm7908_vm6 = vmmov %vm7901_vm10 }
 0x4bd   :  { %v2210_v39 = vmul.f32 %v7823_v23, %v2201_v44  ;;  %v2211_v6 = vmul.f32 %v4737_v0, %v2202_v56  ;;  %v2134_v8 = vmul.f32 %v7892_v35, %v2125_v13  ;;  %v2085_v23 = vpop.permute.xlu2 %2084  ;;  %v7897_v13 = vld [vmem:[#allocation4_spill] sm:$0xff]  ;;  %vm7913_vm7 = vmmov %vm7899_vm0 }
 0x4bf   :  { %v2272_v22 = vpack.c.bf16 %v2210_v39, %v2210_v39  ;;  %v2273_v59 = vpack.c.bf16 %v2211_v6, %v2211_v6  ;;  %v2263_v57 = vpack.c.bf16 %v2134_v8, %v2109_v18  ;;  %v2158_v6 = vsel %vm7898_vm13, %v2149_v58, %v5628_v53  ;;  %vm7917_vm13 = vmmov %vm7899_vm0 }
 0x4c0   :  { %v2162_v18 = vmul.f32 %v4557_v54, %v2158_v6  ;;  %v2100_v53 = vsel %vm7902_vm1, %v2085_v23, %v5633_v2 }
 0x4c1   :  { %v2306_v21 = vsel %vm7642_vm12, %v2272_v22, 0  ;;  %v2309_v63 = vsel %vm7642_vm12, %v2273_v59, 0  ;;  %2319 = vmatpush.bf16.msra.mxu2 %v2263_v57 }
 0x4c2   :  { %2336 = vmatpush.bf16.msrb.mxu1 %v2306_v21  ;;  %2355 = vmatpush.bf16.msra.mxu3 %v2309_v63 }
 0x4c3   :  { %v2147_v10 = vpop.permute.xlu0 %2146  ;;  %v2090_v1 = vpop.permute.xlu1 %2089 }
 0x4c4   :  { %v2151_v52 = vsel %vm7894_vm3, %v2145_v14, %v2147_v10  ;;  %v2093_v35 = vsel %vm7899_vm0, %v5633_v2, %v2090_v1  ;;  %v2152_v8 = vsel %vm7900_vm9, %v2147_v10, %v2149_v58  ;;  %v7909_v10 = vld [vmem:[#allocation22_spill] sm:$0xff]  ;;  %vm7914_vm3 = vmmov %vm7908_vm6  ;;  %vm7641_vm0 = vcmask 588800  }
 0x4c5   :  { %v5677_v30 = vpop.permute.xlu2 %2006  ;;  %v2160_v56 = vmul.f32 %v7815_v28, %v2151_v52  ;;  %v2068_v28 = vsel %vm7901_vm10, %v5638_v61, %v5653_v50  ;;  %v2161_v58 = vmul.f32 %v4550_v32, %v2152_v8  ;;  %v7910_v52 = vld [vmem:[#allocation23_spill] sm:$0xff] }
 0x4cb   :  { %v2122_v29 = vpop.permute.xlu0 %2121  ;;  %v5675_v0 = vpop.permute.xlu1 %2014 }
 0x4cc   :  { %v2126_v9 = vsel %vm7895_vm11, %v2120_v43, %v2122_v29  ;;  %v7903_v43 = vld [vmem:[#allocation12_spill] sm:$0xff]  ;;  %v2127_v57 = vsel %vm7904_vm4, %v2122_v29, %v2124_v60  ;;  %v2018_v63 = vsel %vm7907_vm15, %v5640_v7, %v5675_v0  ;;  %v2077_v60 = vmul.f32 %v7847_v24, %v2068_v28  ;;  %v7911_v29 = vld [vmem:[#allocation14_spill] sm:$0xff]  ;;  %vm7915_vm11 = vmmov %vm7907_vm15 }
 0x4cd   :  { %v2135_v14 = vmul.f32 %v7831_v16, %v2126_v9  ;;  %v2102_v22 = vmul.f32 %v7903_v43, %v2093_v35  ;;  %v2040_v16 = vpop.permute.xlu2 %2039  ;;  %vm7920_vm9 = vmmov %vm7915_vm11 }
 0x4ce   :  { %vm7921_vm10 = vmmov %vm7920_vm9 }
 0x4cf   :  { %v2260_v8 = vpack.c.bf16 %v2102_v22, %v2077_v60  ;;  %v7918_v22 = vld [vmem:[#allocation21_spill] sm:$0xff]  ;;  %v7922_v60 = vlaneseq }
 0x4d3   :  { %v2092_v11 = vpop.permute.xlu0 %2091  ;;  %v2172_v15 = vpop.permute.xlu1 %2171 }
 0x4d4   :  { %v2176_v44 = vsel %vm7896_vm2, %v2170_v55, %v2172_v15  ;;  %v2110_v55 = vmul.f32 %v7817_v48, %v5542_v5  ;;  %vm7916_vm2 = vmmov %vm7914_vm3 }
 0x4d5   :  { %v2185_v39 = vmul.f32 %v7897_v13, %v2176_v44  ;;  %v2101_v44 = vmul.f32 %v7911_v29, %v2100_v53  ;;  %v2136_v13 = vmul.f32 %v4562_v51, %v2127_v57  ;;  %v2025_v51 = vsel %vm7915_vm11, %v5677_v30, %v5640_v7 }
 0x4d6   :  { %v2264_v5 = vpack.c.bf16 %v2135_v14, %v2110_v55  ;;  %v2094_v14 = vsel %vm7913_vm7, %v2090_v1, %v2092_v11  ;;  %v3664_v1 = vld [vmem:[%s7536_s1 + $0xd0] sm:$0xff]  ;;  %v5781_v29 = vshrl.u32 %v7922_v60, 7 }
 0x4d7   :  { %v2268_v12 = vpack.c.bf16 %v2185_v39, %v2160_v56 }
 0x4d9   :  { %2337 = vmatpush.bf16.msrb.mxu1 %v2268_v12  ;;  %v2111_v12 = vmul.f32 %v4597_v19, %v5548_v41  ;;  %v2069_v19 = vsel %vm7916_vm2, %v5653_v50, %v5635_v17  ;;  %v2095_v41 = vsel %vm7917_vm13, %v2092_v11, %v2085_v23 }
 0x4da   :  { %v2078_v50 = vmul.f32 %v7854_v38, %v2069_v19 }
 0x4db   :  { %v2174_v59 = vpop.permute.xlu0 %2173  ;;  %v2060_v54 = vpop.permute.xlu1 %2059  ;;  %v2265_v7 = vpack.c.bf16 %v2136_v13, %v2111_v12  ;;  %v7923_v13 = vld [vmem:[#allocation3_spill] sm:$0xff] }
 0x4dc   :  { %v2177_v21 = vsel %vm7905_vm5, %v2172_v15, %v2174_v59  ;;  %v2183_v48 = vsel %vm7906_vm14, %v2174_v59, %v5614_v25  ;;  %v2075_v2 = vsel %vm7908_vm6, %v2060_v54, %v5638_v61  ;;  %v7912_v15 = vld [vmem:[#allocation16_spill] sm:$0xff]  ;;  %v2043_v25 = vsel %vm176_vm8, %v5630_v34, %v2040_v16  ;;  %v7919_v59 = vld [vmem:[#allocation18_spill] sm:$0xff] }
 0x4dd   :  { %v2186_v32 = vmul.f32 %v7909_v10, %v2177_v21  ;;  %v2187_v9 = vmul.f32 %v7910_v52, %v2183_v48  ;;  %v2076_v56 = vmul.f32 %v7912_v15, %v2075_v2  ;;  %2338 = vmatpush.bf16.msrb.mxu1 %v2264_v5  ;;  %v2027_v61 = vmul.f32 %v7872_v37, %v2018_v63  ;;  %v3663_v37 = vld [vmem:[%s7536_s1 + $0xc0] sm:$0xff] }
 0x4de   :  { %v2070_v24 = vsel %vm7914_vm3, %v5635_v17, %v2060_v54  ;;  %v2253_v17 = vpack.c.bf16 %v3664_v1, %v3663_v37  ;;  %v2524_v15 = vadd.s32 248, %v5781_v29  ;;  %v5791_v12 = vshra.s32 %v7923_v13, 6 }
 0x4df   :  { %v2269_v39 = vpack.c.bf16 %v2186_v32, %v2161_v58  ;;  %v2270_v6 = vpack.c.bf16 %v2187_v9, %v2162_v18  ;;  %v2259_v35 = vpack.c.bf16 %v2101_v44, %v2076_v56  ;;  %v2052_v18 = vmul.f32 %v7866_v45, %v2043_v25 }
 0x4e0   :  { %v2103_v45 = vmul.f32 %v7841_v4, %v2094_v14  ;;  %v2079_v28 = vmul.f32 %v7867_v31, %v2070_v24  ;;  %v2026_v58 = vmul.f32 %v7918_v22, %v2025_v51  ;;  %v2104_v4 = vmul.f32 %v7855_v3, %v2095_v41 }
 0x4e1   :  { %2356 = vmatpush.bf16.msra.mxu3 %v2269_v39  ;;  %2375 = vmatpush.bf16.msrb.mxu0 %v2270_v6  ;;  %v2256_v43 = vpack.c.bf16 %v2052_v18, %v2027_v61  ;;  %v2523_v44 = vadd.s32 240, %v5781_v29  ;;  %v2652_v25 = vand.u32 255, %v2524_v15  ;;  %v2814_v39 = vand.u32 63, %v7923_v13 }
 0x4e2   :  { %2320 = vmatpush.bf16.msra.mxu2 %v2259_v35  ;;  %2339 = vmatpush.bf16.msrb.mxu1 %v2260_v8  ;;  %v2262_v11 = vpack.c.bf16 %v2104_v4, %v2079_v28  ;;  %v2521_v61 = vadd.s32 224, %v5781_v29  ;;  %v2522_v35 = vadd.s32 232, %v5781_v29  ;;  %v2588_v28 = vshra.s32 %v2524_v15, 8 }
 0x4e3   :  { %v2035_v55 = vpop.permute.xlu0 %2034  ;;  %v2042_v31 = vpop.permute.xlu1 %2041  ;;  %v2651_v56 = vand.u32 255, %v2523_v44  ;;  %v2716_v8 = vshra.s32 %v2652_v25, 4  ;;  %v5793_v37 = vshra.s32 %v2814_v39, 3  ;;  %v2587_v19 = vshra.s32 %v2523_v44, 8 }
 0x4e4   :  { %v2050_v53 = vsel %vm176_vm8, %v2035_v55, %v5630_v34  ;;  %v2261_v34 = vpack.c.bf16 %v2103_v45, %v2078_v50  ;;  %v2044_v54 = vsel %vm176_vm8, %v2040_v16, %v2042_v31  ;;  %v2045_v21 = vsel %vm176_vm8, %v2042_v31, %v2035_v55 }
 0x4e5   :  { %v2051_v57 = vmul.f32 %v7919_v59, %v2050_v53  ;;  %2357 = vmatpush.bf16.msra.mxu3 %v2265_v7  ;;  %2376 = vmatpush.bf16.msrb.mxu0 %v2266_v27  ;;  %v2053_v47 = vmul.f32 %v7868_v62, %v2044_v54  ;;  %v2054_v27 = vmul.f32 %v7874_v20, %v2045_v21  ;;  %v5772_v20 = vpop.f32.mrf.mxu0  ;;  %v2715_v6 = vshra.s32 %v2651_v56, 4 }
 0x4e6   :  { %2340 = vmatpush.bf16.msrb.mxu1 %v2256_v43  ;;  %v2779_v24 = vand.u32 15, %v2651_v56  ;;  %v2649_v51 = vand.u32 255, %v2521_v61  ;;  %v2650_v18 = vand.u32 255, %v2522_v35  ;;  %v2780_v41 = vand.u32 15, %v2652_v25 }
 0x4e7   :  { %v2255_v23 = vpack.c.bf16 %v2051_v57, %v2026_v58  ;;  %v2911_v55 = vshra.s32 %v2715_v6, 1  ;;  %v5795_v7 = vand.u32 7, %v2814_v39  ;;  %v2912_v53 = vshra.s32 %v2716_v8, 1 }
 0x4e8   :  { %v2713_v43 = vshra.s32 %v2649_v51, 4  ;;  %v3103_v58 = vshra.s32 %v2779_v24, 1  ;;  %v2714_v59 = vshra.s32 %v2650_v18, 4  ;;  %v2777_v57 = vand.u32 15, %v2649_v51 }
 0x4e9   :  { %3673 = vmatmul.msk.bf16.vlgmr.msrb.gmra.mxu1 %vm7641_vm0, %v2253_v17  ;;  %2321 = vmatpush.bf16.msra.mxu2 %v2255_v23  ;;  %v2585_v50 = vshra.s32 %v2521_v61, 8  ;;  %vm5803_vm8 = vcmp.eq.s32.totalorder %v2587_v19, %v5791_v12  ;;  %vm5808_vm1 = vcmp.eq.s32.totalorder %v2911_v55, %v5793_v37  ;;  %vm5813_vm4 = vcmp.eq.s32.totalorder %v2588_v28, %v5791_v12 }
 0x4ea   :  { %2358 = vmatpush.bf16.msra.mxu3 %v2261_v34  ;;  %2377 = vmatpush.bf16.msrb.mxu0 %v2262_v11  ;;  %v2909_v4 = vshra.s32 %v2713_v43, 1  ;;  %v3104_v34 = vshra.s32 %v2780_v41, 1  ;;  %v2778_v11 = vand.u32 15, %v2650_v18  ;;  %vm5818_vm5 = vcmp.eq.s32.totalorder %v2912_v53, %v5793_v37 }
 0x4eb   :  { %v2017_v36 = vpop.permute.xlu0 %2016  ;;  %v5797_v45 = vpop.permute.xlu1 %2277  ;;  %vm5825_vm14 = vcmp.eq.s32.totalorder %v3103_v58, %v5795_v7  ;;  %vm5831_vm15 = vcmp.eq.s32.totalorder %v2585_v50, %v5791_v12 }
 0x4ec   :  { %v2019_v38 = vsel %vm7920_vm9, %v5675_v0, %v2017_v36  ;;  %v2020_v3 = vsel %vm7921_vm10, %v2017_v36, %v5677_v30  ;;  %3671 = vmatmul.msk.bf16.vlgmr.msra.gmra.mxu2 %vm7641_vm0, %v2253_v17  ;;  %v3665_v0 = vld [vmem:[%s7536_s1 + $0xe0] sm:$0xff]  ;;  %v3666_v30 = vld [vmem:[%s7536_s1 + $0xf0] sm:$0xff]  ;;  %v2586_v36 = vshra.s32 %v2522_v35, 8  ;;  %vm5836_vm6 = vcmp.eq.s32.totalorder %v2909_v4, %v5793_v37 }
 0x4ed   :  { %v2028_v48 = vmul.f32 %v7877_v49, %v2019_v38  ;;  %v2029_v16 = vmul.f32 %v7880_v26, %v2020_v3  ;;  %v2254_v62 = vpack.c.bf16 %v3666_v30, %v3665_v0  ;;  %v5774_v49 = vpop.f32.mrf.mxu2  ;;  %v5776_v26 = vpop.f32.mrf.mxu3  ;;  %v2910_v38 = vshra.s32 %v2714_v59, 1 }
 0x4ee   :  { %v1939_v2 = vpop.f32.mrf.mxu0  ;;  %v2519_v3 = vadd.s32 208, %v5781_v29  ;;  %vm5844_vm7 = vcmp.eq.s32.totalorder %v3104_v34, %v5795_v7  ;;  %vm5850_vm3 = vcmp.eq.s32.totalorder %v2586_v36, %v5791_v12  ;;  %v7948_v4 = vmov 0 }
 0x4ef   :  { %v2257_v5 = vpack.c.bf16 %v2053_v47, %v2028_v48  ;;  %v2258_v63 = vpack.c.bf16 %v2054_v27, %v2029_v16  ;;  %v2520_v47 = vadd.s32 216, %v5781_v29  ;;  %v3101_v16 = vshra.s32 %v2777_v57, 1 }
 0x4f0   :  { %v2647_v30 = vand.u32 255, %v2519_v3  ;;  %v2583_v60 = vshra.s32 %v2519_v3, 8  ;;  %vm5855_vm11 = vcmp.eq.s32.totalorder %v2910_v38, %v5793_v37  ;;  %v7950_v34 = vmov 0 }
 0x4f1   :  { %2359 = vmatpush.bf16.msra.mxu3 %v2257_v5  ;;  %2378 = vmatpush.bf16.msrb.mxu0 %v2258_v63  ;;  %v2507_v5 = vadd.s32 112, %v5781_v29  ;;  %v2584_v44 = vshra.s32 %v2520_v47, 8  ;;  %v2648_v15 = vand.u32 255, %v2520_v47  ;;  %vm5863_vm2 = vcmp.eq.s32.totalorder %v3101_v16, %v5795_v7 }
 0x4f2   :  { %v2711_v6 = vshra.s32 %v2647_v30, 4  ;;  %v2775_v61 = vand.u32 15, %v2647_v30  ;;  %vm5877_vm9 = vcmp.eq.s32.totalorder %v2583_v60, %v5791_v12  ;;  %v7954_v3 = vmov 0 }
 0x4f3   :  { %v5788_v14 = vpop.permute.xlu0 %2287  ;;  %v2635_v35 = vand.u32 255, %v2507_v5  ;;  %v2712_v51 = vshra.s32 %v2648_v15, 4  ;;  %v2776_v18 = vand.u32 15, %v2648_v15  ;;  %v7949_v4 = vsel %vm5877_vm9, 4294967295, %v7948_v4 }
 0x4f4   :  { %3675 = vmatmul.msk.bf16.vlgmr.msra.gmra.mxu3 %vm7641_vm0, %v2253_v17  ;;  %3677 = vmatmul.msk.bf16.vlgmr.msrb.gmra.mxu0 %vm7641_vm0, %v2253_v17  ;;  %v3330_v17 = vpack.c.bf16 %v5550_v40, %v5550_v40  ;;  %v2907_v55 = vshra.s32 %v2711_v6, 1  ;;  %v3099_v28 = vshra.s32 %v2775_v61, 1  ;;  %vm5882_vm10 = vcmp.eq.s32.totalorder %v2584_v44, %v5791_v12 }
 0x4f5   :  { %v1952_v10 = vpop.f32.mrf.mxu2  ;;  %v1965_v32 = vpop.f32.mrf.mxu3  ;;  %v2908_v58 = vshra.s32 %v2712_v51, 1  ;;  %v3100_v59 = vshra.s32 %v2776_v18, 1  ;;  %v7951_v34 = vsel %vm5882_vm10, 4294967295, %v7950_v34  ;;  %v2517_v15 = vadd.s32 192, %v5781_v29 }
 0x4f6   :  { %v5778_v52 = vpop.f32.mrf.mxu0  ;;  %vm5893_vm12 = vcmp.eq.s32.totalorder %v2907_v55, %v5793_v37  ;;  %v7963_v61 = vmov 0  ;;  %v2518_v18 = vadd.s32 200, %v5781_v29  ;;  %v7984_v63 = vmov 0 }
 0x4f7   :  { %vm5904_vm10 = vcmp.eq.s32.totalorder %v2908_v58, %v5793_v37  ;;  %vm5913_vm9 = vcmp.eq.s32.totalorder %v3100_v59, %v5795_v7  ;;  %v2581_v32 = vshra.s32 %v2517_v15, 8  ;;  %v7979_v59 = vmov 0 }
 0x4f8   :  { %v2582_v58 = vshra.s32 %v2518_v18, 8  ;;  %v2645_v39 = vand.u32 255, %v2517_v15  ;;  %v2646_v13 = vand.u32 255, %v2518_v18 }
 0x4f9   :  { %3674 = vmatmul.msk.bf16.gmra.mxu1 %vm7641_vm0, %v2254_v62 }
 0x4fb   :  { %v5841_v2 = vpop.permute.xlu0 %2282 }
 0x4fc   :  { %3672 = vmatmul.msk.bf16.gmra.mxu2 %vm7641_vm0, %v2254_v62 }
 0x4fe   :  { %v1978_v9 = vpop.f32.mrf.mxu0 }
 0x4ff   :  { %v3102_v9 = vshra.s32 %v2778_v11, 1  ;;  %v2699_v11 = vshra.s32 %v2635_v35, 4 }
 0x501   :  { %vm5871_vm13 = vcmp.eq.s32.totalorder %v3102_v9, %v5795_v7  ;;  %v7960_v9 = vmov 0  ;;  %v2895_v60 = vshra.s32 %v2699_v11, 1  ;;  %v2556_v11 = vadd.s32 504, %v5781_v29 }
 0x504   :  { %3676 = vmatmul.msk.bf16.gmra.mxu3 %vm7641_vm0, %v2254_v62  ;;  %3678 = vmatmul.msk.bf16.gmra.mxu0 %vm7641_vm0, %v2254_v62  ;;  %v2508_v62 = vadd.s32 120, %v5781_v29  ;;  %vm7962_vm0 = vmand %vm5803_vm8, %vm5808_vm1  ;;  %vm5952_vm8 = vcmp.eq.s32.totalorder %v2895_v60, %v5793_v37  ;;  %v2774_v60 = vand.u32 15, %v2646_v13 }
 0x505   :  { %vm7969_vm1 = vmand %vm5813_vm4, %vm5818_vm5 }
 0x506   :  { %v2636_v53 = vand.u32 255, %v2508_v62  ;;  %v2572_v57 = vshra.s32 %v2508_v62, 8  ;;  %vm3038_vm4 = vmand %vm5850_vm3, %vm5855_vm11  ;;  %vm6004_vm3 = vcmp.eq.s32.totalorder %v2581_v32, %v5791_v12  ;;  %vm6016_vm11 = vcmp.eq.s32.totalorder %v2582_v58, %v5791_v12 }
 0x507   :  { %v7985_v63 = vsel %vm6016_vm11, 4294967295, %v7984_v63 }
 0x508   :  { %v2700_v47 = vshra.s32 %v2636_v53, 4  ;;  %v2764_v30 = vand.u32 15, %v2636_v53 }
 0x50a   :  { %v2896_v44 = vshra.s32 %v2700_v47, 1  ;;  %v3088_v51 = vshra.s32 %v2764_v30, 1  ;;  %v2710_v30 = vshra.s32 %v2646_v13, 4 }
 0x50c   :  { %vm5988_vm5 = vcmp.eq.s32.totalorder %v3088_v51, %v5795_v7 }
 0x566   :  { %v2342_v1 = vpop.f32.mrf.mxu1 }
 0x567   :  { %v2343_v22 = vadd.f32 %v2342_v1, %v5797_v45  ;;  %v2571_v1 = vshra.s32 %v2507_v5, 8  ;;  %v2763_v5 = vand.u32 15, %v2635_v35  ;;  %v7965_v35 = vmov 0 }
 0x569   :  { %v2391_v27 = vmax.f32 %v2343_v22, 0.0  ;;  %v7946_v22 = vmov 0 }
 0x56a   :  { %v7947_v22 = vsel %vm5871_vm13, 4294967295, %v7946_v22  ;;  %vm5898_vm13 = vcmp.eq.s32.totalorder %v3099_v28, %v5795_v7 }
 0x56b   :  { %v7955_v3 = vsel %vm5898_vm13, 4294967295, %v7954_v3  ;;  %vm5918_vm13 = vcmp.eq.s32.totalorder %v2571_v1, %v5791_v12  ;;  %v5957_v1 = vadd.s32 496, %v5781_v29 }
 0x56c   :  { %v7961_v9 = vsel %vm5918_vm13, 4294967295, %v7960_v9  ;;  %vm5938_vm13 = vcmp.eq.s32.totalorder %v2572_v57, %v5791_v12 }
 0x56d   :  { %v7966_v35 = vsel %vm5938_vm13, 4294967295, %v7965_v35  ;;  %v2619_v0 = vshra.s32 %v5957_v1, 8 }
 0x56e   :  { %v2344_v10 = vpop.f32.mrf.mxu1 }
 0x56f   :  { %v2345_v56 = vadd.f32 %v2344_v10, %v5841_v2  ;;  %v2323_v25 = vpop.f32.mrf.mxu2  ;;  %v7958_v10 = vmov 0 }
 0x570   :  { %v5860_v8 = vadd.f32 %v2323_v25, %v5797_v45  ;;  %v7959_v10 = vsel %vm5913_vm9, 4294967295, %v7958_v10  ;;  %vm5933_vm9 = vmand %vm7962_vm0, %vm5825_vm14  ;;  %vm5972_vm0 = vcmp.eq.s32.totalorder %v2896_v44, %v5793_v37  ;;  %v6027_v44 = vpop.permute.xlu2 %2292 }
 0x571   :  { %v2395_v19 = vmax.f32 %v2345_v56, 0.0  ;;  %v2380_v41 = vpop.f32.mrf.mxu0  ;;  %v7964_v61 = vsel %vm5933_vm9, 4294967295, %v7963_v61  ;;  %vm5967_vm14 = vmand %vm7969_vm1, %vm5844_vm7 }
 0x572   :  { %v5868_v43 = vadd.f32 %v2380_v41, %v5797_v45  ;;  %v2390_v50 = vmax.f32 %v5860_v8, 0.0  ;;  %v3087_v8 = vshra.s32 %v2763_v5, 1  ;;  %vm7978_vm7 = vmand %vm5831_vm15, %vm5836_vm6  ;;  %vm7983_vm15 = vnez %v7949_v4 }
 0x573   :  { %v5886_v36 = vpack.c.bf16 %v2395_v19, %v2391_v27  ;;  %vm5999_vm1 = vmand %vm7978_vm7, %vm5863_vm2  ;;  %vm7986_vm2 = vnez %v7947_v22  ;;  %v7987_v5 = vmov 0  ;;  %vm7989_vm6 = vnez %v7951_v34 }
 0x574   :  { %v2393_v16 = vmax.f32 %v5868_v43, 0.0  ;;  %vm5977_vm13 = vcmp.eq.s32.totalorder %v3087_v8, %v5795_v7  ;;  %v7976_v43 = vmov 0  ;;  %v7980_v59 = vsel %vm5999_vm1, 4294967295, %v7979_v59  ;;  %vm6023_vm7 = vmand %vm3038_vm4, %vm7986_vm2 }
 0x575   :  { %v7977_v43 = vsel %vm5988_vm5, 4294967295, %v7976_v43  ;;  %v7988_v5 = vsel %vm6023_vm7, 4294967295, %v7987_v5  ;;  %v2683_v22 = vand.u32 255, %v5957_v1  ;;  %vm7990_vm2 = vnez %v7955_v3  ;;  %vm7991_vm11 = vmand %vm7983_vm15, %vm5893_vm12 }
 0x576   :  { %v2347_v62 = vpop.f32.mrf.mxu1  ;;  %vm6048_vm5 = vmand %vm7991_vm11, %vm7990_vm2  ;;  %vm7994_vm4 = vnez %v7961_v9  ;;  %v3098_v4 = vshra.s32 %v2774_v60, 1  ;;  %vm7995_vm12 = vnez %v7959_v10  ;;  %v8003_v34 = vmov 0 }
 0x577   :  { %v5924_v56 = vadd.f32 %v2347_v62, %v5788_v14  ;;  %v2325_v25 = vpop.f32.mrf.mxu2  ;;  %v2361_v6 = vpop.f32.mrf.mxu3  ;;  %v2773_v62 = vand.u32 15, %v2645_v39  ;;  %v2747_v38 = vshra.s32 %v2683_v22, 4  ;;  %vm7996_vm15 = vmand %vm7989_vm6, %vm5904_vm10  ;;  %vm8005_vm10 = vnez %v7966_v35 }
 0x578   :  { %v2326_v48 = vadd.f32 %v2325_v25, %v5841_v2  ;;  %v5945_v31 = vadd.f32 %v2361_v6, %v5797_v45  ;;  %v7970_v45 = vmov 0  ;;  %v2620_v25 = vshra.s32 %v2556_v11, 8  ;;  %vm6067_vm11 = vmand %vm7996_vm15, %vm7995_vm12 }
 0x579   :  { %v2399_v19 = vmax.f32 %v5924_v56, 0.0  ;;  %v2382_v41 = vpop.f32.mrf.mxu0  ;;  %v7971_v45 = vsel %vm5967_vm14, 4294967295, %v7970_v45  ;;  %v2684_v6 = vand.u32 255, %v2556_v11  ;;  %v3097_v1 = vshra.s32 %v2773_v62, 1  ;;  %vm3024_vm6 = vmand %vm8005_vm10, %vm5972_vm0 }
 0x57a   :  { %v2394_v53 = vmax.f32 %v2326_v48, 0.0  ;;  %v2392_v54 = vmax.f32 %v5945_v31, 0.0  ;;  %v2383_v21 = vadd.f32 %v2382_v41, %v5841_v2  ;;  %v2906_v31 = vshra.s32 %v2710_v30, 1 }
 0x57b   :  { %vm6082_vm14 = vcmp.eq.s32.totalorder %v3097_v1, %v5795_v7  ;;  %vm6095_vm12 = vcmp.eq.s32.totalorder %v3098_v4, %v5795_v7  ;;  %v2811_v30 = vand.u32 15, %v2683_v22  ;;  %v2812_v62 = vand.u32 15, %v2684_v6 }
 0x57c   :  { %v6009_v47 = vpack.c.bf16 %v2394_v53, %v2390_v50  ;;  %v2397_v24 = vmax.f32 %v2383_v21, 0.0  ;;  %v2709_v50 = vshra.s32 %v2645_v39, 4  ;;  %v7997_v21 = vmov 0 }
 0x57d   :  { %v7998_v21 = vsel %vm6067_vm11, 4294967295, %v7997_v21  ;;  %vm6077_vm9 = vcmp.eq.s32.totalorder %v2906_v31, %v5793_v37  ;;  %v8004_v34 = vsel %vm6082_vm14, 4294967295, %v8003_v34  ;;  %vm8008_vm14 = vmand %vm7994_vm4, %vm5952_vm8  ;;  %vm8015_vm4 = vnez %v7977_v43 }
 0x57e   :  { %v6029_v15 = vpack.c.bf16 %v2397_v24, %v2393_v16  ;;  %v2349_v56 = vpop.f32.mrf.mxu1  ;;  %v7992_v16 = vmov 0  ;;  %v2905_v48 = vshra.s32 %v2709_v50, 1  ;;  %vm6110_vm11 = vmand %vm8008_vm14, %vm5977_vm13  ;;  %v2748_v50 = vshra.s32 %v2684_v6, 4 }
 0x57f   :  { %v2350_v8 = vadd.f32 %v2349_v56, %v6027_v44  ;;  %v2328_v51 = vpop.f32.mrf.mxu2  ;;  %v2363_v18 = vpop.f32.mrf.mxu3  ;;  %v7993_v16 = vsel %vm6048_vm5, 4294967295, %v7992_v16  ;;  %vm6125_vm13 = vcmp.eq.s32.totalorder %v2619_v0, %v5791_v12  ;;  %vm6130_vm14 = vcmp.eq.s32.totalorder %v2620_v25, %v5791_v12  ;;  %vm6141_vm15 = vmand %vm3024_vm6, %vm8015_vm4 }
 0x580   :  { %v6053_v41 = vadd.f32 %v2328_v51, %v5788_v14  ;;  %v2364_v32 = vadd.f32 %v2363_v18, %v5841_v2  ;;  %vm6072_vm2 = vcmp.eq.s32.totalorder %v2905_v48, %v5793_v37  ;;  %v2943_v0 = vshra.s32 %v2747_v38, 1 }
 0x581   :  { %v2403_v3 = vmax.f32 %v2350_v8, 0.0  ;;  %v2385_v53 = vpop.f32.mrf.mxu0  ;;  %v2944_v56 = vshra.s32 %v2748_v50, 1  ;;  %v3135_v22 = vshra.s32 %v2811_v30, 1  ;;  %v3136_v6 = vshra.s32 %v2812_v62, 1  ;;  %vm8021_vm1 = vmand %vm6004_vm3, %vm6072_vm2 }
 0x582   :  { %v2398_v27 = vmax.f32 %v6053_v41, 0.0  ;;  %v2396_v10 = vmax.f32 %v2364_v32, 0.0  ;;  %v6088_v39 = vadd.f32 %v2385_v53, %v5788_v14  ;;  %vm8018_vm8 = vnez %v7985_v63 }
 0x583   :  { %v2416_v11 = vpack.c.bf16 %v2403_v3, %v2399_v19  ;;  %v3679_v19 = vld [vmem:[%s7536_s1 + $0x100] sm:$0xff]  ;;  %v2505_v43 = vadd.s32 96, %v5781_v29  ;;  %v2506_v35 = vadd.s32 104, %v5781_v29  ;;  %vm8020_vm4 = vnez %v8004_v34  ;;  %vm8035_vm2 = vmand %vm8018_vm8, %vm6077_vm9 }
 0x584   :  { %v6117_v60 = vpack.c.bf16 %v2396_v10, %v2392_v54  ;;  %v2401_v28 = vmax.f32 %v6088_v39, 0.0  ;;  %v8016_v54 = vmov 0  ;;  %v6151_v25 = vpack.c.bf16 %v3679_v19, %v3679_v19  ;;  %vm6164_vm7 = vmand %vm8021_vm1, %vm8020_vm4 }
 0x585   :  { %2447 = vmatpush.bf16.msra.mxu1 %v2416_v11  ;;  %v8017_v54 = vsel %vm6141_vm15, 4294967295, %v8016_v54  ;;  %v8022_v51 = vmov 0  ;;  %vm6169_vm0 = vcmp.eq.s32.totalorder %v2943_v0, %v5793_v37  ;;  %vm6174_vm15 = vcmp.eq.s32.totalorder %v2944_v56, %v5793_v37  ;;  %vm6218_vm10 = vmand %vm8035_vm2, %vm6095_vm12 }
 0x586   :  { %v8023_v51 = vsel %vm6164_vm7, 4294967295, %v8022_v51  ;;  %vm6179_vm6 = vcmp.eq.s32.totalorder %v3135_v22, %v5795_v7  ;;  %vm6184_vm1 = vcmp.eq.s32.totalorder %v3136_v6, %v5795_v7  ;;  %v2569_v32 = vshra.s32 %v2505_v43, 8  ;;  %vm8043_vm9 = vmand %vm6130_vm14, %vm6174_vm15 }
 0x587   :  { %v2330_v55 = vpop.f32.mrf.mxu2  ;;  %v2366_v8 = vpop.f32.mrf.mxu3  ;;  %v2570_v4 = vshra.s32 %v2506_v35, 8  ;;  %v2633_v3 = vand.u32 255, %v2505_v43  ;;  %v2634_v53 = vand.u32 255, %v2506_v35  ;;  %v2516_v2 = vadd.s32 184, %v5781_v29  ;;  %vm6245_vm12 = vmand %vm8043_vm9, %vm6184_vm1 }
 0x588   :  { %v2331_v1 = vadd.f32 %v2330_v55, %v6027_v44  ;;  %v6190_v41 = vadd.f32 %v2366_v8, %v5788_v14  ;;  %v2515_v14 = vadd.s32 176, %v5781_v29  ;;  %v3814_v11 = vmov 0.25|0.25  }
 0x589   :  { %2448 = vmatpush.bf16.msra.mxu1 %v5886_v36  ;;  %v2387_v38 = vpop.f32.mrf.mxu0  ;;  %vm8032_vm4 = vnez %v7971_v45  ;;  %vm8033_vm3 = vnez %v7964_v61  ;;  %vm6223_vm7 = vcmp.eq.s32.totalorder %v2569_v32, %v5791_v12  ;;  %v2697_v45 = vshra.s32 %v2633_v3, 4 }
 0x58a   :  { %v2402_v34 = vmax.f32 %v2331_v1, 0.0  ;;  %v2400_v10 = vmax.f32 %v6190_v41, 0.0  ;;  %v2388_v39 = vadd.f32 %v2387_v38, %v6027_v44  ;;  %vm8034_vm5 = vmpackc.low %vm8032_vm4, %vm8033_vm3  ;;  %v2698_v63 = vshra.s32 %v2634_v53, 4 }
 0x58b   :  { %v2761_v58 = vand.u32 15, %v2633_v3  ;;  %v2762_v13 = vand.u32 15, %v2634_v53  ;;  %vm6250_vm8 = vcmp.eq.s32.totalorder %v2570_v4, %v5791_v12  ;;  %v2893_v23 = vshra.s32 %v2697_v45, 1 }
 0x58c   :  { %v2415_v30 = vpack.c.bf16 %v2402_v34, %v2398_v27  ;;  %v2405_v62 = vmax.f32 %v2388_v39, 0.0  ;;  %v2579_v27 = vshra.s32 %v2515_v14, 8  ;;  %v2894_v0 = vshra.s32 %v2698_v63, 1 }
 0x58d   :  { %3702 = vmatpush.bf16.msk.msrb.mxu1 %vm8034_vm5, %v3814_v11  ;;  %vm8040_vm5 = vmand %vm6125_vm13, %vm6169_vm0  ;;  %vm8048_vm13 = vcmask 261120   ;;  %vm8049_vm0 = vnez %v8017_v54  ;;  %v3085_v56 = vshra.s32 %v2761_v58, 1  ;;  %v3086_v22 = vshra.s32 %v2762_v13, 1 }
 0x58e   :  { %vm6234_vm3 = vmand %vm8040_vm5, %vm6179_vm6  ;;  %3682 = vmatmul.msk.bf16.vlgmr.msra.gmra.mxu1 %vm8048_vm13, %v6151_v25  ;;  %v2418_v6 = vpack.c.bf16 %v2405_v62, %v2401_v28  ;;  %vm8050_vm15 = vnez %v7988_v5  ;;  %vm8051_vm14 = vnez %v7980_v59  ;;  %2434 = vmatpush.bf16.msrb.mxu2 %v2415_v30  ;;  %vm8053_vm2 = vnez %v8023_v51 }
 0x58f   :  { %vm8052_vm1 = vmpackc.low %vm8050_vm15, %vm8051_vm14  ;;  %v2580_v43 = vshra.s32 %v2516_v2, 8  ;;  %v2643_v35 = vand.u32 255, %v2515_v14  ;;  %v2644_v55 = vand.u32 255, %v2516_v2  ;;  %v2368_v8 = vpop.f32.mrf.mxu3  ;;  %vm6275_vm9 = vcmp.eq.s32.totalorder %v2893_v23, %v5793_v37 }
 0x590   :  { %vm6280_vm13 = vcmp.eq.s32.totalorder %v2894_v0, %v5793_v37  ;;  %vm6285_vm15 = vcmp.eq.s32.totalorder %v3085_v56, %v5795_v7  ;;  %vm6290_vm14 = vcmp.eq.s32.totalorder %v3086_v22, %v5795_v7  ;;  %v2369_v48 = vadd.f32 %v2368_v8, %v6027_v44  ;;  %2473 = vmatpush.bf16.msra.mxu0 %v2418_v6 }
 0x591   :  { %3704 = vmatpush.bf16.msk.msrb.mxu1 %vm8052_vm1, %v3814_v11  ;;  %vm3021_vm1 = vmand %vm6223_vm7, %vm6275_vm9  ;;  %v2707_v57 = vshra.s32 %v2643_v35, 4  ;;  %v2708_v31 = vshra.s32 %v2644_v55, 4  ;;  %v2771_v1 = vand.u32 15, %v2643_v35  ;;  %v2772_v41 = vand.u32 15, %v2644_v55 }
 0x592   :  { %vm3022_vm4 = vmand %vm6250_vm8, %vm6280_vm13  ;;  %vm6304_vm5 = vcmp.eq.s32.totalorder %v2579_v27, %v5791_v12  ;;  %vm6309_vm6 = vcmp.eq.s32.totalorder %v2580_v43, %v5791_v12  ;;  %v8064_v44 = vmov 0  ;;  %v2553_v4 = vadd.s32 480, %v5781_v29  ;;  %2435 = vmatpush.bf16.msrb.mxu2 %v6009_v47 }
 0x593   :  { %v8065_v44 = vsel %vm6309_vm6, 4294967295, %v8064_v44  ;;  %v2404_v38 = vmax.f32 %v2369_v48, 0.0  ;;  %vm8066_vm7 = vnez %v7998_v21  ;;  %vm8067_vm9 = vnez %v7993_v16  ;;  %vm6323_vm13 = vmand %vm3021_vm1, %vm6285_vm15 }
 0x594   :  { %vm8068_vm8 = vmpackc.low %vm8066_vm7, %vm8067_vm9  ;;  %v2903_v53 = vshra.s32 %v2707_v57, 1  ;;  %v2904_v14 = vshra.s32 %v2708_v31, 1  ;;  %v3095_v2 = vshra.s32 %v2771_v1, 1  ;;  %v3096_v16 = vshra.s32 %v2772_v41, 1  ;;  %2474 = vmatpush.bf16.msra.mxu0 %v6029_v15 }
 0x595   :  { %3706 = vmatpush.bf16.msk.msrb.mxu1 %vm8068_vm8, %v3814_v11  ;;  %vm8071_vm6 = vmpackc.low %vm8049_vm0, %vm6110_vm11  ;;  %v2554_v21 = vadd.s32 488, %v5781_v29  ;;  %v2617_v34 = vshra.s32 %v2553_v4, 8  ;;  %v2681_v39 = vand.u32 255, %v2553_v4  ;;  %v2417_v50 = vpack.c.bf16 %v2404_v38, %v2400_v10 }
 0x596   :  { %3686 = vmatpush.bf16.msk.msra.mxu2 %vm8071_vm6, %v3814_v11  ;;  %vm6335_vm7 = vmand %vm3022_vm4, %vm6290_vm14  ;;  %vm6346_vm0 = vcmp.eq.s32.totalorder %v2903_v53, %v5793_v37  ;;  %vm6351_vm6 = vcmp.eq.s32.totalorder %v2904_v14, %v5793_v37  ;;  %vm6356_vm4 = vcmp.eq.s32.totalorder %v3095_v2, %v5795_v7  ;;  %vm6371_vm1 = vcmp.eq.s32.totalorder %v3096_v16, %v5795_v7 }
 0x597   :  { %vm3687_vm11 = vmpackc.low %vm6335_vm7, %vm6323_vm13  ;;  %v2618_v45 = vshra.s32 %v2554_v21, 8  ;;  %v2682_v63 = vand.u32 255, %v2554_v21  ;;  %v2745_v58 = vshra.s32 %v2681_v39, 4  ;;  %vm8083_vm9 = vcmask 261120   ;;  %2460 = vmatpush.bf16.msrb.mxu3 %v2417_v50 }
 0x598   :  { %vm8080_vm15 = vmpackc.low %vm6245_vm12, %vm6234_vm3  ;;  %3681 = vmatmul.msk.bf16.vlgmr.msrb.gmra.mxu2 %vm8083_vm9, %v6151_v25  ;;  %vm8085_vm12 = vnez %v8065_v44  ;;  %v2809_v61 = vand.u32 15, %v2681_v39  ;;  %vm6388_vm8 = vcmp.eq.s32.totalorder %v2617_v34, %v5791_v12  ;;  %v2503_v30 = vadd.s32 80, %v5781_v29 }
 0x599   :  { %3734 = vmatpush.bf16.msk.msrb.mxu0 %vm8080_vm15, %v3814_v11  ;;  %vm3031_vm14 = vmand %vm6304_vm5, %vm6346_vm0  ;;  %v2504_v36 = vadd.s32 88, %v5781_v29  ;;  %v2746_v62 = vshra.s32 %v2682_v63, 4  ;;  %v2810_v19 = vand.u32 15, %v2682_v63  ;;  %v2941_v27 = vshra.s32 %v2745_v58, 1 }
 0x59a   :  { %vm8084_vm3 = vmpackc.low %vm6218_vm10, %vm8053_vm2  ;;  %3688 = vmatpush.bf16.msk.msra.mxu2 %vm3687_vm11, %v3814_v11  ;;  %vm6407_vm2 = vcmp.eq.s32.totalorder %v2618_v45, %v5791_v12  ;;  %v3133_v23 = vshra.s32 %v2809_v61, 1  ;;  %v2567_v0 = vshra.s32 %v2503_v30, 8  ;;  %v2631_v22 = vand.u32 255, %v2503_v30 }
 0x59b   :  { %3708 = vmatpush.bf16.msk.msrb.mxu1 %vm8084_vm3, %v3814_v11  ;;  %vm3032_vm5 = vmand %vm8085_vm12, %vm6351_vm6  ;;  %v2568_v56 = vshra.s32 %v2504_v36, 8  ;;  %v2942_v6 = vshra.s32 %v2746_v62, 1  ;;  %vm3005_vm11 = vcmp.eq.s32.totalorder %v2941_v27, %v5793_v37  ;;  %v3134_v43 = vshra.s32 %v2810_v19, 1  ;;  %2461 = vmatpush.bf16.msrb.mxu3 %v6117_v60 }
 0x59c   :  { %vm6402_vm10 = vmand %vm3031_vm14, %vm6356_vm4  ;;  %v2632_v35 = vand.u32 255, %v2504_v36  ;;  %vm3197_vm4 = vcmp.eq.s32.totalorder %v3133_v23, %v5795_v7  ;;  %v2695_v55 = vshra.s32 %v2631_v22, 4  ;;  %v2759_v8 = vand.u32 15, %v2631_v22 }
 0x59d   :  { %vm8092_vm0 = vmmov %vm8083_vm9  ;;  %vm6424_vm15 = vcmp.eq.s32.totalorder %v2567_v0, %v5791_v12  ;;  %vm3006_vm14 = vcmp.eq.s32.totalorder %v2942_v6, %v5793_v37  ;;  %vm6437_vm12 = vcmp.eq.s32.totalorder %v2568_v56, %v5791_v12  ;;  %v2539_v31 = vadd.s32 368, %v5781_v29 }
 0x59e   :  { %3684 = vmatmul.msk.bf16.vlgmr.msra.gmra.mxu0 %vm8092_vm0, %v6151_v25  ;;  %vm3224_vm13 = vmand %vm3032_vm5, %vm6371_vm1  ;;  %vm3198_vm1 = vcmp.eq.s32.totalorder %v3134_v43, %v5795_v7  ;;  %v2696_v28 = vshra.s32 %v2632_v35, 4  ;;  %v2760_v18 = vand.u32 15, %v2632_v35  ;;  %v2891_v48 = vshra.s32 %v2695_v55, 1 }
 0x59f   :  { %vm3709_vm7 = vmpackc.low %vm3224_vm13, %vm6402_vm10  ;;  %v3083_v57 = vshra.s32 %v2759_v8, 1  ;;  %v2540_v32 = vadd.s32 376, %v5781_v29  ;;  %v2513_v44 = vadd.s32 160, %v5781_v29  ;;  %v2603_v38 = vshra.s32 %v2539_v31, 8 }
 0x5a0   :  { %3710 = vmatpush.bf16.msk.msrb.mxu1 %vm3709_vm7, %v3814_v11  ;;  %vm3069_vm6 = vmand %vm6388_vm8, %vm3005_vm11  ;;  %v2892_v1 = vshra.s32 %v2696_v28, 1  ;;  %v3084_v41 = vshra.s32 %v2760_v18, 1  ;;  %v2667_v3 = vand.u32 255, %v2539_v31  ;;  %v2514_v21 = vadd.s32 168, %v5781_v29 }
 0x5a1   :  { %vm6430_vm9 = vmand %vm3069_vm6, %vm3197_vm4  ;;  %v2668_v14 = vand.u32 255, %v2540_v32  ;;  %vm6470_vm4 = vcmp.eq.s32.totalorder %v2603_v38, %v5791_v12  ;;  %v2577_v54 = vshra.s32 %v2513_v44, 8  ;;  %v2641_v63 = vand.u32 255, %v2513_v44 }
 0x5a2   :  { %vm3070_vm3 = vmand %vm6407_vm2, %vm3006_vm14  ;;  %vm6449_vm2 = vcmp.eq.s32.totalorder %v2891_v48, %v5793_v37  ;;  %vm6456_vm13 = vcmp.eq.s32.totalorder %v2892_v1, %v5793_v37  ;;  %vm3148_vm11 = vcmp.eq.s32.totalorder %v3084_v41, %v5795_v7  ;;  %v2731_v2 = vshra.s32 %v2667_v3, 4 }
 0x5a3   :  { %vm3262_vm5 = vmand %vm3070_vm3, %vm3198_vm1  ;;  %v2795_v47 = vand.u32 15, %v2667_v3  ;;  %v2732_v39 = vshra.s32 %v2668_v14, 4  ;;  %v2796_v50 = vand.u32 15, %v2668_v14  ;;  %v2578_v45 = vshra.s32 %v2514_v21, 8 }
 0x5a4   :  { %vm8099_vm8 = vmmov %vm8092_vm0  ;;  %vm3147_vm0 = vcmp.eq.s32.totalorder %v3083_v57, %v5795_v7  ;;  %v2927_v10 = vshra.s32 %v2731_v2, 1  ;;  %v2642_v13 = vand.u32 255, %v2514_v21  ;;  %vm6487_vm3 = vcmp.eq.s32.totalorder %v2577_v54, %v5791_v12 }
 0x5a5   :  { %3683 = vmatmul.msk.bf16.vlgmr.msrb.gmra.mxu3 %vm8099_vm8, %v6151_v25  ;;  %vm3735_vm10 = vmpackc.low %vm3262_vm5, %vm6430_vm9  ;;  %v2604_v25 = vshra.s32 %v2540_v32, 8  ;;  %v3119_v15 = vshra.s32 %v2795_v47, 1  ;;  %v2928_v58 = vshra.s32 %v2732_v39, 1  ;;  %v3120_v61 = vshra.s32 %v2796_v50, 1 }
 0x5a6   :  { %3736 = vmatpush.bf16.msk.msrb.mxu0 %vm3735_vm10, %v3814_v11  ;;  %vm3019_vm7 = vmand %vm6424_vm15, %vm6449_vm2  ;;  %v2705_v51 = vshra.s32 %v2641_v63, 4  ;;  %v2769_v62 = vand.u32 15, %v2641_v63  ;;  %v2706_v9 = vshra.s32 %v2642_v13, 4  ;;  %v2770_v27 = vand.u32 15, %v2642_v13 }
 0x5a7   :  { %vm3020_vm6 = vmand %vm6437_vm12, %vm6456_vm13  ;;  %vm6480_vm15 = vcmp.eq.s32.totalorder %v2604_v25, %v5791_v12  ;;  %vm6493_vm12 = vcmp.eq.s32.totalorder %v2927_v10, %v5793_v37  ;;  %vm3183_vm5 = vcmp.eq.s32.totalorder %v3119_v15, %v5795_v7  ;;  %vm6499_vm8 = vcmp.eq.s32.totalorder %v2928_v58, %v5793_v37 }
 0x5a8   :  { %vm6475_vm14 = vmand %vm3019_vm7, %vm3147_vm0  ;;  %vm3184_vm2 = vcmp.eq.s32.totalorder %v3120_v61, %v5795_v7  ;;  %vm6513_vm13 = vcmp.eq.s32.totalorder %v2578_v45, %v5791_v12  ;;  %v2901_v0 = vshra.s32 %v2705_v51, 1  ;;  %v3093_v56 = vshra.s32 %v2769_v62, 1 }
 0x5a9   :  { %vm3212_vm1 = vmand %vm3020_vm6, %vm3148_vm11  ;;  %v2551_v22 = vadd.s32 464, %v5781_v29  ;;  %v2902_v43 = vshra.s32 %v2706_v9, 1  ;;  %v3094_v35 = vshra.s32 %v2770_v27, 1  ;;  %v2552_v55 = vadd.s32 472, %v5781_v29 }
 0x5aa   :  { %vm3689_vm9 = vmpackc.low %vm3212_vm1, %vm6475_vm14  ;;  %v2501_v8 = vadd.s32 64, %v5781_v29  ;;  %vm6525_vm6 = vcmp.eq.s32.totalorder %v2901_v0, %v5793_v37  ;;  %v2502_v44 = vadd.s32 72, %v5781_v29  ;;  %v2537_v30 = vadd.s32 352, %v5781_v29 }
 0x5ab   :  { %3690 = vmatpush.bf16.msk.msra.mxu2 %vm3689_vm9, %v3814_v11  ;;  %vm3055_vm10 = vmand %vm6470_vm4, %vm6493_vm12  ;;  %vm6530_vm4 = vcmp.eq.s32.totalorder %v3093_v56, %v5795_v7  ;;  %v2615_v28 = vshra.s32 %v2551_v22, 8  ;;  %v2679_v18 = vand.u32 255, %v2551_v22  ;;  %vm6542_vm1 = vcmp.eq.s32.totalorder %v3094_v35, %v5795_v7 }
 0x5ac   :  { %vm3056_vm0 = vmand %vm6480_vm15, %vm6499_vm8  ;;  %vm6537_vm15 = vcmp.eq.s32.totalorder %v2902_v43, %v5793_v37  ;;  %v2616_v57 = vshra.s32 %v2552_v55, 8  ;;  %v2680_v31 = vand.u32 255, %v2552_v55  ;;  %v2565_v53 = vshra.s32 %v2501_v8, 8 }
 0x5ad   :  { %vm6518_vm7 = vmand %vm3055_vm10, %vm3183_vm5  ;;  %v2743_v1 = vshra.s32 %v2679_v18, 4  ;;  %v2807_v41 = vand.u32 15, %v2679_v18  ;;  %vm6552_vm12 = vcmp.eq.s32.totalorder %v2615_v28, %v5791_v12  ;;  %v2566_v47 = vshra.s32 %v2502_v44, 8 }
 0x5ae   :  { %vm3248_vm11 = vmand %vm3056_vm0, %vm3184_vm2  ;;  %v2744_v4 = vshra.s32 %v2680_v31, 4  ;;  %v2808_v38 = vand.u32 15, %v2680_v31  ;;  %vm6562_vm8 = vcmp.eq.s32.totalorder %v2616_v57, %v5791_v12  ;;  %v2629_v16 = vand.u32 255, %v2501_v8 }
 0x5af   :  { %vm3717_vm14 = vmpackc.low %vm3248_vm11, %vm6518_vm7  ;;  %v2939_v14 = vshra.s32 %v2743_v1, 1  ;;  %v3131_v2 = vshra.s32 %v2807_v41, 1  ;;  %v2630_v39 = vand.u32 255, %v2502_v44  ;;  %vm6575_vm2 = vcmp.eq.s32.totalorder %v2565_v53, %v5791_v12 }
 0x5b0   :  { %3718 = vmatpush.bf16.msk.msra.mxu3 %vm3717_vm14, %v3814_v11  ;;  %vm3029_vm9 = vmand %vm6487_vm3, %vm6525_vm6  ;;  %v2940_v21 = vshra.s32 %v2744_v4, 1  ;;  %v3132_v34 = vshra.s32 %v2808_v38, 1  ;;  %v2693_v54 = vshra.s32 %v2629_v16, 4  ;;  %v2757_v10 = vand.u32 15, %v2629_v16 }
 0x5b1   :  { %vm3030_vm5 = vmand %vm6513_vm13, %vm6537_vm15  ;;  %vm6582_vm13 = vcmp.eq.s32.totalorder %v2939_v14, %v5793_v37  ;;  %vm3195_vm7 = vcmp.eq.s32.totalorder %v3131_v2, %v5795_v7  ;;  %v2694_v45 = vshra.s32 %v2630_v39, 4  ;;  %v2758_v63 = vand.u32 15, %v2630_v39 }
 0x5b2   :  { %vm6568_vm3 = vmand %vm3029_vm9, %vm6530_vm4  ;;  %vm6589_vm11 = vcmp.eq.s32.totalorder %v2940_v21, %v5793_v37  ;;  %vm3196_vm4 = vcmp.eq.s32.totalorder %v3132_v34, %v5795_v7  ;;  %vm6603_vm15 = vcmp.eq.s32.totalorder %v2566_v47, %v5791_v12  ;;  %v2889_v61 = vshra.s32 %v2693_v54, 1 }
 0x5b3   :  { %vm3222_vm10 = vmand %vm3030_vm5, %vm6542_vm1  ;;  %v3081_v13 = vshra.s32 %v2757_v10, 1  ;;  %v2890_v51 = vshra.s32 %v2694_v45, 1  ;;  %v3082_v62 = vshra.s32 %v2758_v63, 1  ;;  %v2538_v19 = vadd.s32 360, %v5781_v29 }
 0x5b4   :  { %vm3711_vm0 = vmpackc.low %vm3222_vm10, %vm6568_vm3  ;;  %v2511_v9 = vadd.s32 144, %v5781_v29  ;;  %v2601_v0 = vshra.s32 %v2537_v30, 8  ;;  %v2665_v56 = vand.u32 255, %v2537_v30  ;;  %v2512_v5 = vadd.s32 152, %v5781_v29 }
 0x5b5   :  { %3712 = vmatpush.bf16.msk.msrb.mxu1 %vm3711_vm0, %v3814_v11  ;;  %vm3067_vm6 = vmand %vm6552_vm12, %vm6582_vm13  ;;  %vm6615_vm12 = vcmp.eq.s32.totalorder %v2889_v61, %v5793_v37  ;;  %vm6620_vm5 = vcmp.eq.s32.totalorder %v3081_v13, %v5795_v7  ;;  %vm6627_vm3 = vcmp.eq.s32.totalorder %v2890_v51, %v5793_v37  ;;  %vm6632_vm10 = vcmp.eq.s32.totalorder %v3082_v62, %v5795_v7 }
 0x5b6   :  { %vm3068_vm14 = vmand %vm6562_vm8, %vm6589_vm11  ;;  %v2602_v43 = vshra.s32 %v2538_v19, 8  ;;  %v2666_v35 = vand.u32 255, %v2538_v19  ;;  %v2729_v55 = vshra.s32 %v2665_v56, 4  ;;  %v2793_v8 = vand.u32 15, %v2665_v56 }
 0x5b7   :  { %vm6608_vm1 = vmand %vm3067_vm6, %vm3195_vm7  ;;  %vm6642_vm13 = vcmp.eq.s32.totalorder %v2601_v0, %v5791_v12  ;;  %v2575_v48 = vshra.s32 %v2511_v9, 8  ;;  %v2576_v41 = vshra.s32 %v2512_v5, 8  ;;  %v2639_v32 = vand.u32 255, %v2511_v9 }
 0x5b8   :  { %vm3260_vm9 = vmand %vm3068_vm14, %vm3196_vm4  ;;  %v2730_v28 = vshra.s32 %v2666_v35, 4  ;;  %v2794_v18 = vand.u32 15, %v2666_v35  ;;  %vm6652_vm11 = vcmp.eq.s32.totalorder %v2602_v43, %v5791_v12  ;;  %v2925_v31 = vshra.s32 %v2729_v55, 1 }
 0x5b9   :  { %vm3737_vm8 = vmpackc.low %vm3260_vm9, %vm6608_vm1  ;;  %v3117_v1 = vshra.s32 %v2793_v8, 1  ;;  %v2640_v38 = vand.u32 255, %v2512_v5  ;;  %vm6665_vm4 = vcmp.eq.s32.totalorder %v2575_v48, %v5791_v12  ;;  %v2703_v25 = vshra.s32 %v2639_v32, 4 }
 0x5ba   :  { %3738 = vmatpush.bf16.msk.msrb.mxu0 %vm3737_vm8, %v3814_v11  ;;  %vm3017_vm0 = vmand %vm6575_vm2, %vm6615_vm12  ;;  %v2926_v44 = vshra.s32 %v2730_v28, 1  ;;  %v3118_v4 = vshra.s32 %v2794_v18, 1  ;;  %v2767_v14 = vand.u32 15, %v2639_v32  ;;  %v2549_v50 = vadd.s32 448, %v5781_v29 }
 0x5bb   :  { %vm3018_vm7 = vmand %vm6603_vm15, %vm6627_vm3  ;;  %vm6672_vm15 = vcmp.eq.s32.totalorder %v2925_v31, %v5793_v37  ;;  %vm3181_vm1 = vcmp.eq.s32.totalorder %v3117_v1, %v5795_v7  ;;  %v2704_v47 = vshra.s32 %v2640_v38, 4  ;;  %v2768_v16 = vand.u32 15, %v2640_v38 }
 0x5bc   :  { %vm6658_vm2 = vmand %vm3017_vm0, %vm6620_vm5  ;;  %vm6679_vm9 = vcmp.eq.s32.totalorder %v2926_v44, %v5793_v37  ;;  %vm3182_vm5 = vcmp.eq.s32.totalorder %v3118_v4, %v5795_v7  ;;  %vm6693_vm3 = vcmp.eq.s32.totalorder %v2576_v41, %v5791_v12  ;;  %v2899_v34 = vshra.s32 %v2703_v25, 1 }
 0x5bd   :  { %vm3210_vm6 = vmand %vm3018_vm7, %vm6632_vm10  ;;  %v3091_v39 = vshra.s32 %v2767_v14, 1  ;;  %v2900_v54 = vshra.s32 %v2704_v47, 1  ;;  %v3092_v10 = vshra.s32 %v2768_v16, 1  ;;  %v2550_v15 = vadd.s32 456, %v5781_v29 }
 0x5be   :  { %vm3691_vm14 = vmpackc.low %vm3210_vm6, %vm6658_vm2  ;;  %v2499_v45 = vadd.s32 48, %v5781_v29  ;;  %v2613_v61 = vshra.s32 %v2549_v50, 8  ;;  %v2677_v13 = vand.u32 255, %v2549_v50  ;;  %v2500_v23 = vadd.s32 56, %v5781_v29 }
 0x5bf   :  { %3692 = vmatpush.bf16.msk.msra.mxu2 %vm3691_vm14, %v3814_v11  ;;  %vm3053_vm12 = vmand %vm6642_vm13, %vm6672_vm15  ;;  %vm6705_vm13 = vcmp.eq.s32.totalorder %v2899_v34, %v5793_v37  ;;  %vm6710_vm7 = vcmp.eq.s32.totalorder %v3091_v39, %v5795_v7  ;;  %vm6717_vm2 = vcmp.eq.s32.totalorder %v2900_v54, %v5793_v37  ;;  %vm6722_vm6 = vcmp.eq.s32.totalorder %v3092_v10, %v5795_v7 }
 0x5c0   :  { %vm3054_vm8 = vmand %vm6652_vm11, %vm6679_vm9  ;;  %v2614_v51 = vshra.s32 %v2550_v15, 8  ;;  %v2678_v62 = vand.u32 255, %v2550_v15  ;;  %v2741_v19 = vshra.s32 %v2677_v13, 4  ;;  %v2805_v9 = vand.u32 15, %v2677_v13 }
 0x5c1   :  { %vm6698_vm10 = vmand %vm3053_vm12, %vm3181_vm1  ;;  %vm6732_vm15 = vcmp.eq.s32.totalorder %v2613_v61, %v5791_v12  ;;  %v2563_v6 = vshra.s32 %v2499_v45, 8  ;;  %v2564_v8 = vshra.s32 %v2500_v23, 8  ;;  %v2627_v59 = vand.u32 255, %v2499_v45 }
 0x5c2   :  { %vm3246_vm0 = vmand %vm3054_vm8, %vm3182_vm5  ;;  %v2742_v0 = vshra.s32 %v2678_v62, 4  ;;  %v2806_v56 = vand.u32 15, %v2678_v62  ;;  %vm6742_vm9 = vcmp.eq.s32.totalorder %v2614_v51, %v5791_v12  ;;  %v2937_v35 = vshra.s32 %v2741_v19, 1 }
 0x5c3   :  { %vm3719_vm11 = vmpackc.low %vm3246_vm0, %vm6698_vm10  ;;  %v3129_v55 = vshra.s32 %v2805_v9, 1  ;;  %v2628_v18 = vand.u32 255, %v2500_v23  ;;  %vm6755_vm5 = vcmp.eq.s32.totalorder %v2563_v6, %v5791_v12  ;;  %v2691_v57 = vshra.s32 %v2627_v59, 4 }
 0x5c4   :  { %3720 = vmatpush.bf16.msk.msra.mxu3 %vm3719_vm11, %v3814_v11  ;;  %vm3027_vm14 = vmand %vm6665_vm4, %vm6705_vm13  ;;  %v2938_v5 = vshra.s32 %v2742_v0, 1  ;;  %v3130_v28 = vshra.s32 %v2806_v56, 1  ;;  %v2755_v31 = vand.u32 15, %v2627_v59  ;;  %v2535_v3 = vadd.s32 336, %v5781_v29 }
 0x5c5   :  { %vm3028_vm1 = vmand %vm6693_vm3, %vm6717_vm2  ;;  %vm6762_vm3 = vcmp.eq.s32.totalorder %v2937_v35, %v5793_v37  ;;  %vm3193_vm10 = vcmp.eq.s32.totalorder %v3129_v55, %v5795_v7  ;;  %v2692_v41 = vshra.s32 %v2628_v18, 4  ;;  %v2756_v32 = vand.u32 15, %v2628_v18 }
 0x5c6   :  { %vm6748_vm4 = vmand %vm3027_vm14, %vm6710_vm7  ;;  %vm6769_vm0 = vcmp.eq.s32.totalorder %v2938_v5, %v5793_v37  ;;  %vm3194_vm7 = vcmp.eq.s32.totalorder %v3130_v28, %v5795_v7  ;;  %vm6783_vm2 = vcmp.eq.s32.totalorder %v2564_v8, %v5791_v12  ;;  %v2887_v4 = vshra.s32 %v2691_v57, 1 }
 0x5c7   :  { %vm3220_vm12 = vmand %vm3028_vm1, %vm6722_vm6  ;;  %v3079_v38 = vshra.s32 %v2755_v31, 1  ;;  %v2888_v25 = vshra.s32 %v2692_v41, 1  ;;  %v3080_v14 = vshra.s32 %v2756_v32, 1  ;;  %v2536_v2 = vadd.s32 344, %v5781_v29 }
 0x5c8   :  { %vm3713_vm8 = vmpackc.low %vm3220_vm12, %vm6748_vm4  ;;  %v2509_v47 = vadd.s32 128, %v5781_v29  ;;  %v2599_v34 = vshra.s32 %v2535_v3, 8  ;;  %v2663_v39 = vand.u32 255, %v2535_v3  ;;  %v2510_v58 = vadd.s32 136, %v5781_v29 }
 0x5c9   :  { %3714 = vmatpush.bf16.msk.msrb.mxu1 %vm3713_vm8, %v3814_v11  ;;  %vm3065_vm13 = vmand %vm6732_vm15, %vm6762_vm3  ;;  %vm6795_vm15 = vcmp.eq.s32.totalorder %v2887_v4, %v5793_v37  ;;  %vm6800_vm1 = vcmp.eq.s32.totalorder %v3079_v38, %v5795_v7  ;;  %vm6807_vm4 = vcmp.eq.s32.totalorder %v2888_v25, %v5793_v37  ;;  %vm6812_vm12 = vcmp.eq.s32.totalorder %v3080_v14, %v5795_v7 }
 0x5ca   :  { %vm3066_vm11 = vmand %vm6742_vm9, %vm6769_vm0  ;;  %v2600_v54 = vshra.s32 %v2536_v2, 8  ;;  %v2664_v10 = vand.u32 255, %v2536_v2  ;;  %v2727_v15 = vshra.s32 %v2663_v39, 4  ;;  %v2791_v45 = vand.u32 15, %v2663_v39 }
 0x5cb   :  { %vm6788_vm6 = vmand %vm3065_vm13, %vm3193_vm10  ;;  %vm6822_vm3 = vcmp.eq.s32.totalorder %v2599_v34, %v5791_v12  ;;  %v2573_v36 = vshra.s32 %v2509_v47, 8  ;;  %v2574_v9 = vshra.s32 %v2510_v58, 8  ;;  %v2637_v27 = vand.u32 255, %v2509_v47 }
 0x5cc   :  { %vm3258_vm14 = vmand %vm3066_vm11, %vm3194_vm7  ;;  %v2728_v61 = vshra.s32 %v2664_v10, 4  ;;  %v2792_v13 = vand.u32 15, %v2664_v10  ;;  %vm6832_vm0 = vcmp.eq.s32.totalorder %v2600_v54, %v5791_v12  ;;  %v2923_v62 = vshra.s32 %v2727_v15, 1 }
 0x5cd   :  { %vm3739_vm9 = vmpackc.low %vm3258_vm14, %vm6788_vm6  ;;  %v3115_v19 = vshra.s32 %v2791_v45, 1  ;;  %v2638_v56 = vand.u32 255, %v2510_v58  ;;  %vm6845_vm7 = vcmp.eq.s32.totalorder %v2573_v36, %v5791_v12  ;;  %v2701_v43 = vshra.s32 %v2637_v27, 4 }
 0x5ce   :  { %3740 = vmatpush.bf16.msk.msrb.mxu0 %vm3739_vm9, %v3814_v11  ;;  %vm3015_vm8 = vmand %vm6755_vm5, %vm6795_vm15  ;;  %v2924_v23 = vshra.s32 %v2728_v61, 1  ;;  %v3116_v0 = vshra.s32 %v2792_v13, 1  ;;  %v2765_v35 = vand.u32 15, %v2637_v27  ;;  %v2547_v60 = vadd.s32 432, %v5781_v29 }
 0x5cf   :  { %vm3016_vm10 = vmand %vm6783_vm2, %vm6807_vm4  ;;  %vm6852_vm2 = vcmp.eq.s32.totalorder %v2923_v62, %v5793_v37  ;;  %vm3179_vm6 = vcmp.eq.s32.totalorder %v3115_v19, %v5795_v7  ;;  %v2702_v8 = vshra.s32 %v2638_v56, 4  ;;  %v2766_v59 = vand.u32 15, %v2638_v56 }
 0x5d0   :  { %vm6838_vm5 = vmand %vm3015_vm8, %vm6800_vm1  ;;  %vm6859_vm14 = vcmp.eq.s32.totalorder %v2924_v23, %v5793_v37  ;;  %vm3180_vm1 = vcmp.eq.s32.totalorder %v3116_v0, %v5795_v7  ;;  %vm6873_vm4 = vcmp.eq.s32.totalorder %v2574_v9, %v5791_v12  ;;  %v2897_v28 = vshra.s32 %v2701_v43, 1 }
 0x5d1   :  { %vm3208_vm13 = vmand %vm3016_vm10, %vm6812_vm12  ;;  %v3089_v18 = vshra.s32 %v2765_v35, 1  ;;  %v2898_v57 = vshra.s32 %v2702_v8, 1  ;;  %v3090_v31 = vshra.s32 %v2766_v59, 1  ;;  %v2548_v1 = vadd.s32 440, %v5781_v29 }
 0x5d2   :  { %vm3693_vm11 = vmpackc.low %vm3208_vm13, %vm6838_vm5  ;;  %v2497_v41 = vadd.s32 32, %v5781_v29  ;;  %v2611_v4 = vshra.s32 %v2547_v60, 8  ;;  %v2675_v38 = vand.u32 255, %v2547_v60  ;;  %v2498_v21 = vadd.s32 40, %v5781_v29 }
 0x5d3   :  { %3694 = vmatpush.bf16.msk.msra.mxu2 %vm3693_vm11, %v3814_v11  ;;  %vm3051_vm15 = vmand %vm6822_vm3, %vm6852_vm2  ;;  %vm6885_vm3 = vcmp.eq.s32.totalorder %v2897_v28, %v5793_v37  ;;  %vm6890_vm10 = vcmp.eq.s32.totalorder %v3089_v18, %v5795_v7  ;;  %vm6897_vm5 = vcmp.eq.s32.totalorder %v2898_v57, %v5793_v37  ;;  %vm6902_vm13 = vcmp.eq.s32.totalorder %v3090_v31, %v5795_v7 }
 0x5d4   :  { %vm3052_vm9 = vmand %vm6832_vm0, %vm6859_vm14  ;;  %v2612_v25 = vshra.s32 %v2548_v1, 8  ;;  %v2676_v14 = vand.u32 255, %v2548_v1  ;;  %v2739_v2 = vshra.s32 %v2675_v38, 4  ;;  %v2803_v47 = vand.u32 15, %v2675_v38 }
 0x5d5   :  { %vm6878_vm12 = vmand %vm3051_vm15, %vm3179_vm6  ;;  %vm6912_vm2 = vcmp.eq.s32.totalorder %v2611_v4, %v5791_v12  ;;  %v2561_v24 = vshra.s32 %v2497_v41, 8  ;;  %v2562_v45 = vshra.s32 %v2498_v21, 8  ;;  %v2625_v63 = vand.u32 255, %v2497_v41 }
 0x5d6   :  { %vm3244_vm8 = vmand %vm3052_vm9, %vm3180_vm1  ;;  %v2740_v34 = vshra.s32 %v2676_v14, 4  ;;  %v2804_v39 = vand.u32 15, %v2676_v14  ;;  %vm6922_vm14 = vcmp.eq.s32.totalorder %v2612_v25, %v5791_v12  ;;  %v2935_v10 = vshra.s32 %v2739_v2, 1 }
 0x5d7   :  { %vm3721_vm0 = vmpackc.low %vm3244_vm8, %vm6878_vm12  ;;  %v3127_v15 = vshra.s32 %v2803_v47, 1  ;;  %v2626_v13 = vand.u32 255, %v2498_v21  ;;  %vm6935_vm1 = vcmp.eq.s32.totalorder %v2561_v24, %v5791_v12  ;;  %v2689_v51 = vshra.s32 %v2625_v63, 4 }
 0x5d8   :  { %3722 = vmatpush.bf16.msk.msra.mxu3 %vm3721_vm0, %v3814_v11  ;;  %vm3025_vm11 = vmand %vm6845_vm7, %vm6885_vm3  ;;  %v2936_v58 = vshra.s32 %v2740_v34, 1  ;;  %v3128_v61 = vshra.s32 %v2804_v39, 1  ;;  %v2753_v62 = vand.u32 15, %v2625_v63  ;;  %v2533_v22 = vadd.s32 320, %v5781_v29 }
 0x5d9   :  { %vm3026_vm6 = vmand %vm6873_vm4, %vm6897_vm5  ;;  %vm6942_vm4 = vcmp.eq.s32.totalorder %v2935_v10, %v5793_v37  ;;  %vm3191_vm12 = vcmp.eq.s32.totalorder %v3127_v15, %v5795_v7  ;;  %v2690_v9 = vshra.s32 %v2626_v13, 4  ;;  %v2754_v27 = vand.u32 15, %v2626_v13 }
 0x5da   :  { %vm6928_vm7 = vmand %vm3025_vm11, %vm6890_vm10  ;;  %vm6949_vm8 = vcmp.eq.s32.totalorder %v2936_v58, %v5793_v37  ;;  %vm3192_vm10 = vcmp.eq.s32.totalorder %v3128_v61, %v5795_v7  ;;  %vm6963_vm5 = vcmp.eq.s32.totalorder %v2562_v45, %v5791_v12  ;;  %v2885_v0 = vshra.s32 %v2689_v51, 1 }
 0x5db   :  { %vm3218_vm15 = vmand %vm3026_vm6, %vm6902_vm13  ;;  %v3077_v56 = vshra.s32 %v2753_v62, 1  ;;  %v2886_v43 = vshra.s32 %v2690_v9, 1  ;;  %v3078_v35 = vshra.s32 %v2754_v27, 1  ;;  %v2534_v55 = vadd.s32 328, %v5781_v29 }
 0x5dc   :  { %vm3715_vm9 = vmpackc.low %vm3218_vm15, %vm6928_vm7  ;;  %v2545_v8 = vadd.s32 416, %v5781_v29  ;;  %v2597_v28 = vshra.s32 %v2533_v22, 8  ;;  %v2661_v18 = vand.u32 255, %v2533_v22  ;;  %v2546_v41 = vadd.s32 424, %v5781_v29 }
 0x5dd   :  { %3716 = vmatpush.bf16.msk.msrb.mxu1 %vm3715_vm9, %v3814_v11  ;;  %vm3063_vm3 = vmand %vm6912_vm2, %vm6942_vm4  ;;  %vm6975_vm2 = vcmp.eq.s32.totalorder %v2885_v0, %v5793_v37  ;;  %vm6980_vm6 = vcmp.eq.s32.totalorder %v3077_v56, %v5795_v7  ;;  %vm6990_vm7 = vcmp.eq.s32.totalorder %v2886_v43, %v5793_v37  ;;  %vm6995_vm15 = vcmp.eq.s32.totalorder %v3078_v35, %v5795_v7 }
 0x5de   :  { %vm3064_vm0 = vmand %vm6922_vm14, %vm6949_vm8  ;;  %v2598_v57 = vshra.s32 %v2534_v55, 8  ;;  %v2662_v31 = vand.u32 255, %v2534_v55  ;;  %v2725_v40 = vshra.s32 %v2661_v18, 4  ;;  %vm7005_vm4 = vcmp.eq.s32.totalorder %v2597_v28, %v5791_v12 }
 0x5df   :  { %vm6968_vm13 = vmand %vm3063_vm3, %vm3191_vm12  ;;  %v2609_v38 = vshra.s32 %v2545_v8, 8  ;;  %v2610_v14 = vshra.s32 %v2546_v41, 8  ;;  %v2673_v2 = vand.u32 255, %v2545_v8  ;;  %v2674_v21 = vand.u32 255, %v2546_v41 }
 0x5e0   :  { %vm3256_vm11 = vmand %vm3064_vm0, %vm3192_vm10  ;;  %3386 = vmatmul.bf16.vlgmr.msrb.gmra.mxu1 %v3330_v17  ;;  %v2789_v17 = vand.u32 15, %v2661_v18  ;;  %v2726_v32 = vshra.s32 %v2662_v31, 4  ;;  %v2790_v44 = vand.u32 15, %v2662_v31  ;;  %vm7015_vm8 = vcmp.eq.s32.totalorder %v2598_v57, %v5791_v12 }
 0x5e1   :  { %vm3741_vm14 = vmpackc.low %vm3256_vm11, %vm6968_vm13  ;;  %v2921_v53 = vshra.s32 %v2725_v40, 1  ;;  %vm7028_vm10 = vcmp.eq.s32.totalorder %v2609_v38, %v5791_v12  ;;  %v2737_v50 = vshra.s32 %v2673_v2, 4  ;;  %v2801_v24 = vand.u32 15, %v2673_v2 }
 0x5e2   :  { %3742 = vmatpush.bf16.msk.msrb.mxu0 %vm3741_vm14, %v3814_v11  ;;  %vm3013_vm9 = vmand %vm6935_vm1, %vm6975_vm2  ;;  %v3113_v25 = vshra.s32 %v2789_v17, 1  ;;  %v2922_v47 = vshra.s32 %v2726_v32, 1  ;;  %v3114_v16 = vshra.s32 %v2790_v44, 1  ;;  %v2738_v10 = vshra.s32 %v2674_v21, 4 }
 0x5e3   :  { %vm3014_vm12 = vmand %vm6963_vm5, %vm6990_vm7  ;;  %vm7035_vm5 = vcmp.eq.s32.totalorder %v2921_v53, %v5793_v37  ;;  %v2802_v15 = vand.u32 15, %v2674_v21  ;;  %vm7056_vm7 = vcmp.eq.s32.totalorder %v2610_v14, %v5791_v12  ;;  %v2933_v63 = vshra.s32 %v2737_v50, 1 }
 0x5e4   :  { %vm7021_vm1 = vmand %vm3013_vm9, %vm6980_vm6  ;;  %vm3177_vm13 = vcmp.eq.s32.totalorder %v3113_v25, %v5795_v7  ;;  %vm7042_vm11 = vcmp.eq.s32.totalorder %v2922_v47, %v5793_v37  ;;  %vm3178_vm6 = vcmp.eq.s32.totalorder %v3114_v16, %v5795_v7  ;;  %v3125_v58 = vshra.s32 %v2801_v24, 1 }
 0x5e5   :  { %vm3206_vm3 = vmand %vm3014_vm12, %vm6995_vm15  ;;  %v2495_v61 = vadd.s32 16, %v5781_v29  ;;  %v2934_v30 = vshra.s32 %v2738_v10, 1  ;;  %v3126_v36 = vshra.s32 %v2802_v15, 1  ;;  %v2496_v51 = vadd.s32 24, %v5781_v29 }
 0x5e6   :  { %vm3695_vm0 = vmpackc.low %vm3206_vm3, %vm7021_vm1  ;;  %v2531_v62 = vadd.s32 304, %v5781_v29  ;;  %vm7073_vm12 = vcmp.eq.s32.totalorder %v3125_v58, %v5795_v7  ;;  %v2532_v8 = vadd.s32 312, %v5781_v29  ;;  %v2543_v16 = vadd.s32 400, %v5781_v29 }
 0x5e7   :  { %3696 = vmatpush.bf16.msk.msra.mxu2 %vm3695_vm0, %v3814_v11  ;;  %vm3049_vm2 = vmand %vm7005_vm4, %vm7035_vm5  ;;  %vm7068_vm4 = vcmp.eq.s32.totalorder %v2933_v63, %v5793_v37  ;;  %v2559_v27 = vshra.s32 %v2495_v61, 8  ;;  %v2623_v23 = vand.u32 255, %v2495_v61  ;;  %vm7080_vm1 = vcmp.eq.s32.totalorder %v2934_v30, %v5793_v37 }
 0x5e8   :  { %vm3050_vm14 = vmand %vm7015_vm8, %vm7042_vm11  ;;  %vm7085_vm3 = vcmp.eq.s32.totalorder %v3126_v36, %v5795_v7  ;;  %v2560_v22 = vshra.s32 %v2496_v51, 8  ;;  %v2624_v6 = vand.u32 255, %v2496_v51  ;;  %v2595_v18 = vshra.s32 %v2531_v62, 8 }
 0x5e9   :  { %vm7061_vm15 = vmand %vm3049_vm2, %vm3177_vm13  ;;  %v2687_v43 = vshra.s32 %v2623_v23, 4  ;;  %v2751_v35 = vand.u32 15, %v2623_v23  ;;  %vm7095_vm5 = vcmp.eq.s32.totalorder %v2559_v27, %v5791_v12  ;;  %v2596_v31 = vshra.s32 %v2532_v8, 8 }
 0x5ea   :  { %vm3242_vm9 = vmand %vm3050_vm14, %vm3178_vm6  ;;  %v2688_v59 = vshra.s32 %v2624_v6, 4  ;;  %v2752_v5 = vand.u32 15, %v2624_v6  ;;  %vm7105_vm11 = vcmp.eq.s32.totalorder %v2560_v22, %v5791_v12  ;;  %v2659_v40 = vand.u32 255, %v2531_v62 }
 0x5eb   :  { %vm3723_vm8 = vmpackc.low %vm3242_vm9, %vm7061_vm15  ;;  %v2883_v48 = vshra.s32 %v2687_v43, 1  ;;  %v3075_v57 = vshra.s32 %v2751_v35, 1  ;;  %v2660_v41 = vand.u32 255, %v2532_v8  ;;  %vm7118_vm6 = vcmp.eq.s32.totalorder %v2595_v18, %v5791_v12 }
 0x5ec   :  { %3724 = vmatpush.bf16.msk.msra.mxu3 %vm3723_vm8, %v3814_v11  ;;  %vm3061_vm0 = vmand %vm7028_vm10, %vm7068_vm4  ;;  %v2884_v17 = vshra.s32 %v2688_v59, 1  ;;  %v3076_v1 = vshra.s32 %v2752_v5, 1  ;;  %v2723_v4 = vshra.s32 %v2659_v40, 4  ;;  %v2787_v38 = vand.u32 15, %v2659_v40  ;;  %v3762_v59 = vld [vmem:[%s7537_s2 + $0xc0] sm:$0xff] }
 0x5ed   :  { %vm3062_vm13 = vmand %vm7056_vm7, %vm7080_vm1  ;;  %vm7125_vm7 = vcmp.eq.s32.totalorder %v2883_v48, %v5793_v37  ;;  %vm3139_vm15 = vcmp.eq.s32.totalorder %v3075_v57, %v5795_v7  ;;  %v2724_v53 = vshra.s32 %v2660_v41, 4  ;;  %v2788_v25 = vand.u32 15, %v2660_v41  ;;  %v3680_v5 = vld [vmem:[%s7537_s2 + $0x80] sm:$0xff] }
 0x5ee   :  { %vm7111_vm10 = vmand %vm3061_vm0, %vm7073_vm12  ;;  %vm7132_vm9 = vcmp.eq.s32.totalorder %v2884_v17, %v5793_v37  ;;  %vm3140_vm12 = vcmp.eq.s32.totalorder %v3076_v1, %v5795_v7  ;;  %vm7146_vm1 = vcmp.eq.s32.totalorder %v2596_v31, %v5791_v12  ;;  %v2919_v2 = vshra.s32 %v2723_v4, 1 }
 0x5ef   :  { %vm3254_vm2 = vmand %vm3062_vm13, %vm7085_vm3  ;;  %v3111_v47 = vshra.s32 %v2787_v38, 1  ;;  %v2920_v34 = vshra.s32 %v2724_v53, 1  ;;  %v3112_v39 = vshra.s32 %v2788_v25, 1  ;;  %v2544_v50 = vadd.s32 408, %v5781_v29 }
 0x5f0   :  { %vm3743_vm14 = vmpackc.low %vm3254_vm2, %vm7111_vm10  ;;  %v2494_v24 = vadd.s32 8, %v5781_v29  ;;  %v2607_v15 = vshra.s32 %v2543_v16, 8  ;;  %v2671_v45 = vand.u32 255, %v2543_v16  ;;  %v2557_v62 = vshra.s32 %v5781_v29, 8 }
 0x5f1   :  { %3744 = vmatpush.bf16.msk.msrb.mxu0 %vm3743_vm14, %v3814_v11  ;;  %vm3011_vm4 = vmand %vm7095_vm5, %vm7125_vm7  ;;  %vm7158_vm5 = vcmp.eq.s32.totalorder %v2919_v2, %v5793_v37  ;;  %vm7163_vm13 = vcmp.eq.s32.totalorder %v3111_v47, %v5795_v7  ;;  %vm7170_vm10 = vcmp.eq.s32.totalorder %v2920_v34, %v5793_v37  ;;  %vm7175_vm2 = vcmp.eq.s32.totalorder %v3112_v39, %v5795_v7 }
 0x5f2   :  { %vm3012_vm8 = vmand %vm7105_vm11, %vm7132_vm9  ;;  %v2608_v61 = vshra.s32 %v2544_v50, 8  ;;  %v2672_v13 = vand.u32 255, %v2544_v50  ;;  %v2735_v30 = vshra.s32 %v2671_v45, 4  ;;  %v2799_v36 = vand.u32 15, %v2671_v45 }
 0x5f3   :  { %vm7151_vm3 = vmand %vm3011_vm4, %vm3139_vm15  ;;  %vm7185_vm7 = vcmp.eq.s32.totalorder %v2607_v15, %v5791_v12  ;;  %v2558_v23 = vshra.s32 %v2494_v24, 8  ;;  %v2621_v6 = vand.u32 255, %v5781_v29  ;;  %v2622_v43 = vand.u32 255, %v2494_v24 }
 0x5f4   :  { %vm3204_vm0 = vmand %vm3012_vm8, %vm3140_vm12  ;;  %v2736_v19 = vshra.s32 %v2672_v13, 4  ;;  %v2800_v9 = vand.u32 15, %v2672_v13  ;;  %vm7195_vm9 = vcmp.eq.s32.totalorder %v2608_v61, %v5791_v12  ;;  %v2931_v56 = vshra.s32 %v2735_v30, 1 }
 0x5f5   :  { %vm3697_vm11 = vmpackc.low %vm3204_vm0, %vm7151_vm3  ;;  %v3123_v22 = vshra.s32 %v2799_v36, 1  ;;  %vm7209_vm12 = vcmp.eq.s32.totalorder %v2557_v62, %v5791_v12  ;;  %vm7214_vm8 = vcmp.eq.s32.totalorder %v2558_v23, %v5791_v12  ;;  %v2685_v28 = vshra.s32 %v2621_v6, 4 }
 0x5f6   :  { %3698 = vmatpush.bf16.msk.msra.mxu2 %vm3697_vm11, %v3814_v11  ;;  %vm3047_vm14 = vmand %vm7118_vm6, %vm7158_vm5  ;;  %v2932_v35 = vshra.s32 %v2736_v19, 1  ;;  %v3124_v55 = vshra.s32 %v2800_v9, 1  ;;  %vm7221_vm3 = vcmp.eq.s32.totalorder %v2931_v56, %v5793_v37  ;;  %v2686_v18 = vshra.s32 %v2622_v43, 4 }
 0x5f7   :  { %vm3048_vm15 = vmand %vm7146_vm1, %vm7170_vm10  ;;  %vm3187_vm0 = vcmp.eq.s32.totalorder %v3123_v22, %v5795_v7  ;;  %v2749_v48 = vand.u32 15, %v2621_v6  ;;  %v2750_v57 = vand.u32 15, %v2622_v43  ;;  %v2881_v31 = vshra.s32 %v2685_v28, 1  ;;  %v3658_v28 = vld [vmem:[%s7537_s2 + $0x40] sm:$0xff] }
 0x5f8   :  { %vm7201_vm6 = vmand %vm3047_vm14, %vm7163_vm13  ;;  %vm7228_vm5 = vcmp.eq.s32.totalorder %v2932_v35, %v5793_v37  ;;  %vm3188_vm11 = vcmp.eq.s32.totalorder %v3124_v55, %v5795_v7  ;;  %v2882_v40 = vshra.s32 %v2686_v18, 1  ;;  %v2529_v17 = vadd.s32 288, %v5781_v29 }
 0x5f9   :  { %vm3240_vm4 = vmand %vm3048_vm15, %vm7175_vm2  ;;  %v2530_v1 = vadd.s32 296, %v5781_v29  ;;  %v3073_v32 = vshra.s32 %v2749_v48, 1  ;;  %v3074_v44 = vshra.s32 %v2750_v57, 1  ;;  %v2541_v4 = vadd.s32 384, %v5781_v29 }
 0x5fa   :  { %vm3725_vm1 = vmpackc.low %vm3240_vm4, %vm7201_vm6  ;;  %v2542_v38 = vadd.s32 392, %v5781_v29  ;;  %vm7255_vm15 = vcmp.eq.s32.totalorder %v2882_v40, %v5793_v37  ;;  %v2593_v25 = vshra.s32 %v2529_v17, 8  ;;  %v2657_v2 = vand.u32 255, %v2529_v17 }
 0x5fb   :  { %3726 = vmatpush.bf16.msk.msra.mxu3 %vm3725_vm1, %v3814_v11  ;;  %vm3059_vm13 = vmand %vm7185_vm7, %vm7221_vm3  ;;  %vm7250_vm7 = vcmp.eq.s32.totalorder %v2881_v31, %v5793_v37  ;;  %v2594_v14 = vshra.s32 %v2530_v1, 8  ;;  %vm3137_vm6 = vcmp.eq.s32.totalorder %v3073_v32, %v5795_v7  ;;  %v2658_v47 = vand.u32 255, %v2530_v1 }
 0x5fc   :  { %vm3060_vm10 = vmand %vm7195_vm9, %vm7228_vm5  ;;  %v3329_v16 = vpack.c.bf16 %v5528_v42, %v5528_v42  ;;  %vm3138_vm1 = vcmp.eq.s32.totalorder %v3074_v44, %v5795_v7  ;;  %vm7271_vm3 = vcmp.eq.s32.totalorder %v2593_v25, %v5791_v12  ;;  %v2721_v42 = vshra.s32 %v2657_v2, 4 }
 0x5fd   :  { %vm7243_vm2 = vmand %vm3059_vm13, %vm3187_vm0  ;;  %vm7276_vm0 = vcmp.eq.s32.totalorder %v2594_v14, %v5791_v12  ;;  %v2722_v39 = vshra.s32 %v2658_v47, 4  ;;  %v2785_v50 = vand.u32 15, %v2657_v2  ;;  %v2786_v24 = vand.u32 15, %v2658_v47 }
 0x5fe   :  { %vm3252_vm14 = vmand %vm3060_vm10, %vm3188_vm11  ;;  %v2605_v10 = vshra.s32 %v2541_v4, 8  ;;  %v2606_v15 = vshra.s32 %v2542_v38, 8  ;;  %v2669_v45 = vand.u32 255, %v2541_v4  ;;  %v2670_v63 = vand.u32 255, %v2542_v38 }
 0x5ff   :  { %vm3745_vm9 = vmpackc.low %vm3252_vm14, %vm7243_vm2  ;;  %v2917_v58 = vshra.s32 %v2721_v42, 1  ;;  %v2918_v61 = vshra.s32 %v2722_v39, 1  ;;  %v3109_v13 = vshra.s32 %v2785_v50, 1  ;;  %v3110_v30 = vshra.s32 %v2786_v24, 1 }
 0x600   :  { %3746 = vmatpush.bf16.msk.msrb.mxu0 %vm3745_vm9, %v3814_v11  ;;  %vm3009_vm4 = vmand %vm7209_vm12, %vm7250_vm7  ;;  %v2733_v36 = vshra.s32 %v2669_v45, 4  ;;  %v2734_v51 = vshra.s32 %v2670_v63, 4  ;;  %v2797_v62 = vand.u32 15, %v2669_v45  ;;  %v2798_v19 = vand.u32 15, %v2670_v63 }
 0x601   :  { %vm3010_vm5 = vmand %vm7214_vm8, %vm7255_vm15  ;;  %vm7292_vm11 = vcmp.eq.s32.totalorder %v2917_v58, %v5793_v37  ;;  %vm7297_vm10 = vcmp.eq.s32.totalorder %v2918_v61, %v5793_v37  ;;  %vm3173_vm2 = vcmp.eq.s32.totalorder %v3109_v13, %v5795_v7  ;;  %vm7303_vm14 = vcmp.eq.s32.totalorder %v3110_v30, %v5795_v7 }
 0x602   :  { %vm7284_vm12 = vmand %vm3009_vm4, %vm3137_vm6  ;;  %v2929_v0 = vshra.s32 %v2733_v36, 1  ;;  %v2930_v56 = vshra.s32 %v2734_v51, 1  ;;  %v3121_v22 = vshra.s32 %v2797_v62, 1  ;;  %v3122_v6 = vshra.s32 %v2798_v19, 1 }
 0x603   :  { %vm3202_vm13 = vmand %vm3010_vm5, %vm3138_vm1  ;;  %v2527_v43 = vadd.s32 272, %v5781_v29  ;;  %v2528_v35 = vadd.s32 280, %v5781_v29  ;;  %v2525_v55 = vadd.s32 256, %v5781_v29  ;;  %v2526_v8 = vadd.s32 264, %v5781_v29 }
 0x604   :  { %vm3699_vm8 = vmpackc.low %vm3202_vm13, %vm7284_vm12  ;;  %vm7324_vm6 = vcmp.eq.s32.totalorder %v2605_v10, %v5791_v12  ;;  %vm7329_vm4 = vcmp.eq.s32.totalorder %v2606_v15, %v5791_v12  ;;  %vm7334_vm1 = vcmp.eq.s32.totalorder %v2929_v0, %v5793_v37  ;;  %vm7346_vm5 = vcmp.eq.s32.totalorder %v3121_v22, %v5795_v7 }
 0x605   :  { %3700 = vmatpush.bf16.msk.msra.mxu2 %vm3699_vm8, %v3814_v11  ;;  %vm3045_vm7 = vmand %vm7271_vm3, %vm7292_vm11  ;;  %vm7339_vm3 = vcmp.eq.s32.totalorder %v2930_v56, %v5793_v37  ;;  %v2591_v48 = vshra.s32 %v2527_v43, 8  ;;  %v2655_v57 = vand.u32 255, %v2527_v43  ;;  %v2656_v31 = vand.u32 255, %v2528_v35 }
 0x606   :  { %vm3046_vm15 = vmand %vm7276_vm0, %vm7297_vm10  ;;  %vm7353_vm13 = vcmp.eq.s32.totalorder %v3122_v6, %v5795_v7  ;;  %v2592_v17 = vshra.s32 %v2528_v35, 8  ;;  %v2653_v1 = vand.u32 255, %v2525_v55  ;;  %v2654_v41 = vand.u32 255, %v2526_v8 }
 0x607   :  { %vm7319_vm9 = vmand %vm3045_vm7, %vm3173_vm2  ;;  %v2719_v32 = vshra.s32 %v2655_v57, 4  ;;  %v2720_v44 = vshra.s32 %v2656_v31, 4  ;;  %v2783_v4 = vand.u32 15, %v2655_v57  ;;  %v2784_v38 = vand.u32 15, %v2656_v31 }
 0x608   :  { %3373 = vmatmul.bf16.vlgmr.msra.gmra.mxu2 %v3329_v16  ;;  %vm3238_vm0 = vmand %vm3046_vm15, %vm7303_vm14  ;;  %vm7367_vm10 = vcmp.eq.s32.totalorder %v2591_v48, %v5791_v12  ;;  %v2717_v53 = vshra.s32 %v2653_v1, 4  ;;  %v2718_v25 = vshra.s32 %v2654_v41, 4  ;;  %vm7380_vm7 = vcmp.eq.s32.totalorder %v2592_v17, %v5791_v12 }
 0x609   :  { %vm3727_vm12 = vmpackc.low %vm3238_vm0, %vm7319_vm9  ;;  %v2915_v2 = vshra.s32 %v2719_v32, 1  ;;  %v2916_v47 = vshra.s32 %v2720_v44, 1  ;;  %v3107_v16 = vshra.s32 %v2783_v4, 1  ;;  %v3108_v21 = vshra.s32 %v2784_v38, 1 }
 0x60a   :  { %3728 = vmatpush.bf16.msk.msra.mxu3 %vm3727_vm12, %v3814_v11  ;;  %vm3057_vm8 = vmand %vm7324_vm6, %vm7334_vm1  ;;  %v2589_v42 = vshra.s32 %v2525_v55, 8  ;;  %v2781_v39 = vand.u32 15, %v2653_v1  ;;  %v2782_v50 = vand.u32 15, %v2654_v41  ;;  %v2590_v10 = vshra.s32 %v2526_v8, 8  ;;  %v3750_v8 = vld [vmem:[%s7537_s2 + $0xa0] sm:$0xff] }
 0x60b   :  { %vm3058_vm11 = vmand %vm7329_vm4, %vm7339_vm3  ;;  %vm7387_vm9 = vcmp.eq.s32.totalorder %v2915_v2, %v5793_v37  ;;  %vm7392_vm6 = vcmp.eq.s32.totalorder %v2916_v47, %v5793_v37  ;;  %vm3171_vm4 = vcmp.eq.s32.totalorder %v3107_v16, %v5795_v7  ;;  %v7397_v15 = vpop.f32.mrf.mxu1  ;;  %vm3172_vm3 = vcmp.eq.s32.totalorder %v3108_v21, %v5795_v7 }
 0x60c   :  { %vm7373_vm2 = vmand %vm3057_vm8, %vm7346_vm5  ;;  %v2913_v45 = vshra.s32 %v2717_v53, 1  ;;  %v2914_v63 = vshra.s32 %v2718_v25, 1  ;;  %v3105_v58 = vshra.s32 %v2781_v39, 1  ;;  %v3332_v61 = vpack.c.bf16 %v5564_v46, %v5564_v46 }
 0x60d   :  { %vm3250_vm14 = vmand %vm3058_vm11, %vm7353_vm13  ;;  %v3106_v13 = vshra.s32 %v2782_v50, 1  ;;  %vm2849_vm12 = vcmp.eq.s32.totalorder %v2589_v42, %v5791_v12  ;;  %vm2850_vm11 = vcmp.eq.s32.totalorder %v2590_v10, %v5791_v12  ;;  %v3331_v12 = vpack.c.bf16 %v5562_v33, %v5562_v33 }
 0x60e   :  { %vm3747_vm15 = vmpackc.low %vm3250_vm14, %vm7373_vm2  ;;  %vm2977_vm13 = vcmp.eq.s32.totalorder %v2913_v45, %v5793_v37  ;;  %vm3169_vm14 = vcmp.eq.s32.totalorder %v3105_v58, %v5795_v7  ;;  %v3492_v18 = vadd.s32 1, %v5793_v37  ;;  %v3453_v29 = vadd.s32 1, %v5795_v7 }
 0x60f   :  { %3748 = vmatpush.bf16.msk.msrb.mxu0 %vm3747_vm15, %v3814_v11  ;;  %vm3043_vm1 = vmand %vm7367_vm10, %vm7387_vm9  ;;  %vm2978_vm10 = vcmp.eq.s32.totalorder %v2914_v63, %v5793_v37  ;;  %v8354_v48 = vmov 0.0   ;;  %v3429_v32 = vadd.s32 4294967295, %v5795_v7  ;;  %v3425_v4 = vadd.s32 4294967295, %v5793_v37 }
 0x610   :  { %vm3044_vm0 = vmand %vm7380_vm7, %vm7392_vm6  ;;  %vm3170_vm7 = vcmp.eq.s32.totalorder %v3106_v13, %v5795_v7 }
 0x611   :  { %vm3235_vm5 = vmand %vm3043_vm1, %vm3171_vm4 }
 0x612   :  { %vm3236_vm8 = vmand %vm3044_vm0, %vm3172_vm3  ;;  %3412 = vmatmul.bf16.vlgmr.msrb.gmra.mxu0 %v3332_v61  ;;  %vm3493_vm3 = vcmp.ge.s32.totalorder %v3492_v18, 0  ;;  %vm3494_vm0 = vcmp.lt.s32.totalorder %v3492_v18, 8 }
 0x613   :  { %vm3729_vm2 = vmpackc.low %vm3236_vm8, %vm3235_vm5  ;;  %v2452_v46 = vpop.f32.mrf.mxu1  ;;  %vm3456_vm5 = vcmp.lt.s32.totalorder %v3453_v29, 8  ;;  %vm8355_vm8 = vcmask 1043456  }
 0x614   :  { %3730 = vmatpush.bf16.msk.msra.mxu3 %vm3729_vm2, %v3814_v11  ;;  %vm3041_vm15 = vmand %vm2849_vm12, %vm2977_vm13  ;;  %vm3430_vm2 = vcmp.ge.s32.totalorder %v3429_v32, 0 }
 0x615   :  { %vm3042_vm9 = vmand %vm2850_vm11, %vm2978_vm10  ;;  %vm3465_vm11 = vcmp.ge.s32.totalorder %v5793_v37, 0  ;;  %vm3466_vm10 = vcmp.lt.s32.totalorder %v5793_v37, 8 }
 0x616   :  { %vm3233_vm6 = vmand %vm3041_vm15, %vm3169_vm14 }
 0x617   :  { %vm3234_vm4 = vmand %vm3042_vm9, %vm3170_vm7  ;;  %vm3426_vm9 = vcmp.ge.s32.totalorder %v3425_v4, 0 }
 0x618   :  { %vm3731_vm1 = vmpackc.low %vm3234_vm4, %vm3233_vm6  ;;  %vm3427_vm6 = vcmp.lt.s32.totalorder %v3425_v4, 8 }
 0x619   :  { %3732 = vmatpush.bf16.msk.msra.mxu3 %vm3731_vm1, %v3814_v11  ;;  %vm7453_vm12 = vmand %vm3493_vm3, %vm3494_vm0  ;;  %vm1987_vm3 = vcmask 1041408   ;;  %vm1989_vm0 = vcmask 1045508  }
 0x61a   :  { %vm3515_vm13 = vmand %vm7453_vm12, %vm3456_vm5  ;;  %v3758_v7 = vsel %vm7453_vm12, 1.0, %v8354_v48 }
 0x61b   :  { %v7419_v30 = vpop.f32.mrf.mxu0  ;;  %v7423_v36 = vpop.f32.mrf.mxu2  ;;  %v3759_v57 = vsel %vm3515_vm13, 1.0, %v8354_v48  ;;  %vm3496_vm14 = vmand %vm7453_vm12, %vm3430_vm2 }
 0x61c   :  { %3399 = vmatmul.bf16.vlgmr.msra.gmra.mxu3 %v3331_v12  ;;  %vm7469_vm15 = vmand %vm3465_vm11, %vm3466_vm10  ;;  %v3757_v37 = vsel %vm3496_vm14, 1.0, %v8354_v48  ;;  %vm3441_vm14 = vcmask 64512  }
 0x61d   :  { %vm3484_vm7 = vmand %vm7469_vm15, %vm3456_vm5  ;;  %v3755_v21 = vsel %vm7469_vm15, 1.0, %v8354_v48 }
 0x61e   :  { %v3756_v3 = vsel %vm3484_vm7, 1.0, %v8354_v48  ;;  %vm7481_vm4 = vmand %vm3426_vm9, %vm3427_vm6 }
 0x61f   :  { %vm3468_vm1 = vmand %vm7469_vm15, %vm3430_vm2 }
 0x620   :  { %vm3457_vm12 = vmand %vm7481_vm4, %vm3456_vm5  ;;  %v3754_v58 = vsel %vm3468_vm1, 1.0, %v8354_v48 }
 0x621   :  { %v3753_v61 = vsel %vm3457_vm12, 1.0, %v8354_v48  ;;  %vm8360_vm13 = vmmov %vm8355_vm8 }
 0x622   :  { %vm3431_vm5 = vmand %vm7481_vm4, %vm3430_vm2 }
 0x623   :  { %v2478_v51 = vpop.f32.mrf.mxu0  ;;  %v2439_v19 = vpop.f32.mrf.mxu2  ;;  %vm8362_vm11 = vmmov %vm8360_vm13 }
 0x624   :  { %vm8363_vm10 = vmmov %vm8362_vm11 }
 0x625   :  { %vm8364_vm2 = vmmov %vm8363_vm10 }
 0x628   :  { %v7425_v62 = vpop.f32.mrf.mxu3 }
 0x630   :  { %v2465_v9 = vpop.f32.mrf.mxu3 }
 0x65d   :  { %v3387_v27 = vpop.f32.mrf.mxu1 }
 0x665   :  { %v3389_v23 = vpop.f32.mrf.mxu1 }
 0x666   :  { %v3752_v23 = vsel %vm7481_vm4, 1.0, %v8354_v48 }
 0x68b   :  { %v3374_v0 = vpop.f32.mrf.mxu2 }
 0x68c   :  { %v3388_v11 = vadd.f32 %v3387_v27, %v3374_v0  ;;  %v3751_v27 = vsel %vm3431_vm5, 1.0, %v8354_v48 }
 0x68f   :  { %v3413_v56 = vpop.f32.mrf.mxu0 }
 0x693   :  { %v3376_v22 = vpop.f32.mrf.mxu2 }
 0x697   :  { %v3415_v6 = vpop.f32.mrf.mxu0 }
 0x698   :  { %v3749_v6 = vld [vmem:[%s7536_s1 + $0x140] sm:$0xff] }
 0x69f   :  { %v3400_v43 = vpop.f32.mrf.mxu3 }
 0x6a0   :  { %v3401_v35 = vadd.f32 %v3400_v43, %v3388_v11  ;;  %v3529_v43 = vpack.c.bf16 %v3749_v6, %v3749_v6 }
 0x6a2   :  { %v7427_v55 = vadd.f32 %v3413_v56, %v3401_v35 }
 0x6a4   :  { %3502 = vrot.lane.b32.xlu0 %v7427_v55, %s3815_s10  ;;  %3489 = vrot.lane.b32.xlu1 %v7427_v55, %s3816_s11 }
 0x6a5   :  { %3511 = vrot.lane.b32.xlu2 %v7427_v55, %s3817_s12 }
 0x6a7   :  { %v3402_v33 = vpop.f32.mrf.mxu3 }
 0x6ac   :  { %3462 = vrot.lane.b32.xlu0 %v7427_v55, %s3806_s8  ;;  %3450 = vrot.lane.b32.xlu1 %v7427_v55, %s3818_s13 }
 0x6ad   :  { %3480 = vrot.lane.b32.xlu2 %v7427_v55, %s3805_s7 }
 0x6b4   :  { %3537 = vperm.xlu0 %3784, %v3750_v8   ;;  %3438 = vrot.lane.b32.xlu1 %v7427_v55, %s3819_s16 }
 0x6b5   :  { %3422 = vrot.lane.b32.xlu2 %v7427_v55, %s3820_s22 }
 0x6bc   :  { %3568 = vperm.xlu0 %3784, %v3762_v59   ;;  %2421 = vperm.xlu1 %3782, %v3680_v5  }
 0x6bd   :  { %1922 = vperm.xlu2 %3783, %v3658_v28  }
 0x6ff   :  { %v3512_v31 = vpop.permute.xlu2 %3511 }
 0x700   :  { %v3518_v40 = vmul.f32 %v3759_v57, %v3512_v31 }
 0x702   :  { %v3534_v17 = vpack.c.bf16 %v3518_v40, %v3518_v40 }
 0x704   :  { %v3544_v1 = vsel %vm8355_vm8, %v3534_v17, 0  ;;  %vm8361_vm8 = vcmask 588800  }
 0x705   :  { %3549 = vmatpush.bf16.msrb.mxu2 %v3544_v1 }
 0x707   :  { %v3481_v41 = vpop.permute.xlu2 %3480 }
 0x708   :  { %v3487_v50 = vmul.f32 %v3756_v3, %v3481_v41 }
 0x70f   :  { %v3423_v44 = vpop.permute.xlu2 %3422 }
 0x710   :  { %v3436_v56 = vmul.f32 %v3751_v27, %v3423_v44 }
 0x716   :  { %v3503_v53 = vpop.permute.xlu0 %3502  ;;  %v3490_v25 = vpop.permute.xlu1 %3489 }
 0x717   :  { %v3509_v2 = vmul.f32 %v3758_v7, %v3503_v53  ;;  %v3500_v47 = vmul.f32 %v3757_v37, %v3490_v25  ;;  %v1923_v16 = vpop.permute.xlu2 %1922 }
 0x718   :  { %v1951_v34 = vadd.f32 %v5774_v49, %v1923_v16  ;;  %v1964_v42 = vadd.f32 %v5776_v26, %v1923_v16  ;;  %v1977_v39 = vadd.f32 %v5778_v52, %v1923_v16  ;;  %v1938_v54 = vadd.f32 %v5772_v20, %v1923_v16 }
 0x719   :  { %v3533_v24 = vpack.c.bf16 %v3509_v2, %v3500_v47  ;;  %v3478_v26 = vmul.f32 %v3755_v21, %v7427_v55 }
 0x71a   :  { %v1984_v10 = vrot.slane %v1951_v34, 6  ;;  %v1985_v49 = vrot.slane %v1964_v42, 4  ;;  %v1986_v45 = vrot.slane %v1977_v39, 2 }
 0x71b   :  { %3550 = vmatpush.bf16.msrb.mxu2 %v3533_v24  ;;  %v3532_v13 = vpack.c.bf16 %v3487_v50, %v3478_v26 }
 0x71c   :  { %v1988_v52 = vsel %vm1987_vm3, %v1938_v54, %v1984_v10  ;;  %v1990_v63 = vsel %vm1989_vm0, %v1985_v49, %v1986_v45 }
 0x71d   :  { %v1992_v46 = vsel %vm8360_vm13, %v1988_v52, %v1990_v63 }
 0x71e   :  { %1994 = vst [vmem:[%s7538_s3] sm:$0xff] %v1992_v46  ;;  %v3463_v20 = vpop.permute.xlu0 %3462  ;;  %v3451_v12 = vpop.permute.xlu1 %3450 }
 0x71f   :  { %v3472_v51 = vmul.f32 %v3754_v58, %v3463_v20  ;;  %v3460_v19 = vmul.f32 %v3753_v61, %v3451_v12  ;;  %3551 = vmatpush.bf16.msrb.mxu2 %v3532_v13 }
 0x721   :  { %v3531_v9 = vpack.c.bf16 %v3472_v51, %v3460_v19 }
 0x723   :  { %3552 = vmatpush.bf16.msrb.mxu2 %v3531_v9 }
 0x726   :  { %v3439_v0 = vpop.permute.xlu1 %3438 }
 0x727   :  { %v3448_v22 = vmul.f32 %v3752_v23, %v3439_v0 }
 0x729   :  { %v3530_v11 = vpack.c.bf16 %v3448_v22, %v3436_v56 }
 0x72b   :  { %3553 = vmatpush.bf16.msrb.mxu2 %v3530_v11 }
 0x72e   :  { %v2422_v35 = vpop.permute.xlu1 %2421  ;;  %3760 = vmatmul.msk.bf16.vlgmr.msrb.gmra.mxu2 %vm8361_vm8, %v3529_v43 }
 0x72f   :  { %v2451_v55 = vadd.f32 %v7397_v15, %v2422_v35  ;;  %v2477_v33 = vadd.f32 %v7419_v30, %v2422_v35  ;;  %v2438_v8 = vadd.f32 %v7423_v36, %v2422_v35  ;;  %v2464_v59 = vadd.f32 %v7425_v62, %v2422_v35  ;;  %v3538_v15 = vpop.permute.xlu0 %3537  ;;  %v3761_v62 = vld [vmem:[%s7536_s1 + $0x180] sm:$0xff] }
 0x730   :  { %v3564_v31 = vpack.c.bf16 %v3761_v62, %v3761_v62 }
 0x731   :  { %v2484_v5 = vrot.slane %v2451_v55, 4  ;;  %v2485_v28 = vrot.slane %v2477_v33, 4 }
 0x733   :  { %v2486_v18 = vsel %vm8362_vm11, %v2438_v8, %v2484_v5  ;;  %v2487_v29 = vsel %vm8363_vm10, %v2464_v59, %v2485_v28 }
 0x734   :  { %2490 = vst [vmem:[%s7539_s4] sm:$0xff] %v2486_v18 }
 0x735   :  { %2491 = vst [vmem:[%s7539_s4 + $0x8] sm:$0xff] %v2487_v29 }
 0x737   :  { %v3569_v17 = vpop.permute.xlu0 %3568 }
 0x7b1   :  { %v3555_v30 = vpop.f32.mrf.mxu2 }
 0x7b2   :  { %v3556_v60 = vadd.f32 %v3555_v30, %v3538_v15 }
 0x7b4   :  { %v3559_v36 = vmax.f32 %v3556_v60, 0.0 }
 0x7b6   :  { %v3565_v48 = vpack.c.bf16 %v3559_v36, %v3559_v36 }
 0x7b8   :  { %v3575_v57 = vsel %vm8364_vm2, %v3565_v48, 0 }
 0x7b9   :  { %v3557_v40 = vpop.f32.mrf.mxu2  ;;  %3584 = vmatpush.bf16.msra.mxu1 %v3575_v57 }
 0x7bc   :  { %3763 = vmatmul.msk.bf16.vlgmr.msra.gmra.mxu1 %vm3441_vm14, %v3564_v31 }
 0x839   :  { %v3586_v1 = vpop.f32.mrf.mxu1 }
 0x83a   :  { %v3587_v41 = vadd.f32 %v3586_v1, %v3569_v17 }
 0x83c   :  { %3590 = vst [vmem:[%s7540_s5] sm:$0x1] %v3587_v41 }
 0x841   :  { %v3588_v32 = vpop.f32.mrf.mxu1 }

</bundles_post_ra>
